<compile_context>
chip_gen: v7x
topology: tpu7x:2x2x1
jax: 0.10.0
libtpu: 0.0.40
codegen_flags: <defaults>
</compile_context>

<pallas_src>
import functools

import jax
import jax.numpy as jnp
import numpy as np
from jax.experimental import pallas as pl
from jax.experimental.pallas import tpu as pltpu

EPS = 1e-5  # PyTorch BatchNorm2d default


# ----------------------------- Pallas kernel ------------------------------- #
def _pad1_hw(x, H, W, C):
    """Zero-pad a (H, W, C) VMEM value by 1 on H and W (stays in VMEM)."""
    zr = jnp.zeros((1, W, C), jnp.float32)
    zc = jnp.zeros((H + 2, 1, C), jnp.float32)
    xp = jnp.concatenate([zr, x, zr], axis=0)        # (H+2, W,   C)
    return jnp.concatenate([zc, xp, zc], axis=1)     # (H+2, W+2, C)


def _im2col(xp, H, W, C):
    """(H+2, W+2, C) padded tile -> (H*W, 9*C) im2col matrix.

    Column order is (kw, kh, c); weights are flattened to match.  Only the 3
    kw slices shift data along the sublane axis; the kh slices are on the
    leading (untiled) dim and the reshape keeps the lane dim, so they are
    cheap.
    """
    cols = []
    for kw in range(3):
        strip = xp[:, kw:kw + W, :]                  # (H+2, W, C)
        for kh in range(3):
            cols.append(strip[kh:kh + H].reshape(H * W, C))
    return jnp.concatenate(cols, axis=1)             # (H*W, 9*C)


def _resblock_kernel(H, W, has_skip, *refs):
    """Fused ResBlock2D (+ optional hourglass skip add) for one image.

    refs (in order):
      x_ref    : (H, W, Cin)
      skip_ref : (H, W, Cout)        [only if has_skip]
      wa_ref   : (9*Cin, 2*Cout)     [conv1 (BN folded) | identity conv] stacked
      ba_ref   : (1, 2*Cout)         [b1 (BN folded)    | identity bias]
      w2_ref   : (9*Cout, Cout)      conv2, BN folded
      b2_ref   : (1, Cout)
      o_ref    : (H, W, Cout)
    """
    if has_skip:
        x_ref, skip_ref, wa_ref, ba_ref, w2_ref, b2_ref, o_ref = refs
    else:
        x_ref, wa_ref, ba_ref, w2_ref, b2_ref, o_ref = refs
        skip_ref = None
    Cin = x_ref.shape[-1]
    Cout = o_ref.shape[-1]

    # conv1 (+BN+ReLU) and identity conv: one stacked im2col matmul.
    xp = _pad1_hw(x_ref[...], H, W, Cin)
    cols = _im2col(xp, H, W, Cin)                               # (H*W, 9*Cin)
    t = jnp.dot(cols, wa_ref[...],
                preferred_element_type=jnp.float32) + ba_ref[...]
    h1 = jnp.maximum(t[:, :Cout], 0.0)                          # conv1->BN->ReLU
    res = t[:, Cout:]                                           # identity branch

    # conv2 (+BN+ReLU); intermediate never leaves VMEM.
    hp = _pad1_hw(h1.reshape(H, W, Cout), H, W, Cout)
    cols2 = _im2col(hp, H, W, Cout)                             # (H*W, 9*Cout)
    t2 = jnp.dot(cols2, w2_ref[...],
                 preferred_element_type=jnp.float32) + b2_ref[...]
    out = jnp.maximum(t2, 0.0)

    # residual add + ReLU, plus (optionally) the fused hourglass up1+up2 add.
    y = jnp.maximum(out + res, 0.0)
    if has_skip:
        y = y + skip_ref[...].reshape(H * W, Cout)
    o_ref[...] = y.reshape(H, W, Cout)


def resblock(x_nhwc, packed, skip=None):
    """Apply one fused ResBlock2D. x_nhwc (N,H,W,Cin) -> (N,H,W,Cout)."""
    wa, ba, w2, b2 = packed
    N, H, W, Cin = x_nhwc.shape
    Cout = w2.shape[-1]
    has_skip = skip is not None

    kernel = functools.partial(_resblock_kernel, H, W, has_skip)

    in_specs = [pl.BlockSpec((pl.Squeezed(), H, W, Cin),
                             lambda n: (n, 0, 0, 0))]
    args = [x_nhwc]
    if has_skip:
        in_specs.append(pl.BlockSpec((pl.Squeezed(), H, W, Cout),
                                      lambda n: (n, 0, 0, 0)))
        args.append(skip)
    in_specs += [
        pl.BlockSpec((9 * Cin, 2 * Cout), lambda n: (0, 0)),
        pl.BlockSpec((1, 2 * Cout), lambda n: (0, 0)),
        pl.BlockSpec((9 * Cout, Cout), lambda n: (0, 0)),
        pl.BlockSpec((1, Cout), lambda n: (0, 0)),
    ]
    args += [wa, ba, w2, b2]

    return pl.pallas_call(
        kernel,
        out_shape=jax.ShapeDtypeStruct((N, H, W, Cout), jnp.float32),
        grid_spec=pltpu.PrefetchScalarGridSpec(
            num_scalar_prefetch=0,
            grid=(N,),
            in_specs=in_specs,
            out_specs=pl.BlockSpec((pl.Squeezed(), H, W, Cout),
                                   lambda n: (n, 0, 0, 0)),
        ),
        compiler_params=pltpu.CompilerParams(
            dimension_semantics=("parallel",)),
    )(*args)


# ------------------------------ XLA glue ----------------------------------- #
# TODO(synk): fuse the 2x2 maxpool / nearest upsample into the neighbouring
# ResBlock kernels; left as (tiny) XLA ops because the sublane-dim reshapes
# they need in-kernel are not worth the lowering risk at these sizes.
def _maxpool2x2(x):                       # NHWC
    N, H, W, C = x.shape
    return x.reshape(N, H // 2, 2, W // 2, 2, C).max(axis=(2, 4))


def _upsample2x(x):                       # NHWC, nearest
    x = jnp.repeat(x, 2, axis=1)
    return jnp.repeat(x, 2, axis=2)


# --------------------------- parameters & packing -------------------------- #
def _init_resblock(key, cin, cout):
    ks = jax.random.split(key, 6)
    conv = lambda k, ci, co: 0.1 * jax.random.normal(
        k, (3, 3, ci, co), jnp.float32)                     # HWIO

    def bn(k, c):
        k1, k2, k3, k4 = jax.random.split(k, 4)
        return dict(
            g=1.0 + 0.1 * jax.random.normal(k1, (c,), jnp.float32),
            b=0.1 * jax.random.normal(k2, (c,), jnp.float32),
            m=0.1 * jax.random.normal(k3, (c,), jnp.float32),
            v=0.5 + jnp.abs(jax.random.normal(k4, (c,), jnp.float32)))

    return dict(w1=conv(ks[0], cin, cout), bn1=bn(ks[1], cout),
                w2=conv(ks[2], cout, cout), bn2=bn(ks[3], cout),
                wid=conv(ks[4], cin, cout),
                bid=0.05 * jax.random.normal(ks[5], (cout,), jnp.float32))


def init_hourglass(key, n, f, increase=0):
    nf = f + increase
    ks = jax.random.split(key, 4)
    p = dict(up1=_init_resblock(ks[0], f, f),
             low1=_init_resblock(ks[1], f, nf))
    if n > 1:
        p['low2'] = init_hourglass(ks[2], n - 1, nf)
    else:
        p['low2'] = _init_resblock(ks[2], nf, nf)
    p['low3'] = _init_resblock(ks[3], nf, f)
    return p


def _fold_bn(w, bn):
    """Fold inference-mode BatchNorm after a bias-free conv into (w', b')."""
    s = bn['g'] / jnp.sqrt(bn['v'] + EPS)
    return w * s, bn['b'] - s * bn['m']


def _flat9(w):
    """HWIO (3,3,Ci,Co) -> (9*Ci, Co) in the kernel's (kw, kh, ci) order."""
    return jnp.transpose(w, (1, 0, 2, 3)).reshape(9 * w.shape[2], w.shape[3])


def _pack_resblock(rp):
    w1, b1 = _fold_bn(rp['w1'], rp['bn1'])
    w2, b2 = _fold_bn(rp['w2'], rp['bn2'])
    cout = w1.shape[-1]
    wa = jnp.concatenate([_flat9(w1), _flat9(rp['wid'])], axis=1)  # (9Cin, 2Cout)
    ba = jnp.concatenate([b1, rp['bid']]).reshape(1, 2 * cout)
    return (wa, ba, _flat9(w2), b2.reshape(1, cout))


def pack_hourglass(p, n):
    q = dict(up1=_pack_resblock(p['up1']),
             low1=_pack_resblock(p['low1']),
             low3=_pack_resblock(p['low3']))
    q['low2'] = (pack_hourglass(p['low2'], n - 1) if n > 1
                 else _pack_resblock(p['low2']))
    return q


# ------------------------------ forward pass ------------------------------- #
def _hourglass_apply(x, q, n):
    # Lower branch first, then up1 with the hourglass skip add fused in.
    low1 = resblock(_maxpool2x2(x), q['low1'])
    if n > 1:
        low2 = _hourglass_apply(low1, q['low2'], n - 1)
    else:
        low2 = resblock(low1, q['low2'])
    low3 = resblock(low2, q['low3'])
    up2 = _upsample2x(low3)
    return resblock(x, q['up1'], skip=up2)           # up1(x) + up2, fused add


def hourglass2d_forward(x_nchw, params, n):
    q = pack_hourglass(params, n)
    x = jnp.transpose(x_nchw, (0, 2, 3, 1))          # NCHW -> NHWC
    y = _hourglass_apply(x, q, n)
    return jnp.transpose(y, (0, 3, 1, 2))            # NHWC -> NCHW


# ------------------------------ reference ---------------------------------- #
def _ref_conv(x, w, b):
    y = jax.lax.conv_general_dilated(
        x, w, window_strides=(1, 1), padding='SAME',
        dimension_numbers=('NHWC', 'HWIO', 'NHWC'))
    return y + b


def _ref_resblock(x, rp):
    # Same (exact) inference-mode BN folding so the check isolates the
    # Pallas conv / im2col / padding / residual pipeline.
    w1, b1 = _fold_bn(rp['w1'], rp['bn1'])
    w2, b2 = _fold_bn(rp['w2'], rp['bn2'])
    h = jax.nn.relu(_ref_conv(x, w1, b1))
    h = jax.nn.relu(_ref_conv(h, w2, b2))
    res = _ref_conv(x, rp['wid'], rp['bid'])
    return jax.nn.relu(h + res)


def _ref_hourglass(x, p, n):
    up1 = _ref_resblock(x, p['up1'])
    low1 = _ref_resblock(_maxpool2x2(x), p['low1'])
    low2 = (_ref_hourglass(low1, p['low2'], n - 1) if n > 1
            else _ref_resblock(low1, p['low2']))
    low3 = _ref_resblock(low2, p['low3'])
    return up1 + _upsample2x(low3)


def ref_forward(x_nchw, params, n):
    x = jnp.transpose(x_nchw, (0, 2, 3, 1))
    return jnp.transpose(_ref_hourglass(x, params, n), (0, 3, 1, 2))


# --------------------------------- main ------------------------------------ #
if __name__ == "__main__":
    key = jax.random.PRNGKey(0)
    k_x, k_p = jax.random.split(key)

    N, F, H, W = 2, 4, 16, 16      # batch=2, channels=4, spatial=16
    DEPTH = 2                      # Hourglass2D(n=2, f=4): 16 -> 8 -> 4

    x = jax.random.normal(k_x, (N, F, H, W), jnp.float32)   # NCHW like PyTorch
    params = init_hourglass(k_p, DEPTH, F)

    fwd = jax.jit(hourglass2d_forward, static_argnums=2)
    out = jax.block_until_ready(fwd(x, params, DEPTH))
    assert out.shape == (N, F, H, W), out.shape

    ref = jax.block_until_ready(ref_forward(x, params, DEPTH))
    np.testing.assert_allclose(np.asarray(out), np.asarray(ref),
                               rtol=1e-3, atol=1e-3)

    print("KERNEL_OK")
</pallas_src>

<mosaic_0001>
module attributes {stable_mosaic.version = 11 : i64} {
  func.func @_resblock_kernel(%arg0: i32, %arg1: memref<1x8x8x4xf32, #tpu.memory_space<vmem>>, %arg2: memref<36x8xf32, #tpu.memory_space<vmem>>, %arg3: memref<1x8xf32, #tpu.memory_space<vmem>>, %arg4: memref<36x4xf32, #tpu.memory_space<vmem>>, %arg5: memref<1x4xf32, #tpu.memory_space<vmem>>, %arg6: memref<1x8x8x4xf32, #tpu.memory_space<vmem>>) attributes {dimension_semantics = [#tpu.dimension_semantics<parallel>], iteration_bounds = array<i64: 2>, scalar_prefetch = 0 : i64, scratch_operands = 0 : i64, tpu.core_type = #tpu.core_type<tc>, window_params = [{transform_indices = @transform_0, window_bounds = array<i64: 1, 8, 8, 4>}, {pipeline_mode = #tpu.pipeline_mode<synchronous>, transform_indices = @transform_1, window_bounds = array<i64: 36, 8>}, {pipeline_mode = #tpu.pipeline_mode<synchronous>, transform_indices = @transform_2, window_bounds = array<i64: 1, 8>}, {pipeline_mode = #tpu.pipeline_mode<synchronous>, transform_indices = @transform_3, window_bounds = array<i64: 36, 4>}, {pipeline_mode = #tpu.pipeline_mode<synchronous>, transform_indices = @transform_4, window_bounds = array<i64: 1, 4>}, {transform_indices = @transform_5, window_bounds = array<i64: 1, 8, 8, 4>}]} {
    %c0 = arith.constant 0 : index
    %c0_0 = arith.constant 0 : index
    %c0_1 = arith.constant 0 : index
    %c0_2 = arith.constant 0 : index
    %0 = vector.load %arg1[%c0, %c0_0, %c0_1, %c0_2] : memref<1x8x8x4xf32, #tpu.memory_space<vmem>>, vector<1x8x8x4xf32>
    %1 = vector.shape_cast %0 : vector<1x8x8x4xf32> to vector<8x8x4xf32>
    %cst = arith.constant 0.000000e+00 : f32
    %2 = vector.broadcast %cst : f32 to vector<1x8x4xf32>
    %cst_3 = arith.constant 0.000000e+00 : f32
    %3 = vector.broadcast %cst_3 : f32 to vector<10x1x4xf32>
    %4 = tpu.concatenate %2, %1, %2 in 0 : vector<1x8x4xf32>, vector<8x8x4xf32>, vector<1x8x4xf32> -> vector<10x8x4xf32>
    %5 = tpu.concatenate %3, %4, %3 in 1 : vector<10x1x4xf32>, vector<10x8x4xf32>, vector<10x1x4xf32> -> vector<10x10x4xf32>
    %6 = vector.extract_strided_slice %5 {offsets = [0, 0, 0], sizes = [10, 8, 4], strides = [1, 1, 1]} : vector<10x10x4xf32> to vector<10x8x4xf32>
    %7 = vector.extract_strided_slice %6 {offsets = [0, 0, 0], sizes = [8, 8, 4], strides = [1, 1, 1]} : vector<10x8x4xf32> to vector<8x8x4xf32>
    %8 = vector.shape_cast %7 : vector<8x8x4xf32> to vector<64x4xf32>
    %9 = vector.extract_strided_slice %6 {offsets = [1, 0, 0], sizes = [8, 8, 4], strides = [1, 1, 1]} : vector<10x8x4xf32> to vector<8x8x4xf32>
    %10 = vector.shape_cast %9 : vector<8x8x4xf32> to vector<64x4xf32>
    %11 = vector.extract_strided_slice %6 {offsets = [2, 0, 0], sizes = [8, 8, 4], strides = [1, 1, 1]} : vector<10x8x4xf32> to vector<8x8x4xf32>
    %12 = vector.shape_cast %11 : vector<8x8x4xf32> to vector<64x4xf32>
    %13 = vector.extract_strided_slice %5 {offsets = [0, 1, 0], sizes = [10, 8, 4], strides = [1, 1, 1]} : vector<10x10x4xf32> to vector<10x8x4xf32>
    %14 = vector.extract_strided_slice %13 {offsets = [0, 0, 0], sizes = [8, 8, 4], strides = [1, 1, 1]} : vector<10x8x4xf32> to vector<8x8x4xf32>
    %15 = vector.shape_cast %14 : vector<8x8x4xf32> to vector<64x4xf32>
    %16 = vector.extract_strided_slice %13 {offsets = [1, 0, 0], sizes = [8, 8, 4], strides = [1, 1, 1]} : vector<10x8x4xf32> to vector<8x8x4xf32>
    %17 = vector.shape_cast %16 : vector<8x8x4xf32> to vector<64x4xf32>
    %18 = vector.extract_strided_slice %13 {offsets = [2, 0, 0], sizes = [8, 8, 4], strides = [1, 1, 1]} : vector<10x8x4xf32> to vector<8x8x4xf32>
    %19 = vector.shape_cast %18 : vector<8x8x4xf32> to vector<64x4xf32>
    %20 = vector.extract_strided_slice %5 {offsets = [0, 2, 0], sizes = [10, 8, 4], strides = [1, 1, 1]} : vector<10x10x4xf32> to vector<10x8x4xf32>
    %21 = vector.extract_strided_slice %20 {offsets = [0, 0, 0], sizes = [8, 8, 4], strides = [1, 1, 1]} : vector<10x8x4xf32> to vector<8x8x4xf32>
    %22 = vector.shape_cast %21 : vector<8x8x4xf32> to vector<64x4xf32>
    %23 = vector.extract_strided_slice %20 {offsets = [1, 0, 0], sizes = [8, 8, 4], strides = [1, 1, 1]} : vector<10x8x4xf32> to vector<8x8x4xf32>
    %24 = vector.shape_cast %23 : vector<8x8x4xf32> to vector<64x4xf32>
    %25 = vector.extract_strided_slice %20 {offsets = [2, 0, 0], sizes = [8, 8, 4], strides = [1, 1, 1]} : vector<10x8x4xf32> to vector<8x8x4xf32>
    %26 = vector.shape_cast %25 : vector<8x8x4xf32> to vector<64x4xf32>
    %27 = tpu.concatenate %8, %10, %12, %15, %17, %19, %22, %24, %26 in 1 : vector<64x4xf32>, vector<64x4xf32>, vector<64x4xf32>, vector<64x4xf32>, vector<64x4xf32>, vector<64x4xf32>, vector<64x4xf32>, vector<64x4xf32>, vector<64x4xf32> -> vector<64x36xf32>
    %c0_4 = arith.constant 0 : index
    %c0_5 = arith.constant 0 : index
    %28 = vector.load %arg2[%c0_4, %c0_5] : memref<36x8xf32, #tpu.memory_space<vmem>>, vector<36x8xf32>
    %cst_6 = arith.constant dense<0.000000e+00> : vector<64x8xf32>
    %29 = tpu.matmul %27, %28, %cst_6 {dimension_numbers = #tpu.dot_dimension_numbers<[1], [0], [0], [1], [0, 0, 1, 1], [], []>} : vector<64x36xf32>, vector<36x8xf32>, vector<64x8xf32> -> vector<64x8xf32>
    %c0_7 = arith.constant 0 : index
    %c0_8 = arith.constant 0 : index
    %30 = vector.load %arg3[%c0_7, %c0_8] : memref<1x8xf32, #tpu.memory_space<vmem>>, vector<1x8xf32>
    %31 = vector.broadcast %30 : vector<1x8xf32> to vector<64x8xf32>
    %32 = arith.addf %29, %31 : vector<64x8xf32>
    %33 = vector.extract_strided_slice %32 {offsets = [0, 0], sizes = [64, 4], strides = [1, 1]} : vector<64x8xf32> to vector<64x4xf32>
    %cst_9 = arith.constant 0.000000e+00 : f32
    %34 = vector.broadcast %cst_9 : f32 to vector<64x4xf32>
    %35 = arith.maximumf %33, %34 : vector<64x4xf32>
    %36 = vector.extract_strided_slice %32 {offsets = [0, 4], sizes = [64, 4], strides = [1, 1]} : vector<64x8xf32> to vector<64x4xf32>
    %37 = vector.shape_cast %35 : vector<64x4xf32> to vector<8x8x4xf32>
    %cst_10 = arith.constant 0.000000e+00 : f32
    %38 = vector.broadcast %cst_10 : f32 to vector<1x8x4xf32>
    %cst_11 = arith.constant 0.000000e+00 : f32
    %39 = vector.broadcast %cst_11 : f32 to vector<10x1x4xf32>
    %40 = tpu.concatenate %38, %37, %38 in 0 : vector<1x8x4xf32>, vector<8x8x4xf32>, vector<1x8x4xf32> -> vector<10x8x4xf32>
    %41 = tpu.concatenate %39, %40, %39 in 1 : vector<10x1x4xf32>, vector<10x8x4xf32>, vector<10x1x4xf32> -> vector<10x10x4xf32>
    %42 = vector.extract_strided_slice %41 {offsets = [0, 0, 0], sizes = [10, 8, 4], strides = [1, 1, 1]} : vector<10x10x4xf32> to vector<10x8x4xf32>
    %43 = vector.extract_strided_slice %42 {offsets = [0, 0, 0], sizes = [8, 8, 4], strides = [1, 1, 1]} : vector<10x8x4xf32> to vector<8x8x4xf32>
    %44 = vector.shape_cast %43 : vector<8x8x4xf32> to vector<64x4xf32>
    %45 = vector.extract_strided_slice %42 {offsets = [1, 0, 0], sizes = [8, 8, 4], strides = [1, 1, 1]} : vector<10x8x4xf32> to vector<8x8x4xf32>
    %46 = vector.shape_cast %45 : vector<8x8x4xf32> to vector<64x4xf32>
    %47 = vector.extract_strided_slice %42 {offsets = [2, 0, 0], sizes = [8, 8, 4], strides = [1, 1, 1]} : vector<10x8x4xf32> to vector<8x8x4xf32>
    %48 = vector.shape_cast %47 : vector<8x8x4xf32> to vector<64x4xf32>
    %49 = vector.extract_strided_slice %41 {offsets = [0, 1, 0], sizes = [10, 8, 4], strides = [1, 1, 1]} : vector<10x10x4xf32> to vector<10x8x4xf32>
    %50 = vector.extract_strided_slice %49 {offsets = [0, 0, 0], sizes = [8, 8, 4], strides = [1, 1, 1]} : vector<10x8x4xf32> to vector<8x8x4xf32>
    %51 = vector.shape_cast %50 : vector<8x8x4xf32> to vector<64x4xf32>
    %52 = vector.extract_strided_slice %49 {offsets = [1, 0, 0], sizes = [8, 8, 4], strides = [1, 1, 1]} : vector<10x8x4xf32> to vector<8x8x4xf32>
    %53 = vector.shape_cast %52 : vector<8x8x4xf32> to vector<64x4xf32>
    %54 = vector.extract_strided_slice %49 {offsets = [2, 0, 0], sizes = [8, 8, 4], strides = [1, 1, 1]} : vector<10x8x4xf32> to vector<8x8x4xf32>
    %55 = vector.shape_cast %54 : vector<8x8x4xf32> to vector<64x4xf32>
    %56 = vector.extract_strided_slice %41 {offsets = [0, 2, 0], sizes = [10, 8, 4], strides = [1, 1, 1]} : vector<10x10x4xf32> to vector<10x8x4xf32>
    %57 = vector.extract_strided_slice %56 {offsets = [0, 0, 0], sizes = [8, 8, 4], strides = [1, 1, 1]} : vector<10x8x4xf32> to vector<8x8x4xf32>
    %58 = vector.shape_cast %57 : vector<8x8x4xf32> to vector<64x4xf32>
    %59 = vector.extract_strided_slice %56 {offsets = [1, 0, 0], sizes = [8, 8, 4], strides = [1, 1, 1]} : vector<10x8x4xf32> to vector<8x8x4xf32>
    %60 = vector.shape_cast %59 : vector<8x8x4xf32> to vector<64x4xf32>
    %61 = vector.extract_strided_slice %56 {offsets = [2, 0, 0], sizes = [8, 8, 4], strides = [1, 1, 1]} : vector<10x8x4xf32> to vector<8x8x4xf32>
    %62 = vector.shape_cast %61 : vector<8x8x4xf32> to vector<64x4xf32>
    %63 = tpu.concatenate %44, %46, %48, %51, %53, %55, %58, %60, %62 in 1 : vector<64x4xf32>, vector<64x4xf32>, vector<64x4xf32>, vector<64x4xf32>, vector<64x4xf32>, vector<64x4xf32>, vector<64x4xf32>, vector<64x4xf32>, vector<64x4xf32> -> vector<64x36xf32>
    %c0_12 = arith.constant 0 : index
    %c0_13 = arith.constant 0 : index
    %64 = vector.load %arg4[%c0_12, %c0_13] : memref<36x4xf32, #tpu.memory_space<vmem>>, vector<36x4xf32>
    %cst_14 = arith.constant dense<0.000000e+00> : vector<64x4xf32>
    %65 = tpu.matmul %63, %64, %cst_14 {dimension_numbers = #tpu.dot_dimension_numbers<[1], [0], [0], [1], [0, 0, 1, 1], [], []>} : vector<64x36xf32>, vector<36x4xf32>, vector<64x4xf32> -> vector<64x4xf32>
    %c0_15 = arith.constant 0 : index
    %c0_16 = arith.constant 0 : index
    %66 = vector.load %arg5[%c0_15, %c0_16] : memref<1x4xf32, #tpu.memory_space<vmem>>, vector<1x4xf32>
    %67 = vector.broadcast %66 : vector<1x4xf32> to vector<64x4xf32>
    %68 = arith.addf %65, %67 : vector<64x4xf32>
    %cst_17 = arith.constant 0.000000e+00 : f32
    %69 = vector.broadcast %cst_17 : f32 to vector<64x4xf32>
    %70 = arith.maximumf %68, %69 : vector<64x4xf32>
    %71 = arith.addf %70, %36 : vector<64x4xf32>
    %cst_18 = arith.constant 0.000000e+00 : f32
    %72 = vector.broadcast %cst_18 : f32 to vector<64x4xf32>
    %73 = arith.maximumf %71, %72 : vector<64x4xf32>
    %74 = vector.shape_cast %73 : vector<64x4xf32> to vector<8x8x4xf32>
    %c0_19 = arith.constant 0 : index
    %c0_20 = arith.constant 0 : index
    %c0_21 = arith.constant 0 : index
    %c0_22 = arith.constant 0 : index
    %75 = vector.load %arg6[%c0_19, %c0_20, %c0_21, %c0_22] : memref<1x8x8x4xf32, #tpu.memory_space<vmem>>, vector<1x8x8x4xf32>
    %76 = vector.shape_cast %75 : vector<1x8x8x4xf32> to vector<8x8x4xf32>
    %77 = vector.shape_cast %74 : vector<8x8x4xf32> to vector<1x8x8x4xf32>
    tpu.vector_store %arg6[%c0_19, %c0_20, %c0_21, %c0_22], %77 {strides = array<i32>} : memref<1x8x8x4xf32, #tpu.memory_space<vmem>>, vector<1x8x8x4xf32>,
    return
  }
  func.func @transform_0(%arg0: i32) -> (i32, i32, i32, i32) {
    %c0_i32 = arith.constant 0 : i32
    %c0_i32_0 = arith.constant 0 : i32
    %c0_i32_1 = arith.constant 0 : i32
    %c0_i32_2 = arith.constant 0 : i32
    return %arg0, %c0_i32, %c0_i32_0, %c0_i32_1 : i32, i32, i32, i32
  }
  func.func @transform_1(%arg0: i32) -> (i32, i32) {
    %c0_i32 = arith.constant 0 : i32
    %c0_i32_0 = arith.constant 0 : i32
    %c0_i32_1 = arith.constant 0 : i32
    return %c0_i32, %c0_i32_0 : i32, i32
  }
  func.func @transform_2(%arg0: i32) -> (i32, i32) {
    %c0_i32 = arith.constant 0 : i32
    %c0_i32_0 = arith.constant 0 : i32
    %c0_i32_1 = arith.constant 0 : i32
    return %c0_i32, %c0_i32_0 : i32, i32
  }
  func.func @transform_3(%arg0: i32) -> (i32, i32) {
    %c0_i32 = arith.constant 0 : i32
    %c0_i32_0 = arith.constant 0 : i32
    %c0_i32_1 = arith.constant 0 : i32
    return %c0_i32, %c0_i32_0 : i32, i32
  }
  func.func @transform_4(%arg0: i32) -> (i32, i32) {
    %c0_i32 = arith.constant 0 : i32
    %c0_i32_0 = arith.constant 0 : i32
    %c0_i32_1 = arith.constant 0 : i32
    return %c0_i32, %c0_i32_0 : i32, i32
  }
  func.func @transform_5(%arg0: i32) -> (i32, i32, i32, i32) {
    %c0_i32 = arith.constant 0 : i32
    %c0_i32_0 = arith.constant 0 : i32
    %c0_i32_1 = arith.constant 0 : i32
    %c0_i32_2 = arith.constant 0 : i32
    return %arg0, %c0_i32, %c0_i32_0, %c0_i32_1 : i32, i32, i32, i32
  }
}

module attributes {stable_mosaic.version = 11 : i64} {
  func.func @_resblock_kernel(%arg0: i32, %arg1: memref<1x4x4x4xf32, #tpu.memory_space<vmem>>, %arg2: memref<36x8xf32, #tpu.memory_space<vmem>>, %arg3: memref<1x8xf32, #tpu.memory_space<vmem>>, %arg4: memref<36x4xf32, #tpu.memory_space<vmem>>, %arg5: memref<1x4xf32, #tpu.memory_space<vmem>>, %arg6: memref<1x4x4x4xf32, #tpu.memory_space<vmem>>) attributes {dimension_semantics = [#tpu.dimension_semantics<parallel>], iteration_bounds = array<i64: 2>, scalar_prefetch = 0 : i64, scratch_operands = 0 : i64, tpu.core_type = #tpu.core_type<tc>, window_params = [{transform_indices = @transform_0, window_bounds = array<i64: 1, 4, 4, 4>}, {pipeline_mode = #tpu.pipeline_mode<synchronous>, transform_indices = @transform_1, window_bounds = array<i64: 36, 8>}, {pipeline_mode = #tpu.pipeline_mode<synchronous>, transform_indices = @transform_2, window_bounds = array<i64: 1, 8>}, {pipeline_mode = #tpu.pipeline_mode<synchronous>, transform_indices = @transform_3, window_bounds = array<i64: 36, 4>}, {pipeline_mode = #tpu.pipeline_mode<synchronous>, transform_indices = @transform_4, window_bounds = array<i64: 1, 4>}, {transform_indices = @transform_5, window_bounds = array<i64: 1, 4, 4, 4>}]} {
    %c0 = arith.constant 0 : index
    %c0_0 = arith.constant 0 : index
    %c0_1 = arith.constant 0 : index
    %c0_2 = arith.constant 0 : index
    %0 = vector.load %arg1[%c0, %c0_0, %c0_1, %c0_2] : memref<1x4x4x4xf32, #tpu.memory_space<vmem>>, vector<1x4x4x4xf32>
    %1 = vector.shape_cast %0 : vector<1x4x4x4xf32> to vector<4x4x4xf32>
    %cst = arith.constant 0.000000e+00 : f32
    %2 = vector.broadcast %cst : f32 to vector<1x4x4xf32>
    %cst_3 = arith.constant 0.000000e+00 : f32
    %3 = vector.broadcast %cst_3 : f32 to vector<6x1x4xf32>
    %4 = tpu.concatenate %2, %1, %2 in 0 : vector<1x4x4xf32>, vector<4x4x4xf32>, vector<1x4x4xf32> -> vector<6x4x4xf32>
    %5 = tpu.concatenate %3, %4, %3 in 1 : vector<6x1x4xf32>, vector<6x4x4xf32>, vector<6x1x4xf32> -> vector<6x6x4xf32>
    %6 = vector.extract_strided_slice %5 {offsets = [0, 0, 0], sizes = [6, 4, 4], strides = [1, 1, 1]} : vector<6x6x4xf32> to vector<6x4x4xf32>
    %7 = vector.extract_strided_slice %6 {offsets = [0, 0, 0], sizes = [4, 4, 4], strides = [1, 1, 1]} : vector<6x4x4xf32> to vector<4x4x4xf32>
    %8 = vector.shape_cast %7 : vector<4x4x4xf32> to vector<16x4xf32>
    %9 = vector.extract_strided_slice %6 {offsets = [1, 0, 0], sizes = [4, 4, 4], strides = [1, 1, 1]} : vector<6x4x4xf32> to vector<4x4x4xf32>
    %10 = vector.shape_cast %9 : vector<4x4x4xf32> to vector<16x4xf32>
    %11 = vector.extract_strided_slice %6 {offsets = [2, 0, 0], sizes = [4, 4, 4], strides = [1, 1, 1]} : vector<6x4x4xf32> to vector<4x4x4xf32>
    %12 = vector.shape_cast %11 : vector<4x4x4xf32> to vector<16x4xf32>
    %13 = vector.extract_strided_slice %5 {offsets = [0, 1, 0], sizes = [6, 4, 4], strides = [1, 1, 1]} : vector<6x6x4xf32> to vector<6x4x4xf32>
    %14 = vector.extract_strided_slice %13 {offsets = [0, 0, 0], sizes = [4, 4, 4], strides = [1, 1, 1]} : vector<6x4x4xf32> to vector<4x4x4xf32>
    %15 = vector.shape_cast %14 : vector<4x4x4xf32> to vector<16x4xf32>
    %16 = vector.extract_strided_slice %13 {offsets = [1, 0, 0], sizes = [4, 4, 4], strides = [1, 1, 1]} : vector<6x4x4xf32> to vector<4x4x4xf32>
    %17 = vector.shape_cast %16 : vector<4x4x4xf32> to vector<16x4xf32>
    %18 = vector.extract_strided_slice %13 {offsets = [2, 0, 0], sizes = [4, 4, 4], strides = [1, 1, 1]} : vector<6x4x4xf32> to vector<4x4x4xf32>
    %19 = vector.shape_cast %18 : vector<4x4x4xf32> to vector<16x4xf32>
    %20 = vector.extract_strided_slice %5 {offsets = [0, 2, 0], sizes = [6, 4, 4], strides = [1, 1, 1]} : vector<6x6x4xf32> to vector<6x4x4xf32>
    %21 = vector.extract_strided_slice %20 {offsets = [0, 0, 0], sizes = [4, 4, 4], strides = [1, 1, 1]} : vector<6x4x4xf32> to vector<4x4x4xf32>
    %22 = vector.shape_cast %21 : vector<4x4x4xf32> to vector<16x4xf32>
    %23 = vector.extract_strided_slice %20 {offsets = [1, 0, 0], sizes = [4, 4, 4], strides = [1, 1, 1]} : vector<6x4x4xf32> to vector<4x4x4xf32>
    %24 = vector.shape_cast %23 : vector<4x4x4xf32> to vector<16x4xf32>
    %25 = vector.extract_strided_slice %20 {offsets = [2, 0, 0], sizes = [4, 4, 4], strides = [1, 1, 1]} : vector<6x4x4xf32> to vector<4x4x4xf32>
    %26 = vector.shape_cast %25 : vector<4x4x4xf32> to vector<16x4xf32>
    %27 = tpu.concatenate %8, %10, %12, %15, %17, %19, %22, %24, %26 in 1 : vector<16x4xf32>, vector<16x4xf32>, vector<16x4xf32>, vector<16x4xf32>, vector<16x4xf32>, vector<16x4xf32>, vector<16x4xf32>, vector<16x4xf32>, vector<16x4xf32> -> vector<16x36xf32>
    %c0_4 = arith.constant 0 : index
    %c0_5 = arith.constant 0 : index
    %28 = vector.load %arg2[%c0_4, %c0_5] : memref<36x8xf32, #tpu.memory_space<vmem>>, vector<36x8xf32>
    %cst_6 = arith.constant dense<0.000000e+00> : vector<16x8xf32>
    %29 = tpu.matmul %27, %28, %cst_6 {dimension_numbers = #tpu.dot_dimension_numbers<[1], [0], [0], [1], [0, 0, 1, 1], [], []>} : vector<16x36xf32>, vector<36x8xf32>, vector<16x8xf32> -> vector<16x8xf32>
    %c0_7 = arith.constant 0 : index
    %c0_8 = arith.constant 0 : index
    %30 = vector.load %arg3[%c0_7, %c0_8] : memref<1x8xf32, #tpu.memory_space<vmem>>, vector<1x8xf32>
    %31 = vector.broadcast %30 : vector<1x8xf32> to vector<16x8xf32>
    %32 = arith.addf %29, %31 : vector<16x8xf32>
    %33 = vector.extract_strided_slice %32 {offsets = [0, 0], sizes = [16, 4], strides = [1, 1]} : vector<16x8xf32> to vector<16x4xf32>
    %cst_9 = arith.constant 0.000000e+00 : f32
    %34 = vector.broadcast %cst_9 : f32 to vector<16x4xf32>
    %35 = arith.maximumf %33, %34 : vector<16x4xf32>
    %36 = vector.extract_strided_slice %32 {offsets = [0, 4], sizes = [16, 4], strides = [1, 1]} : vector<16x8xf32> to vector<16x4xf32>
    %37 = vector.shape_cast %35 : vector<16x4xf32> to vector<4x4x4xf32>
    %cst_10 = arith.constant 0.000000e+00 : f32
    %38 = vector.broadcast %cst_10 : f32 to vector<1x4x4xf32>
    %cst_11 = arith.constant 0.000000e+00 : f32
    %39 = vector.broadcast %cst_11 : f32 to vector<6x1x4xf32>
    %40 = tpu.concatenate %38, %37, %38 in 0 : vector<1x4x4xf32>, vector<4x4x4xf32>, vector<1x4x4xf32> -> vector<6x4x4xf32>
    %41 = tpu.concatenate %39, %40, %39 in 1 : vector<6x1x4xf32>, vector<6x4x4xf32>, vector<6x1x4xf32> -> vector<6x6x4xf32>
    %42 = vector.extract_strided_slice %41 {offsets = [0, 0, 0], sizes = [6, 4, 4], strides = [1, 1, 1]} : vector<6x6x4xf32> to vector<6x4x4xf32>
    %43 = vector.extract_strided_slice %42 {offsets = [0, 0, 0], sizes = [4, 4, 4], strides = [1, 1, 1]} : vector<6x4x4xf32> to vector<4x4x4xf32>
    %44 = vector.shape_cast %43 : vector<4x4x4xf32> to vector<16x4xf32>
    %45 = vector.extract_strided_slice %42 {offsets = [1, 0, 0], sizes = [4, 4, 4], strides = [1, 1, 1]} : vector<6x4x4xf32> to vector<4x4x4xf32>
    %46 = vector.shape_cast %45 : vector<4x4x4xf32> to vector<16x4xf32>
    %47 = vector.extract_strided_slice %42 {offsets = [2, 0, 0], sizes = [4, 4, 4], strides = [1, 1, 1]} : vector<6x4x4xf32> to vector<4x4x4xf32>
    %48 = vector.shape_cast %47 : vector<4x4x4xf32> to vector<16x4xf32>
    %49 = vector.extract_strided_slice %41 {offsets = [0, 1, 0], sizes = [6, 4, 4], strides = [1, 1, 1]} : vector<6x6x4xf32> to vector<6x4x4xf32>
    %50 = vector.extract_strided_slice %49 {offsets = [0, 0, 0], sizes = [4, 4, 4], strides = [1, 1, 1]} : vector<6x4x4xf32> to vector<4x4x4xf32>
    %51 = vector.shape_cast %50 : vector<4x4x4xf32> to vector<16x4xf32>
    %52 = vector.extract_strided_slice %49 {offsets = [1, 0, 0], sizes = [4, 4, 4], strides = [1, 1, 1]} : vector<6x4x4xf32> to vector<4x4x4xf32>
    %53 = vector.shape_cast %52 : vector<4x4x4xf32> to vector<16x4xf32>
    %54 = vector.extract_strided_slice %49 {offsets = [2, 0, 0], sizes = [4, 4, 4], strides = [1, 1, 1]} : vector<6x4x4xf32> to vector<4x4x4xf32>
    %55 = vector.shape_cast %54 : vector<4x4x4xf32> to vector<16x4xf32>
    %56 = vector.extract_strided_slice %41 {offsets = [0, 2, 0], sizes = [6, 4, 4], strides = [1, 1, 1]} : vector<6x6x4xf32> to vector<6x4x4xf32>
    %57 = vector.extract_strided_slice %56 {offsets = [0, 0, 0], sizes = [4, 4, 4], strides = [1, 1, 1]} : vector<6x4x4xf32> to vector<4x4x4xf32>
    %58 = vector.shape_cast %57 : vector<4x4x4xf32> to vector<16x4xf32>
    %59 = vector.extract_strided_slice %56 {offsets = [1, 0, 0], sizes = [4, 4, 4], strides = [1, 1, 1]} : vector<6x4x4xf32> to vector<4x4x4xf32>
    %60 = vector.shape_cast %59 : vector<4x4x4xf32> to vector<16x4xf32>
    %61 = vector.extract_strided_slice %56 {offsets = [2, 0, 0], sizes = [4, 4, 4], strides = [1, 1, 1]} : vector<6x4x4xf32> to vector<4x4x4xf32>
    %62 = vector.shape_cast %61 : vector<4x4x4xf32> to vector<16x4xf32>
    %63 = tpu.concatenate %44, %46, %48, %51, %53, %55, %58, %60, %62 in 1 : vector<16x4xf32>, vector<16x4xf32>, vector<16x4xf32>, vector<16x4xf32>, vector<16x4xf32>, vector<16x4xf32>, vector<16x4xf32>, vector<16x4xf32>, vector<16x4xf32> -> vector<16x36xf32>
    %c0_12 = arith.constant 0 : index
    %c0_13 = arith.constant 0 : index
    %64 = vector.load %arg4[%c0_12, %c0_13] : memref<36x4xf32, #tpu.memory_space<vmem>>, vector<36x4xf32>
    %cst_14 = arith.constant dense<0.000000e+00> : vector<16x4xf32>
    %65 = tpu.matmul %63, %64, %cst_14 {dimension_numbers = #tpu.dot_dimension_numbers<[1], [0], [0], [1], [0, 0, 1, 1], [], []>} : vector<16x36xf32>, vector<36x4xf32>, vector<16x4xf32> -> vector<16x4xf32>
    %c0_15 = arith.constant 0 : index
    %c0_16 = arith.constant 0 : index
    %66 = vector.load %arg5[%c0_15, %c0_16] : memref<1x4xf32, #tpu.memory_space<vmem>>, vector<1x4xf32>
    %67 = vector.broadcast %66 : vector<1x4xf32> to vector<16x4xf32>
    %68 = arith.addf %65, %67 : vector<16x4xf32>
    %cst_17 = arith.constant 0.000000e+00 : f32
    %69 = vector.broadcast %cst_17 : f32 to vector<16x4xf32>
    %70 = arith.maximumf %68, %69 : vector<16x4xf32>
    %71 = arith.addf %70, %36 : vector<16x4xf32>
    %cst_18 = arith.constant 0.000000e+00 : f32
    %72 = vector.broadcast %cst_18 : f32 to vector<16x4xf32>
    %73 = arith.maximumf %71, %72 : vector<16x4xf32>
    %74 = vector.shape_cast %73 : vector<16x4xf32> to vector<4x4x4xf32>
    %c0_19 = arith.constant 0 : index
    %c0_20 = arith.constant 0 : index
    %c0_21 = arith.constant 0 : index
    %c0_22 = arith.constant 0 : index
    %75 = vector.load %arg6[%c0_19, %c0_20, %c0_21, %c0_22] : memref<1x4x4x4xf32, #tpu.memory_space<vmem>>, vector<1x4x4x4xf32>
    %76 = vector.shape_cast %75 : vector<1x4x4x4xf32> to vector<4x4x4xf32>
    %77 = vector.shape_cast %74 : vector<4x4x4xf32> to vector<1x4x4x4xf32>
    tpu.vector_store %arg6[%c0_19, %c0_20, %c0_21, %c0_22], %77 {strides = array<i32>} : memref<1x4x4x4xf32, #tpu.memory_space<vmem>>, vector<1x4x4x4xf32>,
    return
  }
  func.func @transform_0(%arg0: i32) -> (i32, i32, i32, i32) {
    %c0_i32 = arith.constant 0 : i32
    %c0_i32_0 = arith.constant 0 : i32
    %c0_i32_1 = arith.constant 0 : i32
    %c0_i32_2 = arith.constant 0 : i32
    return %arg0, %c0_i32, %c0_i32_0, %c0_i32_1 : i32, i32, i32, i32
  }
  func.func @transform_1(%arg0: i32) -> (i32, i32) {
    %c0_i32 = arith.constant 0 : i32
    %c0_i32_0 = arith.constant 0 : i32
    %c0_i32_1 = arith.constant 0 : i32
    return %c0_i32, %c0_i32_0 : i32, i32
  }
  func.func @transform_2(%arg0: i32) -> (i32, i32) {
    %c0_i32 = arith.constant 0 : i32
    %c0_i32_0 = arith.constant 0 : i32
    %c0_i32_1 = arith.constant 0 : i32
    return %c0_i32, %c0_i32_0 : i32, i32
  }
  func.func @transform_3(%arg0: i32) -> (i32, i32) {
    %c0_i32 = arith.constant 0 : i32
    %c0_i32_0 = arith.constant 0 : i32
    %c0_i32_1 = arith.constant 0 : i32
    return %c0_i32, %c0_i32_0 : i32, i32
  }
  func.func @transform_4(%arg0: i32) -> (i32, i32) {
    %c0_i32 = arith.constant 0 : i32
    %c0_i32_0 = arith.constant 0 : i32
    %c0_i32_1 = arith.constant 0 : i32
    return %c0_i32, %c0_i32_0 : i32, i32
  }
  func.func @transform_5(%arg0: i32) -> (i32, i32, i32, i32) {
    %c0_i32 = arith.constant 0 : i32
    %c0_i32_0 = arith.constant 0 : i32
    %c0_i32_1 = arith.constant 0 : i32
    %c0_i32_2 = arith.constant 0 : i32
    return %arg0, %c0_i32, %c0_i32_0, %c0_i32_1 : i32, i32, i32, i32
  }
}

module attributes {stable_mosaic.version = 11 : i64} {
  func.func @_resblock_kernel(%arg0: i32, %arg1: memref<1x8x8x4xf32, #tpu.memory_space<vmem>>, %arg2: memref<1x8x8x4xf32, #tpu.memory_space<vmem>>, %arg3: memref<36x8xf32, #tpu.memory_space<vmem>>, %arg4: memref<1x8xf32, #tpu.memory_space<vmem>>, %arg5: memref<36x4xf32, #tpu.memory_space<vmem>>, %arg6: memref<1x4xf32, #tpu.memory_space<vmem>>, %arg7: memref<1x8x8x4xf32, #tpu.memory_space<vmem>>) attributes {dimension_semantics = [#tpu.dimension_semantics<parallel>], iteration_bounds = array<i64: 2>, scalar_prefetch = 0 : i64, scratch_operands = 0 : i64, tpu.core_type = #tpu.core_type<tc>, window_params = [{transform_indices = @transform_0, window_bounds = array<i64: 1, 8, 8, 4>}, {transform_indices = @transform_1, window_bounds = array<i64: 1, 8, 8, 4>}, {pipeline_mode = #tpu.pipeline_mode<synchronous>, transform_indices = @transform_2, window_bounds = array<i64: 36, 8>}, {pipeline_mode = #tpu.pipeline_mode<synchronous>, transform_indices = @transform_3, window_bounds = array<i64: 1, 8>}, {pipeline_mode = #tpu.pipeline_mode<synchronous>, transform_indices = @transform_4, window_bounds = array<i64: 36, 4>}, {pipeline_mode = #tpu.pipeline_mode<synchronous>, transform_indices = @transform_5, window_bounds = array<i64: 1, 4>}, {transform_indices = @transform_6, window_bounds = array<i64: 1, 8, 8, 4>}]} {
    %c0 = arith.constant 0 : index
    %c0_0 = arith.constant 0 : index
    %c0_1 = arith.constant 0 : index
    %c0_2 = arith.constant 0 : index
    %0 = vector.load %arg1[%c0, %c0_0, %c0_1, %c0_2] : memref<1x8x8x4xf32, #tpu.memory_space<vmem>>, vector<1x8x8x4xf32>
    %1 = vector.shape_cast %0 : vector<1x8x8x4xf32> to vector<8x8x4xf32>
    %cst = arith.constant 0.000000e+00 : f32
    %2 = vector.broadcast %cst : f32 to vector<1x8x4xf32>
    %cst_3 = arith.constant 0.000000e+00 : f32
    %3 = vector.broadcast %cst_3 : f32 to vector<10x1x4xf32>
    %4 = tpu.concatenate %2, %1, %2 in 0 : vector<1x8x4xf32>, vector<8x8x4xf32>, vector<1x8x4xf32> -> vector<10x8x4xf32>
    %5 = tpu.concatenate %3, %4, %3 in 1 : vector<10x1x4xf32>, vector<10x8x4xf32>, vector<10x1x4xf32> -> vector<10x10x4xf32>
    %6 = vector.extract_strided_slice %5 {offsets = [0, 0, 0], sizes = [10, 8, 4], strides = [1, 1, 1]} : vector<10x10x4xf32> to vector<10x8x4xf32>
    %7 = vector.extract_strided_slice %6 {offsets = [0, 0, 0], sizes = [8, 8, 4], strides = [1, 1, 1]} : vector<10x8x4xf32> to vector<8x8x4xf32>
    %8 = vector.shape_cast %7 : vector<8x8x4xf32> to vector<64x4xf32>
    %9 = vector.extract_strided_slice %6 {offsets = [1, 0, 0], sizes = [8, 8, 4], strides = [1, 1, 1]} : vector<10x8x4xf32> to vector<8x8x4xf32>
    %10 = vector.shape_cast %9 : vector<8x8x4xf32> to vector<64x4xf32>
    %11 = vector.extract_strided_slice %6 {offsets = [2, 0, 0], sizes = [8, 8, 4], strides = [1, 1, 1]} : vector<10x8x4xf32> to vector<8x8x4xf32>
    %12 = vector.shape_cast %11 : vector<8x8x4xf32> to vector<64x4xf32>
    %13 = vector.extract_strided_slice %5 {offsets = [0, 1, 0], sizes = [10, 8, 4], strides = [1, 1, 1]} : vector<10x10x4xf32> to vector<10x8x4xf32>
    %14 = vector.extract_strided_slice %13 {offsets = [0, 0, 0], sizes = [8, 8, 4], strides = [1, 1, 1]} : vector<10x8x4xf32> to vector<8x8x4xf32>
    %15 = vector.shape_cast %14 : vector<8x8x4xf32> to vector<64x4xf32>
    %16 = vector.extract_strided_slice %13 {offsets = [1, 0, 0], sizes = [8, 8, 4], strides = [1, 1, 1]} : vector<10x8x4xf32> to vector<8x8x4xf32>
    %17 = vector.shape_cast %16 : vector<8x8x4xf32> to vector<64x4xf32>
    %18 = vector.extract_strided_slice %13 {offsets = [2, 0, 0], sizes = [8, 8, 4], strides = [1, 1, 1]} : vector<10x8x4xf32> to vector<8x8x4xf32>
    %19 = vector.shape_cast %18 : vector<8x8x4xf32> to vector<64x4xf32>
    %20 = vector.extract_strided_slice %5 {offsets = [0, 2, 0], sizes = [10, 8, 4], strides = [1, 1, 1]} : vector<10x10x4xf32> to vector<10x8x4xf32>
    %21 = vector.extract_strided_slice %20 {offsets = [0, 0, 0], sizes = [8, 8, 4], strides = [1, 1, 1]} : vector<10x8x4xf32> to vector<8x8x4xf32>
    %22 = vector.shape_cast %21 : vector<8x8x4xf32> to vector<64x4xf32>
    %23 = vector.extract_strided_slice %20 {offsets = [1, 0, 0], sizes = [8, 8, 4], strides = [1, 1, 1]} : vector<10x8x4xf32> to vector<8x8x4xf32>
    %24 = vector.shape_cast %23 : vector<8x8x4xf32> to vector<64x4xf32>
    %25 = vector.extract_strided_slice %20 {offsets = [2, 0, 0], sizes = [8, 8, 4], strides = [1, 1, 1]} : vector<10x8x4xf32> to vector<8x8x4xf32>
    %26 = vector.shape_cast %25 : vector<8x8x4xf32> to vector<64x4xf32>
    %27 = tpu.concatenate %8, %10, %12, %15, %17, %19, %22, %24, %26 in 1 : vector<64x4xf32>, vector<64x4xf32>, vector<64x4xf32>, vector<64x4xf32>, vector<64x4xf32>, vector<64x4xf32>, vector<64x4xf32>, vector<64x4xf32>, vector<64x4xf32> -> vector<64x36xf32>
    %c0_4 = arith.constant 0 : index
    %c0_5 = arith.constant 0 : index
    %28 = vector.load %arg3[%c0_4, %c0_5] : memref<36x8xf32, #tpu.memory_space<vmem>>, vector<36x8xf32>
    %cst_6 = arith.constant dense<0.000000e+00> : vector<64x8xf32>
    %29 = tpu.matmul %27, %28, %cst_6 {dimension_numbers = #tpu.dot_dimension_numbers<[1], [0], [0], [1], [0, 0, 1, 1], [], []>} : vector<64x36xf32>, vector<36x8xf32>, vector<64x8xf32> -> vector<64x8xf32>
    %c0_7 = arith.constant 0 : index
    %c0_8 = arith.constant 0 : index
    %30 = vector.load %arg4[%c0_7, %c0_8] : memref<1x8xf32, #tpu.memory_space<vmem>>, vector<1x8xf32>
    %31 = vector.broadcast %30 : vector<1x8xf32> to vector<64x8xf32>
    %32 = arith.addf %29, %31 : vector<64x8xf32>
    %33 = vector.extract_strided_slice %32 {offsets = [0, 0], sizes = [64, 4], strides = [1, 1]} : vector<64x8xf32> to vector<64x4xf32>
    %cst_9 = arith.constant 0.000000e+00 : f32
    %34 = vector.broadcast %cst_9 : f32 to vector<64x4xf32>
    %35 = arith.maximumf %33, %34 : vector<64x4xf32>
    %36 = vector.extract_strided_slice %32 {offsets = [0, 4], sizes = [64, 4], strides = [1, 1]} : vector<64x8xf32> to vector<64x4xf32>
    %37 = vector.shape_cast %35 : vector<64x4xf32> to vector<8x8x4xf32>
    %cst_10 = arith.constant 0.000000e+00 : f32
    %38 = vector.broadcast %cst_10 : f32 to vector<1x8x4xf32>
    %cst_11 = arith.constant 0.000000e+00 : f32
    %39 = vector.broadcast %cst_11 : f32 to vector<10x1x4xf32>
    %40 = tpu.concatenate %38, %37, %38 in 0 : vector<1x8x4xf32>, vector<8x8x4xf32>, vector<1x8x4xf32> -> vector<10x8x4xf32>
    %41 = tpu.concatenate %39, %40, %39 in 1 : vector<10x1x4xf32>, vector<10x8x4xf32>, vector<10x1x4xf32> -> vector<10x10x4xf32>
    %42 = vector.extract_strided_slice %41 {offsets = [0, 0, 0], sizes = [10, 8, 4], strides = [1, 1, 1]} : vector<10x10x4xf32> to vector<10x8x4xf32>
    %43 = vector.extract_strided_slice %42 {offsets = [0, 0, 0], sizes = [8, 8, 4], strides = [1, 1, 1]} : vector<10x8x4xf32> to vector<8x8x4xf32>
    %44 = vector.shape_cast %43 : vector<8x8x4xf32> to vector<64x4xf32>
    %45 = vector.extract_strided_slice %42 {offsets = [1, 0, 0], sizes = [8, 8, 4], strides = [1, 1, 1]} : vector<10x8x4xf32> to vector<8x8x4xf32>
    %46 = vector.shape_cast %45 : vector<8x8x4xf32> to vector<64x4xf32>
    %47 = vector.extract_strided_slice %42 {offsets = [2, 0, 0], sizes = [8, 8, 4], strides = [1, 1, 1]} : vector<10x8x4xf32> to vector<8x8x4xf32>
    %48 = vector.shape_cast %47 : vector<8x8x4xf32> to vector<64x4xf32>
    %49 = vector.extract_strided_slice %41 {offsets = [0, 1, 0], sizes = [10, 8, 4], strides = [1, 1, 1]} : vector<10x10x4xf32> to vector<10x8x4xf32>
    %50 = vector.extract_strided_slice %49 {offsets = [0, 0, 0], sizes = [8, 8, 4], strides = [1, 1, 1]} : vector<10x8x4xf32> to vector<8x8x4xf32>
    %51 = vector.shape_cast %50 : vector<8x8x4xf32> to vector<64x4xf32>
    %52 = vector.extract_strided_slice %49 {offsets = [1, 0, 0], sizes = [8, 8, 4], strides = [1, 1, 1]} : vector<10x8x4xf32> to vector<8x8x4xf32>
    %53 = vector.shape_cast %52 : vector<8x8x4xf32> to vector<64x4xf32>
    %54 = vector.extract_strided_slice %49 {offsets = [2, 0, 0], sizes = [8, 8, 4], strides = [1, 1, 1]} : vector<10x8x4xf32> to vector<8x8x4xf32>
    %55 = vector.shape_cast %54 : vector<8x8x4xf32> to vector<64x4xf32>
    %56 = vector.extract_strided_slice %41 {offsets = [0, 2, 0], sizes = [10, 8, 4], strides = [1, 1, 1]} : vector<10x10x4xf32> to vector<10x8x4xf32>
    %57 = vector.extract_strided_slice %56 {offsets = [0, 0, 0], sizes = [8, 8, 4], strides = [1, 1, 1]} : vector<10x8x4xf32> to vector<8x8x4xf32>
    %58 = vector.shape_cast %57 : vector<8x8x4xf32> to vector<64x4xf32>
    %59 = vector.extract_strided_slice %56 {offsets = [1, 0, 0], sizes = [8, 8, 4], strides = [1, 1, 1]} : vector<10x8x4xf32> to vector<8x8x4xf32>
    %60 = vector.shape_cast %59 : vector<8x8x4xf32> to vector<64x4xf32>
    %61 = vector.extract_strided_slice %56 {offsets = [2, 0, 0], sizes = [8, 8, 4], strides = [1, 1, 1]} : vector<10x8x4xf32> to vector<8x8x4xf32>
    %62 = vector.shape_cast %61 : vector<8x8x4xf32> to vector<64x4xf32>
    %63 = tpu.concatenate %44, %46, %48, %51, %53, %55, %58, %60, %62 in 1 : vector<64x4xf32>, vector<64x4xf32>, vector<64x4xf32>, vector<64x4xf32>, vector<64x4xf32>, vector<64x4xf32>, vector<64x4xf32>, vector<64x4xf32>, vector<64x4xf32> -> vector<64x36xf32>
    %c0_12 = arith.constant 0 : index
    %c0_13 = arith.constant 0 : index
    %64 = vector.load %arg5[%c0_12, %c0_13] : memref<36x4xf32, #tpu.memory_space<vmem>>, vector<36x4xf32>
    %cst_14 = arith.constant dense<0.000000e+00> : vector<64x4xf32>
    %65 = tpu.matmul %63, %64, %cst_14 {dimension_numbers = #tpu.dot_dimension_numbers<[1], [0], [0], [1], [0, 0, 1, 1], [], []>} : vector<64x36xf32>, vector<36x4xf32>, vector<64x4xf32> -> vector<64x4xf32>
    %c0_15 = arith.constant 0 : index
    %c0_16 = arith.constant 0 : index
    %66 = vector.load %arg6[%c0_15, %c0_16] : memref<1x4xf32, #tpu.memory_space<vmem>>, vector<1x4xf32>
    %67 = vector.broadcast %66 : vector<1x4xf32> to vector<64x4xf32>
    %68 = arith.addf %65, %67 : vector<64x4xf32>
    %cst_17 = arith.constant 0.000000e+00 : f32
    %69 = vector.broadcast %cst_17 : f32 to vector<64x4xf32>
    %70 = arith.maximumf %68, %69 : vector<64x4xf32>
    %71 = arith.addf %70, %36 : vector<64x4xf32>
    %cst_18 = arith.constant 0.000000e+00 : f32
    %72 = vector.broadcast %cst_18 : f32 to vector<64x4xf32>
    %73 = arith.maximumf %71, %72 : vector<64x4xf32>
    %c0_19 = arith.constant 0 : index
    %c0_20 = arith.constant 0 : index
    %c0_21 = arith.constant 0 : index
    %c0_22 = arith.constant 0 : index
    %74 = vector.load %arg2[%c0_19, %c0_20, %c0_21, %c0_22] : memref<1x8x8x4xf32, #tpu.memory_space<vmem>>, vector<1x8x8x4xf32>
    %75 = vector.shape_cast %74 : vector<1x8x8x4xf32> to vector<8x8x4xf32>
    %76 = vector.shape_cast %75 : vector<8x8x4xf32> to vector<64x4xf32>
    %77 = arith.addf %73, %76 : vector<64x4xf32>
    %78 = vector.shape_cast %77 : vector<64x4xf32> to vector<8x8x4xf32>
    %c0_23 = arith.constant 0 : index
    %c0_24 = arith.constant 0 : index
    %c0_25 = arith.constant 0 : index
    %c0_26 = arith.constant 0 : index
    %79 = vector.load %arg7[%c0_23, %c0_24, %c0_25, %c0_26] : memref<1x8x8x4xf32, #tpu.memory_space<vmem>>, vector<1x8x8x4xf32>
    %80 = vector.shape_cast %79 : vector<1x8x8x4xf32> to vector<8x8x4xf32>
    %81 = vector.shape_cast %78 : vector<8x8x4xf32> to vector<1x8x8x4xf32>
    tpu.vector_store %arg7[%c0_23, %c0_24, %c0_25, %c0_26], %81 {strides = array<i32>} : memref<1x8x8x4xf32, #tpu.memory_space<vmem>>, vector<1x8x8x4xf32>,
    return
  }
  func.func @transform_0(%arg0: i32) -> (i32, i32, i32, i32) {
    %c0_i32 = arith.constant 0 : i32
    %c0_i32_0 = arith.constant 0 : i32
    %c0_i32_1 = arith.constant 0 : i32
    %c0_i32_2 = arith.constant 0 : i32
    return %arg0, %c0_i32, %c0_i32_0, %c0_i32_1 : i32, i32, i32, i32
  }
  func.func @transform_1(%arg0: i32) -> (i32, i32, i32, i32) {
    %c0_i32 = arith.constant 0 : i32
    %c0_i32_0 = arith.constant 0 : i32
    %c0_i32_1 = arith.constant 0 : i32
    %c0_i32_2 = arith.constant 0 : i32
    return %arg0, %c0_i32, %c0_i32_0, %c0_i32_1 : i32, i32, i32, i32
  }
  func.func @transform_2(%arg0: i32) -> (i32, i32) {
    %c0_i32 = arith.constant 0 : i32
    %c0_i32_0 = arith.constant 0 : i32
    %c0_i32_1 = arith.constant 0 : i32
    return %c0_i32, %c0_i32_0 : i32, i32
  }
  func.func @transform_3(%arg0: i32) -> (i32, i32) {
    %c0_i32 = arith.constant 0 : i32
    %c0_i32_0 = arith.constant 0 : i32
    %c0_i32_1 = arith.constant 0 : i32
    return %c0_i32, %c0_i32_0 : i32, i32
  }
  func.func @transform_4(%arg0: i32) -> (i32, i32) {
    %c0_i32 = arith.constant 0 : i32
    %c0_i32_0 = arith.constant 0 : i32
    %c0_i32_1 = arith.constant 0 : i32
    return %c0_i32, %c0_i32_0 : i32, i32
  }
  func.func @transform_5(%arg0: i32) -> (i32, i32) {
    %c0_i32 = arith.constant 0 : i32
    %c0_i32_0 = arith.constant 0 : i32
    %c0_i32_1 = arith.constant 0 : i32
    return %c0_i32, %c0_i32_0 : i32, i32
  }
  func.func @transform_6(%arg0: i32) -> (i32, i32, i32, i32) {
    %c0_i32 = arith.constant 0 : i32
    %c0_i32_0 = arith.constant 0 : i32
    %c0_i32_1 = arith.constant 0 : i32
    %c0_i32_2 = arith.constant 0 : i32
    return %arg0, %c0_i32, %c0_i32_0, %c0_i32_1 : i32, i32, i32, i32
  }
}

module attributes {stable_mosaic.version = 11 : i64} {
  func.func @_resblock_kernel(%arg0: i32, %arg1: memref<1x16x16x4xf32, #tpu.memory_space<vmem>>, %arg2: memref<1x16x16x4xf32, #tpu.memory_space<vmem>>, %arg3: memref<36x8xf32, #tpu.memory_space<vmem>>, %arg4: memref<1x8xf32, #tpu.memory_space<vmem>>, %arg5: memref<36x4xf32, #tpu.memory_space<vmem>>, %arg6: memref<1x4xf32, #tpu.memory_space<vmem>>, %arg7: memref<1x16x16x4xf32, #tpu.memory_space<vmem>>) attributes {dimension_semantics = [#tpu.dimension_semantics<parallel>], iteration_bounds = array<i64: 2>, scalar_prefetch = 0 : i64, scratch_operands = 0 : i64, tpu.core_type = #tpu.core_type<tc>, window_params = [{transform_indices = @transform_0, window_bounds = array<i64: 1, 16, 16, 4>}, {transform_indices = @transform_1, window_bounds = array<i64: 1, 16, 16, 4>}, {pipeline_mode = #tpu.pipeline_mode<synchronous>, transform_indices = @transform_2, window_bounds = array<i64: 36, 8>}, {pipeline_mode = #tpu.pipeline_mode<synchronous>, transform_indices = @transform_3, window_bounds = array<i64: 1, 8>}, {pipeline_mode = #tpu.pipeline_mode<synchronous>, transform_indices = @transform_4, window_bounds = array<i64: 36, 4>}, {pipeline_mode = #tpu.pipeline_mode<synchronous>, transform_indices = @transform_5, window_bounds = array<i64: 1, 4>}, {transform_indices = @transform_6, window_bounds = array<i64: 1, 16, 16, 4>}]} {
    %c0 = arith.constant 0 : index
    %c0_0 = arith.constant 0 : index
    %c0_1 = arith.constant 0 : index
    %c0_2 = arith.constant 0 : index
    %0 = vector.load %arg1[%c0, %c0_0, %c0_1, %c0_2] : memref<1x16x16x4xf32, #tpu.memory_space<vmem>>, vector<1x16x16x4xf32>
    %1 = vector.shape_cast %0 : vector<1x16x16x4xf32> to vector<16x16x4xf32>
    %cst = arith.constant 0.000000e+00 : f32
    %2 = vector.broadcast %cst : f32 to vector<1x16x4xf32>
    %cst_3 = arith.constant 0.000000e+00 : f32
    %3 = vector.broadcast %cst_3 : f32 to vector<18x1x4xf32>
    %4 = tpu.concatenate %2, %1, %2 in 0 : vector<1x16x4xf32>, vector<16x16x4xf32>, vector<1x16x4xf32> -> vector<18x16x4xf32>
    %5 = tpu.concatenate %3, %4, %3 in 1 : vector<18x1x4xf32>, vector<18x16x4xf32>, vector<18x1x4xf32> -> vector<18x18x4xf32>
    %6 = vector.extract_strided_slice %5 {offsets = [0, 0, 0], sizes = [18, 16, 4], strides = [1, 1, 1]} : vector<18x18x4xf32> to vector<18x16x4xf32>
    %7 = vector.extract_strided_slice %6 {offsets = [0, 0, 0], sizes = [16, 16, 4], strides = [1, 1, 1]} : vector<18x16x4xf32> to vector<16x16x4xf32>
    %8 = vector.shape_cast %7 : vector<16x16x4xf32> to vector<256x4xf32>
    %9 = vector.extract_strided_slice %6 {offsets = [1, 0, 0], sizes = [16, 16, 4], strides = [1, 1, 1]} : vector<18x16x4xf32> to vector<16x16x4xf32>
    %10 = vector.shape_cast %9 : vector<16x16x4xf32> to vector<256x4xf32>
    %11 = vector.extract_strided_slice %6 {offsets = [2, 0, 0], sizes = [16, 16, 4], strides = [1, 1, 1]} : vector<18x16x4xf32> to vector<16x16x4xf32>
    %12 = vector.shape_cast %11 : vector<16x16x4xf32> to vector<256x4xf32>
    %13 = vector.extract_strided_slice %5 {offsets = [0, 1, 0], sizes = [18, 16, 4], strides = [1, 1, 1]} : vector<18x18x4xf32> to vector<18x16x4xf32>
    %14 = vector.extract_strided_slice %13 {offsets = [0, 0, 0], sizes = [16, 16, 4], strides = [1, 1, 1]} : vector<18x16x4xf32> to vector<16x16x4xf32>
    %15 = vector.shape_cast %14 : vector<16x16x4xf32> to vector<256x4xf32>
    %16 = vector.extract_strided_slice %13 {offsets = [1, 0, 0], sizes = [16, 16, 4], strides = [1, 1, 1]} : vector<18x16x4xf32> to vector<16x16x4xf32>
    %17 = vector.shape_cast %16 : vector<16x16x4xf32> to vector<256x4xf32>
    %18 = vector.extract_strided_slice %13 {offsets = [2, 0, 0], sizes = [16, 16, 4], strides = [1, 1, 1]} : vector<18x16x4xf32> to vector<16x16x4xf32>
    %19 = vector.shape_cast %18 : vector<16x16x4xf32> to vector<256x4xf32>
    %20 = vector.extract_strided_slice %5 {offsets = [0, 2, 0], sizes = [18, 16, 4], strides = [1, 1, 1]} : vector<18x18x4xf32> to vector<18x16x4xf32>
    %21 = vector.extract_strided_slice %20 {offsets = [0, 0, 0], sizes = [16, 16, 4], strides = [1, 1, 1]} : vector<18x16x4xf32> to vector<16x16x4xf32>
    %22 = vector.shape_cast %21 : vector<16x16x4xf32> to vector<256x4xf32>
    %23 = vector.extract_strided_slice %20 {offsets = [1, 0, 0], sizes = [16, 16, 4], strides = [1, 1, 1]} : vector<18x16x4xf32> to vector<16x16x4xf32>
    %24 = vector.shape_cast %23 : vector<16x16x4xf32> to vector<256x4xf32>
    %25 = vector.extract_strided_slice %20 {offsets = [2, 0, 0], sizes = [16, 16, 4], strides = [1, 1, 1]} : vector<18x16x4xf32> to vector<16x16x4xf32>
    %26 = vector.shape_cast %25 : vector<16x16x4xf32> to vector<256x4xf32>
    %27 = tpu.concatenate %8, %10, %12, %15, %17, %19, %22, %24, %26 in 1 : vector<256x4xf32>, vector<256x4xf32>, vector<256x4xf32>, vector<256x4xf32>, vector<256x4xf32>, vector<256x4xf32>, vector<256x4xf32>, vector<256x4xf32>, vector<256x4xf32> -> vector<256x36xf32>
    %c0_4 = arith.constant 0 : index
    %c0_5 = arith.constant 0 : index
    %28 = vector.load %arg3[%c0_4, %c0_5] : memref<36x8xf32, #tpu.memory_space<vmem>>, vector<36x8xf32>
    %cst_6 = arith.constant dense<0.000000e+00> : vector<256x8xf32>
    %29 = tpu.matmul %27, %28, %cst_6 {dimension_numbers = #tpu.dot_dimension_numbers<[1], [0], [0], [1], [0, 0, 1, 1], [], []>} : vector<256x36xf32>, vector<36x8xf32>, vector<256x8xf32> -> vector<256x8xf32>
    %c0_7 = arith.constant 0 : index
    %c0_8 = arith.constant 0 : index
    %30 = vector.load %arg4[%c0_7, %c0_8] : memref<1x8xf32, #tpu.memory_space<vmem>>, vector<1x8xf32>
    %31 = vector.broadcast %30 : vector<1x8xf32> to vector<256x8xf32>
    %32 = arith.addf %29, %31 : vector<256x8xf32>
    %33 = vector.extract_strided_slice %32 {offsets = [0, 0], sizes = [256, 4], strides = [1, 1]} : vector<256x8xf32> to vector<256x4xf32>
    %cst_9 = arith.constant 0.000000e+00 : f32
    %34 = vector.broadcast %cst_9 : f32 to vector<256x4xf32>
    %35 = arith.maximumf %33, %34 : vector<256x4xf32>
    %36 = vector.extract_strided_slice %32 {offsets = [0, 4], sizes = [256, 4], strides = [1, 1]} : vector<256x8xf32> to vector<256x4xf32>
    %37 = vector.shape_cast %35 : vector<256x4xf32> to vector<16x16x4xf32>
    %cst_10 = arith.constant 0.000000e+00 : f32
    %38 = vector.broadcast %cst_10 : f32 to vector<1x16x4xf32>
    %cst_11 = arith.constant 0.000000e+00 : f32
    %39 = vector.broadcast %cst_11 : f32 to vector<18x1x4xf32>
    %40 = tpu.concatenate %38, %37, %38 in 0 : vector<1x16x4xf32>, vector<16x16x4xf32>, vector<1x16x4xf32> -> vector<18x16x4xf32>
    %41 = tpu.concatenate %39, %40, %39 in 1 : vector<18x1x4xf32>, vector<18x16x4xf32>, vector<18x1x4xf32> -> vector<18x18x4xf32>
    %42 = vector.extract_strided_slice %41 {offsets = [0, 0, 0], sizes = [18, 16, 4], strides = [1, 1, 1]} : vector<18x18x4xf32> to vector<18x16x4xf32>
    %43 = vector.extract_strided_slice %42 {offsets = [0, 0, 0], sizes = [16, 16, 4], strides = [1, 1, 1]} : vector<18x16x4xf32> to vector<16x16x4xf32>
    %44 = vector.shape_cast %43 : vector<16x16x4xf32> to vector<256x4xf32>
    %45 = vector.extract_strided_slice %42 {offsets = [1, 0, 0], sizes = [16, 16, 4], strides = [1, 1, 1]} : vector<18x16x4xf32> to vector<16x16x4xf32>
    %46 = vector.shape_cast %45 : vector<16x16x4xf32> to vector<256x4xf32>
    %47 = vector.extract_strided_slice %42 {offsets = [2, 0, 0], sizes = [16, 16, 4], strides = [1, 1, 1]} : vector<18x16x4xf32> to vector<16x16x4xf32>
    %48 = vector.shape_cast %47 : vector<16x16x4xf32> to vector<256x4xf32>
    %49 = vector.extract_strided_slice %41 {offsets = [0, 1, 0], sizes = [18, 16, 4], strides = [1, 1, 1]} : vector<18x18x4xf32> to vector<18x16x4xf32>
    %50 = vector.extract_strided_slice %49 {offsets = [0, 0, 0], sizes = [16, 16, 4], strides = [1, 1, 1]} : vector<18x16x4xf32> to vector<16x16x4xf32>
    %51 = vector.shape_cast %50 : vector<16x16x4xf32> to vector<256x4xf32>
    %52 = vector.extract_strided_slice %49 {offsets = [1, 0, 0], sizes = [16, 16, 4], strides = [1, 1, 1]} : vector<18x16x4xf32> to vector<16x16x4xf32>
    %53 = vector.shape_cast %52 : vector<16x16x4xf32> to vector<256x4xf32>
    %54 = vector.extract_strided_slice %49 {offsets = [2, 0, 0], sizes = [16, 16, 4], strides = [1, 1, 1]} : vector<18x16x4xf32> to vector<16x16x4xf32>
    %55 = vector.shape_cast %54 : vector<16x16x4xf32> to vector<256x4xf32>
    %56 = vector.extract_strided_slice %41 {offsets = [0, 2, 0], sizes = [18, 16, 4], strides = [1, 1, 1]} : vector<18x18x4xf32> to vector<18x16x4xf32>
    %57 = vector.extract_strided_slice %56 {offsets = [0, 0, 0], sizes = [16, 16, 4], strides = [1, 1, 1]} : vector<18x16x4xf32> to vector<16x16x4xf32>
    %58 = vector.shape_cast %57 : vector<16x16x4xf32> to vector<256x4xf32>
    %59 = vector.extract_strided_slice %56 {offsets = [1, 0, 0], sizes = [16, 16, 4], strides = [1, 1, 1]} : vector<18x16x4xf32> to vector<16x16x4xf32>
    %60 = vector.shape_cast %59 : vector<16x16x4xf32> to vector<256x4xf32>
    %61 = vector.extract_strided_slice %56 {offsets = [2, 0, 0], sizes = [16, 16, 4], strides = [1, 1, 1]} : vector<18x16x4xf32> to vector<16x16x4xf32>
    %62 = vector.shape_cast %61 : vector<16x16x4xf32> to vector<256x4xf32>
    %63 = tpu.concatenate %44, %46, %48, %51, %53, %55, %58, %60, %62 in 1 : vector<256x4xf32>, vector<256x4xf32>, vector<256x4xf32>, vector<256x4xf32>, vector<256x4xf32>, vector<256x4xf32>, vector<256x4xf32>, vector<256x4xf32>, vector<256x4xf32> -> vector<256x36xf32>
    %c0_12 = arith.constant 0 : index
    %c0_13 = arith.constant 0 : index
    %64 = vector.load %arg5[%c0_12, %c0_13] : memref<36x4xf32, #tpu.memory_space<vmem>>, vector<36x4xf32>
    %cst_14 = arith.constant dense<0.000000e+00> : vector<256x4xf32>
    %65 = tpu.matmul %63, %64, %cst_14 {dimension_numbers = #tpu.dot_dimension_numbers<[1], [0], [0], [1], [0, 0, 1, 1], [], []>} : vector<256x36xf32>, vector<36x4xf32>, vector<256x4xf32> -> vector<256x4xf32>
    %c0_15 = arith.constant 0 : index
    %c0_16 = arith.constant 0 : index
    %66 = vector.load %arg6[%c0_15, %c0_16] : memref<1x4xf32, #tpu.memory_space<vmem>>, vector<1x4xf32>
    %67 = vector.broadcast %66 : vector<1x4xf32> to vector<256x4xf32>
    %68 = arith.addf %65, %67 : vector<256x4xf32>
    %cst_17 = arith.constant 0.000000e+00 : f32
    %69 = vector.broadcast %cst_17 : f32 to vector<256x4xf32>
    %70 = arith.maximumf %68, %69 : vector<256x4xf32>
    %71 = arith.addf %70, %36 : vector<256x4xf32>
    %cst_18 = arith.constant 0.000000e+00 : f32
    %72 = vector.broadcast %cst_18 : f32 to vector<256x4xf32>
    %73 = arith.maximumf %71, %72 : vector<256x4xf32>
    %c0_19 = arith.constant 0 : index
    %c0_20 = arith.constant 0 : index
    %c0_21 = arith.constant 0 : index
    %c0_22 = arith.constant 0 : index
    %74 = vector.load %arg2[%c0_19, %c0_20, %c0_21, %c0_22] : memref<1x16x16x4xf32, #tpu.memory_space<vmem>>, vector<1x16x16x4xf32>
    %75 = vector.shape_cast %74 : vector<1x16x16x4xf32> to vector<16x16x4xf32>
    %76 = vector.shape_cast %75 : vector<16x16x4xf32> to vector<256x4xf32>
    %77 = arith.addf %73, %76 : vector<256x4xf32>
    %78 = vector.shape_cast %77 : vector<256x4xf32> to vector<16x16x4xf32>
    %c0_23 = arith.constant 0 : index
    %c0_24 = arith.constant 0 : index
    %c0_25 = arith.constant 0 : index
    %c0_26 = arith.constant 0 : index
    %79 = vector.load %arg7[%c0_23, %c0_24, %c0_25, %c0_26] : memref<1x16x16x4xf32, #tpu.memory_space<vmem>>, vector<1x16x16x4xf32>
    %80 = vector.shape_cast %79 : vector<1x16x16x4xf32> to vector<16x16x4xf32>
    %81 = vector.shape_cast %78 : vector<16x16x4xf32> to vector<1x16x16x4xf32>
    tpu.vector_store %arg7[%c0_23, %c0_24, %c0_25, %c0_26], %81 {strides = array<i32>} : memref<1x16x16x4xf32, #tpu.memory_space<vmem>>, vector<1x16x16x4xf32>,
    return
  }
  func.func @transform_0(%arg0: i32) -> (i32, i32, i32, i32) {
    %c0_i32 = arith.constant 0 : i32
    %c0_i32_0 = arith.constant 0 : i32
    %c0_i32_1 = arith.constant 0 : i32
    %c0_i32_2 = arith.constant 0 : i32
    return %arg0, %c0_i32, %c0_i32_0, %c0_i32_1 : i32, i32, i32, i32
  }
  func.func @transform_1(%arg0: i32) -> (i32, i32, i32, i32) {
    %c0_i32 = arith.constant 0 : i32
    %c0_i32_0 = arith.constant 0 : i32
    %c0_i32_1 = arith.constant 0 : i32
    %c0_i32_2 = arith.constant 0 : i32
    return %arg0, %c0_i32, %c0_i32_0, %c0_i32_1 : i32, i32, i32, i32
  }
  func.func @transform_2(%arg0: i32) -> (i32, i32) {
    %c0_i32 = arith.constant 0 : i32
    %c0_i32_0 = arith.constant 0 : i32
    %c0_i32_1 = arith.constant 0 : i32
    return %c0_i32, %c0_i32_0 : i32, i32
  }
  func.func @transform_3(%arg0: i32) -> (i32, i32) {
    %c0_i32 = arith.constant 0 : i32
    %c0_i32_0 = arith.constant 0 : i32
    %c0_i32_1 = arith.constant 0 : i32
    return %c0_i32, %c0_i32_0 : i32, i32
  }
  func.func @transform_4(%arg0: i32) -> (i32, i32) {
    %c0_i32 = arith.constant 0 : i32
    %c0_i32_0 = arith.constant 0 : i32
    %c0_i32_1 = arith.constant 0 : i32
    return %c0_i32, %c0_i32_0 : i32, i32
  }
  func.func @transform_5(%arg0: i32) -> (i32, i32) {
    %c0_i32 = arith.constant 0 : i32
    %c0_i32_0 = arith.constant 0 : i32
    %c0_i32_1 = arith.constant 0 : i32
    return %c0_i32, %c0_i32_0 : i32, i32
  }
  func.func @transform_6(%arg0: i32) -> (i32, i32, i32, i32) {
    %c0_i32 = arith.constant 0 : i32
    %c0_i32_0 = arith.constant 0 : i32
    %c0_i32_1 = arith.constant 0 : i32
    %c0_i32_2 = arith.constant 0 : i32
    return %arg0, %c0_i32, %c0_i32_0, %c0_i32_1 : i32, i32, i32, i32
  }
}

</mosaic_0001>

<bundles_post_ra>
// kernel: hourglass2d_forward.8
= control target key start
LH: loop header
LB: loop body
LE: loop exit
PB: predicated region body
PF: predicated region fallthrough
CT: control target
= control target key end

     0   :  { %s979_s18 = smov 0   ;;  %s1258_s0 = inlined_call_operand.vmem [shape: f32[2,4,4,4], index: 0, kind: input, shape index: {}]   ;;  %s1259_s1 = inlined_call_operand.vmem [shape: f32[36,8], index: 1, kind: input, shape index: {}]   ;;  %s1260_s2 = inlined_call_operand.vmem [shape: f32[1,8], index: 2, kind: input, shape index: {}]   ;;  %s1261_s3 = inlined_call_operand.vmem [shape: f32[36,4], index: 3, kind: input, shape index: {}]   ;;  %s1262_s4 = inlined_call_operand.vmem [shape: f32[1,4], index: 4, kind: input, shape index: {}]   ;;  %s1263_s5 = inlined_call_operand.vmem [shape: f32[2,4,4,4], index: 5, kind: output, shape index: {}]  }
   0x1 LB: > { %s818_s19 = sadd.s32 4294967295, %s937_s18   ;;  %p822_p0 = scmp.ge.s32.totalorder %s937_s18, 1  ;;  %s937_s18 = sphi %s979_s18, %s15_s18  }
   0x2   : > { %p187_p1 = scmp.lt.s32.totalorder %s937_s18, 3 }
   0x4   : > { %p188_p2 = pnand %p822_p0, %p187_p1 }
   0x5   : > { %p215_p3 = scmp.lt.s32.totalorder (!%p188_p2), %s818_s19, 1  ;;  %v939_v0 = vmov (!%p188_p2), 0.0   ;;  %vm244_vm0 = vcmask (!%p188_p2), 1040384   ;;  %vm250_vm1 = vcmask (!%p188_p2), 1044480   ;;  %vm264_vm2 = vcmask (!%p188_p2), 1042432   ;;  %s940_s24 = smov (!%p188_p2), 8  }
   0x6   : > { %191 = sbr.rel (%p188_p2) target bundleno = 762 (0x2fa), region = 40  ;;  %v234_v1 = vrot.slane (!%p188_p2), %v939_v0, 7  ;;  %vm265_vm3 = vcmask (!%p188_p2), 1046532   ;;  %s941_s25 = smov (!%p188_p2), 4   ;;  %v401_v47 = vld [vmem:[%s1259_s1] sm:$0xff] (!%p188_p2)  ;;  %v402_v48 = vld [vmem:[%s1259_s1 + $0x8] sm:$0xff] (!%p188_p2) }
   0x7   : > { %vm1037_vm4 = vmor (!%p188_p2), %vm264_vm2, %vm265_vm3  ;;  %vm289_vm5 = vcmask (!%p188_p2), 1041408   ;;  %vm290_vm6 = vcmask (!%p188_p2), 1045508   ;;  %s942_s30 = smov (!%p188_p2), 12   ;;  %v897_v56 = vpack.c.bf16 (!%p188_p2), %v402_v48, %v401_v47  ;;  %v403_v57 = vld [vmem:[%s1259_s1 + $0x10] sm:$0xff] (!%p188_p2)  ;;  %v404_v58 = vld [vmem:[%s1259_s1 + $0x18] sm:$0xff] (!%p188_p2)  ;;  %s943_s10 = smov (!%p188_p2), 16  }
   0x8   : > { %v245_v2 = vsel (!%p188_p2), %vm244_vm0, 0.0, %v234_v1  ;;  %vm1086_vm7 = vmor (!%p188_p2), %vm289_vm5, %vm290_vm6  ;;  %v901_v63 = vpack.c.bf16 (!%p188_p2), %v404_v58, %v403_v57  ;;  %vm420_vm8 = vcmask (!%p188_p2), 1043456   ;;  %s944_s13 = smov (!%p188_p2), 20   ;;  %s945_s14 = smov (!%p188_p2), 24   ;;  %vm377_vm9 = vcmask (!%p188_p2), 31744  }
   0x9   : > { %v992_v3 = vsel (!%p188_p2), %vm250_vm1, %v245_v2, 0.0  ;;  %898 = vmatprep.subr.bf16.mxu0 (!%p188_p2), %v897_v56  ;;  %s946_s15 = smov (!%p188_p2), 28   ;;  %s947_s16 = smov (!%p188_p2), 32   ;;  %vm380_vm10 = vcmask (!%p188_p2), 64512   ;;  %vm383_vm11 = vcmask (!%p188_p2), 97280   ;;  %vm386_vm12 = vcmask (!%p188_p2), 130048  }
   0xa   : > { %v1001_v4 = vcombine.high (!%p188_p2), %v992_v3, %v992_v3  ;;  %v827_v13 = vrot.slane (!%p188_p2), %v992_v3, 9  ;;  %v832_v51 = vrot.slane (!%p188_p2), %v992_v3, 10  ;;  %900 = vmatpush3.bf16.msra.mxu0 (!%p188_p2), %v897_v56  ;;  %vm389_vm13 = vcmask (!%p188_p2), 162816   ;;  %v646_v59 = vld [vmem:[%s1261_s3 + $0x20] sm:$0xf] (!%p188_p2)  ;;  %s948_s8 = smov (!%p188_p2), 124  }
   0xb   : > { %902 = vmatprep.subr.bf16.mxu0 (!%p188_p2), %v901_v63  ;;  %vm392_vm14 = vcmask (!%p188_p2), 195584   ;;  %vm395_vm15 = vcmask (!%p188_p2), 228352   ;;  %vm398_vm2 = vcmask (!%p188_p2), 261120   ;;  %vm413_vm3 = vcmask (!%p188_p2), 293888  }
   0xc   : > { %v269_v17 = vrot.slane (!%p188_p2), %v1001_v4, 5  ;;  %v294_v52 = vrot.slane (!%p188_p2), %v1001_v4, 6 }
   0xd   : > { %s1269_s19 = smov (!%p215_p3, %s818_s19), 1 }
   0xe   : > { %s855_s20 = sshll.u32 %s1269_s19, 4  ;;  %v1056_v39 = vsel %vm1037_vm4, %v827_v13, %v269_v17  ;;  %v1098_v2 = vsel %vm1086_vm7, %v832_v51, %v294_v52  ;;  %904 = vmatpush3.bf16.msra.mxu0 %v901_v63 }
   0xf   : > { %s219_s23 = scalar_lea.vmem %s1258_s0, %s855_s20  ;;  %s224_s12 = scalar_lea.vmem %s1263_s5, %s855_s20 }
  0x10   : > { %v226_v5 = vld [vmem:[%s219_s23 + $0x4] sm:$0xf]  ;;  %v227_v6 = vld [vmem:[%s219_s23 + $0x8] sm:$0xf]  ;;  %v225_v7 = vld [vmem:[%s219_s23] sm:$0xf] }
  0x11   : > { %v236_v8 = vrot.slane %v226_v5, 7  ;;  %v237_v9 = vrot.slane %v227_v6, 7  ;;  %v235_v10 = vrot.slane %v225_v7, 7  ;;  %v228_v11 = vld [vmem:[%s219_s23 + $0xc] sm:$0xf] }
  0x12   : > { %v238_v12 = vrot.slane %v228_v11, 7 }
  0x13   : > { %v247_v14 = vsel %vm244_vm0, 0.0, %v236_v8  ;;  %v248_v15 = vsel %vm244_vm0, 0.0, %v237_v9  ;;  %v246_v16 = vsel %vm244_vm0, 0.0, %v235_v10  ;;  %v405_v8 = vld [vmem:[%s1259_s1 + $0x20] sm:$0xf] }
  0x14   : > { %v1009_v18 = vsel %vm250_vm1, %v247_v14, 0.0  ;;  %v1012_v19 = vsel %vm250_vm1, %v248_v15, 0.0  ;;  %v1015_v20 = vsel %vm250_vm1, %v246_v16, 0.0  ;;  %v249_v21 = vsel %vm244_vm0, 0.0, %v238_v12  ;;  %879 = vmatprep.subr.msk.mxu0 %vm420_vm8, %v405_v8 }
  0x15   : > { %v1020_v22 = vcombine.low %v1009_v18, %v1012_v19  ;;  %v316_v23 = vcombine.low %v1015_v20, %v1009_v18  ;;  %v1025_v24 = vsel %vm250_vm1, %v249_v21, 0.0  ;;  %v262_v25 = vcombine.high %v1009_v18, %v1009_v18  ;;  %880 = vmatpush3.msk.msra.mxu0 %vm420_vm8, %v405_v8 }
  0x16   : > { %v324_v26 = vcombine.low %v1025_v24, %v992_v3  ;;  %v317_v27 = vcombine.low %v1012_v19, %v1025_v24  ;;  %v263_v28 = vcombine.high %v1012_v19, %v1012_v19  ;;  %v829_v30 = vrot.slane %v1009_v18, 9 }
  0x17   : > { %325 = vrot.lane.b32.xlu1 %v1020_v22, %s940_s24  ;;  %318 = vrot.lane.b32.xlu0 %v316_v23, %s941_s25  ;;  %v277_v31 = vrot.slane %v262_v25, 5  ;;  %v830_v32 = vrot.slane %v1012_v19, 9  ;;  %v261_v33 = vcombine.high %v1015_v20, %v1015_v20  ;;  %v828_v34 = vrot.slane %v1015_v20, 9 }
  0x18   : > { %v281_v35 = vrot.slane %v263_v28, 5  ;;  %v284_v36 = vcombine.high %v1025_v24, %v1025_v24  ;;  %v831_v37 = vrot.slane %v1025_v24, 9  ;;  %v834_v49 = vrot.slane %v1009_v18, 10 }
  0x19   : > { %v278_v38 = vsel %vm1037_vm4, %v829_v30, %v277_v31  ;;  %v273_v40 = vrot.slane %v261_v33, 5  ;;  %v302_v50 = vrot.slane %v262_v25, 6  ;;  %v835_v55 = vrot.slane %v1012_v19, 10 }
  0x1a   : > { %v282_v41 = vsel %vm1037_vm4, %v830_v32, %v281_v35  ;;  %v287_v42 = vrot.slane %v284_v36, 5  ;;  %v306_v60 = vrot.slane %v263_v28, 6  ;;  %v833_v61 = vrot.slane %v1015_v20, 10 }
  0x1b   : > { %327 = vrot.lane.b32.xlu1 %v324_v26, %s940_s24  ;;  %320 = vrot.lane.b32.xlu0 %v317_v27, %s941_s25  ;;  %v332_v43 = vcombine.low %v278_v38, %v282_v41  ;;  %v274_v44 = vsel %vm1037_vm4, %v828_v34, %v273_v40  ;;  %v298_v62 = vrot.slane %v261_v33, 6  ;;  %v303_v1 = vsel %vm1086_vm7, %v834_v49, %v302_v50  ;;  %v837_v50 = vld [vmem:[%s1260_s2] ss:$0 sm:$0xff] }
  0x1c   : > { %v331_v45 = vcombine.low %v1056_v39, %v274_v44  ;;  %v288_v46 = vsel %vm1037_vm4, %v831_v37, %v287_v42  ;;  %v339_v54 = vcombine.low %v274_v44, %v278_v38  ;;  %v307_v4 = vsel %vm1086_vm7, %v835_v55, %v306_v60 }
  0x1d   : > { %v340_v53 = vcombine.low %v282_v41, %v288_v46  ;;  %v347_v0 = vcombine.low %v288_v46, %v1056_v39  ;;  %v299_v5 = vsel %vm1086_vm7, %v833_v61, %v298_v62  ;;  %v836_v6 = vrot.slane %v1025_v24, 10 }
  0x1e   : > { %v310_v7 = vrot.slane %v284_v36, 6  ;;  %v355_v9 = vcombine.low %v303_v1, %v307_v4  ;;  %v354_v10 = vcombine.low %v1098_v2, %v299_v5  ;;  %v362_v13 = vcombine.low %v299_v5, %v303_v1 }
  0x1f   : > { %335 = vrot.lane.b32.xlu1 %v332_v43, %s942_s30  ;;  %333 = vrot.lane.b32.xlu0 %v331_v45, %s942_s30  ;;  %v312_v25 = vcombine.low %v992_v3, %v1015_v20 }
  0x20   : > { %v311_v11 = vsel %vm1086_vm7, %v836_v6, %v310_v7 }
  0x21   : > { %v363_v12 = vcombine.low %v307_v4, %v311_v11  ;;  %v370_v14 = vcombine.low %v311_v11, %v1098_v2 }
  0x23   : > { %343 = vrot.lane.b32.xlu1 %v340_v53, %s943_s10  ;;  %341 = vrot.lane.b32.xlu0 %v339_v54, %s943_s10 }
  0x27   : > { %350 = vrot.lane.b32.xlu1 %v347_v0, %s944_s13  ;;  %348 = vrot.lane.b32.xlu0 %v332_v43, %s944_s13 }
  0x2b   : > { %358 = vrot.lane.b32.xlu1 %v355_v9, %s945_s14  ;;  %356 = vrot.lane.b32.xlu0 %v354_v10, %s945_s14 }
  0x2f   : > { %366 = vrot.lane.b32.xlu1 %v363_v12, %s946_s15  ;;  %364 = vrot.lane.b32.xlu0 %v362_v13, %s946_s15 }
  0x33   : > { %373 = vrot.lane.b32.xlu1 %v370_v14, %s947_s16  ;;  %371 = vrot.lane.b32.xlu0 %v355_v9, %s947_s16 }
  0x89   : > { %v326_v15 = vpop.permute.xlu1 %325  ;;  %v319_v16 = vpop.permute.xlu0 %318 }
  0x8a   : > { %v378_v28 = vsel %vm377_vm9, %v312_v25, %v319_v16 }
  0x8b   : > { %v381_v34 = vsel %vm380_vm10, %v378_v28, %v326_v15 }
  0x8d   : > { %v328_v17 = vpop.permute.xlu1 %327  ;;  %v321_v18 = vpop.permute.xlu0 %320 }
  0x8e   : > { %v379_v30 = vsel %vm377_vm9, %v1020_v22, %v321_v18 }
  0x8f   : > { %v382_v33 = vsel %vm380_vm10, %v379_v30, %v328_v17 }
  0x91   : > { %v336_v19 = vpop.permute.xlu1 %335  ;;  %v334_v21 = vpop.permute.xlu0 %333 }
  0x92   : > { %v385_v20 = vsel %vm383_vm11, %v382_v33, %v336_v19  ;;  %v384_v35 = vsel %vm383_vm11, %v381_v34, %v334_v21 }
  0x95   : > { %v344_v23 = vpop.permute.xlu1 %343  ;;  %v342_v24 = vpop.permute.xlu0 %341 }
  0x96   : > { %v388_v38 = vsel %vm386_vm12, %v385_v20, %v344_v23  ;;  %v387_v22 = vsel %vm386_vm12, %v384_v35, %v342_v24 }
  0x99   : > { %v351_v26 = vpop.permute.xlu1 %350  ;;  %v349_v27 = vpop.permute.xlu0 %348 }
  0x9a   : > { %v391_v40 = vsel %vm389_vm13, %v388_v38, %v351_v26  ;;  %v390_v41 = vsel %vm389_vm13, %v387_v22, %v349_v27 }
  0x9d   : > { %v359_v31 = vpop.permute.xlu1 %358  ;;  %v357_v32 = vpop.permute.xlu0 %356 }
  0x9e   : > { %v394_v42 = vsel %vm392_vm14, %v391_v40, %v359_v31  ;;  %v393_v43 = vsel %vm392_vm14, %v390_v41, %v357_v32 }
  0xa1   : > { %v367_v36 = vpop.permute.xlu1 %366  ;;  %v365_v37 = vpop.permute.xlu0 %364 }
  0xa2   : > { %v397_v44 = vsel %vm395_vm15, %v394_v42, %v367_v36  ;;  %v396_v45 = vsel %vm395_vm15, %v393_v43, %v365_v37 }
  0xa5   : > { %v374_v46 = vpop.permute.xlu1 %373  ;;  %v372_v47 = vpop.permute.xlu0 %371 }
  0xa6   : > { %v400_v48 = vsel %vm398_vm2, %v397_v44, %v374_v46  ;;  %v399_v49 = vsel %vm398_vm2, %v396_v45, %v372_v47  ;;  %v642_v46 = vld [vmem:[%s1261_s3] sm:$0xff]  ;;  %v643_v47 = vld [vmem:[%s1261_s3 + $0x8] sm:$0xff] }
  0xa7   : > { %881 = vmatprep.mubr.msk.f32.mxu0 %vm413_vm3, %v399_v49 }
  0xa8   : > { %882 = vmatmul.mubr.msk.f32.vlgmr.msra.gmra.mrb[0].mxu0 %vm413_vm3, %v400_v48  ;;  %v905_v48 = vpack.c.bf16 %v643_v47, %v642_v46 }
  0xaa   : > { %906 = vmatprep.subr.bf16.mxu1 %v905_v48 }
  0xab   : > { %908 = vmatpush3.bf16.msra.mxu1 %v905_v48 }
 0x17b   : > { %v883_v51 = vpop.f32.mrb[0].mxu0 }
 0x17c   : > { %v1146_v52 = vadd.f32 %v883_v51, %v837_v50  ;;  %v490_v53 = vpop.f32.mrb[1].mxu0 }
 0x17d   : > { %v1148_v54 = vadd.f32 %v837_v50, %v490_v53  ;;  %v644_v53 = vld [vmem:[%s1261_s3 + $0x10] sm:$0xff] }
 0x17e   : > { %v500_v55 = vmax.f32 %v1146_v52, 0.0 }
 0x17f   : > { %v499_v56 = vmax.f32 %v1148_v54, 0.0 }
 0x180   : > { %v504_v57 = vcombine.high %v500_v55, %v500_v55  ;;  %v507_v58 = vrot.slane %v500_v55, 7  ;;  %v645_v55 = vld [vmem:[%s1261_s3 + $0x18] sm:$0xff] }
 0x181   : > { %v503_v60 = vcombine.high %v499_v56, %v499_v56  ;;  %v505_v61 = vrot.slane %v499_v56, 7 }
 0x182   : > { %v508_v62 = vrot.slane %v504_v57, 7  ;;  %v515_v63 = vsel %vm244_vm0, 0.0, %v507_v58 }
 0x183   : > { %v519_v0 = vsel %vm250_vm1, %v515_v63, 0.0  ;;  %v506_v1 = vrot.slane %v503_v60, 7  ;;  %v513_v4 = vsel %vm244_vm0, 0.0, %v505_v61 }
 0x184   : > { %v516_v5 = vsel %vm244_vm0, 0.0, %v508_v62  ;;  %v1157_v6 = vsel %vm250_vm1, %v513_v4, 0.0  ;;  %v526_v7 = vcombine.high %v519_v0, %v519_v0  ;;  %v843_v23 = vrot.slane %v519_v0, 9 }
 0x185   : > { %v520_v8 = vsel %vm250_vm1, %v516_v5, 0.0  ;;  %v514_v9 = vsel %vm244_vm0, 0.0, %v506_v1  ;;  %v524_v10 = vcombine.high %v1157_v6, %v1157_v6  ;;  %v841_v24 = vrot.slane %v1157_v6, 9 }
 0x186   : > { %v518_v11 = vsel %vm250_vm1, %v514_v9, 0.0  ;;  %v566_v12 = vcombine.low %v519_v0, %v520_v8  ;;  %v540_v15 = vcombine.high %v520_v8, %v520_v8  ;;  %v537_v16 = vrot.slane %v526_v7, 5 }
 0x187   : > { %v565_v13 = vcombine.low %v1157_v6, %v518_v11  ;;  %v1165_v14 = vcombine.low %v518_v11, %v519_v0  ;;  %v529_v17 = vrot.slane %v524_v10, 5  ;;  %v844_v18 = vrot.slane %v520_v8, 9 }
 0x188   : > { %569 = vrot.lane.b32.xlu1 %v566_v12, %s941_s25  ;;  %v543_v19 = vrot.slane %v540_v15, 5  ;;  %v573_v21 = vcombine.low %v520_v8, %v992_v3  ;;  %v525_v25 = vcombine.high %v518_v11, %v518_v11  ;;  %v555_v27 = vrot.slane %v526_v7, 6 }
 0x189   : > { %567 = vrot.lane.b32.xlu0 %v565_v13, %s941_s25  ;;  %v538_v28 = vsel %vm1037_vm4, %v843_v23, %v537_v16  ;;  %v530_v30 = vsel %vm1037_vm4, %v841_v24, %v529_v17  ;;  %v547_v31 = vrot.slane %v524_v10, 6  ;;  %v847_v32 = vrot.slane %v519_v0, 10 }
 0x18a   : > { %v544_v26 = vsel %vm1037_vm4, %v844_v18, %v543_v19  ;;  %v842_v33 = vrot.slane %v518_v11, 9  ;;  %v533_v34 = vrot.slane %v525_v25, 5  ;;  %v846_v20 = vrot.slane %v518_v11, 10 }
 0x18b   : > { %v551_v35 = vrot.slane %v525_v25, 6  ;;  %v589_v36 = vcombine.low %v538_v28, %v544_v26  ;;  %v845_v37 = vrot.slane %v1157_v6, 10  ;;  %v559_v38 = vrot.slane %v540_v15, 6 }
 0x18c   : > { %576 = vrot.lane.b32.xlu1 %v573_v21, %s940_s24  ;;  %v580_v22 = vcombine.low %v1056_v39, %v530_v30  ;;  %v556_v40 = vsel %vm1086_vm7, %v847_v32, %v555_v27  ;;  %v534_v41 = vsel %vm1037_vm4, %v842_v33, %v533_v34  ;;  %v848_v29 = vrot.slane %v520_v8, 10 }
 0x18d   : > { %574 = vrot.lane.b32.xlu0 %v1165_v14, %s940_s24  ;;  %v552_v42 = vsel %vm1086_vm7, %v846_v20, %v551_v35  ;;  %v548_v43 = vsel %vm1086_vm7, %v845_v37, %v547_v31  ;;  %v581_v44 = vcombine.low %v534_v41, %v538_v28  ;;  %v596_v49 = vcombine.low %v544_v26, %v1056_v39  ;;  %v849_v31 = vld [vmem:[%s1262_s4] ss:$0 sm:$0xff] }
 0x18e   : > { %v604_v45 = vcombine.low %v552_v42, %v556_v40  ;;  %v603_v50 = vcombine.low %v1098_v2, %v548_v43  ;;  %v560_v51 = vsel %vm1086_vm7, %v848_v29, %v559_v38  ;;  %v909_v39 = vpack.c.bf16 %v645_v55, %v644_v53 }
 0x18f   : > { %v612_v56 = vcombine.low %v556_v40, %v560_v51  ;;  %v588_v57 = vcombine.low %v530_v30, %v534_v41  ;;  %v611_v58 = vcombine.low %v548_v43, %v552_v42  ;;  %v619_v60 = vcombine.low %v560_v51, %v1098_v2 }
 0x190   : > { %592 = vrot.lane.b32.xlu1 %v589_v36, %s943_s10  ;;  %910 = vmatprep.subr.bf16.mxu1 %v909_v39  ;;  %v561_v10 = vcombine.low %v992_v3, %v1157_v6  ;;  %vm758_vm0 = vcmask 27648  }
 0x191   : > { %582 = vrot.lane.b32.xlu0 %v580_v22, %s942_s30  ;;  %912 = vmatpush3.bf16.msra.mxu1 %v909_v39 }
 0x192   : > { %892 = vmatprep.subr.msk.mxu1 %vm420_vm8, %v646_v59 }
 0x194   : > { %599 = vrot.lane.b32.xlu1 %v596_v49, %s944_s13 }
 0x195   : > { %605 = vrot.lane.b32.xlu0 %v603_v50, %s945_s14  ;;  %893 = vmatpush3.msk.msra.mxu1 %vm420_vm8, %v646_v59 }
 0x198   : > { %615 = vrot.lane.b32.xlu1 %v612_v56, %s946_s15 }
 0x199   : > { %590 = vrot.lane.b32.xlu0 %v588_v57, %s943_s10 }
 0x19c   : > { %584 = vrot.lane.b32.xlu1 %v581_v44, %s942_s30 }
 0x19d   : > { %597 = vrot.lane.b32.xlu0 %v581_v44, %s944_s13 }
 0x1a0   : > { %607 = vrot.lane.b32.xlu1 %v604_v45, %s945_s14 }
 0x1a1   : > { %613 = vrot.lane.b32.xlu0 %v611_v58, %s946_s15 }
 0x1a4   : > { %622 = vrot.lane.b32.xlu1 %v619_v60, %s947_s16 }
 0x1a5   : > { %620 = vrot.lane.b32.xlu0 %v604_v45, %s947_s16 }
 0x1a8   : > { %744 = vrot.lane.b32.xlu1 %v1146_v52, %s948_s8 }
 0x1a9   : > { %742 = vrot.lane.b32.xlu0 %v1148_v54, %s948_s8 }
 0x1fa   : > { %v570_v61 = vpop.permute.xlu1 %569 }
 0x1fb   : > { %v568_v62 = vpop.permute.xlu0 %567  ;;  %v627_v2 = vsel %vm377_vm9, %v1165_v14, %v570_v61 }
 0x1fc   : > { %v626_v54 = vsel %vm377_vm9, %v561_v10, %v568_v62 }
 0x1fe   : > { %v577_v63 = vpop.permute.xlu1 %576 }
 0x1ff   : > { %v575_v0 = vpop.permute.xlu0 %574  ;;  %v629_v52 = vsel %vm380_vm10, %v627_v2, %v577_v63 }
 0x200   : > { %v628_v15 = vsel %vm380_vm10, %v626_v54, %v575_v0 }
 0x202   : > { %v593_v1 = vpop.permute.xlu1 %592 }
 0x203   : > { %v583_v4 = vpop.permute.xlu0 %582 }
 0x204   : > { %v630_v17 = vsel %vm383_vm11, %v628_v15, %v583_v4 }
 0x206   : > { %v600_v5 = vpop.permute.xlu1 %599 }
 0x207   : > { %v606_v7 = vpop.permute.xlu0 %605 }
 0x20a   : > { %v616_v8 = vpop.permute.xlu1 %615 }
 0x20b   : > { %v591_v9 = vpop.permute.xlu0 %590 }
 0x20c   : > { %v632_v18 = vsel %vm386_vm12, %v630_v17, %v591_v9 }
 0x20e   : > { %v585_v11 = vpop.permute.xlu1 %584 }
 0x20f   : > { %v631_v12 = vsel %vm383_vm11, %v629_v52, %v585_v11  ;;  %v598_v13 = vpop.permute.xlu0 %597 }
 0x210   : > { %v633_v16 = vsel %vm386_vm12, %v631_v12, %v593_v1  ;;  %v634_v3 = vsel %vm389_vm13, %v632_v18, %v598_v13 }
 0x211   : > { %v635_v14 = vsel %vm389_vm13, %v633_v16, %v600_v5  ;;  %v636_v23 = vsel %vm392_vm14, %v634_v3, %v606_v7 }
 0x212   : > { %v608_v19 = vpop.permute.xlu1 %607 }
 0x213   : > { %v614_v6 = vpop.permute.xlu0 %613  ;;  %v637_v21 = vsel %vm392_vm14, %v635_v14, %v608_v19 }
 0x214   : > { %v638_v25 = vsel %vm395_vm15, %v636_v23, %v614_v6  ;;  %v639_v27 = vsel %vm395_vm15, %v637_v21, %v616_v8 }
 0x216   : > { %v623_v24 = vpop.permute.xlu1 %622 }
 0x217   : > { %v621_v26 = vpop.permute.xlu0 %620  ;;  %v641_v30 = vsel %vm398_vm2, %v639_v27, %v623_v24 }
 0x218   : > { %v640_v28 = vsel %vm398_vm2, %v638_v25, %v621_v26 }
 0x219   : > { %894 = vmatprep.mubr.msk.f32.mxu1 %vm413_vm3, %v640_v28 }
 0x21a   : > { %895 = vmatmul.mubr.msk.f32.vlgmr.msra.gmra.mrb[0].mxu1 %vm413_vm3, %v641_v30  ;;  %v745_v36 = vpop.permute.xlu1 %744 }
 0x21b   : > { %v743_v38 = vpop.permute.xlu0 %742 }
 0x2ed   : > { %v896_v32 = vpop.f32.mrb[0].mxu1 }
 0x2ee   : > { %v735_v33 = vadd.f32 %v896_v32, %v849_v31  ;;  %v729_v34 = vpop.f32.mrb[1].mxu1 }
 0x2ef   : > { %v730_v20 = vadd.f32 %v849_v31, %v729_v34 }
 0x2f0   : > { %v739_v35 = vmax.f32 %v735_v33, 0.0 }
 0x2f1   : > { %v738_v37 = vmax.f32 %v730_v20, 0.0 }
 0x2f2   : > { %v749_v22 = vadd.f32 %v745_v36, %v739_v35 }
 0x2f3   : > { %v748_v40 = vadd.f32 %v743_v38, %v738_v37 }
 0x2f4   : > { %v751_v41 = vmax.f32 %v749_v22, 0.0 }
 0x2f5   : > { %v750_v42 = vmax.f32 %v748_v40, 0.0 }
 0x2f6   : > { %v755_v43 = vcombine.high %v751_v41, %v751_v41  ;;  %761 = vst.msk [vmem:[%s224_s12 + $0x8] sm:$0xf] %vm758_vm0, %v751_v41 }
 0x2f7   : > { %v754_v44 = vcombine.high %v750_v42, %v750_v42  ;;  %759 = vst.msk [vmem:[%s224_s12] sm:$0xf] %vm758_vm0, %v750_v42 }
 0x2f8   : > { %762 = vst.msk [vmem:[%s224_s12 + $0xc] sm:$0xf] %vm758_vm0, %v755_v43 }
 0x2f9   : > { %760 = vst.msk [vmem:[%s224_s12 + $0x4] sm:$0xf] %vm758_vm0, %v754_v44 }
 0x2fa PF: > { %s15_s18 = sadd.s32 1, %s937_s18  }
 0x2fb   : > { %p12_p4 = scmp.ge.s32.totalorder %s15_s18, 4  }
 0x2fd   :  { %14 = sbr.rel (!%p12_p4) target bundleno = 1 (0x1), region = 70 }

// kernel: hourglass2d_forward.7
= control target key start
LH: loop header
LB: loop body
LE: loop exit
PB: predicated region body
PF: predicated region fallthrough
CT: control target
= control target key end

     0   :  { %s1564_s18 = smov 0   ;;  %s2170_s0 = inlined_call_operand.vmem [shape: f32[2,8,8,4], index: 0, kind: input, shape index: {}]   ;;  %s2171_s1 = inlined_call_operand.vmem [shape: f32[36,8], index: 1, kind: input, shape index: {}]   ;;  %s2172_s2 = inlined_call_operand.vmem [shape: f32[1,8], index: 2, kind: input, shape index: {}]   ;;  %s2173_s3 = inlined_call_operand.vmem [shape: f32[36,4], index: 3, kind: input, shape index: {}]   ;;  %s2174_s4 = inlined_call_operand.vmem [shape: f32[1,4], index: 4, kind: input, shape index: {}]   ;;  %s2175_s5 = inlined_call_operand.vmem [shape: f32[2,8,8,4], index: 5, kind: output, shape index: {}]  }
   0x1 LB: > { %s1379_s19 = sadd.s32 4294967295, %s1522_s18   ;;  %p1383_p0 = scmp.ge.s32.totalorder %s1522_s18, 1  ;;  %s1522_s18 = sphi %s1564_s18, %s15_s18  }
   0x2   : > { %p187_p1 = scmp.lt.s32.totalorder %s1522_s18, 3 }
   0x4   : > { %p188_p2 = pnand %p1383_p0, %p187_p1 }
   0x5   : > { %vm260_vm0 = vcmask (!%p188_p2), 1040384   ;;  %p215_p3 = scmp.lt.s32.totalorder (!%p188_p2), %s1379_s19, 1  ;;  %v1524_v0 = vmov (!%p188_p2), 0.0   ;;  %vm295_vm1 = vcmask (!%p188_p2), 1046528   ;;  %s1525_s24 = smov (!%p188_p2), 12   ;;  %vm325_vm2 = vcmask (!%p188_p2), 1045504  }
   0x6   : > { %191 = sbr.rel (%p188_p2) target bundleno = 874 (0x36a), region = 40  ;;  %v242_v1 = vrot.slane (!%p188_p2), %v1524_v0, 7  ;;  %s1526_s25 = smov (!%p188_p2), 8   ;;  %v617_v39 = vld [vmem:[%s2171_s1] sm:$0xff] (!%p188_p2)  ;;  %v618_v40 = vld [vmem:[%s2171_s1 + $0x8] sm:$0xff] (!%p188_p2)  ;;  %v619_v43 = vld [vmem:[%s2171_s1 + $0x10] sm:$0xff] (!%p188_p2) }
   0x7   : > { %s1527_s26 = smov (!%p188_p2), 4   ;;  %s1528_s27 = smov (!%p188_p2), 16   ;;  %v1482_v41 = vpack.c.bf16 (!%p188_p2), %v618_v40, %v617_v39  ;;  %v620_v44 = vld [vmem:[%s2171_s1 + $0x18] sm:$0xff] (!%p188_p2)  ;;  %v621_v48 = vld [vmem:[%s2171_s1 + $0x20] sm:$0xf] (!%p188_p2)  ;;  %vm654_vm3 = vcmask (!%p188_p2), 1043456  }
   0x8   : > { %v1575_v2 = vsel (!%p188_p2), %vm260_vm0, 0.0, %v242_v1  ;;  %v270_v3 = vsel (!%p188_p2), %vm260_vm0, %v242_v1, 0.0  ;;  %s1529_s28 = smov (!%p188_p2), 20   ;;  %s1530_s8 = smov (!%p188_p2), 24   ;;  %v1486_v45 = vpack.c.bf16 (!%p188_p2), %v620_v44, %v619_v43  ;;  %vm545_vm4 = vcmask (!%p188_p2), 31744  }
   0x9   : > { %v296_v4 = vrot.slane (!%p188_p2), %v1575_v2, 1  ;;  %v297_v5 = vrot.slane (!%p188_p2), %v270_v3, 1  ;;  %v326_v31 = vrot.slane (!%p188_p2), %v1575_v2, 2  ;;  %v327_v32 = vrot.slane (!%p188_p2), %v270_v3, 2  ;;  %1483 = vmatprep.subr.bf16.mxu0 (!%p188_p2), %v1482_v41  ;;  %s1531_s13 = smov (!%p188_p2), 28   ;;  %s1532_s16 = smov (!%p188_p2), 32  }
   0xa   : > { %1485 = vmatpush3.bf16.msra.mxu0 (!%p188_p2), %v1482_v41  ;;  %vm554_vm5 = vcmask (!%p188_p2), 64512   ;;  %vm563_vm6 = vcmask (!%p188_p2), 97280   ;;  %vm572_vm7 = vcmask (!%p188_p2), 130048   ;;  %vm581_vm8 = vcmask (!%p188_p2), 162816  }
   0xb   : > { %v1588_v6 = vsel (!%p188_p2), %vm295_vm1, %v296_v4, %v297_v5  ;;  %v1642_v35 = vsel (!%p188_p2), %vm325_vm2, %v326_v31, %v327_v32  ;;  %1487 = vmatprep.subr.bf16.mxu0 (!%p188_p2), %v1486_v45  ;;  %vm590_vm9 = vcmask (!%p188_p2), 195584   ;;  %vm599_vm10 = vcmask (!%p188_p2), 228352  }
   0xc   : > { %401 = vrot.lane.b32.xlu0 (!%p188_p2), %v1588_v6, %s1525_s24  ;;  %vm608_vm11 = vcmask (!%p188_p2), 261120   ;;  %vm629_vm12 = vcmask (!%p188_p2), 293888  }
   0xd   : > { %s2177_s19 = smov (!%p215_p3, %s1379_s19), 1 }
   0xe   : > { %s1410_s20 = sshll.u32 %s2177_s19, 6  ;;  %1489 = vmatpush3.bf16.msra.mxu0 %v1486_v45 }
   0xf   : > { %s1585_s23 = scalar_lea.vmem %s2170_s0, %s1410_s20  ;;  %1446 = vmatprep.subr.msk.mxu0 %vm654_vm3, %v621_v48 }
  0x10   : > { %v226_v7 = vld [vmem:[%s1585_s23 + $0x8] sm:$0xff]  ;;  %v225_v8 = vld [vmem:[%s1585_s23] sm:$0xff]  ;;  %v227_v9 = vld [vmem:[%s1585_s23 + $0x10] sm:$0xff] }
  0x11   : > { %v244_v10 = vrot.slane %v226_v7, 7  ;;  %v243_v11 = vrot.slane %v225_v8, 7  ;;  %v245_v12 = vrot.slane %v227_v9, 7  ;;  %v228_v23 = vld [vmem:[%s1585_s23 + $0x18] sm:$0xff]  ;;  %v229_v30 = vld [vmem:[%s1585_s23 + $0x20] sm:$0xff]  ;;  %v230_v53 = vld [vmem:[%s1585_s23 + $0x28] sm:$0xff] }
  0x12   : > { %v246_v25 = vrot.slane %v228_v23, 7  ;;  %v247_v34 = vrot.slane %v229_v30, 7  ;;  %1447 = vmatpush3.msk.msra.mxu0 %vm654_vm3, %v621_v48  ;;  %v248_v57 = vrot.slane %v230_v53, 7  ;;  %v231_v63 = vld [vmem:[%s1585_s23 + $0x30] sm:$0xff] }
  0x13   : > { %v1596_v13 = vsel %vm260_vm0, 0.0, %v244_v10  ;;  %v1599_v14 = vsel %vm260_vm0, 0.0, %v243_v11  ;;  %v271_v15 = vsel %vm260_vm0, %v243_v11, 0.0  ;;  %v1607_v16 = vsel %vm260_vm0, 0.0, %v245_v12  ;;  %v232_v11 = vld [vmem:[%s1585_s23 + $0x38] sm:$0xff] }
  0x14   : > { %377 = vrot.lane.b32.xlu1 %v1596_v13, %s1526_s25  ;;  %353 = vrot.lane.b32.xlu0 %v1599_v14, %s1527_s26  ;;  %v299_v17 = vrot.slane %v1599_v14, 1  ;;  %v300_v18 = vrot.slane %v271_v15, 1  ;;  %v272_v19 = vsel %vm260_vm0, %v244_v10, 0.0  ;;  %v302_v21 = vrot.slane %v1596_v13, 1 }
  0x15   : > { %v303_v22 = vrot.slane %v272_v19, 1  ;;  %v1623_v26 = vsel %vm260_vm0, %v245_v12, 0.0  ;;  %v1628_v27 = vsel %vm260_vm0, 0.0, %v246_v25  ;;  %v305_v28 = vrot.slane %v1607_v16, 1 }
  0x16   : > { %v301_v20 = vsel %vm295_vm1, %v299_v17, %v300_v18  ;;  %v306_v29 = vrot.slane %v1623_v26, 1  ;;  %v1645_v36 = vsel %vm260_vm0, 0.0, %v247_v34  ;;  %v329_v37 = vrot.slane %v1599_v14, 2 }
  0x17   : > { %v304_v24 = vsel %vm295_vm1, %v302_v21, %v303_v22  ;;  %v330_v38 = vrot.slane %v271_v15, 2  ;;  %v332_v46 = vrot.slane %v1596_v13, 2  ;;  %v333_v47 = vrot.slane %v272_v19, 2 }
  0x18   : > { %379 = vrot.lane.b32.xlu1 %v1607_v16, %s1526_s25  ;;  %355 = vrot.lane.b32.xlu0 %v1596_v13, %s1527_s26  ;;  %v307_v33 = vsel %vm295_vm1, %v305_v28, %v306_v29  ;;  %v274_v50 = vsel %vm260_vm0, %v246_v25, 0.0  ;;  %v308_v51 = vrot.slane %v1628_v27, 1  ;;  %v335_v55 = vrot.slane %v1607_v16, 2 }
  0x19   : > { %v331_v42 = vsel %vm325_vm2, %v329_v37, %v330_v38  ;;  %v334_v49 = vsel %vm325_vm2, %v332_v46, %v333_v47  ;;  %v309_v52 = vrot.slane %v274_v50, 1  ;;  %v336_v56 = vrot.slane %v1623_v26, 2 }
  0x1a   : > { %v275_v58 = vsel %vm260_vm0, %v247_v34, 0.0  ;;  %v1692_v60 = vsel %vm260_vm0, 0.0, %v248_v57  ;;  %v311_v61 = vrot.slane %v1645_v36, 1  ;;  %v249_v1 = vrot.slane %v231_v63, 7 }
  0x1b   : > { %v310_v54 = vsel %vm295_vm1, %v308_v51, %v309_v52  ;;  %v337_v59 = vsel %vm325_vm2, %v335_v55, %v336_v56  ;;  %v312_v62 = vrot.slane %v275_v58, 1  ;;  %v338_v4 = vrot.slane %v1628_v27, 2 }
  0x1c   : > { %357 = vrot.lane.b32.xlu1 %v1607_v16, %s1527_s26  ;;  %425 = vrot.lane.b32.xlu0 %v301_v20, %s1528_s27  ;;  %v1704_v3 = vsel %vm260_vm0, 0.0, %v249_v1  ;;  %v339_v5 = vrot.slane %v274_v50, 2  ;;  %v276_v8 = vsel %vm260_vm0, %v248_v57, 0.0  ;;  %v314_v9 = vrot.slane %v1692_v60, 1 }
  0x1d   : > { %v313_v0 = vsel %vm295_vm1, %v311_v61, %v312_v62  ;;  %v315_v10 = vrot.slane %v276_v8, 1  ;;  %v341_v15 = vrot.slane %v1645_v36, 2  ;;  %v342_v17 = vrot.slane %v275_v58, 2 }
  0x1e   : > { %v340_v7 = vsel %vm325_vm2, %v338_v4, %v339_v5  ;;  %v250_v18 = vrot.slane %v232_v11, 7  ;;  %v277_v19 = vsel %vm260_vm0, %v249_v1, 0.0  ;;  %v317_v22 = vrot.slane %v1704_v3, 1 }
  0x1f   : > { %v316_v12 = vsel %vm295_vm1, %v314_v9, %v315_v10  ;;  %v318_v23 = vrot.slane %v277_v19, 1  ;;  %v344_v25 = vrot.slane %v1692_v60, 2  ;;  %v345_v26 = vrot.slane %v276_v8, 2 }
  0x20   : > { %403 = vrot.lane.b32.xlu1 %v301_v20, %s1525_s24  ;;  %427 = vrot.lane.b32.xlu0 %v304_v24, %s1528_s27  ;;  %v343_v20 = vsel %vm325_vm2, %v341_v15, %v342_v17  ;;  %v269_v21 = vsel %vm260_vm0, 0.0, %v250_v18  ;;  %v278_v28 = vsel %vm260_vm0, %v250_v18, 0.0  ;;  %v348_v34 = vrot.slane %v277_v19, 2 }
  0x21   : > { %v346_v29 = vsel %vm325_vm2, %v344_v25, %v345_v26  ;;  %v322_v30 = vrot.slane %v269_v21, 1  ;;  %v323_v31 = vrot.slane %v278_v28, 1  ;;  %v350_v39 = vrot.slane %v269_v21, 2 }
  0x22   : > { %v351_v40 = vrot.slane %v278_v28, 2 }
  0x23   : > { %v324_v32 = vsel %vm295_vm1, %v322_v30, %v323_v31 }
  0x24   : > { %449 = vrot.lane.b32.xlu1 %v304_v24, %s1529_s28  ;;  %359 = vrot.lane.b32.xlu0 %v1628_v27, %s1527_s26  ;;  %v352_v43 = vsel %vm325_vm2, %v350_v39, %v351_v40 }
  0x28   : > { %381 = vrot.lane.b32.xlu1 %v1628_v27, %s1526_s25  ;;  %451 = vrot.lane.b32.xlu0 %v307_v33, %s1529_s28 }
  0x2c   : > { %473 = vrot.lane.b32.xlu1 %v1642_v35, %s1530_s8  ;;  %383 = vrot.lane.b32.xlu0 %v1645_v36, %s1526_s25 }
  0x30   : > { %405 = vrot.lane.b32.xlu1 %v304_v24, %s1525_s24  ;;  %475 = vrot.lane.b32.xlu0 %v331_v42, %s1530_s8  ;;  %v319_v24 = vsel %vm295_vm1, %v317_v22, %v318_v23 }
  0x34   : > { %497 = vrot.lane.b32.xlu1 %v331_v42, %s1531_s13  ;;  %407 = vrot.lane.b32.xlu0 %v307_v33, %s1525_s24 }
  0x38   : > { %429 = vrot.lane.b32.xlu1 %v307_v33, %s1528_s27  ;;  %499 = vrot.lane.b32.xlu0 %v334_v49, %s1531_s13  ;;  %v347_v33 = vrot.slane %v1704_v3, 2 }
  0x3a   : > { %v349_v37 = vsel %vm325_vm2, %v347_v33, %v348_v34 }
  0x3c   : > { %521 = vrot.lane.b32.xlu1 %v334_v49, %s1532_s16  ;;  %361 = vrot.lane.b32.xlu0 %v1645_v36, %s1527_s26 }
  0x40   : > { %431 = vrot.lane.b32.xlu1 %v310_v54, %s1528_s27  ;;  %453 = vrot.lane.b32.xlu0 %v310_v54, %s1529_s28 }
  0x44   : > { %523 = vrot.lane.b32.xlu1 %v337_v59, %s1532_s16  ;;  %363 = vrot.lane.b32.xlu0 %v1692_v60, %s1527_s26 }
  0x48   : > { %385 = vrot.lane.b32.xlu1 %v1692_v60, %s1526_s25  ;;  %455 = vrot.lane.b32.xlu0 %v313_v0, %s1529_s28 }
  0x4c   : > { %477 = vrot.lane.b32.xlu1 %v334_v49, %s1530_s8  ;;  %387 = vrot.lane.b32.xlu0 %v1704_v3, %s1526_s25 }
  0x50   : > { %409 = vrot.lane.b32.xlu1 %v310_v54, %s1525_s24  ;;  %479 = vrot.lane.b32.xlu0 %v337_v59, %s1530_s8 }
  0x54   : > { %501 = vrot.lane.b32.xlu1 %v337_v59, %s1531_s13  ;;  %411 = vrot.lane.b32.xlu0 %v313_v0, %s1525_s24 }
  0x58   : > { %433 = vrot.lane.b32.xlu1 %v313_v0, %s1528_s27  ;;  %503 = vrot.lane.b32.xlu0 %v340_v7, %s1531_s13 }
  0x5c   : > { %525 = vrot.lane.b32.xlu1 %v340_v7, %s1532_s16  ;;  %365 = vrot.lane.b32.xlu0 %v1704_v3, %s1527_s26 }
  0x60   : > { %435 = vrot.lane.b32.xlu1 %v316_v12, %s1528_s27  ;;  %457 = vrot.lane.b32.xlu0 %v316_v12, %s1529_s28 }
  0x64   : > { %527 = vrot.lane.b32.xlu1 %v343_v20, %s1532_s16  ;;  %367 = vrot.lane.b32.xlu0 %v269_v21, %s1527_s26 }
  0x68   : > { %389 = vrot.lane.b32.xlu1 %v269_v21, %s1526_s25  ;;  %459 = vrot.lane.b32.xlu0 %v319_v24, %s1529_s28 }
  0x6c   : > { %481 = vrot.lane.b32.xlu1 %v340_v7, %s1530_s8  ;;  %391 = vrot.lane.b32.xlu0 %v1575_v2, %s1526_s25 }
  0x70   : > { %413 = vrot.lane.b32.xlu1 %v316_v12, %s1525_s24  ;;  %483 = vrot.lane.b32.xlu0 %v343_v20, %s1530_s8 }
  0x74   : > { %505 = vrot.lane.b32.xlu1 %v343_v20, %s1531_s13  ;;  %415 = vrot.lane.b32.xlu0 %v319_v24, %s1525_s24 }
  0x78   : > { %437 = vrot.lane.b32.xlu1 %v319_v24, %s1528_s27  ;;  %507 = vrot.lane.b32.xlu0 %v346_v29, %s1531_s13 }
  0x7c   : > { %529 = vrot.lane.b32.xlu1 %v346_v29, %s1532_s16  ;;  %439 = vrot.lane.b32.xlu0 %v324_v32, %s1528_s27 }
  0x7e   : > { %v1755_v38 = vpop.permute.xlu0 %401 }
  0x80   : > { %461 = vrot.lane.b32.xlu1 %v324_v32, %s1529_s28  ;;  %531 = vrot.lane.b32.xlu0 %v349_v37, %s1532_s16 }
  0x84   : > { %463 = vrot.lane.b32.xlu1 %v1588_v6, %s1529_s28  ;;  %485 = vrot.lane.b32.xlu0 %v346_v29, %s1530_s8 }
  0x86   : > { %v378_v41 = vpop.permute.xlu1 %377  ;;  %v354_v42 = vpop.permute.xlu0 %353 }
  0x87   : > { %v546_v57 = vsel %vm545_vm4, %v1575_v2, %v354_v42 }
  0x88   : > { %487 = vrot.lane.b32.xlu1 %v349_v37, %s1530_s8  ;;  %509 = vrot.lane.b32.xlu0 %v349_v37, %s1531_s13 }
  0x8a   : > { %v380_v44 = vpop.permute.xlu1 %379  ;;  %v356_v45 = vpop.permute.xlu0 %355 }
  0x8b   : > { %v547_v1 = vsel %vm545_vm4, %v1599_v14, %v356_v45 }
  0x8c   : > { %511 = vrot.lane.b32.xlu1 %v352_v43, %s1531_s13  ;;  %533 = vrot.lane.b32.xlu0 %v352_v43, %s1532_s16  ;;  %v556_v9 = vsel %vm554_vm5, %v547_v1, %v380_v44 }
  0x8e   : > { %v358_v46 = vpop.permute.xlu1 %357  ;;  %v426_v6 = vpop.permute.xlu0 %425 }
  0x8f   : > { %v548_v33 = vsel %vm545_vm4, %v1596_v13, %v358_v46 }
  0x90   : > { %535 = vrot.lane.b32.xlu1 %v1642_v35, %s1532_s16  ;;  %v555_v35 = vsel %vm554_vm5, %v546_v57, %v378_v41 }
  0x91   : > { %v564_v61 = vsel %vm563_vm6, %v555_v35, %v1755_v38 }
  0x92   : > { %v404_v47 = vpop.permute.xlu1 %403  ;;  %v428_v48 = vpop.permute.xlu0 %427  ;;  %v573_v63 = vsel %vm572_vm7, %v564_v61, %v426_v6 }
  0x93   : > { %v565_v12 = vsel %vm563_vm6, %v556_v9, %v404_v47 }
  0x94   : > { %v574_v15 = vsel %vm572_vm7, %v565_v12, %v428_v48 }
  0x96   : > { %v450_v49 = vpop.permute.xlu1 %449  ;;  %v1767_v50 = vpop.permute.xlu0 %359 }
  0x97   : > { %v582_v4 = vsel %vm581_vm8, %v573_v63, %v450_v49  ;;  %v549_v13 = vsel %vm545_vm4, %v1607_v16, %v1767_v50 }
  0x9a   : > { %v382_v51 = vpop.permute.xlu1 %381  ;;  %v452_v52 = vpop.permute.xlu0 %451 }
  0x9b   : > { %v583_v18 = vsel %vm581_vm8, %v574_v15, %v452_v52  ;;  %v557_v34 = vsel %vm554_vm5, %v548_v33, %v382_v51 }
  0x9e   : > { %v1769_v53 = vpop.permute.xlu1 %473  ;;  %v1771_v54 = vpop.permute.xlu0 %383 }
  0x9f   : > { %v591_v5 = vsel %vm590_vm9, %v582_v4, %v1769_v53  ;;  %v558_v46 = vsel %vm554_vm5, %v549_v13, %v1771_v54 }
  0xa2   : > { %v406_v55 = vpop.permute.xlu1 %405  ;;  %v476_v56 = vpop.permute.xlu0 %475 }
  0xa3   : > { %v592_v19 = vsel %vm590_vm9, %v583_v18, %v476_v56  ;;  %v566_v37 = vsel %vm563_vm6, %v557_v34, %v406_v55 }
  0xa6   : > { %v498_v58 = vpop.permute.xlu1 %497  ;;  %v408_v59 = vpop.permute.xlu0 %407 }
  0xa7   : > { %v600_v7 = vsel %vm599_vm10, %v591_v5, %v498_v58  ;;  %v567_v48 = vsel %vm563_vm6, %v558_v46, %v408_v59 }
  0xaa   : > { %v430_v62 = vpop.permute.xlu1 %429  ;;  %v500_v0 = vpop.permute.xlu0 %499 }
  0xab   : > { %v601_v20 = vsel %vm599_vm10, %v592_v19, %v500_v0  ;;  %v575_v40 = vsel %vm572_vm7, %v566_v37, %v430_v62 }
  0xae   : > { %v522_v8 = vpop.permute.xlu1 %521  ;;  %v362_v10 = vpop.permute.xlu0 %361 }
  0xaf   : > { %v609_v11 = vsel %vm608_vm11, %v600_v7, %v522_v8  ;;  %v550_v4 = vsel %vm545_vm4, %v1628_v27, %v362_v10 }
  0xb0   : > { %1448 = vmatprep.mubr.msk.f32.mxu0 %vm629_vm12, %v609_v11 }
  0xb2   : > { %v432_v14 = vpop.permute.xlu1 %431  ;;  %v454_v17 = vpop.permute.xlu0 %453 }
  0xb3   : > { %v584_v42 = vsel %vm581_vm8, %v575_v40, %v454_v17  ;;  %v576_v51 = vsel %vm572_vm7, %v567_v48, %v432_v14 }
  0xb6   : > { %v524_v21 = vpop.permute.xlu1 %523  ;;  %v364_v23 = vpop.permute.xlu0 %363 }
  0xb7   : > { %v610_v22 = vsel %vm608_vm11, %v601_v20, %v524_v21  ;;  %v551_v14 = vsel %vm545_vm4, %v1645_v36, %v364_v23 }
  0xb8   : > { %1449 = vmatmul.mubr.msk.f32.vlgmr.msra.gmra.mrb[0].mxu0 %vm629_vm12, %v610_v22 }
  0xba   : > { %v386_v24 = vpop.permute.xlu1 %385  ;;  %v456_v25 = vpop.permute.xlu0 %455 }
  0xbb   : > { %v585_v55 = vsel %vm581_vm8, %v576_v51, %v456_v25  ;;  %v559_v5 = vsel %vm554_vm5, %v550_v4, %v386_v24  ;;  %v1869_v51 = vld [vmem:[%s2172_s2] ss:$0 sm:$0xff] }
  0xbe   : > { %v478_v26 = vpop.permute.xlu1 %477  ;;  %v388_v28 = vpop.permute.xlu0 %387 }
  0xbf   : > { %v593_v43 = vsel %vm590_vm9, %v584_v42, %v478_v26  ;;  %v560_v17 = vsel %vm554_vm5, %v551_v14, %v388_v28 }
  0xc2   : > { %v410_v29 = vpop.permute.xlu1 %409  ;;  %v480_v30 = vpop.permute.xlu0 %479 }
  0xc3   : > { %v594_v56 = vsel %vm590_vm9, %v585_v55, %v480_v30  ;;  %v568_v7 = vsel %vm563_vm6, %v559_v5, %v410_v29 }
  0xc6   : > { %v502_v31 = vpop.permute.xlu1 %501  ;;  %v412_v32 = vpop.permute.xlu0 %411 }
  0xc7   : > { %v602_v44 = vsel %vm599_vm10, %v593_v43, %v502_v31  ;;  %v569_v10 = vsel %vm563_vm6, %v560_v17, %v412_v32 }
  0xca   : > { %v434_v39 = vpop.permute.xlu1 %433  ;;  %v504_v41 = vpop.permute.xlu0 %503 }
  0xcb   : > { %v603_v57 = vsel %vm599_vm10, %v594_v56, %v504_v41  ;;  %v577_v9 = vsel %vm572_vm7, %v568_v7, %v434_v39 }
  0xce   : > { %v526_v45 = vpop.permute.xlu1 %525  ;;  %v366_v47 = vpop.permute.xlu0 %365 }
  0xcf   : > { %v611_v6 = vsel %vm608_vm11, %v602_v44, %v526_v45  ;;  %v552_v30 = vsel %vm545_vm4, %v1692_v60, %v366_v47 }
  0xd0   : > { %1451 = vmatprep.mubr.msk.f32.mxu0 %vm629_vm12, %v611_v6 }
  0xd2   : > { %v436_v49 = vpop.permute.xlu1 %435  ;;  %v458_v52 = vpop.permute.xlu0 %457 }
  0xd3   : > { %v586_v12 = vsel %vm581_vm8, %v577_v9, %v458_v52  ;;  %v578_v21 = vsel %vm572_vm7, %v569_v10, %v436_v49 }
  0xd6   : > { %v528_v58 = vpop.permute.xlu1 %527  ;;  %v368_v50 = vpop.permute.xlu0 %367 }
  0xd7   : > { %v612_v16 = vsel %vm608_vm11, %v603_v57, %v528_v58  ;;  %v553_v37 = vsel %vm545_vm4, %v1704_v3, %v368_v50 }
  0xd8   : > { %1452 = vmatmul.mubr.msk.f32.gmra.mrb[2].mxu0 %vm629_vm12, %v612_v16 }
  0xda   : > { %v390_v35 = vpop.permute.xlu1 %389  ;;  %v460_v54 = vpop.permute.xlu0 %459 }
  0xdb   : > { %v587_v22 = vsel %vm581_vm8, %v578_v21, %v460_v54  ;;  %v561_v31 = vsel %vm554_vm5, %v552_v30, %v390_v35  ;;  %v1116_v30 = vld [vmem:[%s2173_s3] sm:$0xff] }
  0xde   : > { %v482_v61 = vpop.permute.xlu1 %481  ;;  %v1817_v59 = vpop.permute.xlu0 %391 }
  0xdf   : > { %v595_v15 = vsel %vm590_vm9, %v586_v12, %v482_v61  ;;  %v562_v40 = vsel %vm554_vm5, %v553_v37, %v1817_v59 }
  0xe2   : > { %v414_v62 = vpop.permute.xlu1 %413  ;;  %v484_v63 = vpop.permute.xlu0 %483 }
  0xe3   : > { %v596_v36 = vsel %vm590_vm9, %v587_v22, %v484_v63  ;;  %v570_v33 = vsel %vm563_vm6, %v561_v31, %v414_v62  ;;  %v1117_v31 = vld [vmem:[%s2173_s3 + $0x8] sm:$0xff] }
  0xe4   : > { %v1490_v37 = vpack.c.bf16 %v1117_v31, %v1116_v30 }
  0xe6   : > { %v506_v0 = vpop.permute.xlu1 %505  ;;  %v416_v1 = vpop.permute.xlu0 %415  ;;  %1491 = vmatprep.subr.bf16.mxu1 %v1490_v37 }
  0xe7   : > { %v604_v18 = vsel %vm599_vm10, %v595_v15, %v506_v0  ;;  %v571_v42 = vsel %vm563_vm6, %v562_v40, %v416_v1  ;;  %1493 = vmatpush3.bf16.msra.mxu1 %v1490_v37 }
  0xea   : > { %v438_v8 = vpop.permute.xlu1 %437  ;;  %v508_v11 = vpop.permute.xlu0 %507 }
  0xeb   : > { %v605_v24 = vsel %vm599_vm10, %v596_v36, %v508_v11  ;;  %v579_v39 = vsel %vm572_vm7, %v570_v33, %v438_v8 }
  0xee   : > { %v530_v27 = vpop.permute.xlu1 %529  ;;  %v440_v20 = vpop.permute.xlu0 %439 }
  0xef   : > { %v613_v19 = vsel %vm608_vm11, %v604_v18, %v530_v27  ;;  %v580_v44 = vsel %vm572_vm7, %v571_v42, %v440_v20 }
  0xf0   : > { %1454 = vmatprep.mubr.msk.f32.mxu0 %vm629_vm12, %v613_v19 }
  0xf2   : > { %v462_v23 = vpop.permute.xlu1 %461  ;;  %v532_v25 = vpop.permute.xlu0 %531 }
  0xf3   : > { %v614_v26 = vsel %vm608_vm11, %v605_v24, %v532_v25  ;;  %v588_v41 = vsel %vm581_vm8, %v579_v39, %v462_v23 }
  0xf4   : > { %1455 = vmatmul.mubr.msk.f32.gmra.mrb[4].mxu0 %vm629_vm12, %v614_v26 }
  0xf6   : > { %v1839_v28 = vpop.permute.xlu1 %463  ;;  %v486_v29 = vpop.permute.xlu0 %485 }
  0xf7   : > { %v597_v60 = vsel %vm590_vm9, %v588_v41, %v486_v29  ;;  %v589_v3 = vsel %vm581_vm8, %v580_v44, %v1839_v28 }
  0xfa   : > { %v488_v32 = vpop.permute.xlu1 %487  ;;  %v510_v34 = vpop.permute.xlu0 %509 }
  0xfb   : > { %v606_v45 = vsel %vm599_vm10, %v597_v60, %v510_v34  ;;  %v598_v13 = vsel %vm590_vm9, %v589_v3, %v488_v32  ;;  %v1118_v60 = vld [vmem:[%s2173_s3 + $0x10] sm:$0xff] }
  0xfe   : > { %v512_v43 = vpop.permute.xlu1 %511  ;;  %v534_v6 = vpop.permute.xlu0 %533 }
  0xff   : > { %v615_v47 = vsel %vm608_vm11, %v606_v45, %v534_v6  ;;  %v607_v46 = vsel %vm599_vm10, %v598_v13, %v512_v43  ;;  %v1119_v43 = vld [vmem:[%s2173_s3 + $0x18] sm:$0xff]  ;;  %v1120_v6 = vld [vmem:[%s2173_s3 + $0x20] sm:$0xf] }
 0x100   : > { %1457 = vmatprep.mubr.msk.f32.mxu0 %vm629_vm12, %v615_v47  ;;  %v1494_v44 = vpack.c.bf16 %v1119_v43, %v1118_v60 }
 0x102   : > { %v1861_v48 = vpop.permute.xlu1 %535  ;;  %1495 = vmatprep.subr.bf16.mxu1 %v1494_v44 }
 0x103   : > { %v616_v49 = vsel %vm608_vm11, %v607_v46, %v1861_v48  ;;  %1497 = vmatpush3.bf16.msra.mxu1 %v1494_v44 }
 0x104   : > { %1458 = vmatmul.mubr.msk.f32.gmra.mrb[6].mxu0 %vm629_vm12, %v616_v49  ;;  %1468 = vmatprep.subr.msk.mxu1 %vm654_vm3, %v1120_v6 }
 0x107   : > { %1469 = vmatpush3.msk.msra.mxu1 %vm654_vm3, %v1120_v6 }
 0x18b   : > { %v1450_v52 = vpop.f32.mrb[0].mxu0 }
 0x18c   : > { %v1872_v55 = vadd.f32 %v1450_v52, %v1869_v51  ;;  %v724_v56 = vpop.f32.mrb[1].mxu0 }
 0x18d   : > { %v1875_v57 = vadd.f32 %v1869_v51, %v724_v56 }
 0x18e   : > { %v764_v58 = vmax.f32 %v1872_v55, 0.0 }
 0x18f   : > { %v763_v16 = vmax.f32 %v1875_v57, 0.0 }
 0x190   : > { %v780_v50 = vrot.slane %v764_v58, 7 }
 0x191   : > { %v779_v61 = vrot.slane %v763_v16, 7 }
 0x192   : > { %v1880_v35 = vsel %vm260_vm0, 0.0, %v780_v50  ;;  %v804_v54 = vsel %vm260_vm0, %v780_v50, 0.0 }
 0x193   : > { %v829_v62 = vrot.slane %v804_v54, 1  ;;  %899 = vrot.lane.b32.xlu0 %v1880_v35, %s1526_s25  ;;  %877 = vrot.lane.b32.xlu1 %v1880_v35, %s1527_s26  ;;  %v828_v63 = vrot.slane %v1880_v35, 1  ;;  %v1890_v1 = vsel %vm260_vm0, 0.0, %v779_v61  ;;  %v855_v4 = vrot.slane %v804_v54, 2 }
 0x194   : > { %v854_v5 = vrot.slane %v1880_v35, 2  ;;  %v803_v7 = vsel %vm260_vm0, %v779_v61, 0.0  ;;  %v825_v11 = vrot.slane %v1890_v1, 1  ;;  %v851_v22 = vrot.slane %v1890_v1, 2 }
 0x195   : > { %v830_v0 = vsel %vm295_vm1, %v828_v63, %v829_v62  ;;  %v826_v8 = vrot.slane %v803_v7, 1  ;;  %v852_v19 = vrot.slane %v803_v7, 2 }
 0x196   : > { %v856_v9 = vsel %vm325_vm2, %v854_v5, %v855_v4 }
 0x197   : > { %943 = vrot.lane.b32.xlu1 %v830_v0, %s1528_s27  ;;  %875 = vrot.lane.b32.xlu0 %v1890_v1, %s1527_s26  ;;  %v827_v12 = vsel %vm295_vm1, %v825_v11, %v826_v8  ;;  %v853_v23 = vsel %vm325_vm2, %v851_v22, %v852_v19 }
 0x19b   : > { %922 = vrot.lane.b32.xlu1 %v830_v0, %s1525_s24  ;;  %965 = vrot.lane.b32.xlu0 %v830_v0, %s1529_s28 }
 0x19f   : > { %1031 = vrot.lane.b32.xlu1 %v856_v9, %s1532_s16  ;;  %1009 = vrot.lane.b32.xlu0 %v856_v9, %s1531_s13 }
 0x1a3   : > { %988 = vrot.lane.b32.xlu1 %v856_v9, %s1530_s8  ;;  %920 = vrot.lane.b32.xlu0 %v827_v12, %s1525_s24 }
 0x1a7   : > { %941 = vrot.lane.b32.xlu1 %v827_v12, %s1528_s27 }
 0x1ab   : > { %v1453_v14 = vpop.f32.mrb[2].mxu0 }
 0x1ac   : > { %v1908_v15 = vadd.f32 %v1453_v14, %v1869_v51  ;;  %v734_v17 = vpop.f32.mrb[3].mxu0 }
 0x1ad   : > { %v1912_v27 = vadd.f32 %v1869_v51, %v734_v17 }
 0x1ae   : > { %v766_v18 = vmax.f32 %v1908_v15, 0.0 }
 0x1af   : > { %v765_v21 = vmax.f32 %v1912_v27, 0.0 }
 0x1b0   : > { %v782_v10 = vrot.slane %v766_v18, 7 }
 0x1b1   : > { %v781_v36 = vrot.slane %v765_v21, 7 }
 0x1b2   : > { %v1915_v20 = vsel %vm260_vm0, 0.0, %v782_v10  ;;  %v806_v24 = vsel %vm260_vm0, %v782_v10, 0.0 }
 0x1b3   : > { %903 = vrot.lane.b32.xlu0 %v1915_v20, %s1526_s25  ;;  %881 = vrot.lane.b32.xlu1 %v1915_v20, %s1527_s26  ;;  %v835_v25 = vrot.slane %v806_v24, 1  ;;  %v1928_v26 = vsel %vm260_vm0, 0.0, %v781_v36  ;;  %v834_v29 = vrot.slane %v1915_v20, 1  ;;  %v861_v32 = vrot.slane %v806_v24, 2 }
 0x1b4   : > { %v860_v34 = vrot.slane %v1915_v20, 2  ;;  %v805_v39 = vsel %vm260_vm0, %v781_v36, 0.0  ;;  %v831_v42 = vrot.slane %v1928_v26, 1  ;;  %v857_v50 = vrot.slane %v1928_v26, 2 }
 0x1b5   : > { %v836_v33 = vsel %vm295_vm1, %v834_v29, %v835_v25  ;;  %v832_v40 = vrot.slane %v805_v39, 1  ;;  %v858_v56 = vrot.slane %v805_v39, 2 }
 0x1b6   : > { %v862_v41 = vsel %vm325_vm2, %v860_v34, %v861_v32 }
 0x1b7   : > { %986 = vrot.lane.b32.xlu0 %v853_v23, %s1530_s8  ;;  %1007 = vrot.lane.b32.xlu1 %v853_v23, %s1531_s13  ;;  %v833_v45 = vsel %vm295_vm1, %v831_v42, %v832_v40  ;;  %v859_v61 = vsel %vm325_vm2, %v857_v50, %v858_v56 }
 0x1bb   : > { %879 = vrot.lane.b32.xlu0 %v1928_v26, %s1527_s26  ;;  %901 = vrot.lane.b32.xlu1 %v1928_v26, %s1526_s25 }
 0x1bf   : > { %969 = vrot.lane.b32.xlu0 %v836_v33, %s1529_s28  ;;  %947 = vrot.lane.b32.xlu1 %v836_v33, %s1528_s27 }
 0x1c3   : > { %1013 = vrot.lane.b32.xlu0 %v862_v41, %s1531_s13  ;;  %926 = vrot.lane.b32.xlu1 %v836_v33, %s1525_s24 }
 0x1c7   : > { %1035 = vrot.lane.b32.xlu1 %v862_v41, %s1532_s16  ;;  %924 = vrot.lane.b32.xlu0 %v833_v45, %s1525_s24  ;;  %v1456_v3 = vpop.f32.mrb[4].mxu0 }
 0x1c8   : > { %v1963_v47 = vadd.f32 %v1456_v3, %v1869_v51  ;;  %v744_v13 = vpop.f32.mrb[5].mxu0 }
 0x1c9   : > { %v1968_v49 = vadd.f32 %v1869_v51, %v744_v13 }
 0x1ca   : > { %v768_v46 = vmax.f32 %v1963_v47, 0.0 }
 0x1cb   : > { %992 = vrot.lane.b32.xlu1 %v862_v41, %s1530_s8  ;;  %v767_v16 = vmax.f32 %v1968_v49, 0.0 }
 0x1cc   : > { %v784_v52 = vrot.slane %v768_v46, 7 }
 0x1cd   : > { %v783_v54 = vrot.slane %v767_v16, 7 }
 0x1ce   : > { %v1973_v58 = vsel %vm260_vm0, 0.0, %v784_v52  ;;  %v808_v0 = vsel %vm260_vm0, %v784_v52, 0.0 }
 0x1cf   : > { %967 = vrot.lane.b32.xlu1 %v833_v45, %s1529_s28  ;;  %885 = vrot.lane.b32.xlu0 %v1973_v58, %s1527_s26  ;;  %v1984_v62 = vsel %vm260_vm0, 0.0, %v783_v54  ;;  %v841_v5 = vrot.slane %v808_v0, 1  ;;  %v840_v7 = vrot.slane %v1973_v58, 1  ;;  %v867_v9 = vrot.slane %v808_v0, 2 }
 0x1d0   : > { %v866_v11 = vrot.slane %v1973_v58, 2  ;;  %v807_v12 = vsel %vm260_vm0, %v783_v54, 0.0  ;;  %v837_v10 = vrot.slane %v1984_v62, 1  ;;  %v863_v36 = vrot.slane %v1984_v62, 2 }
 0x1d1   : > { %v842_v8 = vsel %vm295_vm1, %v840_v7, %v841_v5  ;;  %v838_v14 = vrot.slane %v807_v12, 1  ;;  %v864_v19 = vrot.slane %v807_v12, 2 }
 0x1d2   : > { %v868_v18 = vsel %vm325_vm2, %v866_v11, %v867_v9 }
 0x1d3   : > { %945 = vrot.lane.b32.xlu1 %v833_v45, %s1528_s27  ;;  %990 = vrot.lane.b32.xlu0 %v859_v61, %s1530_s8  ;;  %v839_v22 = vsel %vm295_vm1, %v837_v10, %v838_v14  ;;  %v865_v25 = vsel %vm325_vm2, %v863_v36, %v864_v19 }
 0x1d7   : > { %1033 = vrot.lane.b32.xlu1 %v859_v61, %s1532_s16  ;;  %v1459_v63 = vpop.f32.mrb[6].mxu0  ;;  %905 = vrot.lane.b32.xlu0 %v1984_v62, %s1526_s25 }
 0x1d8   : > { %v754_v4 = vpop.f32.mrb[7].mxu0  ;;  %v2003_v17 = vadd.f32 %v1459_v63, %v1869_v51 }
 0x1d9   : > { %v755_v23 = vadd.f32 %v1869_v51, %v754_v4 }
 0x1da   : > { %v770_v21 = vmax.f32 %v2003_v17, 0.0 }
 0x1db   : > { %907 = vrot.lane.b32.xlu1 %v1973_v58, %s1526_s25  ;;  %883 = vrot.lane.b32.xlu0 %v1984_v62, %s1527_s26  ;;  %v769_v29 = vmax.f32 %v755_v23, 0.0 }
 0x1dc   : > { %v786_v24 = vrot.slane %v770_v21, 7 }
 0x1dd   : > { %v785_v32 = vrot.slane %v769_v29, 7 }
 0x1de   : > { %v802_v30 = vsel %vm260_vm0, 0.0, %v786_v24  ;;  %v810_v31 = vsel %vm260_vm0, %v786_v24, 0.0 }
 0x1df   : > { %1011 = vrot.lane.b32.xlu1 %v859_v61, %s1531_s13  ;;  %973 = vrot.lane.b32.xlu0 %v842_v8, %s1529_s28  ;;  %v849_v51 = vrot.slane %v810_v31, 1  ;;  %v848_v33 = vrot.slane %v802_v30, 1  ;;  %v2023_v34 = vsel %vm260_vm0, 0.0, %v785_v32  ;;  %v809_v37 = vsel %vm260_vm0, %v785_v32, 0.0 }
 0x1e0   : > { %v844_v39 = vrot.slane %v809_v37, 1  ;;  %v843_v41 = vrot.slane %v2023_v34, 1  ;;  %v870_v42 = vrot.slane %v809_v37, 2  ;;  %v869_v43 = vrot.slane %v2023_v34, 2 }
 0x1e1   : > { %v850_v40 = vsel %vm295_vm1, %v848_v33, %v849_v51  ;;  %v873_v6 = vrot.slane %v810_v31, 2  ;;  %v872_v3 = vrot.slane %v802_v30, 2 }
 0x1e2   : > { %v845_v60 = vsel %vm295_vm1, %v843_v41, %v844_v39  ;;  %v871_v44 = vsel %vm325_vm2, %v869_v43, %v870_v42 }
 0x1e3   : > { %951 = vrot.lane.b32.xlu1 %v842_v8, %s1528_s27  ;;  %930 = vrot.lane.b32.xlu0 %v842_v8, %s1525_s24  ;;  %v874_v52 = vsel %vm325_vm2, %v872_v3, %v873_v6 }
 0x1e7   : > { %1017 = vrot.lane.b32.xlu1 %v868_v18, %s1531_s13  ;;  %1039 = vrot.lane.b32.xlu0 %v868_v18, %s1532_s16 }
 0x1eb   : > { %949 = vrot.lane.b32.xlu1 %v839_v22, %s1528_s27  ;;  %996 = vrot.lane.b32.xlu0 %v868_v18, %s1530_s8 }
 0x1ef   : > { %1037 = vrot.lane.b32.xlu1 %v865_v25, %s1532_s16  ;;  %971 = vrot.lane.b32.xlu0 %v839_v22, %s1529_s28 }
 0x1f3   : > { %911 = vrot.lane.b32.xlu1 %v802_v30, %s1526_s25  ;;  %928 = vrot.lane.b32.xlu0 %v839_v22, %s1525_s24 }
 0x1f7   : > { %994 = vrot.lane.b32.xlu1 %v865_v25, %s1530_s8  ;;  %889 = vrot.lane.b32.xlu0 %v802_v30, %s1527_s26 }
 0x1fb   : > { %955 = vrot.lane.b32.xlu1 %v850_v40, %s1528_s27  ;;  %1015 = vrot.lane.b32.xlu0 %v865_v25, %s1531_s13 }
 0x1ff   : > { %932 = vrot.lane.b32.xlu1 %v845_v60, %s1525_s24  ;;  %909 = vrot.lane.b32.xlu0 %v2023_v34, %s1526_s25  ;;  %s1533_s24 = smov 124  }
 0x203   : > { %1041 = vrot.lane.b32.xlu1 %v871_v44, %s1532_s16  ;;  %887 = vrot.lane.b32.xlu0 %v2023_v34, %s1527_s26 }
 0x205   : > { %v878_v45 = vpop.permute.xlu1 %877  ;;  %v900_v13 = vpop.permute.xlu0 %899 }
 0x207   : > { %998 = vrot.lane.b32.xlu1 %v871_v44, %s1530_s8  ;;  %977 = vrot.lane.b32.xlu0 %v850_v40, %s1529_s28  ;;  %s2149_s8 = scalar_lea.vmem %s2175_s5, %s1410_s20 }
 0x209   : > { %v944_v46 = vpop.permute.xlu1 %943  ;;  %v876_v16 = vpop.permute.xlu0 %875 }
 0x20a   : > { %v1052_v0 = vsel %vm545_vm4, %v1575_v2, %v876_v16 }
 0x20b   : > { %1021 = vrot.lane.b32.xlu1 %v874_v52, %s1531_s13  ;;  %975 = vrot.lane.b32.xlu0 %v845_v60, %s1529_s28 }
 0x20d   : > { %v923_v56 = vpop.permute.xlu1 %922  ;;  %v966_v54 = vpop.permute.xlu0 %965 }
 0x20f   : > { %1276 = vrot.lane.b32.xlu1 %v1875_v57, %s1533_s24  ;;  %953 = vrot.lane.b32.xlu0 %v845_v60, %s1528_s27  ;;  %v1060_v57 = vsel %vm554_vm5, %v1052_v0, %v900_v13 }
 0x210   : > { %v1068_v5 = vsel %vm563_vm6, %v1060_v57, %v1755_v38 }
 0x211   : > { %v1032_v50 = vpop.permute.xlu1 %1031  ;;  %v1010_v63 = vpop.permute.xlu0 %1009 }
 0x213   : > { %1280 = vrot.lane.b32.xlu1 %v1912_v27, %s1533_s24  ;;  %1019 = vrot.lane.b32.xlu0 %v871_v44, %s1531_s13 }
 0x215   : > { %v989_v61 = vpop.permute.xlu1 %988  ;;  %v921_v27 = vpop.permute.xlu0 %920 }
 0x217   : > { %1284 = vrot.lane.b32.xlu1 %v1968_v49, %s1533_s24  ;;  %1043 = vrot.lane.b32.xlu0 %v874_v52, %s1532_s16 }
 0x219   : > { %v942_v4 = vpop.permute.xlu1 %941 }
 0x21a   : > { %v1076_v49 = vsel %vm572_vm7, %v1068_v5, %v942_v4 }
 0x21b   : > { %1288 = vrot.lane.b32.xlu1 %v755_v23, %s1533_s24  ;;  %1278 = vrot.lane.b32.xlu0 %v1872_v55, %s1533_s24  ;;  %v1084_v9 = vsel %vm581_vm8, %v1076_v49, %v966_v54 }
 0x21c   : > { %v1092_v55 = vsel %vm590_vm9, %v1084_v9, %v1769_v53 }
 0x21f   : > { %1282 = vrot.lane.b32.xlu0 %v1908_v15, %s1533_s24 }
 0x223   : > { %1286 = vrot.lane.b32.xlu0 %v1963_v47, %s1533_s24 }
 0x225   : > { %v904_v7 = vpop.permute.xlu0 %903  ;;  %v882_v8 = vpop.permute.xlu1 %881 }
 0x226   : > { %v1055_v54 = vsel %vm545_vm4, %v1928_v26, %v882_v8 }
 0x227   : > { %1290 = vrot.lane.b32.xlu0 %v2003_v17, %s1533_s24  ;;  %v1053_v17 = vsel %vm545_vm4, %v1890_v1, %v878_v45 }
 0x229   : > { %v987_v2 = vpop.permute.xlu0 %986  ;;  %v1008_v11 = vpop.permute.xlu1 %1007 }
 0x22a   : > { %v1100_v15 = vsel %vm599_vm10, %v1092_v55, %v1008_v11 }
 0x22b   : > { %v1108_v12 = vsel %vm608_vm11, %v1100_v15, %v1032_v50 }
 0x22c   : > { %1470 = vmatprep.mubr.msk.f32.mxu1 %vm629_vm12, %v1108_v12 }
 0x22d   : > { %v880_v38 = vpop.permute.xlu0 %879  ;;  %v902_v14 = vpop.permute.xlu1 %901 }
 0x22e   : > { %v1061_v22 = vsel %vm554_vm5, %v1053_v17, %v902_v14  ;;  %v1054_v31 = vsel %vm545_vm4, %v1880_v35, %v880_v38 }
 0x22f   : > { %v1069_v23 = vsel %vm563_vm6, %v1061_v22, %v921_v27  ;;  %v1062_v1 = vsel %vm554_vm5, %v1054_v31, %v904_v7 }
 0x230   : > { %v1077_v25 = vsel %vm572_vm7, %v1069_v23, %v944_v46  ;;  %v1070_v40 = vsel %vm563_vm6, %v1062_v1, %v923_v56 }
 0x231   : > { %v948_v47 = vpop.permute.xlu1 %947  ;;  %v970_v18 = vpop.permute.xlu0 %969 }
 0x235   : > { %v927_v10 = vpop.permute.xlu1 %926  ;;  %v1014_v19 = vpop.permute.xlu0 %1013 }
 0x239   : > { %v1036_v21 = vpop.permute.xlu1 %1035  ;;  %v925_v36 = vpop.permute.xlu0 %924 }
 0x23d   : > { %v993_v53 = vpop.permute.xlu1 %992 }
 0x241   : > { %v968_v24 = vpop.permute.xlu1 %967  ;;  %v886_v29 = vpop.permute.xlu0 %885 }
 0x242   : > { %v1085_v30 = vsel %vm581_vm8, %v1077_v25, %v968_v24  ;;  %v1057_v23 = vsel %vm545_vm4, %v1984_v62, %v886_v29 }
 0x243   : > { %v1093_v51 = vsel %vm590_vm9, %v1085_v30, %v987_v2 }
 0x244   : > { %v1101_v37 = vsel %vm599_vm10, %v1093_v51, %v1010_v63 }
 0x245   : > { %v946_v32 = vpop.permute.xlu1 %945  ;;  %v991_v33 = vpop.permute.xlu0 %990 }
 0x246   : > { %v1078_v60 = vsel %vm572_vm7, %v1070_v40, %v946_v32 }
 0x247   : > { %v1086_v35 = vsel %vm581_vm8, %v1078_v60, %v970_v18 }
 0x248   : > { %v1094_v45 = vsel %vm590_vm9, %v1086_v35, %v989_v61 }
 0x249   : > { %v1034_v39 = vpop.permute.xlu1 %1033  ;;  %v906_v42 = vpop.permute.xlu0 %905 }
 0x24a   : > { %v1109_v41 = vsel %vm608_vm11, %v1101_v37, %v1034_v39  ;;  %v1063_v63 = vsel %vm554_vm5, %v1055_v54, %v906_v42 }
 0x24b   : > { %1471 = vmatmul.mubr.msk.f32.vlgmr.msra.gmra.mrb[0].mxu1 %vm629_vm12, %v1109_v41  ;;  %v1071_v61 = vsel %vm563_vm6, %v1063_v63, %v925_v36 }
 0x24c   : > { %v1079_v49 = vsel %vm572_vm7, %v1071_v61, %v948_v47 }
 0x24d   : > { %v908_v43 = vpop.permute.xlu1 %907  ;;  %v884_v44 = vpop.permute.xlu0 %883 }
 0x24e   : > { %v1056_v4 = vsel %vm545_vm4, %v1915_v20, %v884_v44 }
 0x24f   : > { %v1064_v9 = vsel %vm554_vm5, %v1056_v4, %v908_v43 }
 0x250   : > { %v1072_v15 = vsel %vm563_vm6, %v1064_v9, %v927_v10 }
 0x251   : > { %v1012_v6 = vpop.permute.xlu1 %1011  ;;  %v974_v13 = vpop.permute.xlu0 %973 }
 0x252   : > { %v1102_v3 = vsel %vm599_vm10, %v1094_v45, %v1012_v6 }
 0x253   : > { %v1110_v46 = vsel %vm608_vm11, %v1102_v3, %v1036_v21 }
 0x254   : > { %1473 = vmatprep.mubr.msk.f32.mxu1 %vm629_vm12, %v1110_v46 }
 0x255   : > { %v952_v52 = vpop.permute.xlu1 %951  ;;  %v931_v56 = vpop.permute.xlu0 %930 }
 0x259   : > { %v1018_v16 = vpop.permute.xlu1 %1017  ;;  %v1040_v50 = vpop.permute.xlu0 %1039 }
 0x25d   : > { %v950_v0 = vpop.permute.xlu1 %949  ;;  %v997_v57 = vpop.permute.xlu0 %996 }
 0x25e   : > { %v1080_v20 = vsel %vm572_vm7, %v1072_v15, %v950_v0 }
 0x25f   : > { %v1088_v14 = vsel %vm581_vm8, %v1080_v20, %v974_v13 }
 0x260   : > { %v1096_v21 = vsel %vm590_vm9, %v1088_v14, %v993_v53 }
 0x261   : > { %v1038_v27 = vpop.permute.xlu1 %1037  ;;  %v972_v5 = vpop.permute.xlu0 %971 }
 0x262   : > { %v1087_v7 = vsel %vm581_vm8, %v1079_v49, %v972_v5 }
 0x263   : > { %v1095_v2 = vsel %vm590_vm9, %v1087_v7, %v991_v33 }
 0x264   : > { %v1103_v8 = vsel %vm599_vm10, %v1095_v2, %v1014_v19 }
 0x265   : > { %v912_v26 = vpop.permute.xlu1 %911  ;;  %v929_v55 = vpop.permute.xlu0 %928  ;;  %v1111_v11 = vsel %vm608_vm11, %v1103_v8, %v1038_v27 }
 0x266   : > { %1474 = vmatmul.mubr.msk.f32.gmra.mrb[2].mxu1 %vm629_vm12, %v1111_v11 }
 0x269   : > { %v995_v12 = vpop.permute.xlu1 %994  ;;  %v890_v38 = vpop.permute.xlu0 %889 }
 0x26a   : > { %v1059_v32 = vsel %vm545_vm4, %v2023_v34, %v890_v38 }
 0x26b   : > { %v1067_v62 = vsel %vm554_vm5, %v1059_v32, %v1817_v59 }
 0x26d   : > { %v956_v47 = vpop.permute.xlu1 %955  ;;  %v1016_v18 = vpop.permute.xlu0 %1015 }
 0x26e   : > { %v1104_v17 = vsel %vm599_vm10, %v1096_v21, %v1016_v18 }
 0x26f   : > { %v1112_v19 = vsel %vm608_vm11, %v1104_v17, %v1040_v50 }
 0x270   : > { %1476 = vmatprep.mubr.msk.f32.mxu1 %vm629_vm12, %v1112_v19 }
 0x271   : > { %v910_v22 = vpop.permute.xlu0 %909  ;;  %v933_v10 = vpop.permute.xlu1 %932 }
 0x272   : > { %v1065_v24 = vsel %vm554_vm5, %v1057_v23, %v910_v22  ;;  %v1075_v40 = vsel %vm563_vm6, %v1067_v62, %v933_v10 }
 0x273   : > { %v1073_v31 = vsel %vm563_vm6, %v1065_v24, %v929_v55  ;;  %v1083_v43 = vsel %vm572_vm7, %v1075_v40, %v956_v47 }
 0x274   : > { %v1081_v33 = vsel %vm572_vm7, %v1073_v31, %v952_v52  ;;  %v1091_v45 = vsel %vm581_vm8, %v1083_v43, %v1839_v28  ;;  %v1398_v28 = vld [vmem:[%s2174_s4] ss:$0 sm:$0xff] }
 0x275   : > { %v888_v36 = vpop.permute.xlu0 %887  ;;  %v1042_v25 = vpop.permute.xlu1 %1041 }
 0x276   : > { %v1058_v53 = vsel %vm545_vm4, %v1973_v58, %v888_v36 }
 0x277   : > { %v1066_v1 = vsel %vm554_vm5, %v1058_v53, %v912_v26 }
 0x278   : > { %v1074_v34 = vsel %vm563_vm6, %v1066_v1, %v931_v56 }
 0x279   : > { %v978_v30 = vpop.permute.xlu0 %977  ;;  %v999_v29 = vpop.permute.xlu1 %998 }
 0x27a   : > { %v1099_v3 = vsel %vm590_vm9, %v1091_v45, %v999_v29 }
 0x27d   : > { %v976_v51 = vpop.permute.xlu0 %975  ;;  %v1022_v35 = vpop.permute.xlu1 %1021 }
 0x27e   : > { %v1089_v37 = vsel %vm581_vm8, %v1081_v33, %v976_v51  ;;  %v1107_v13 = vsel %vm599_vm10, %v1099_v3, %v1022_v35 }
 0x27f   : > { %v1097_v39 = vsel %vm590_vm9, %v1089_v37, %v995_v12 }
 0x280   : > { %v1105_v58 = vsel %vm599_vm10, %v1097_v39, %v1018_v16  ;;  %v1115_v16 = vsel %vm608_vm11, %v1107_v13, %v1861_v48 }
 0x281   : > { %v954_v41 = vpop.permute.xlu0 %953  ;;  %v1113_v42 = vsel %vm608_vm11, %v1105_v58, %v1042_v25  ;;  %v1277_v27 = vpop.permute.xlu1 %1276 }
 0x282   : > { %v1082_v60 = vsel %vm572_vm7, %v1074_v34, %v954_v41  ;;  %1477 = vmatmul.mubr.msk.f32.gmra.mrb[4].mxu1 %vm629_vm12, %v1113_v42 }
 0x283   : > { %v1090_v59 = vsel %vm581_vm8, %v1082_v60, %v978_v30 }
 0x284   : > { %v1098_v6 = vsel %vm590_vm9, %v1090_v59, %v997_v57 }
 0x285   : > { %v1020_v44 = vpop.permute.xlu0 %1019  ;;  %v1281_v20 = vpop.permute.xlu1 %1280 }
 0x286   : > { %v1106_v46 = vsel %vm599_vm10, %v1098_v6, %v1020_v44 }
 0x289   : > { %v1044_v52 = vpop.permute.xlu0 %1043  ;;  %v1285_v23 = vpop.permute.xlu1 %1284 }
 0x28a   : > { %v1114_v56 = vsel %vm608_vm11, %v1106_v46, %v1044_v52 }
 0x28b   : > { %1479 = vmatprep.mubr.msk.f32.mxu1 %vm629_vm12, %v1114_v56 }
 0x28c   : > { %1480 = vmatmul.mubr.msk.f32.gmra.mrb[6].mxu1 %vm629_vm12, %v1115_v16 }
 0x28d   : > { %v1279_v61 = vpop.permute.xlu0 %1278  ;;  %v1289_v29 = vpop.permute.xlu1 %1288 }
 0x291   : > { %v1283_v11 = vpop.permute.xlu0 %1282 }
 0x295   : > { %v1287_v10 = vpop.permute.xlu0 %1286 }
 0x299   : > { %v1291_v37 = vpop.permute.xlu0 %1290 }
 0x31e   : > { %v1472_v50 = vpop.f32.mrb[0].mxu1 }
 0x31f   : > { %v1227_v54 = vadd.f32 %v1472_v50, %v1398_v28  ;;  %v1221_v63 = vpop.f32.mrb[1].mxu1 }
 0x320   : > { %v1222_v0 = vadd.f32 %v1398_v28, %v1221_v63 }
 0x321   : > { %v1261_v57 = vmax.f32 %v1227_v54, 0.0 }
 0x322   : > { %v1260_v4 = vmax.f32 %v1222_v0, 0.0 }
 0x323   : > { %v1301_v5 = vadd.f32 %v1279_v61, %v1261_v57 }
 0x324   : > { %v1300_v48 = vadd.f32 %v1277_v27, %v1260_v4 }
 0x325   : > { %v1309_v49 = vmax.f32 %v1301_v5, 0.0 }
 0x326   : > { %v1308_v7 = vmax.f32 %v1300_v48, 0.0 }
 0x327   : > { %1317 = vst.msk [vmem:[%s2149_s8 + $0x8] sm:$0xff] %vm545_vm4, %v1309_v49 }
 0x328   : > { %1316 = vst.msk [vmem:[%s2149_s8] sm:$0xff] %vm545_vm4, %v1308_v7 }
 0x339   : > { %v1475_v9 = vpop.f32.mrb[2].mxu1 }
 0x33a   : > { %v1237_v2 = vadd.f32 %v1475_v9, %v1398_v28  ;;  %v1231_v26 = vpop.f32.mrb[3].mxu1 }
 0x33b   : > { %v1232_v8 = vadd.f32 %v1398_v28, %v1231_v26 }
 0x33c   : > { %v1263_v55 = vmax.f32 %v1237_v2, 0.0 }
 0x33d   : > { %v1262_v15 = vmax.f32 %v1232_v8, 0.0 }
 0x33e   : > { %v1303_v12 = vadd.f32 %v1283_v11, %v1263_v55 }
 0x33f   : > { %v1302_v38 = vadd.f32 %v1281_v20, %v1262_v15 }
 0x340   : > { %v1311_v14 = vmax.f32 %v1303_v12, 0.0 }
 0x341   : > { %v1310_v47 = vmax.f32 %v1302_v38, 0.0 }
 0x342   : > { %1319 = vst.msk [vmem:[%s2149_s8 + $0x18] sm:$0xff] %vm545_vm4, %v1311_v14 }
 0x343   : > { %1318 = vst.msk [vmem:[%s2149_s8 + $0x10] sm:$0xff] %vm545_vm4, %v1310_v47 }
 0x355   : > { %v1478_v18 = vpop.f32.mrb[4].mxu1 }
 0x356   : > { %v1247_v21 = vadd.f32 %v1478_v18, %v1398_v28  ;;  %v1241_v17 = vpop.f32.mrb[5].mxu1 }
 0x357   : > { %v1242_v19 = vadd.f32 %v1398_v28, %v1241_v17 }
 0x358   : > { %v1265_v22 = vmax.f32 %v1247_v21, 0.0 }
 0x359   : > { %v1264_v36 = vmax.f32 %v1242_v19, 0.0 }
 0x35a   : > { %v1305_v24 = vadd.f32 %v1287_v10, %v1265_v22 }
 0x35b   : > { %v1304_v25 = vadd.f32 %v1285_v23, %v1264_v36 }
 0x35c   : > { %v1313_v30 = vmax.f32 %v1305_v24, 0.0 }
 0x35d   : > { %v1312_v31 = vmax.f32 %v1304_v25, 0.0 }
 0x35e   : > { %1321 = vst.msk [vmem:[%s2149_s8 + $0x28] sm:$0xff] %vm545_vm4, %v1313_v30 }
 0x35f   : > { %1320 = vst.msk [vmem:[%s2149_s8 + $0x20] sm:$0xff] %vm545_vm4, %v1312_v31  ;;  %v1481_v53 = vpop.f32.mrb[6].mxu1 }
 0x360   : > { %v1257_v32 = vadd.f32 %v1481_v53, %v1398_v28  ;;  %v1251_v51 = vpop.f32.mrb[7].mxu1 }
 0x361   : > { %v1252_v33 = vadd.f32 %v1398_v28, %v1251_v51 }
 0x362   : > { %v1267_v1 = vmax.f32 %v1257_v32, 0.0 }
 0x363   : > { %v1266_v62 = vmax.f32 %v1252_v33, 0.0 }
 0x364   : > { %v1307_v39 = vadd.f32 %v1291_v37, %v1267_v1 }
 0x365   : > { %v1306_v40 = vadd.f32 %v1289_v29, %v1266_v62 }
 0x366   : > { %v1315_v58 = vmax.f32 %v1307_v39, 0.0 }
 0x367   : > { %v1314_v41 = vmax.f32 %v1306_v40, 0.0 }
 0x368   : > { %1323 = vst.msk [vmem:[%s2149_s8 + $0x38] sm:$0xff] %vm545_vm4, %v1315_v58 }
 0x369   : > { %1322 = vst.msk [vmem:[%s2149_s8 + $0x30] sm:$0xff] %vm545_vm4, %v1314_v41 }
 0x36a PF: > { %s15_s18 = sadd.s32 1, %s1522_s18  }
 0x36b   : > { %p12_p4 = scmp.ge.s32.totalorder %s15_s18, 4  }
 0x36d   :  { %14 = sbr.rel (!%p12_p4) target bundleno = 1 (0x1), region = 70 }

// kernel: hourglass2d_forward.11
= control target key start
LH: loop header
LB: loop body
LE: loop exit
PB: predicated region body
PF: predicated region fallthrough
CT: control target
= control target key end

     0   :  { %s1647_s21 = smov 0   ;;  %s2264_s0 = inlined_call_operand.vmem [shape: f32[2,8,8,4], index: 0, kind: input, shape index: {}]   ;;  %s2265_s1 = inlined_call_operand.vmem [shape: f32[2,8,8,4], index: 1, kind: input, shape index: {}]   ;;  %s2266_s2 = inlined_call_operand.vmem [shape: f32[36,8], index: 2, kind: input, shape index: {}]   ;;  %s2267_s3 = inlined_call_operand.vmem [shape: f32[1,8], index: 3, kind: input, shape index: {}]   ;;  %s2268_s4 = inlined_call_operand.vmem [shape: f32[36,4], index: 4, kind: input, shape index: {}]   ;;  %s2269_s5 = inlined_call_operand.vmem [shape: f32[1,4], index: 5, kind: input, shape index: {}]   ;;  %s2270_s6 = inlined_call_operand.vmem [shape: f32[2,8,8,4], index: 6, kind: output, shape index: {}]  }
   0x1 LB: > { %s1454_s22 = sadd.s32 4294967295, %s1600_s21   ;;  %p1458_p0 = scmp.ge.s32.totalorder %s1600_s21, 1  ;;  %s1600_s21 = sphi %s1647_s21, %s16_s21  }
   0x2   : > { %p222_p1 = scmp.lt.s32.totalorder %s1600_s21, 3 }
   0x4   : > { %p223_p2 = pnand %p1458_p0, %p222_p1 }
   0x5   : > { %vm307_vm0 = vcmask (!%p223_p2), 1040384   ;;  %p257_p3 = scmp.lt.s32.totalorder (!%p223_p2), %s1454_s22, 1  ;;  %v1602_v0 = vmov (!%p223_p2), 0.0   ;;  %vm342_vm1 = vcmask (!%p223_p2), 1046528   ;;  %s1603_s27 = smov (!%p223_p2), 12   ;;  %vm372_vm2 = vcmask (!%p223_p2), 1045504  }
   0x6   : > { %226 = sbr.rel (%p223_p2) target bundleno = 876 (0x36c), region = 44  ;;  %v289_v1 = vrot.slane (!%p223_p2), %v1602_v0, 7  ;;  %s1604_s28 = smov (!%p223_p2), 8   ;;  %v664_v39 = vld [vmem:[%s2266_s2] sm:$0xff] (!%p223_p2)  ;;  %v665_v40 = vld [vmem:[%s2266_s2 + $0x8] sm:$0xff] (!%p223_p2)  ;;  %v666_v43 = vld [vmem:[%s2266_s2 + $0x10] sm:$0xff] (!%p223_p2) }
   0x7   : > { %s1605_s29 = smov (!%p223_p2), 4   ;;  %s1606_s30 = smov (!%p223_p2), 16   ;;  %v1560_v41 = vpack.c.bf16 (!%p223_p2), %v665_v40, %v664_v39  ;;  %v667_v44 = vld [vmem:[%s2266_s2 + $0x18] sm:$0xff] (!%p223_p2)  ;;  %v668_v48 = vld [vmem:[%s2266_s2 + $0x20] sm:$0xf] (!%p223_p2)  ;;  %vm701_vm3 = vcmask (!%p223_p2), 1043456  }
   0x8   : > { %v1656_v2 = vsel (!%p223_p2), %vm307_vm0, 0.0, %v289_v1  ;;  %v317_v3 = vsel (!%p223_p2), %vm307_vm0, %v289_v1, 0.0  ;;  %s1607_s7 = smov (!%p223_p2), 20   ;;  %s1608_s12 = smov (!%p223_p2), 24   ;;  %v1564_v45 = vpack.c.bf16 (!%p223_p2), %v667_v44, %v666_v43  ;;  %vm592_vm4 = vcmask (!%p223_p2), 31744  }
   0x9   : > { %v343_v4 = vrot.slane (!%p223_p2), %v1656_v2, 1  ;;  %v344_v5 = vrot.slane (!%p223_p2), %v317_v3, 1  ;;  %v373_v31 = vrot.slane (!%p223_p2), %v1656_v2, 2  ;;  %v374_v32 = vrot.slane (!%p223_p2), %v317_v3, 2  ;;  %1561 = vmatprep.subr.bf16.mxu0 (!%p223_p2), %v1560_v41  ;;  %s1609_s17 = smov (!%p223_p2), 28   ;;  %s1610_s20 = smov (!%p223_p2), 32  }
   0xa   : > { %1563 = vmatpush3.bf16.msra.mxu0 (!%p223_p2), %v1560_v41  ;;  %vm601_vm5 = vcmask (!%p223_p2), 64512   ;;  %vm610_vm6 = vcmask (!%p223_p2), 97280   ;;  %vm619_vm7 = vcmask (!%p223_p2), 130048   ;;  %vm628_vm8 = vcmask (!%p223_p2), 162816  }
   0xb   : > { %v1669_v6 = vsel (!%p223_p2), %vm342_vm1, %v343_v4, %v344_v5  ;;  %v1723_v35 = vsel (!%p223_p2), %vm372_vm2, %v373_v31, %v374_v32  ;;  %1565 = vmatprep.subr.bf16.mxu0 (!%p223_p2), %v1564_v45  ;;  %vm637_vm9 = vcmask (!%p223_p2), 195584   ;;  %vm646_vm10 = vcmask (!%p223_p2), 228352  }
   0xc   : > { %448 = vrot.lane.b32.xlu0 (!%p223_p2), %v1669_v6, %s1603_s27  ;;  %vm655_vm11 = vcmask (!%p223_p2), 261120   ;;  %vm676_vm12 = vcmask (!%p223_p2), 293888  }
   0xd   : > { %s2272_s22 = smov (!%p257_p3, %s1454_s22), 1 }
   0xe   : > { %s1660_s23 = sshll.u32 %s2272_s22, 6  ;;  %1567 = vmatpush3.bf16.msra.mxu0 %v1564_v45 }
   0xf   : > { %s1666_s26 = scalar_lea.vmem %s2264_s0, %s1660_s23  ;;  %1524 = vmatprep.subr.msk.mxu0 %vm701_vm3, %v668_v48  ;;  %s2237_s19 = scalar_lea.vmem %s2270_s6, %s1660_s23 }
  0x10   : > { %v273_v7 = vld [vmem:[%s1666_s26 + $0x8] sm:$0xff]  ;;  %v272_v8 = vld [vmem:[%s1666_s26] sm:$0xff]  ;;  %v274_v9 = vld [vmem:[%s1666_s26 + $0x10] sm:$0xff] }
  0x11   : > { %v291_v10 = vrot.slane %v273_v7, 7  ;;  %v290_v11 = vrot.slane %v272_v8, 7  ;;  %v292_v12 = vrot.slane %v274_v9, 7  ;;  %v275_v23 = vld [vmem:[%s1666_s26 + $0x18] sm:$0xff]  ;;  %v276_v30 = vld [vmem:[%s1666_s26 + $0x20] sm:$0xff]  ;;  %v277_v53 = vld [vmem:[%s1666_s26 + $0x28] sm:$0xff] }
  0x12   : > { %v293_v25 = vrot.slane %v275_v23, 7  ;;  %v294_v34 = vrot.slane %v276_v30, 7  ;;  %1525 = vmatpush3.msk.msra.mxu0 %vm701_vm3, %v668_v48  ;;  %v295_v57 = vrot.slane %v277_v53, 7  ;;  %v278_v63 = vld [vmem:[%s1666_s26 + $0x30] sm:$0xff] }
  0x13   : > { %v1677_v13 = vsel %vm307_vm0, 0.0, %v291_v10  ;;  %v1680_v14 = vsel %vm307_vm0, 0.0, %v290_v11  ;;  %v318_v15 = vsel %vm307_vm0, %v290_v11, 0.0  ;;  %v1688_v16 = vsel %vm307_vm0, 0.0, %v292_v12  ;;  %v279_v11 = vld [vmem:[%s1666_s26 + $0x38] sm:$0xff] }
  0x14   : > { %424 = vrot.lane.b32.xlu1 %v1677_v13, %s1604_s28  ;;  %400 = vrot.lane.b32.xlu0 %v1680_v14, %s1605_s29  ;;  %v346_v17 = vrot.slane %v1680_v14, 1  ;;  %v347_v18 = vrot.slane %v318_v15, 1  ;;  %v319_v19 = vsel %vm307_vm0, %v291_v10, 0.0  ;;  %v349_v21 = vrot.slane %v1677_v13, 1 }
  0x15   : > { %v350_v22 = vrot.slane %v319_v19, 1  ;;  %v1704_v26 = vsel %vm307_vm0, %v292_v12, 0.0  ;;  %v1709_v27 = vsel %vm307_vm0, 0.0, %v293_v25  ;;  %v352_v28 = vrot.slane %v1688_v16, 1 }
  0x16   : > { %v348_v20 = vsel %vm342_vm1, %v346_v17, %v347_v18  ;;  %v353_v29 = vrot.slane %v1704_v26, 1  ;;  %v1726_v36 = vsel %vm307_vm0, 0.0, %v294_v34  ;;  %v376_v37 = vrot.slane %v1680_v14, 2 }
  0x17   : > { %v351_v24 = vsel %vm342_vm1, %v349_v21, %v350_v22  ;;  %v377_v38 = vrot.slane %v318_v15, 2  ;;  %v379_v46 = vrot.slane %v1677_v13, 2  ;;  %v380_v47 = vrot.slane %v319_v19, 2 }
  0x18   : > { %426 = vrot.lane.b32.xlu1 %v1688_v16, %s1604_s28  ;;  %402 = vrot.lane.b32.xlu0 %v1677_v13, %s1605_s29  ;;  %v354_v33 = vsel %vm342_vm1, %v352_v28, %v353_v29  ;;  %v321_v50 = vsel %vm307_vm0, %v293_v25, 0.0  ;;  %v355_v51 = vrot.slane %v1709_v27, 1  ;;  %v382_v55 = vrot.slane %v1688_v16, 2 }
  0x19   : > { %v378_v42 = vsel %vm372_vm2, %v376_v37, %v377_v38  ;;  %v381_v49 = vsel %vm372_vm2, %v379_v46, %v380_v47  ;;  %v356_v52 = vrot.slane %v321_v50, 1  ;;  %v383_v56 = vrot.slane %v1704_v26, 2 }
  0x1a   : > { %v322_v58 = vsel %vm307_vm0, %v294_v34, 0.0  ;;  %v1773_v60 = vsel %vm307_vm0, 0.0, %v295_v57  ;;  %v358_v61 = vrot.slane %v1726_v36, 1  ;;  %v296_v1 = vrot.slane %v278_v63, 7 }
  0x1b   : > { %v357_v54 = vsel %vm342_vm1, %v355_v51, %v356_v52  ;;  %v384_v59 = vsel %vm372_vm2, %v382_v55, %v383_v56  ;;  %v359_v62 = vrot.slane %v322_v58, 1  ;;  %v385_v4 = vrot.slane %v1709_v27, 2 }
  0x1c   : > { %404 = vrot.lane.b32.xlu1 %v1688_v16, %s1605_s29  ;;  %472 = vrot.lane.b32.xlu0 %v348_v20, %s1606_s30  ;;  %v1785_v3 = vsel %vm307_vm0, 0.0, %v296_v1  ;;  %v386_v5 = vrot.slane %v321_v50, 2  ;;  %v323_v8 = vsel %vm307_vm0, %v295_v57, 0.0  ;;  %v361_v9 = vrot.slane %v1773_v60, 1 }
  0x1d   : > { %v360_v0 = vsel %vm342_vm1, %v358_v61, %v359_v62  ;;  %v362_v10 = vrot.slane %v323_v8, 1  ;;  %v388_v15 = vrot.slane %v1726_v36, 2  ;;  %v389_v17 = vrot.slane %v322_v58, 2 }
  0x1e   : > { %v387_v7 = vsel %vm372_vm2, %v385_v4, %v386_v5  ;;  %v297_v18 = vrot.slane %v279_v11, 7  ;;  %v324_v19 = vsel %vm307_vm0, %v296_v1, 0.0  ;;  %v364_v22 = vrot.slane %v1785_v3, 1 }
  0x1f   : > { %v363_v12 = vsel %vm342_vm1, %v361_v9, %v362_v10  ;;  %v365_v23 = vrot.slane %v324_v19, 1  ;;  %v391_v25 = vrot.slane %v1773_v60, 2  ;;  %v392_v26 = vrot.slane %v323_v8, 2 }
  0x20   : > { %450 = vrot.lane.b32.xlu1 %v348_v20, %s1603_s27  ;;  %474 = vrot.lane.b32.xlu0 %v351_v24, %s1606_s30  ;;  %v390_v20 = vsel %vm372_vm2, %v388_v15, %v389_v17  ;;  %v316_v21 = vsel %vm307_vm0, 0.0, %v297_v18  ;;  %v325_v28 = vsel %vm307_vm0, %v297_v18, 0.0  ;;  %v395_v34 = vrot.slane %v324_v19, 2 }
  0x21   : > { %v393_v29 = vsel %vm372_vm2, %v391_v25, %v392_v26  ;;  %v369_v30 = vrot.slane %v316_v21, 1  ;;  %v370_v31 = vrot.slane %v325_v28, 1  ;;  %v397_v39 = vrot.slane %v316_v21, 2 }
  0x22   : > { %v398_v40 = vrot.slane %v325_v28, 2 }
  0x23   : > { %v371_v32 = vsel %vm342_vm1, %v369_v30, %v370_v31 }
  0x24   : > { %496 = vrot.lane.b32.xlu1 %v351_v24, %s1607_s7  ;;  %406 = vrot.lane.b32.xlu0 %v1709_v27, %s1605_s29  ;;  %v399_v43 = vsel %vm372_vm2, %v397_v39, %v398_v40 }
  0x28   : > { %428 = vrot.lane.b32.xlu1 %v1709_v27, %s1604_s28  ;;  %498 = vrot.lane.b32.xlu0 %v354_v33, %s1607_s7 }
  0x2c   : > { %520 = vrot.lane.b32.xlu1 %v1723_v35, %s1608_s12  ;;  %430 = vrot.lane.b32.xlu0 %v1726_v36, %s1604_s28 }
  0x30   : > { %452 = vrot.lane.b32.xlu1 %v351_v24, %s1603_s27  ;;  %522 = vrot.lane.b32.xlu0 %v378_v42, %s1608_s12  ;;  %v366_v24 = vsel %vm342_vm1, %v364_v22, %v365_v23 }
  0x34   : > { %544 = vrot.lane.b32.xlu1 %v378_v42, %s1609_s17  ;;  %454 = vrot.lane.b32.xlu0 %v354_v33, %s1603_s27 }
  0x38   : > { %476 = vrot.lane.b32.xlu1 %v354_v33, %s1606_s30  ;;  %546 = vrot.lane.b32.xlu0 %v381_v49, %s1609_s17  ;;  %v394_v33 = vrot.slane %v1785_v3, 2 }
  0x3a   : > { %v396_v37 = vsel %vm372_vm2, %v394_v33, %v395_v34 }
  0x3c   : > { %568 = vrot.lane.b32.xlu1 %v381_v49, %s1610_s20  ;;  %408 = vrot.lane.b32.xlu0 %v1726_v36, %s1605_s29 }
  0x40   : > { %478 = vrot.lane.b32.xlu1 %v357_v54, %s1606_s30  ;;  %500 = vrot.lane.b32.xlu0 %v357_v54, %s1607_s7 }
  0x44   : > { %570 = vrot.lane.b32.xlu1 %v384_v59, %s1610_s20  ;;  %410 = vrot.lane.b32.xlu0 %v1773_v60, %s1605_s29 }
  0x48   : > { %432 = vrot.lane.b32.xlu1 %v1773_v60, %s1604_s28  ;;  %502 = vrot.lane.b32.xlu0 %v360_v0, %s1607_s7 }
  0x4c   : > { %524 = vrot.lane.b32.xlu1 %v381_v49, %s1608_s12  ;;  %434 = vrot.lane.b32.xlu0 %v1785_v3, %s1604_s28 }
  0x50   : > { %456 = vrot.lane.b32.xlu1 %v357_v54, %s1603_s27  ;;  %526 = vrot.lane.b32.xlu0 %v384_v59, %s1608_s12 }
  0x54   : > { %548 = vrot.lane.b32.xlu1 %v384_v59, %s1609_s17  ;;  %458 = vrot.lane.b32.xlu0 %v360_v0, %s1603_s27 }
  0x58   : > { %480 = vrot.lane.b32.xlu1 %v360_v0, %s1606_s30  ;;  %550 = vrot.lane.b32.xlu0 %v387_v7, %s1609_s17 }
  0x5c   : > { %572 = vrot.lane.b32.xlu1 %v387_v7, %s1610_s20  ;;  %412 = vrot.lane.b32.xlu0 %v1785_v3, %s1605_s29 }
  0x60   : > { %482 = vrot.lane.b32.xlu1 %v363_v12, %s1606_s30  ;;  %504 = vrot.lane.b32.xlu0 %v363_v12, %s1607_s7 }
  0x64   : > { %574 = vrot.lane.b32.xlu1 %v390_v20, %s1610_s20  ;;  %414 = vrot.lane.b32.xlu0 %v316_v21, %s1605_s29 }
  0x68   : > { %436 = vrot.lane.b32.xlu1 %v316_v21, %s1604_s28  ;;  %506 = vrot.lane.b32.xlu0 %v366_v24, %s1607_s7 }
  0x6c   : > { %528 = vrot.lane.b32.xlu1 %v387_v7, %s1608_s12  ;;  %438 = vrot.lane.b32.xlu0 %v1656_v2, %s1604_s28 }
  0x70   : > { %460 = vrot.lane.b32.xlu1 %v363_v12, %s1603_s27  ;;  %530 = vrot.lane.b32.xlu0 %v390_v20, %s1608_s12 }
  0x74   : > { %552 = vrot.lane.b32.xlu1 %v390_v20, %s1609_s17  ;;  %462 = vrot.lane.b32.xlu0 %v366_v24, %s1603_s27 }
  0x78   : > { %484 = vrot.lane.b32.xlu1 %v366_v24, %s1606_s30  ;;  %554 = vrot.lane.b32.xlu0 %v393_v29, %s1609_s17 }
  0x7c   : > { %576 = vrot.lane.b32.xlu1 %v393_v29, %s1610_s20  ;;  %486 = vrot.lane.b32.xlu0 %v371_v32, %s1606_s30 }
  0x7e   : > { %v1836_v38 = vpop.permute.xlu0 %448 }
  0x80   : > { %508 = vrot.lane.b32.xlu1 %v371_v32, %s1607_s7  ;;  %578 = vrot.lane.b32.xlu0 %v396_v37, %s1610_s20 }
  0x84   : > { %510 = vrot.lane.b32.xlu1 %v1669_v6, %s1607_s7  ;;  %532 = vrot.lane.b32.xlu0 %v393_v29, %s1608_s12 }
  0x86   : > { %v425_v41 = vpop.permute.xlu1 %424  ;;  %v401_v42 = vpop.permute.xlu0 %400 }
  0x87   : > { %v593_v57 = vsel %vm592_vm4, %v1656_v2, %v401_v42 }
  0x88   : > { %534 = vrot.lane.b32.xlu1 %v396_v37, %s1608_s12  ;;  %556 = vrot.lane.b32.xlu0 %v396_v37, %s1609_s17 }
  0x8a   : > { %v427_v44 = vpop.permute.xlu1 %426  ;;  %v403_v45 = vpop.permute.xlu0 %402 }
  0x8b   : > { %v594_v1 = vsel %vm592_vm4, %v1680_v14, %v403_v45 }
  0x8c   : > { %558 = vrot.lane.b32.xlu1 %v399_v43, %s1609_s17  ;;  %580 = vrot.lane.b32.xlu0 %v399_v43, %s1610_s20  ;;  %v603_v9 = vsel %vm601_vm5, %v594_v1, %v427_v44 }
  0x8e   : > { %v405_v46 = vpop.permute.xlu1 %404  ;;  %v473_v6 = vpop.permute.xlu0 %472 }
  0x8f   : > { %v595_v33 = vsel %vm592_vm4, %v1677_v13, %v405_v46 }
  0x90   : > { %582 = vrot.lane.b32.xlu1 %v1723_v35, %s1610_s20  ;;  %v602_v35 = vsel %vm601_vm5, %v593_v57, %v425_v41 }
  0x91   : > { %v611_v61 = vsel %vm610_vm6, %v602_v35, %v1836_v38 }
  0x92   : > { %v451_v47 = vpop.permute.xlu1 %450  ;;  %v475_v48 = vpop.permute.xlu0 %474  ;;  %v620_v63 = vsel %vm619_vm7, %v611_v61, %v473_v6 }
  0x93   : > { %v612_v12 = vsel %vm610_vm6, %v603_v9, %v451_v47 }
  0x94   : > { %v621_v15 = vsel %vm619_vm7, %v612_v12, %v475_v48 }
  0x96   : > { %v497_v49 = vpop.permute.xlu1 %496  ;;  %v1848_v50 = vpop.permute.xlu0 %406 }
  0x97   : > { %v629_v4 = vsel %vm628_vm8, %v620_v63, %v497_v49  ;;  %v596_v13 = vsel %vm592_vm4, %v1688_v16, %v1848_v50 }
  0x9a   : > { %v429_v51 = vpop.permute.xlu1 %428  ;;  %v499_v52 = vpop.permute.xlu0 %498 }
  0x9b   : > { %v630_v18 = vsel %vm628_vm8, %v621_v15, %v499_v52  ;;  %v604_v34 = vsel %vm601_vm5, %v595_v33, %v429_v51 }
  0x9e   : > { %v1850_v53 = vpop.permute.xlu1 %520  ;;  %v1852_v54 = vpop.permute.xlu0 %430 }
  0x9f   : > { %v638_v5 = vsel %vm637_vm9, %v629_v4, %v1850_v53  ;;  %v605_v46 = vsel %vm601_vm5, %v596_v13, %v1852_v54 }
  0xa2   : > { %v453_v55 = vpop.permute.xlu1 %452  ;;  %v523_v56 = vpop.permute.xlu0 %522 }
  0xa3   : > { %v639_v19 = vsel %vm637_vm9, %v630_v18, %v523_v56  ;;  %v613_v37 = vsel %vm610_vm6, %v604_v34, %v453_v55 }
  0xa6   : > { %v545_v58 = vpop.permute.xlu1 %544  ;;  %v455_v59 = vpop.permute.xlu0 %454 }
  0xa7   : > { %v647_v7 = vsel %vm646_vm10, %v638_v5, %v545_v58  ;;  %v614_v48 = vsel %vm610_vm6, %v605_v46, %v455_v59 }
  0xaa   : > { %v477_v62 = vpop.permute.xlu1 %476  ;;  %v547_v0 = vpop.permute.xlu0 %546 }
  0xab   : > { %v648_v20 = vsel %vm646_vm10, %v639_v19, %v547_v0  ;;  %v622_v40 = vsel %vm619_vm7, %v613_v37, %v477_v62 }
  0xae   : > { %v569_v8 = vpop.permute.xlu1 %568  ;;  %v409_v10 = vpop.permute.xlu0 %408 }
  0xaf   : > { %v656_v11 = vsel %vm655_vm11, %v647_v7, %v569_v8  ;;  %v597_v4 = vsel %vm592_vm4, %v1709_v27, %v409_v10 }
  0xb0   : > { %1526 = vmatprep.mubr.msk.f32.mxu0 %vm676_vm12, %v656_v11 }
  0xb2   : > { %v479_v14 = vpop.permute.xlu1 %478  ;;  %v501_v17 = vpop.permute.xlu0 %500 }
  0xb3   : > { %v631_v42 = vsel %vm628_vm8, %v622_v40, %v501_v17  ;;  %v623_v51 = vsel %vm619_vm7, %v614_v48, %v479_v14 }
  0xb6   : > { %v571_v21 = vpop.permute.xlu1 %570  ;;  %v411_v23 = vpop.permute.xlu0 %410 }
  0xb7   : > { %v657_v22 = vsel %vm655_vm11, %v648_v20, %v571_v21  ;;  %v598_v14 = vsel %vm592_vm4, %v1726_v36, %v411_v23 }
  0xb8   : > { %1527 = vmatmul.mubr.msk.f32.vlgmr.msra.gmra.mrb[0].mxu0 %vm676_vm12, %v657_v22 }
  0xba   : > { %v433_v24 = vpop.permute.xlu1 %432  ;;  %v503_v25 = vpop.permute.xlu0 %502 }
  0xbb   : > { %v632_v55 = vsel %vm628_vm8, %v623_v51, %v503_v25  ;;  %v606_v5 = vsel %vm601_vm5, %v597_v4, %v433_v24  ;;  %v1950_v51 = vld [vmem:[%s2267_s3] ss:$0 sm:$0xff] }
  0xbe   : > { %v525_v26 = vpop.permute.xlu1 %524  ;;  %v435_v28 = vpop.permute.xlu0 %434 }
  0xbf   : > { %v640_v43 = vsel %vm637_vm9, %v631_v42, %v525_v26  ;;  %v607_v17 = vsel %vm601_vm5, %v598_v14, %v435_v28 }
  0xc2   : > { %v457_v29 = vpop.permute.xlu1 %456  ;;  %v527_v30 = vpop.permute.xlu0 %526 }
  0xc3   : > { %v641_v56 = vsel %vm637_vm9, %v632_v55, %v527_v30  ;;  %v615_v7 = vsel %vm610_vm6, %v606_v5, %v457_v29 }
  0xc6   : > { %v549_v31 = vpop.permute.xlu1 %548  ;;  %v459_v32 = vpop.permute.xlu0 %458 }
  0xc7   : > { %v649_v44 = vsel %vm646_vm10, %v640_v43, %v549_v31  ;;  %v616_v10 = vsel %vm610_vm6, %v607_v17, %v459_v32 }
  0xca   : > { %v481_v39 = vpop.permute.xlu1 %480  ;;  %v551_v41 = vpop.permute.xlu0 %550 }
  0xcb   : > { %v650_v57 = vsel %vm646_vm10, %v641_v56, %v551_v41  ;;  %v624_v9 = vsel %vm619_vm7, %v615_v7, %v481_v39 }
  0xce   : > { %v573_v45 = vpop.permute.xlu1 %572  ;;  %v413_v47 = vpop.permute.xlu0 %412 }
  0xcf   : > { %v658_v6 = vsel %vm655_vm11, %v649_v44, %v573_v45  ;;  %v599_v30 = vsel %vm592_vm4, %v1773_v60, %v413_v47 }
  0xd0   : > { %1529 = vmatprep.mubr.msk.f32.mxu0 %vm676_vm12, %v658_v6 }
  0xd2   : > { %v483_v49 = vpop.permute.xlu1 %482  ;;  %v505_v52 = vpop.permute.xlu0 %504 }
  0xd3   : > { %v633_v12 = vsel %vm628_vm8, %v624_v9, %v505_v52  ;;  %v625_v21 = vsel %vm619_vm7, %v616_v10, %v483_v49 }
  0xd6   : > { %v575_v58 = vpop.permute.xlu1 %574  ;;  %v415_v50 = vpop.permute.xlu0 %414 }
  0xd7   : > { %v659_v16 = vsel %vm655_vm11, %v650_v57, %v575_v58  ;;  %v600_v37 = vsel %vm592_vm4, %v1785_v3, %v415_v50 }
  0xd8   : > { %1530 = vmatmul.mubr.msk.f32.gmra.mrb[2].mxu0 %vm676_vm12, %v659_v16 }
  0xda   : > { %v437_v35 = vpop.permute.xlu1 %436  ;;  %v507_v54 = vpop.permute.xlu0 %506 }
  0xdb   : > { %v634_v22 = vsel %vm628_vm8, %v625_v21, %v507_v54  ;;  %v608_v31 = vsel %vm601_vm5, %v599_v30, %v437_v35  ;;  %v1163_v30 = vld [vmem:[%s2268_s4] sm:$0xff] }
  0xde   : > { %v529_v61 = vpop.permute.xlu1 %528  ;;  %v1898_v59 = vpop.permute.xlu0 %438 }
  0xdf   : > { %v642_v15 = vsel %vm637_vm9, %v633_v12, %v529_v61  ;;  %v609_v40 = vsel %vm601_vm5, %v600_v37, %v1898_v59 }
  0xe2   : > { %v461_v62 = vpop.permute.xlu1 %460  ;;  %v531_v63 = vpop.permute.xlu0 %530 }
  0xe3   : > { %v643_v36 = vsel %vm637_vm9, %v634_v22, %v531_v63  ;;  %v617_v33 = vsel %vm610_vm6, %v608_v31, %v461_v62  ;;  %v1164_v31 = vld [vmem:[%s2268_s4 + $0x8] sm:$0xff] }
  0xe4   : > { %v1568_v37 = vpack.c.bf16 %v1164_v31, %v1163_v30 }
  0xe6   : > { %v553_v0 = vpop.permute.xlu1 %552  ;;  %v463_v1 = vpop.permute.xlu0 %462  ;;  %1569 = vmatprep.subr.bf16.mxu1 %v1568_v37 }
  0xe7   : > { %v651_v18 = vsel %vm646_vm10, %v642_v15, %v553_v0  ;;  %v618_v42 = vsel %vm610_vm6, %v609_v40, %v463_v1  ;;  %1571 = vmatpush3.bf16.msra.mxu1 %v1568_v37 }
  0xea   : > { %v485_v8 = vpop.permute.xlu1 %484  ;;  %v555_v11 = vpop.permute.xlu0 %554 }
  0xeb   : > { %v652_v24 = vsel %vm646_vm10, %v643_v36, %v555_v11  ;;  %v626_v39 = vsel %vm619_vm7, %v617_v33, %v485_v8 }
  0xee   : > { %v577_v27 = vpop.permute.xlu1 %576  ;;  %v487_v20 = vpop.permute.xlu0 %486 }
  0xef   : > { %v660_v19 = vsel %vm655_vm11, %v651_v18, %v577_v27  ;;  %v627_v44 = vsel %vm619_vm7, %v618_v42, %v487_v20 }
  0xf0   : > { %1532 = vmatprep.mubr.msk.f32.mxu0 %vm676_vm12, %v660_v19 }
  0xf2   : > { %v509_v23 = vpop.permute.xlu1 %508  ;;  %v579_v25 = vpop.permute.xlu0 %578 }
  0xf3   : > { %v661_v26 = vsel %vm655_vm11, %v652_v24, %v579_v25  ;;  %v635_v41 = vsel %vm628_vm8, %v626_v39, %v509_v23 }
  0xf4   : > { %1533 = vmatmul.mubr.msk.f32.gmra.mrb[4].mxu0 %vm676_vm12, %v661_v26 }
  0xf6   : > { %v1920_v28 = vpop.permute.xlu1 %510  ;;  %v533_v29 = vpop.permute.xlu0 %532 }
  0xf7   : > { %v644_v60 = vsel %vm637_vm9, %v635_v41, %v533_v29  ;;  %v636_v3 = vsel %vm628_vm8, %v627_v44, %v1920_v28 }
  0xfa   : > { %v535_v32 = vpop.permute.xlu1 %534  ;;  %v557_v34 = vpop.permute.xlu0 %556 }
  0xfb   : > { %v653_v45 = vsel %vm646_vm10, %v644_v60, %v557_v34  ;;  %v645_v13 = vsel %vm637_vm9, %v636_v3, %v535_v32  ;;  %v1165_v60 = vld [vmem:[%s2268_s4 + $0x10] sm:$0xff] }
  0xfe   : > { %v559_v43 = vpop.permute.xlu1 %558  ;;  %v581_v6 = vpop.permute.xlu0 %580 }
  0xff   : > { %v662_v47 = vsel %vm655_vm11, %v653_v45, %v581_v6  ;;  %v654_v46 = vsel %vm646_vm10, %v645_v13, %v559_v43  ;;  %v1166_v43 = vld [vmem:[%s2268_s4 + $0x18] sm:$0xff]  ;;  %v1167_v6 = vld [vmem:[%s2268_s4 + $0x20] sm:$0xf] }
 0x100   : > { %1535 = vmatprep.mubr.msk.f32.mxu0 %vm676_vm12, %v662_v47  ;;  %v1572_v44 = vpack.c.bf16 %v1166_v43, %v1165_v60 }
 0x102   : > { %v1942_v48 = vpop.permute.xlu1 %582  ;;  %1573 = vmatprep.subr.bf16.mxu1 %v1572_v44 }
 0x103   : > { %v663_v49 = vsel %vm655_vm11, %v654_v46, %v1942_v48  ;;  %1575 = vmatpush3.bf16.msra.mxu1 %v1572_v44 }
 0x104   : > { %1536 = vmatmul.mubr.msk.f32.gmra.mrb[6].mxu0 %vm676_vm12, %v663_v49  ;;  %1546 = vmatprep.subr.msk.mxu1 %vm701_vm3, %v1167_v6 }
 0x107   : > { %1547 = vmatpush3.msk.msra.mxu1 %vm701_vm3, %v1167_v6 }
 0x18b   : > { %v1528_v52 = vpop.f32.mrb[0].mxu0 }
 0x18c   : > { %v1953_v55 = vadd.f32 %v1528_v52, %v1950_v51  ;;  %v771_v56 = vpop.f32.mrb[1].mxu0 }
 0x18d   : > { %v1956_v57 = vadd.f32 %v1950_v51, %v771_v56 }
 0x18e   : > { %v811_v58 = vmax.f32 %v1953_v55, 0.0 }
 0x18f   : > { %v810_v16 = vmax.f32 %v1956_v57, 0.0 }
 0x190   : > { %v827_v50 = vrot.slane %v811_v58, 7 }
 0x191   : > { %v826_v61 = vrot.slane %v810_v16, 7 }
 0x192   : > { %v1961_v35 = vsel %vm307_vm0, 0.0, %v827_v50  ;;  %v851_v54 = vsel %vm307_vm0, %v827_v50, 0.0 }
 0x193   : > { %v876_v62 = vrot.slane %v851_v54, 1  ;;  %946 = vrot.lane.b32.xlu0 %v1961_v35, %s1604_s28  ;;  %924 = vrot.lane.b32.xlu1 %v1961_v35, %s1605_s29  ;;  %v875_v63 = vrot.slane %v1961_v35, 1  ;;  %v1971_v1 = vsel %vm307_vm0, 0.0, %v826_v61  ;;  %v902_v4 = vrot.slane %v851_v54, 2 }
 0x194   : > { %v901_v5 = vrot.slane %v1961_v35, 2  ;;  %v850_v7 = vsel %vm307_vm0, %v826_v61, 0.0  ;;  %v872_v11 = vrot.slane %v1971_v1, 1  ;;  %v898_v22 = vrot.slane %v1971_v1, 2 }
 0x195   : > { %v877_v0 = vsel %vm342_vm1, %v875_v63, %v876_v62  ;;  %v873_v8 = vrot.slane %v850_v7, 1  ;;  %v899_v19 = vrot.slane %v850_v7, 2 }
 0x196   : > { %v903_v9 = vsel %vm372_vm2, %v901_v5, %v902_v4 }
 0x197   : > { %990 = vrot.lane.b32.xlu1 %v877_v0, %s1606_s30  ;;  %922 = vrot.lane.b32.xlu0 %v1971_v1, %s1605_s29  ;;  %v874_v12 = vsel %vm342_vm1, %v872_v11, %v873_v8  ;;  %v900_v23 = vsel %vm372_vm2, %v898_v22, %v899_v19 }
 0x19b   : > { %969 = vrot.lane.b32.xlu1 %v877_v0, %s1603_s27  ;;  %1012 = vrot.lane.b32.xlu0 %v877_v0, %s1607_s7 }
 0x19f   : > { %1078 = vrot.lane.b32.xlu1 %v903_v9, %s1610_s20  ;;  %1056 = vrot.lane.b32.xlu0 %v903_v9, %s1609_s17 }
 0x1a3   : > { %1035 = vrot.lane.b32.xlu1 %v903_v9, %s1608_s12  ;;  %967 = vrot.lane.b32.xlu0 %v874_v12, %s1603_s27 }
 0x1a7   : > { %988 = vrot.lane.b32.xlu1 %v874_v12, %s1606_s30 }
 0x1ab   : > { %v1531_v14 = vpop.f32.mrb[2].mxu0 }
 0x1ac   : > { %v1989_v15 = vadd.f32 %v1531_v14, %v1950_v51  ;;  %v781_v17 = vpop.f32.mrb[3].mxu0 }
 0x1ad   : > { %v1993_v27 = vadd.f32 %v1950_v51, %v781_v17 }
 0x1ae   : > { %v813_v18 = vmax.f32 %v1989_v15, 0.0 }
 0x1af   : > { %v812_v21 = vmax.f32 %v1993_v27, 0.0 }
 0x1b0   : > { %v829_v10 = vrot.slane %v813_v18, 7 }
 0x1b1   : > { %v828_v36 = vrot.slane %v812_v21, 7 }
 0x1b2   : > { %v1996_v20 = vsel %vm307_vm0, 0.0, %v829_v10  ;;  %v853_v24 = vsel %vm307_vm0, %v829_v10, 0.0 }
 0x1b3   : > { %950 = vrot.lane.b32.xlu0 %v1996_v20, %s1604_s28  ;;  %928 = vrot.lane.b32.xlu1 %v1996_v20, %s1605_s29  ;;  %v882_v25 = vrot.slane %v853_v24, 1  ;;  %v2009_v26 = vsel %vm307_vm0, 0.0, %v828_v36  ;;  %v881_v29 = vrot.slane %v1996_v20, 1  ;;  %v908_v32 = vrot.slane %v853_v24, 2 }
 0x1b4   : > { %v907_v34 = vrot.slane %v1996_v20, 2  ;;  %v852_v39 = vsel %vm307_vm0, %v828_v36, 0.0  ;;  %v878_v42 = vrot.slane %v2009_v26, 1  ;;  %v904_v50 = vrot.slane %v2009_v26, 2 }
 0x1b5   : > { %v883_v33 = vsel %vm342_vm1, %v881_v29, %v882_v25  ;;  %v879_v40 = vrot.slane %v852_v39, 1  ;;  %v905_v56 = vrot.slane %v852_v39, 2 }
 0x1b6   : > { %v909_v41 = vsel %vm372_vm2, %v907_v34, %v908_v32 }
 0x1b7   : > { %1033 = vrot.lane.b32.xlu0 %v900_v23, %s1608_s12  ;;  %1054 = vrot.lane.b32.xlu1 %v900_v23, %s1609_s17  ;;  %v880_v45 = vsel %vm342_vm1, %v878_v42, %v879_v40  ;;  %v906_v61 = vsel %vm372_vm2, %v904_v50, %v905_v56 }
 0x1bb   : > { %926 = vrot.lane.b32.xlu0 %v2009_v26, %s1605_s29  ;;  %948 = vrot.lane.b32.xlu1 %v2009_v26, %s1604_s28 }
 0x1bf   : > { %1016 = vrot.lane.b32.xlu0 %v883_v33, %s1607_s7  ;;  %994 = vrot.lane.b32.xlu1 %v883_v33, %s1606_s30 }
 0x1c3   : > { %1060 = vrot.lane.b32.xlu0 %v909_v41, %s1609_s17  ;;  %973 = vrot.lane.b32.xlu1 %v883_v33, %s1603_s27 }
 0x1c7   : > { %1082 = vrot.lane.b32.xlu1 %v909_v41, %s1610_s20  ;;  %971 = vrot.lane.b32.xlu0 %v880_v45, %s1603_s27  ;;  %v1534_v3 = vpop.f32.mrb[4].mxu0 }
 0x1c8   : > { %v2044_v47 = vadd.f32 %v1534_v3, %v1950_v51  ;;  %v791_v13 = vpop.f32.mrb[5].mxu0 }
 0x1c9   : > { %v2049_v49 = vadd.f32 %v1950_v51, %v791_v13 }
 0x1ca   : > { %v815_v46 = vmax.f32 %v2044_v47, 0.0 }
 0x1cb   : > { %1039 = vrot.lane.b32.xlu1 %v909_v41, %s1608_s12  ;;  %v814_v16 = vmax.f32 %v2049_v49, 0.0 }
 0x1cc   : > { %v831_v52 = vrot.slane %v815_v46, 7 }
 0x1cd   : > { %v830_v54 = vrot.slane %v814_v16, 7 }
 0x1ce   : > { %v2054_v58 = vsel %vm307_vm0, 0.0, %v831_v52  ;;  %v855_v0 = vsel %vm307_vm0, %v831_v52, 0.0 }
 0x1cf   : > { %1014 = vrot.lane.b32.xlu1 %v880_v45, %s1607_s7  ;;  %932 = vrot.lane.b32.xlu0 %v2054_v58, %s1605_s29  ;;  %v2065_v62 = vsel %vm307_vm0, 0.0, %v830_v54  ;;  %v888_v5 = vrot.slane %v855_v0, 1  ;;  %v887_v7 = vrot.slane %v2054_v58, 1  ;;  %v914_v9 = vrot.slane %v855_v0, 2 }
 0x1d0   : > { %v913_v11 = vrot.slane %v2054_v58, 2  ;;  %v854_v12 = vsel %vm307_vm0, %v830_v54, 0.0  ;;  %v884_v10 = vrot.slane %v2065_v62, 1  ;;  %v910_v36 = vrot.slane %v2065_v62, 2 }
 0x1d1   : > { %v889_v8 = vsel %vm342_vm1, %v887_v7, %v888_v5  ;;  %v885_v14 = vrot.slane %v854_v12, 1  ;;  %v911_v19 = vrot.slane %v854_v12, 2 }
 0x1d2   : > { %v915_v18 = vsel %vm372_vm2, %v913_v11, %v914_v9 }
 0x1d3   : > { %992 = vrot.lane.b32.xlu1 %v880_v45, %s1606_s30  ;;  %1037 = vrot.lane.b32.xlu0 %v906_v61, %s1608_s12  ;;  %v886_v22 = vsel %vm342_vm1, %v884_v10, %v885_v14  ;;  %v912_v25 = vsel %vm372_vm2, %v910_v36, %v911_v19 }
 0x1d7   : > { %1080 = vrot.lane.b32.xlu1 %v906_v61, %s1610_s20  ;;  %v1537_v63 = vpop.f32.mrb[6].mxu0  ;;  %952 = vrot.lane.b32.xlu0 %v2065_v62, %s1604_s28 }
 0x1d8   : > { %v801_v4 = vpop.f32.mrb[7].mxu0  ;;  %v2084_v17 = vadd.f32 %v1537_v63, %v1950_v51 }
 0x1d9   : > { %v802_v23 = vadd.f32 %v1950_v51, %v801_v4 }
 0x1da   : > { %v817_v21 = vmax.f32 %v2084_v17, 0.0 }
 0x1db   : > { %954 = vrot.lane.b32.xlu1 %v2054_v58, %s1604_s28  ;;  %930 = vrot.lane.b32.xlu0 %v2065_v62, %s1605_s29  ;;  %v816_v29 = vmax.f32 %v802_v23, 0.0 }
 0x1dc   : > { %v833_v24 = vrot.slane %v817_v21, 7 }
 0x1dd   : > { %v832_v32 = vrot.slane %v816_v29, 7 }
 0x1de   : > { %v849_v30 = vsel %vm307_vm0, 0.0, %v833_v24  ;;  %v857_v31 = vsel %vm307_vm0, %v833_v24, 0.0 }
 0x1df   : > { %1058 = vrot.lane.b32.xlu1 %v906_v61, %s1609_s17  ;;  %1020 = vrot.lane.b32.xlu0 %v889_v8, %s1607_s7  ;;  %v896_v51 = vrot.slane %v857_v31, 1  ;;  %v895_v33 = vrot.slane %v849_v30, 1  ;;  %v2104_v34 = vsel %vm307_vm0, 0.0, %v832_v32  ;;  %v856_v37 = vsel %vm307_vm0, %v832_v32, 0.0 }
 0x1e0   : > { %v891_v39 = vrot.slane %v856_v37, 1  ;;  %v890_v41 = vrot.slane %v2104_v34, 1  ;;  %v917_v42 = vrot.slane %v856_v37, 2  ;;  %v916_v43 = vrot.slane %v2104_v34, 2 }
 0x1e1   : > { %v897_v40 = vsel %vm342_vm1, %v895_v33, %v896_v51  ;;  %v920_v6 = vrot.slane %v857_v31, 2  ;;  %v919_v3 = vrot.slane %v849_v30, 2 }
 0x1e2   : > { %v892_v60 = vsel %vm342_vm1, %v890_v41, %v891_v39  ;;  %v918_v44 = vsel %vm372_vm2, %v916_v43, %v917_v42 }
 0x1e3   : > { %998 = vrot.lane.b32.xlu1 %v889_v8, %s1606_s30  ;;  %977 = vrot.lane.b32.xlu0 %v889_v8, %s1603_s27  ;;  %v921_v52 = vsel %vm372_vm2, %v919_v3, %v920_v6 }
 0x1e7   : > { %1064 = vrot.lane.b32.xlu1 %v915_v18, %s1609_s17  ;;  %1086 = vrot.lane.b32.xlu0 %v915_v18, %s1610_s20 }
 0x1eb   : > { %996 = vrot.lane.b32.xlu1 %v886_v22, %s1606_s30  ;;  %1043 = vrot.lane.b32.xlu0 %v915_v18, %s1608_s12 }
 0x1ef   : > { %1084 = vrot.lane.b32.xlu1 %v912_v25, %s1610_s20  ;;  %1018 = vrot.lane.b32.xlu0 %v886_v22, %s1607_s7 }
 0x1f3   : > { %958 = vrot.lane.b32.xlu1 %v849_v30, %s1604_s28  ;;  %975 = vrot.lane.b32.xlu0 %v886_v22, %s1603_s27 }
 0x1f7   : > { %1041 = vrot.lane.b32.xlu1 %v912_v25, %s1608_s12  ;;  %936 = vrot.lane.b32.xlu0 %v849_v30, %s1605_s29 }
 0x1fb   : > { %1002 = vrot.lane.b32.xlu1 %v897_v40, %s1606_s30  ;;  %1062 = vrot.lane.b32.xlu0 %v912_v25, %s1609_s17 }
 0x1ff   : > { %979 = vrot.lane.b32.xlu1 %v892_v60, %s1603_s27  ;;  %956 = vrot.lane.b32.xlu0 %v2104_v34, %s1604_s28  ;;  %s1611_s27 = smov 124  }
 0x203   : > { %1088 = vrot.lane.b32.xlu1 %v918_v44, %s1610_s20  ;;  %934 = vrot.lane.b32.xlu0 %v2104_v34, %s1605_s29 }
 0x205   : > { %v925_v45 = vpop.permute.xlu1 %924  ;;  %v947_v13 = vpop.permute.xlu0 %946 }
 0x207   : > { %1045 = vrot.lane.b32.xlu1 %v918_v44, %s1608_s12  ;;  %1024 = vrot.lane.b32.xlu0 %v897_v40, %s1607_s7  ;;  %s2229_s12 = scalar_lea.vmem %s2265_s1, %s1660_s23 }
 0x209   : > { %v991_v46 = vpop.permute.xlu1 %990  ;;  %v923_v16 = vpop.permute.xlu0 %922 }
 0x20a   : > { %v1099_v0 = vsel %vm592_vm4, %v1656_v2, %v923_v16 }
 0x20b   : > { %1068 = vrot.lane.b32.xlu1 %v921_v52, %s1609_s17  ;;  %1022 = vrot.lane.b32.xlu0 %v892_v60, %s1607_s7 }
 0x20d   : > { %v970_v56 = vpop.permute.xlu1 %969  ;;  %v1013_v54 = vpop.permute.xlu0 %1012 }
 0x20f   : > { %1323 = vrot.lane.b32.xlu1 %v1956_v57, %s1611_s27  ;;  %1000 = vrot.lane.b32.xlu0 %v892_v60, %s1606_s30  ;;  %v1107_v57 = vsel %vm601_vm5, %v1099_v0, %v947_v13 }
 0x210   : > { %v1115_v5 = vsel %vm610_vm6, %v1107_v57, %v1836_v38 }
 0x211   : > { %v1079_v50 = vpop.permute.xlu1 %1078  ;;  %v1057_v63 = vpop.permute.xlu0 %1056 }
 0x213   : > { %1327 = vrot.lane.b32.xlu1 %v1993_v27, %s1611_s27  ;;  %1066 = vrot.lane.b32.xlu0 %v918_v44, %s1609_s17 }
 0x215   : > { %v1036_v61 = vpop.permute.xlu1 %1035  ;;  %v968_v27 = vpop.permute.xlu0 %967 }
 0x217   : > { %1331 = vrot.lane.b32.xlu1 %v2049_v49, %s1611_s27  ;;  %1090 = vrot.lane.b32.xlu0 %v921_v52, %s1610_s20 }
 0x219   : > { %v989_v4 = vpop.permute.xlu1 %988 }
 0x21a   : > { %v1123_v49 = vsel %vm619_vm7, %v1115_v5, %v989_v4 }
 0x21b   : > { %1335 = vrot.lane.b32.xlu1 %v802_v23, %s1611_s27  ;;  %1325 = vrot.lane.b32.xlu0 %v1953_v55, %s1611_s27  ;;  %v1131_v9 = vsel %vm628_vm8, %v1123_v49, %v1013_v54 }
 0x21c   : > { %v1139_v55 = vsel %vm637_vm9, %v1131_v9, %v1850_v53 }
 0x21f   : > { %1329 = vrot.lane.b32.xlu0 %v1989_v15, %s1611_s27 }
 0x223   : > { %1333 = vrot.lane.b32.xlu0 %v2044_v47, %s1611_s27 }
 0x225   : > { %v951_v7 = vpop.permute.xlu0 %950  ;;  %v929_v8 = vpop.permute.xlu1 %928 }
 0x226   : > { %v1102_v54 = vsel %vm592_vm4, %v2009_v26, %v929_v8 }
 0x227   : > { %1337 = vrot.lane.b32.xlu0 %v2084_v17, %s1611_s27  ;;  %v1100_v17 = vsel %vm592_vm4, %v1971_v1, %v925_v45 }
 0x229   : > { %v1034_v2 = vpop.permute.xlu0 %1033  ;;  %v1055_v11 = vpop.permute.xlu1 %1054 }
 0x22a   : > { %v1147_v15 = vsel %vm646_vm10, %v1139_v55, %v1055_v11 }
 0x22b   : > { %v1155_v12 = vsel %vm655_vm11, %v1147_v15, %v1079_v50 }
 0x22c   : > { %1548 = vmatprep.mubr.msk.f32.mxu1 %vm676_vm12, %v1155_v12 }
 0x22d   : > { %v927_v38 = vpop.permute.xlu0 %926  ;;  %v949_v14 = vpop.permute.xlu1 %948 }
 0x22e   : > { %v1108_v22 = vsel %vm601_vm5, %v1100_v17, %v949_v14  ;;  %v1101_v31 = vsel %vm592_vm4, %v1961_v35, %v927_v38 }
 0x22f   : > { %v1116_v23 = vsel %vm610_vm6, %v1108_v22, %v968_v27  ;;  %v1109_v1 = vsel %vm601_vm5, %v1101_v31, %v951_v7 }
 0x230   : > { %v1124_v25 = vsel %vm619_vm7, %v1116_v23, %v991_v46  ;;  %v1117_v40 = vsel %vm610_vm6, %v1109_v1, %v970_v56 }
 0x231   : > { %v995_v47 = vpop.permute.xlu1 %994  ;;  %v1017_v18 = vpop.permute.xlu0 %1016 }
 0x235   : > { %v974_v10 = vpop.permute.xlu1 %973  ;;  %v1061_v19 = vpop.permute.xlu0 %1060 }
 0x239   : > { %v1083_v21 = vpop.permute.xlu1 %1082  ;;  %v972_v36 = vpop.permute.xlu0 %971 }
 0x23d   : > { %v1040_v53 = vpop.permute.xlu1 %1039 }
 0x241   : > { %v1015_v24 = vpop.permute.xlu1 %1014  ;;  %v933_v29 = vpop.permute.xlu0 %932 }
 0x242   : > { %v1132_v30 = vsel %vm628_vm8, %v1124_v25, %v1015_v24  ;;  %v1104_v23 = vsel %vm592_vm4, %v2065_v62, %v933_v29 }
 0x243   : > { %v1140_v51 = vsel %vm637_vm9, %v1132_v30, %v1034_v2 }
 0x244   : > { %v1148_v37 = vsel %vm646_vm10, %v1140_v51, %v1057_v63 }
 0x245   : > { %v993_v32 = vpop.permute.xlu1 %992  ;;  %v1038_v33 = vpop.permute.xlu0 %1037 }
 0x246   : > { %v1125_v60 = vsel %vm619_vm7, %v1117_v40, %v993_v32 }
 0x247   : > { %v1133_v35 = vsel %vm628_vm8, %v1125_v60, %v1017_v18 }
 0x248   : > { %v1141_v45 = vsel %vm637_vm9, %v1133_v35, %v1036_v61 }
 0x249   : > { %v1081_v39 = vpop.permute.xlu1 %1080  ;;  %v953_v42 = vpop.permute.xlu0 %952 }
 0x24a   : > { %v1156_v41 = vsel %vm655_vm11, %v1148_v37, %v1081_v39  ;;  %v1110_v63 = vsel %vm601_vm5, %v1102_v54, %v953_v42 }
 0x24b   : > { %1549 = vmatmul.mubr.msk.f32.vlgmr.msra.gmra.mrb[0].mxu1 %vm676_vm12, %v1156_v41  ;;  %v1118_v61 = vsel %vm610_vm6, %v1110_v63, %v972_v36 }
 0x24c   : > { %v1126_v49 = vsel %vm619_vm7, %v1118_v61, %v995_v47 }
 0x24d   : > { %v955_v43 = vpop.permute.xlu1 %954  ;;  %v931_v44 = vpop.permute.xlu0 %930 }
 0x24e   : > { %v1103_v4 = vsel %vm592_vm4, %v1996_v20, %v931_v44 }
 0x24f   : > { %v1111_v9 = vsel %vm601_vm5, %v1103_v4, %v955_v43 }
 0x250   : > { %v1119_v15 = vsel %vm610_vm6, %v1111_v9, %v974_v10  ;;  %v1363_v9 = vld [vmem:[%s2229_s12] sm:$0xff] }
 0x251   : > { %v1059_v6 = vpop.permute.xlu1 %1058  ;;  %v1021_v13 = vpop.permute.xlu0 %1020 }
 0x252   : > { %v1149_v3 = vsel %vm646_vm10, %v1141_v45, %v1059_v6 }
 0x253   : > { %v1157_v46 = vsel %vm655_vm11, %v1149_v3, %v1083_v21 }
 0x254   : > { %1551 = vmatprep.mubr.msk.f32.mxu1 %vm676_vm12, %v1157_v46 }
 0x255   : > { %v999_v52 = vpop.permute.xlu1 %998  ;;  %v978_v56 = vpop.permute.xlu0 %977 }
 0x259   : > { %v1065_v16 = vpop.permute.xlu1 %1064  ;;  %v1087_v50 = vpop.permute.xlu0 %1086 }
 0x25d   : > { %v997_v0 = vpop.permute.xlu1 %996  ;;  %v1044_v57 = vpop.permute.xlu0 %1043 }
 0x25e   : > { %v1127_v20 = vsel %vm619_vm7, %v1119_v15, %v997_v0 }
 0x25f   : > { %v1135_v14 = vsel %vm628_vm8, %v1127_v20, %v1021_v13 }
 0x260   : > { %v1143_v21 = vsel %vm637_vm9, %v1135_v14, %v1040_v53 }
 0x261   : > { %v1085_v27 = vpop.permute.xlu1 %1084  ;;  %v1019_v5 = vpop.permute.xlu0 %1018 }
 0x262   : > { %v1134_v7 = vsel %vm628_vm8, %v1126_v49, %v1019_v5  ;;  %v1364_v5 = vld [vmem:[%s2229_s12 + $0x8] sm:$0xff] }
 0x263   : > { %v1142_v2 = vsel %vm637_vm9, %v1134_v7, %v1038_v33 }
 0x264   : > { %v1150_v8 = vsel %vm646_vm10, %v1142_v2, %v1061_v19 }
 0x265   : > { %v959_v26 = vpop.permute.xlu1 %958  ;;  %v976_v55 = vpop.permute.xlu0 %975  ;;  %v1158_v11 = vsel %vm655_vm11, %v1150_v8, %v1085_v27 }
 0x266   : > { %1552 = vmatmul.mubr.msk.f32.gmra.mrb[2].mxu1 %vm676_vm12, %v1158_v11 }
 0x269   : > { %v1042_v12 = vpop.permute.xlu1 %1041  ;;  %v937_v38 = vpop.permute.xlu0 %936 }
 0x26a   : > { %v1106_v32 = vsel %vm592_vm4, %v2104_v34, %v937_v38 }
 0x26b   : > { %v1114_v62 = vsel %vm601_vm5, %v1106_v32, %v1898_v59 }
 0x26d   : > { %v1003_v47 = vpop.permute.xlu1 %1002  ;;  %v1063_v18 = vpop.permute.xlu0 %1062 }
 0x26e   : > { %v1151_v17 = vsel %vm646_vm10, %v1143_v21, %v1063_v18  ;;  %v1366_v21 = vld [vmem:[%s2229_s12 + $0x18] sm:$0xff] }
 0x26f   : > { %v1159_v19 = vsel %vm655_vm11, %v1151_v17, %v1087_v50 }
 0x270   : > { %1554 = vmatprep.mubr.msk.f32.mxu1 %vm676_vm12, %v1159_v19 }
 0x271   : > { %v957_v22 = vpop.permute.xlu0 %956  ;;  %v980_v10 = vpop.permute.xlu1 %979 }
 0x272   : > { %v1112_v24 = vsel %vm601_vm5, %v1104_v23, %v957_v22  ;;  %v1122_v40 = vsel %vm610_vm6, %v1114_v62, %v980_v10  ;;  %v1365_v22 = vld [vmem:[%s2229_s12 + $0x10] sm:$0xff] }
 0x273   : > { %v1120_v31 = vsel %vm610_vm6, %v1112_v24, %v976_v55  ;;  %v1130_v43 = vsel %vm619_vm7, %v1122_v40, %v1003_v47 }
 0x274   : > { %v1128_v33 = vsel %vm619_vm7, %v1120_v31, %v999_v52  ;;  %v1138_v45 = vsel %vm628_vm8, %v1130_v43, %v1920_v28  ;;  %v1475_v28 = vld [vmem:[%s2269_s5] ss:$0 sm:$0xff] }
 0x275   : > { %v935_v36 = vpop.permute.xlu0 %934  ;;  %v1089_v25 = vpop.permute.xlu1 %1088 }
 0x276   : > { %v1105_v53 = vsel %vm592_vm4, %v2054_v58, %v935_v36 }
 0x277   : > { %v1113_v1 = vsel %vm601_vm5, %v1105_v53, %v959_v26 }
 0x278   : > { %v1121_v34 = vsel %vm610_vm6, %v1113_v1, %v978_v56 }
 0x279   : > { %v1025_v30 = vpop.permute.xlu0 %1024  ;;  %v1046_v29 = vpop.permute.xlu1 %1045 }
 0x27a   : > { %v1146_v3 = vsel %vm637_vm9, %v1138_v45, %v1046_v29 }
 0x27d   : > { %v1023_v51 = vpop.permute.xlu0 %1022  ;;  %v1069_v35 = vpop.permute.xlu1 %1068 }
 0x27e   : > { %v1136_v37 = vsel %vm628_vm8, %v1128_v33, %v1023_v51  ;;  %v1154_v13 = vsel %vm646_vm10, %v1146_v3, %v1069_v35  ;;  %v1370_v3 = vld [vmem:[%s2229_s12 + $0x38] sm:$0xff] }
 0x27f   : > { %v1144_v39 = vsel %vm637_vm9, %v1136_v37, %v1042_v12  ;;  %v1368_v37 = vld [vmem:[%s2229_s12 + $0x28] sm:$0xff] }
 0x280   : > { %v1152_v58 = vsel %vm646_vm10, %v1144_v39, %v1065_v16  ;;  %v1162_v16 = vsel %vm655_vm11, %v1154_v13, %v1942_v48  ;;  %v1367_v39 = vld [vmem:[%s2229_s12 + $0x20] sm:$0xff] }
 0x281   : > { %v1001_v41 = vpop.permute.xlu0 %1000  ;;  %v1160_v42 = vsel %vm655_vm11, %v1152_v58, %v1089_v25  ;;  %v1324_v4 = vpop.permute.xlu1 %1323 }
 0x282   : > { %v1129_v60 = vsel %vm619_vm7, %v1121_v34, %v1001_v41  ;;  %1555 = vmatmul.mubr.msk.f32.gmra.mrb[4].mxu1 %vm676_vm12, %v1160_v42 }
 0x283   : > { %v1137_v59 = vsel %vm628_vm8, %v1129_v60, %v1025_v30 }
 0x284   : > { %v1145_v6 = vsel %vm637_vm9, %v1137_v59, %v1044_v57 }
 0x285   : > { %v1067_v44 = vpop.permute.xlu0 %1066  ;;  %v1328_v47 = vpop.permute.xlu1 %1327 }
 0x286   : > { %v1153_v46 = vsel %vm646_vm10, %v1145_v6, %v1067_v44 }
 0x289   : > { %v1091_v52 = vpop.permute.xlu0 %1090  ;;  %v1332_v33 = vpop.permute.xlu1 %1331 }
 0x28a   : > { %v1161_v56 = vsel %vm655_vm11, %v1153_v46, %v1091_v52  ;;  %v1369_v52 = vld [vmem:[%s2229_s12 + $0x30] sm:$0xff] }
 0x28b   : > { %1557 = vmatprep.mubr.msk.f32.mxu1 %vm676_vm12, %v1161_v56 }
 0x28c   : > { %1558 = vmatmul.mubr.msk.f32.gmra.mrb[6].mxu1 %vm676_vm12, %v1162_v16 }
 0x28d   : > { %v1326_v48 = vpop.permute.xlu0 %1325  ;;  %v1336_v45 = vpop.permute.xlu1 %1335 }
 0x291   : > { %v1330_v38 = vpop.permute.xlu0 %1329 }
 0x295   : > { %v1334_v32 = vpop.permute.xlu0 %1333 }
 0x299   : > { %v1338_v35 = vpop.permute.xlu0 %1337 }
 0x31e   : > { %v1550_v50 = vpop.f32.mrb[0].mxu1 }
 0x31f   : > { %v1274_v54 = vadd.f32 %v1550_v50, %v1475_v28  ;;  %v1268_v63 = vpop.f32.mrb[1].mxu1 }
 0x320   : > { %v1269_v0 = vadd.f32 %v1475_v28, %v1268_v63 }
 0x321   : > { %v1308_v57 = vmax.f32 %v1274_v54, 0.0 }
 0x322   : > { %v1307_v61 = vmax.f32 %v1269_v0, 0.0 }
 0x323   : > { %v1348_v27 = vadd.f32 %v1326_v48, %v1308_v57 }
 0x324   : > { %v1347_v49 = vadd.f32 %v1324_v4, %v1307_v61 }
 0x325   : > { %v1356_v7 = vmax.f32 %v1348_v27, 0.0 }
 0x326   : > { %v1355_v2 = vmax.f32 %v1347_v49, 0.0 }
 0x327   : > { %v1372_v26 = vadd.f32 %v1364_v5, %v1356_v7 }
 0x328   : > { %v1371_v8 = vadd.f32 %v1363_v9, %v1355_v2 }
 0x329   : > { %1380 = vst.msk [vmem:[%s2237_s19 + $0x8] sm:$0xff] %vm592_vm4, %v1372_v26 }
 0x32a   : > { %1379 = vst.msk [vmem:[%s2237_s19] sm:$0xff] %vm592_vm4, %v1371_v8 }
 0x339   : > { %v1553_v55 = vpop.f32.mrb[2].mxu1 }
 0x33a   : > { %v1284_v11 = vadd.f32 %v1553_v55, %v1475_v28  ;;  %v1278_v15 = vpop.f32.mrb[3].mxu1 }
 0x33b   : > { %v1279_v20 = vadd.f32 %v1475_v28, %v1278_v15 }
 0x33c   : > { %v1310_v12 = vmax.f32 %v1284_v11, 0.0 }
 0x33d   : > { %v1309_v14 = vmax.f32 %v1279_v20, 0.0 }
 0x33e   : > { %v1350_v18 = vadd.f32 %v1330_v38, %v1310_v12 }
 0x33f   : > { %v1349_v17 = vadd.f32 %v1328_v47, %v1309_v14 }
 0x340   : > { %v1358_v19 = vmax.f32 %v1350_v18, 0.0 }
 0x341   : > { %v1357_v10 = vmax.f32 %v1349_v17, 0.0 }
 0x342   : > { %v1374_v36 = vadd.f32 %v1366_v21, %v1358_v19 }
 0x343   : > { %v1373_v23 = vadd.f32 %v1365_v22, %v1357_v10 }
 0x344   : > { %1382 = vst.msk [vmem:[%s2237_s19 + $0x18] sm:$0xff] %vm592_vm4, %v1374_v36 }
 0x345   : > { %1381 = vst.msk [vmem:[%s2237_s19 + $0x10] sm:$0xff] %vm592_vm4, %v1373_v23 }
 0x355   : > { %v1556_v24 = vpop.f32.mrb[4].mxu1 }
 0x356   : > { %v1294_v25 = vadd.f32 %v1556_v24, %v1475_v28  ;;  %v1288_v30 = vpop.f32.mrb[5].mxu1 }
 0x357   : > { %v1289_v31 = vadd.f32 %v1475_v28, %v1288_v30 }
 0x358   : > { %v1312_v53 = vmax.f32 %v1294_v25, 0.0 }
 0x359   : > { %v1311_v51 = vmax.f32 %v1289_v31, 0.0 }
 0x35a   : > { %v1352_v1 = vadd.f32 %v1334_v32, %v1312_v53 }
 0x35b   : > { %v1351_v62 = vadd.f32 %v1332_v33, %v1311_v51 }
 0x35c   : > { %v1360_v29 = vmax.f32 %v1352_v1, 0.0 }
 0x35d   : > { %v1359_v40 = vmax.f32 %v1351_v62, 0.0 }
 0x35e   : > { %v1376_v58 = vadd.f32 %v1368_v37, %v1360_v29 }
 0x35f   : > { %v1375_v41 = vadd.f32 %v1367_v39, %v1359_v40  ;;  %v1559_v34 = vpop.f32.mrb[6].mxu1 }
 0x360   : > { %1384 = vst.msk [vmem:[%s2237_s19 + $0x28] sm:$0xff] %vm592_vm4, %v1376_v58  ;;  %v1304_v42 = vadd.f32 %v1559_v34, %v1475_v28  ;;  %v1298_v60 = vpop.f32.mrb[7].mxu1 }
 0x361   : > { %1383 = vst.msk [vmem:[%s2237_s19 + $0x20] sm:$0xff] %vm592_vm4, %v1375_v41  ;;  %v1299_v43 = vadd.f32 %v1475_v28, %v1298_v60 }
 0x362   : > { %v1314_v59 = vmax.f32 %v1304_v42, 0.0 }
 0x363   : > { %v1313_v44 = vmax.f32 %v1299_v43, 0.0 }
 0x364   : > { %v1354_v6 = vadd.f32 %v1338_v35, %v1314_v59 }
 0x365   : > { %v1353_v13 = vadd.f32 %v1336_v45, %v1313_v44 }
 0x366   : > { %v1362_v46 = vmax.f32 %v1354_v6, 0.0 }
 0x367   : > { %v1361_v56 = vmax.f32 %v1353_v13, 0.0 }
 0x368   : > { %v1378_v16 = vadd.f32 %v1370_v3, %v1362_v46 }
 0x369   : > { %v1377_v50 = vadd.f32 %v1369_v52, %v1361_v56 }
 0x36a   : > { %1386 = vst.msk [vmem:[%s2237_s19 + $0x38] sm:$0xff] %vm592_vm4, %v1378_v16 }
 0x36b   : > { %1385 = vst.msk [vmem:[%s2237_s19 + $0x30] sm:$0xff] %vm592_vm4, %v1377_v50 }
 0x36c PF: > { %s16_s21 = sadd.s32 1, %s1600_s21  }
 0x36d   : > { %p13_p4 = scmp.ge.s32.totalorder %s16_s21, 4  }
 0x36f   :  { %15 = sbr.rel (!%p13_p4) target bundleno = 1 (0x1), region = 77 }

// kernel: hourglass2d_forward.13
= control target key start
LH: loop header
LB: loop body
LE: loop exit
PB: predicated region body
PF: predicated region fallthrough
CT: control target
= control target key end

     0   :  { %s4533_s21 = smov 0   ;;  %s8535_s0 = inlined_call_operand.vmem [shape: f32[2,16,16,4], index: 0, kind: input, shape index: {}]   ;;  %s8536_s1 = inlined_call_operand.vmem [shape: f32[2,16,16,4], index: 1, kind: input, shape index: {}]   ;;  %s8537_s2 = inlined_call_operand.vmem [shape: f32[36,8], index: 2, kind: input, shape index: {}]   ;;  %s8538_s3 = inlined_call_operand.vmem [shape: f32[1,8], index: 3, kind: input, shape index: {}]   ;;  %s8539_s4 = inlined_call_operand.vmem [shape: f32[36,4], index: 4, kind: input, shape index: {}]   ;;  %s8540_s5 = inlined_call_operand.vmem [shape: f32[1,4], index: 5, kind: input, shape index: {}]   ;;  %s8541_s6 = inlined_call_operand.vmem [shape: f32[2,16,16,4], index: 6, kind: output, shape index: {}]  }
   0x1 LB: > { %s4147_s22 = sadd.s32 4294967295, %s4486_s21   ;;  %p4151_p0 = scmp.ge.s32.totalorder %s4486_s21, 1  ;;  %s4486_s21 = sphi %s4533_s21, %s16_s21  }
   0x2   : > { %p222_p1 = scmp.lt.s32.totalorder %s4486_s21, 3 }
   0x4   : > { %p223_p2 = pnand %p4151_p0, %p222_p1 }
   0x6   : > { %226 = sbr.rel (%p223_p2) target bundleno = 1631 (0x65f), region = 44 }
   0xd   : > { %p257_p3 = scmp.lt.s32.totalorder %s4147_s22, 1  ;;  %v4488_v0 = vmov 0.0   ;;  %vm337_vm0 = vcmask 1040384   ;;  %vm503_vm1 = vcmask 1046528   ;;  %s4489_s27 = smov 4   ;;  %vm591_vm2 = vcmask 1045504  }
   0xe   : > { %v4541_v1 = vrot.slane %v4488_v0, 7  ;;  %s4490_s28 = smov 8   ;;  %s4491_s29 = smov 12   ;;  %vm1818_vm3 = vcmask 1043456   ;;  %vm1445_vm4 = vcmask 31744   ;;  %vm1478_vm5 = vcmask 64512  }
   0xf   : > { %s9477_s22 = smov (!%p257_p3, %s4147_s22), 1  ;;  %s4492_s30 = smov 16   ;;  %vm1511_vm6 = vcmask 97280   ;;  %vm1544_vm7 = vcmask 130048   ;;  %vm1577_vm8 = vcmask 162816   ;;  %vm1610_vm9 = vcmask 195584  }
  0x10   : > { %8714 = vst [vmem:[#allocation2_spill] sm:$0xff] %v4541_v1  ;;  %v4545_v2 = vsel %vm337_vm0, 0.0, %v4541_v1  ;;  %v4549_v3 = vsel %vm337_vm0, %v4541_v1, 0.0  ;;  %v505_v4 = vrot.slane %v4541_v1, 1  ;;  %s4552_s23 = sshll.u32 %s9477_s22, 8  ;;  %s4493_s7 = smov 20  }
  0x11   : > { %8715 = vst [vmem:[#allocation3_spill] sm:$0xff] %v4545_v2  ;;  %v504_v5 = vrot.slane %v4545_v2, 1  ;;  %v507_v6 = vrot.slane %v4549_v3, 1  ;;  %s4560_s26 = scalar_lea.vmem %s8535_s0, %s4552_s23  ;;  %s4494_s8 = smov 24   ;;  %vm1643_vm10 = vcmask 228352   ;;  %vm1676_vm11 = vcmask 261120  }
  0x12   : > { %v274_v7 = vld [vmem:[%s4560_s26 + $0x10] sm:$0xff]  ;;  %v272_v8 = vld [vmem:[%s4560_s26] sm:$0xff]  ;;  %v4565_v9 = vld [vmem:[%s4560_s26 + $0x18] sm:$0xff]  ;;  %s4495_s9 = smov 28   ;;  %s4496_s20 = smov 32   ;;  %vm1721_vm12 = vcmask 293888  }
  0x13   : > { %v506_v10 = vsel %vm503_vm1, %v504_v5, %v505_v4  ;;  %v508_v11 = vsel %vm503_vm1, %v505_v4, %v507_v6  ;;  %v343_v12 = vrot.slane %v274_v7, 7  ;;  %v340_v13 = vrot.slane %v272_v8, 7  ;;  %v4571_v15 = vld [vmem:[%s4560_s26 + $0x8] sm:$0xff]  ;;  %v276_v18 = vld [vmem:[%s4560_s26 + $0x20] sm:$0xff]  ;;  %v278_v26 = vld [vmem:[%s4560_s26 + $0x30] sm:$0xff]  ;;  %s8392_s16 = scalar_lea.vmem %s8536_s1, %s4552_s23  ;;  %s8410_s19 = scalar_lea.vmem %s8541_s6, %s4552_s23 }
  0x14   : > { %v344_v14 = vrot.slane %v4565_v9, 7  ;;  %v4573_v16 = vpack.i.bf16 %v508_v11, %v506_v10  ;;  %v341_v17 = vrot.slane %v4571_v15, 7  ;;  %v4578_v19 = vld [vmem:[%s4560_s26 + $0x28] sm:$0xff]  ;;  %v346_v24 = vrot.slane %v276_v18, 7  ;;  %v4603_v27 = vld [vmem:[%s4560_s26 + $0x38] sm:$0xff]  ;;  %v280_v32 = vld [vmem:[%s4560_s26 + $0x40] sm:$0xff] }
  0x15   : > { %v4581_v20 = vsel %vm337_vm0, 0.0, %v343_v12  ;;  %v4584_v21 = vsel %vm337_vm0, 0.0, %v340_v13  ;;  %v8555_v25 = vrot.slane %v4578_v19, 7  ;;  %v349_v30 = vrot.slane %v278_v26, 7  ;;  %v4620_v33 = vld [vmem:[%s4560_s26 + $0x48] sm:$0xff]  ;;  %v282_v38 = vld [vmem:[%s4560_s26 + $0x50] sm:$0xff] }
  0x16   : > { %8716 = vst [vmem:[#allocation4_spill] sm:$0xff] %v4581_v20  ;;  %681 = vrot.lane.b32.xlu1 %v4581_v20, %s4489_s27  ;;  %677 = vrot.lane.b32.xlu0 %v4584_v21, %s4489_s27  ;;  %v4593_v22 = vsel %vm337_vm0, %v343_v12, %v344_v14  ;;  %v4598_v23 = vsel %vm337_vm0, %v340_v13, %v341_v17  ;;  %v4615_v29 = vsel %vm337_vm0, 0.0, %v346_v24  ;;  %v8554_v31 = vrot.slane %v4603_v27, 7  ;;  %v4637_v39 = vld [vmem:[%s4560_s26 + $0x58] sm:$0xff]  ;;  %v284_v44 = vld [vmem:[%s4560_s26 + $0x60] sm:$0xff] }
  0x17   : > { %v4612_v28 = vsel %vm337_vm0, %v346_v24, %v8555_v25  ;;  %8717 = vst [vmem:[#allocation5_spill] sm:$0xff] %v4615_v29  ;;  %v4632_v35 = vsel %vm337_vm0, 0.0, %v349_v30  ;;  %v352_v36 = vrot.slane %v280_v32, 7  ;;  %v8553_v37 = vrot.slane %v4620_v33, 7  ;;  %v4654_v45 = vld [vmem:[%s4560_s26 + $0x68] sm:$0xff]  ;;  %v286_v50 = vld [vmem:[%s4560_s26 + $0x70] sm:$0xff] }
  0x18   : > { %v4629_v34 = vsel %vm337_vm0, %v349_v30, %v8554_v31  ;;  %8719 = vst [vmem:[#allocation7_spill] sm:$0xff] %v4632_v35  ;;  %v355_v42 = vrot.slane %v282_v38, 7  ;;  %v8552_v43 = vrot.slane %v4637_v39, 7  ;;  %v358_v48 = vrot.slane %v284_v44, 7  ;;  %v4671_v51 = vld [vmem:[%s4560_s26 + $0x78] sm:$0xff]  ;;  %v288_v56 = vld [vmem:[%s4560_s26 + $0x80] sm:$0xff] }
  0x19   : > { %8718 = vst [vmem:[#allocation6_spill] sm:$0xff] %v4629_v34  ;;  %v4646_v40 = vsel %vm337_vm0, %v352_v36, %v8553_v37  ;;  %v4649_v41 = vsel %vm337_vm0, 0.0, %v352_v36  ;;  %v8551_v49 = vrot.slane %v4654_v45, 7  ;;  %v361_v54 = vrot.slane %v286_v50, 7  ;;  %v4688_v57 = vld [vmem:[%s4560_s26 + $0x88] sm:$0xff]  ;;  %v290_v62 = vld [vmem:[%s4560_s26 + $0x90] sm:$0xff] }
  0x1a   : > { %683 = vrot.lane.b32.xlu1 %v4593_v22, %s4489_s27  ;;  %679 = vrot.lane.b32.xlu0 %v4598_v23, %s4489_s27  ;;  %8720 = vst [vmem:[#allocation8_spill] sm:$0xff] %v4646_v40  ;;  %8721 = vst [vmem:[#allocation9_spill] sm:$0xff] %v4649_v41  ;;  %v4663_v46 = vsel %vm337_vm0, %v355_v42, %v8552_v43  ;;  %v4666_v47 = vsel %vm337_vm0, 0.0, %v355_v42  ;;  %v4683_v53 = vsel %vm337_vm0, 0.0, %v358_v48  ;;  %v8550_v55 = vrot.slane %v4671_v51, 7  ;;  %v4705_v63 = vld [vmem:[%s4560_s26 + $0x98] sm:$0xff] }
  0x1b   : > { %8722 = vst [vmem:[#allocation10_spill] sm:$0xff] %v4663_v46  ;;  %8723 = vst [vmem:[#allocation11_spill] sm:$0xff] %v4666_v47  ;;  %v4680_v52 = vsel %vm337_vm0, %v358_v48, %v8551_v49  ;;  %v4700_v59 = vsel %vm337_vm0, 0.0, %v361_v54  ;;  %v364_v60 = vrot.slane %v288_v56, 7  ;;  %v8547_v61 = vrot.slane %v4688_v57, 7  ;;  %v292_v7 = vld [vmem:[%s4560_s26 + $0xa0] sm:$0xff] }
  0x1c   : > { %8724 = vst [vmem:[#allocation12_spill] sm:$0xff] %v4680_v52  ;;  %8725 = vst [vmem:[#allocation13_spill] sm:$0xff] %v4683_v53  ;;  %v4697_v58 = vsel %vm337_vm0, %v361_v54, %v8550_v55  ;;  %v367_v5 = vrot.slane %v290_v62, 7  ;;  %v8546_v6 = vrot.slane %v4705_v63, 7  ;;  %v4722_v8 = vld [vmem:[%s4560_s26 + $0xa8] sm:$0xff]  ;;  %v370_v12 = vrot.slane %v292_v7, 7 }
  0x1d   : > { %8726 = vst [vmem:[#allocation14_spill] sm:$0xff] %v4697_v58  ;;  %8727 = vst [vmem:[#allocation15_spill] sm:$0xff] %v4700_v59  ;;  %v4714_v0 = vsel %vm337_vm0, %v364_v60, %v8547_v61  ;;  %v4717_v4 = vsel %vm337_vm0, 0.0, %v364_v60  ;;  %v8544_v13 = vrot.slane %v4722_v8, 7  ;;  %v294_v18 = vld [vmem:[%s4560_s26 + $0xb0] sm:$0xff]  ;;  %v4739_v24 = vld [vmem:[%s4560_s26 + $0xb8] sm:$0xff]  ;;  %v4455_v49 = vpack.i.bf16 %v4541_v1, %v4545_v2 }
  0x1e   : > { %687 = vrot.lane.b32.xlu1 %v4612_v28, %s4489_s27  ;;  %685 = vrot.lane.b32.xlu0 %v4615_v29, %s4489_s27  ;;  %8728 = vst [vmem:[#allocation16_spill] sm:$0xff] %v4714_v0  ;;  %8729 = vst [vmem:[#allocation17_spill] sm:$0xff] %v4717_v4  ;;  %v4731_v10 = vsel %vm337_vm0, %v367_v5, %v8546_v6  ;;  %v4734_v11 = vsel %vm337_vm0, 0.0, %v367_v5  ;;  %v4751_v30 = vsel %vm337_vm0, 0.0, %v370_v12  ;;  %v373_v32 = vrot.slane %v294_v18, 7  ;;  %v296_v38 = vld [vmem:[%s4560_s26 + $0xc0] sm:$0xff] }
  0x1f   : > { %8730 = vst [vmem:[#allocation18_spill] sm:$0xff] %v4731_v10  ;;  %8731 = vst [vmem:[#allocation19_spill] sm:$0xff] %v4734_v11  ;;  %v4748_v26 = vsel %vm337_vm0, %v370_v12, %v8544_v13  ;;  %v8543_v36 = vrot.slane %v4739_v24, 7  ;;  %v4756_v42 = vld [vmem:[%s4560_s26 + $0xc8] sm:$0xff]  ;;  %v376_v50 = vrot.slane %v296_v38, 7  ;;  %v298_v56 = vld [vmem:[%s4560_s26 + $0xd0] sm:$0xff] }
  0x20   : > { %8732 = vst [vmem:[#allocation20_spill] sm:$0xff] %v4748_v26  ;;  %8733 = vst [vmem:[#allocation21_spill] sm:$0xff] %v4751_v30  ;;  %v4768_v48 = vsel %vm337_vm0, 0.0, %v373_v32  ;;  %v8542_v54 = vrot.slane %v4756_v42, 7  ;;  %v4773_v60 = vld [vmem:[%s4560_s26 + $0xd8] sm:$0xff]  ;;  %v379_v7 = vrot.slane %v298_v56, 7 }
  0x21   : > { %v4765_v44 = vsel %vm337_vm0, %v373_v32, %v8543_v36  ;;  %8735 = vst [vmem:[#allocation23_spill] sm:$0xff] %v4768_v48  ;;  %v4785_v5 = vsel %vm337_vm0, 0.0, %v376_v50  ;;  %v8545_v12 = vrot.slane %v4773_v60, 7  ;;  %v300_v18 = vld [vmem:[%s4560_s26 + $0xe0] sm:$0xff]  ;;  %v4790_v32 = vld [vmem:[%s4560_s26 + $0xe8] sm:$0xff]  ;;  %v302_v36 = vld [vmem:[%s4560_s26 + $0xf0] sm:$0xff] }
  0x22   : > { %691 = vrot.lane.b32.xlu1 %v4629_v34, %s4489_s27  ;;  %689 = vrot.lane.b32.xlu0 %v4632_v35, %s4489_s27  ;;  %8734 = vst [vmem:[#allocation22_spill] sm:$0xff] %v4765_v44  ;;  %v4782_v62 = vsel %vm337_vm0, %v376_v50, %v8542_v54  ;;  %8737 = vst [vmem:[#allocation25_spill] sm:$0xff] %v4785_v5  ;;  %v4802_v50 = vsel %vm337_vm0, 0.0, %v379_v7  ;;  %v382_v56 = vrot.slane %v300_v18, 7  ;;  %v8548_v54 = vrot.slane %v4790_v32, 7  ;;  %v4807_v13 = vld [vmem:[%s4560_s26 + $0xf8] sm:$0xff] }
  0x23   : > { %8736 = vst [vmem:[#allocation24_spill] sm:$0xff] %v4782_v62  ;;  %v4799_v38 = vsel %vm337_vm0, %v379_v7, %v8545_v12  ;;  %8739 = vst [vmem:[#allocation27_spill] sm:$0xff] %v4802_v50  ;;  %v385_v18 = vrot.slane %v302_v36, 7  ;;  %v8549_v6 = vrot.slane %v4807_v13, 7  ;;  %v4905_v55 = vsel %vm337_vm0, %v341_v17, 0.0 }
  0x24   : > { %8738 = vst [vmem:[#allocation26_spill] sm:$0xff] %v4799_v38  ;;  %v4816_v12 = vsel %vm337_vm0, %v382_v56, %v8548_v54  ;;  %v4819_v7 = vsel %vm337_vm0, 0.0, %v382_v56  ;;  %v510_v43 = vrot.slane %v4598_v23, 1  ;;  %v512_v37 = vrot.slane %v4905_v55, 1 }
  0x25   : > { %8740 = vst [vmem:[#allocation28_spill] sm:$0xff] %v4816_v12  ;;  %8741 = vst [vmem:[#allocation29_spill] sm:$0xff] %v4819_v7  ;;  %v4829_v61 = vsel %vm337_vm0, %v385_v18, %v8549_v6  ;;  %v4832_v54 = vsel %vm337_vm0, 0.0, %v385_v18  ;;  %v509_v31 = vrot.slane %v4584_v21, 1  ;;  %v4923_v17 = vsel %vm337_vm0, %v344_v14, 0.0 }
  0x26   : > { %695 = vrot.lane.b32.xlu1 %v4646_v40, %s4489_s27  ;;  %693 = vrot.lane.b32.xlu0 %v4649_v41, %s4489_s27  ;;  %8748 = vst [vmem:[#allocation36_spill] sm:$0xff] %v4923_v17  ;;  %v514_v9 = vrot.slane %v4581_v20, 1 }
  0x2a   : > { %699 = vrot.lane.b32.xlu1 %v4663_v46, %s4489_s27  ;;  %697 = vrot.lane.b32.xlu0 %v4666_v47, %s4489_s27 }
  0x2e   : > { %703 = vrot.lane.b32.xlu1 %v4680_v52, %s4489_s27  ;;  %701 = vrot.lane.b32.xlu0 %v4683_v53, %s4489_s27 }
  0x32   : > { %707 = vrot.lane.b32.xlu1 %v4697_v58, %s4489_s27  ;;  %705 = vrot.lane.b32.xlu0 %v4700_v59, %s4489_s27 }
  0x36   : > { %711 = vrot.lane.b32.xlu1 %v4714_v0, %s4489_s27  ;;  %709 = vrot.lane.b32.xlu0 %v4717_v4, %s4489_s27 }
  0x3a   : > { %715 = vrot.lane.b32.xlu1 %v4731_v10, %s4489_s27  ;;  %713 = vrot.lane.b32.xlu0 %v4734_v11, %s4489_s27 }
  0x3e   : > { %719 = vrot.lane.b32.xlu1 %v4748_v26, %s4489_s27  ;;  %717 = vrot.lane.b32.xlu0 %v4751_v30, %s4489_s27 }
  0x42   : > { %723 = vrot.lane.b32.xlu1 %v4765_v44, %s4489_s27  ;;  %721 = vrot.lane.b32.xlu0 %v4768_v48, %s4489_s27 }
  0x46   : > { %727 = vrot.lane.b32.xlu1 %v4782_v62, %s4489_s27  ;;  %725 = vrot.lane.b32.xlu0 %v4785_v5, %s4489_s27 }
  0x4a   : > { %731 = vrot.lane.b32.xlu1 %v4799_v38, %s4489_s27  ;;  %729 = vrot.lane.b32.xlu0 %v4802_v50, %s4489_s27 }
  0x4e   : > { %735 = vrot.lane.b32.xlu1 %v4816_v12, %s4489_s27  ;;  %733 = vrot.lane.b32.xlu0 %v4819_v7, %s4489_s27 }
  0x52   : > { %739 = vrot.lane.b32.xlu1 %v4829_v61, %s4489_s27  ;;  %737 = vrot.lane.b32.xlu0 %v4832_v54, %s4489_s27 }
  0x56   : > { %775 = vrot.lane.b32.xlu1 %v4593_v22, %s4490_s28  ;;  %773 = vrot.lane.b32.xlu0 %v4581_v20, %s4490_s28  ;;  %v8755_v20 = vrot.slane %v4603_v27, 7  ;;  %v524_v27 = vrot.slane %v4632_v35, 1 }
  0x5a   : > { %779 = vrot.lane.b32.xlu1 %v4612_v28, %s4490_s28  ;;  %777 = vrot.lane.b32.xlu0 %v4615_v29, %s4490_s28 }
  0x5e   : > { %783 = vrot.lane.b32.xlu1 %v4629_v34, %s4490_s28  ;;  %781 = vrot.lane.b32.xlu0 %v4632_v35, %s4490_s28  ;;  %v8763_v35 = vrot.slane %v4637_v39, 7 }
  0x62   : > { %787 = vrot.lane.b32.xlu1 %v4646_v40, %s4490_s28  ;;  %785 = vrot.lane.b32.xlu0 %v4649_v41, %s4490_s28 }
  0x66   : > { %791 = vrot.lane.b32.xlu1 %v4663_v46, %s4490_s28  ;;  %789 = vrot.lane.b32.xlu0 %v4666_v47, %s4490_s28 }
  0x6a   : > { %795 = vrot.lane.b32.xlu1 %v4680_v52, %s4490_s28  ;;  %793 = vrot.lane.b32.xlu0 %v4683_v53, %s4490_s28 }
  0x6e   : > { %799 = vrot.lane.b32.xlu1 %v4697_v58, %s4490_s28  ;;  %797 = vrot.lane.b32.xlu0 %v4700_v59, %s4490_s28 }
  0x72   : > { %803 = vrot.lane.b32.xlu1 %v4714_v0, %s4490_s28  ;;  %801 = vrot.lane.b32.xlu0 %v4717_v4, %s4490_s28 }
  0x76   : > { %807 = vrot.lane.b32.xlu1 %v4731_v10, %s4490_s28  ;;  %805 = vrot.lane.b32.xlu0 %v4734_v11, %s4490_s28 }
  0x7a   : > { %811 = vrot.lane.b32.xlu1 %v4748_v26, %s4490_s28  ;;  %809 = vrot.lane.b32.xlu0 %v4751_v30, %s4490_s28 }
  0x7e   : > { %815 = vrot.lane.b32.xlu1 %v4765_v44, %s4490_s28  ;;  %813 = vrot.lane.b32.xlu0 %v4768_v48, %s4490_s28 }
  0x82   : > { %819 = vrot.lane.b32.xlu1 %v4782_v62, %s4490_s28  ;;  %817 = vrot.lane.b32.xlu0 %v4785_v5, %s4490_s28 }
  0x86   : > { %823 = vrot.lane.b32.xlu1 %v4799_v38, %s4490_s28  ;;  %821 = vrot.lane.b32.xlu0 %v4802_v50, %s4490_s28 }
  0x88   : > { %v4890_v36 = vpop.permute.xlu1 %681  ;;  %v4892_v56 = vpop.permute.xlu0 %677 }
  0x89   : > { %8742 = vst [vmem:[#allocation30_spill] sm:$0xff] %v4890_v36  ;;  %8743 = vst [vmem:[#allocation31_spill] sm:$0xff] %v4892_v56  ;;  %v4930_v36 = vsel %vm503_vm1, %v510_v43, %v512_v37 }
  0x8a   : > { %827 = vrot.lane.b32.xlu1 %v4816_v12, %s4490_s28  ;;  %825 = vrot.lane.b32.xlu0 %v4819_v7, %s4490_s28 }
  0x8c   : > { %v4898_v18 = vpop.permute.xlu1 %683  ;;  %v4900_v6 = vpop.permute.xlu0 %679 }
  0x8d   : > { %8744 = vst [vmem:[#allocation32_spill] sm:$0xff] %v4898_v18  ;;  %8745 = vst [vmem:[#allocation33_spill] sm:$0xff] %v4900_v6  ;;  %v515_v18 = vrot.slane %v4593_v22, 1  ;;  %v8751_v6 = vrot.slane %v4578_v19, 7  ;;  %v519_v19 = vrot.slane %v4615_v29, 1  ;;  %v8759_v29 = vrot.slane %v4620_v33, 7 }
  0x8e   : > { %831 = vrot.lane.b32.xlu1 %v4829_v61, %s4490_s28  ;;  %829 = vrot.lane.b32.xlu0 %v4832_v54, %s4490_s28  ;;  %v529_v33 = vrot.slane %v4649_v41, 1  ;;  %v8767_v41 = vrot.slane %v4654_v45, 7  ;;  %v539_v45 = vrot.slane %v4683_v53, 1  ;;  %v8775_v53 = vrot.slane %v4688_v57, 7 }
  0x8f   : > { %v549_v57 = vrot.slane %v4717_v4, 1  ;;  %v8783_v4 = vrot.slane %v4722_v8, 7  ;;  %v559_v8 = vrot.slane %v4751_v30, 1  ;;  %v8791_v30 = vrot.slane %v4756_v42, 7 }
  0x90   : > { %v4916_v25 = vpop.permute.xlu1 %687  ;;  %v4918_v15 = vpop.permute.xlu0 %685  ;;  %v569_v42 = vrot.slane %v4785_v5, 1  ;;  %v8798_v5 = vrot.slane %v4790_v32, 7  ;;  %v579_v32 = vrot.slane %v4819_v7, 1 }
  0x91   : > { %8746 = vst [vmem:[#allocation34_spill] sm:$0xff] %v4916_v25  ;;  %8747 = vst [vmem:[#allocation35_spill] sm:$0xff] %v4918_v15  ;;  %v4933_v25 = vsel %vm503_vm1, %v509_v31, %v510_v43  ;;  %v517_v15 = vrot.slane %v4923_v17, 1  ;;  %v520_v31 = vrot.slane %v4612_v28, 1  ;;  %v4955_v43 = vsel %vm503_vm1, %v514_v9, %v515_v18 }
  0x92   : > { %4461 = vrot.lane.b32.xlu1 %v4573_v16, %s4491_s29  ;;  %4456 = vrot.lane.b32.xlu0 %v4455_v49, %s4490_s28  ;;  %v4944_v49 = vsel %vm337_vm0, %v8751_v6, 0.0  ;;  %v4966_v17 = vsel %vm337_vm0, %v8755_v20, 0.0 }
  0x93   : > { %8752 = vst [vmem:[#allocation39_spill] sm:$0xff] %v4944_v49  ;;  %v4952_v37 = vsel %vm503_vm1, %v515_v18, %v517_v15  ;;  %8756 = vst [vmem:[#allocation42_spill] sm:$0xff] %v4966_v17  ;;  %v525_v18 = vrot.slane %v4629_v34, 1  ;;  %v4977_v9 = vsel %vm503_vm1, %v519_v19, %v520_v31 }
  0x94   : > { %v4937_v14 = vpop.permute.xlu1 %691  ;;  %v4939_v56 = vpop.permute.xlu0 %689 }
  0x95   : > { %8749 = vst [vmem:[#allocation37_spill] sm:$0xff] %v4937_v14  ;;  %8750 = vst [vmem:[#allocation38_spill] sm:$0xff] %v4939_v56  ;;  %v522_v56 = vrot.slane %v4944_v49, 1  ;;  %v4988_v49 = vsel %vm337_vm0, %v8759_v29, 0.0  ;;  %v4999_v19 = vsel %vm503_vm1, %v524_v27, %v525_v18 }
  0x96   : > { %875 = vrot.lane.b32.xlu1 %v4930_v36, %s4491_s29  ;;  %873 = vrot.lane.b32.xlu0 %v4933_v25, %s4491_s29  ;;  %8760 = vst [vmem:[#allocation45_spill] sm:$0xff] %v4988_v49 }
  0x97   : > { %v4974_v15 = vsel %vm503_vm1, %v520_v31, %v522_v56  ;;  %v530_v56 = vrot.slane %v4646_v40, 1 }
  0x98   : > { %v4959_v6 = vpop.permute.xlu1 %695  ;;  %v4961_v14 = vpop.permute.xlu0 %693 }
  0x99   : > { %8753 = vst [vmem:[#allocation40_spill] sm:$0xff] %v4959_v6  ;;  %8754 = vst [vmem:[#allocation41_spill] sm:$0xff] %v4961_v14  ;;  %v527_v14 = vrot.slane %v4966_v17, 1  ;;  %v5010_v17 = vsel %vm337_vm0, %v8763_v35, 0.0 }
  0x9a   : > { %879 = vrot.lane.b32.xlu1 %v4952_v37, %s4491_s29  ;;  %877 = vrot.lane.b32.xlu0 %v4955_v43, %s4491_s29  ;;  %8764 = vst [vmem:[#allocation48_spill] sm:$0xff] %v5010_v17  ;;  %v537_v39 = vrot.slane %v5010_v17, 1 }
  0x9b   : > { %v4996_v31 = vsel %vm503_vm1, %v525_v18, %v527_v14  ;;  %v535_v14 = vrot.slane %v4663_v46, 1  ;;  %v534_v18 = vrot.slane %v4666_v47, 1 }
  0x9c   : > { %v4981_v20 = vpop.permute.xlu1 %699  ;;  %v4983_v6 = vpop.permute.xlu0 %697 }
  0x9d   : > { %8757 = vst [vmem:[#allocation43_spill] sm:$0xff] %v4981_v20  ;;  %8758 = vst [vmem:[#allocation44_spill] sm:$0xff] %v4983_v6  ;;  %v532_v6 = vrot.slane %v4988_v49, 1  ;;  %v5032_v49 = vsel %vm337_vm0, %v8767_v41, 0.0  ;;  %v8769_v41 = vrot.slane %v4671_v51, 7 }
  0x9e   : > { %883 = vrot.lane.b32.xlu1 %v4974_v15, %s4491_s29  ;;  %881 = vrot.lane.b32.xlu0 %v4977_v9, %s4491_s29  ;;  %8768 = vst [vmem:[#allocation51_spill] sm:$0xff] %v5032_v49 }
  0x9f   : > { %v5019_v27 = vsel %vm503_vm1, %v530_v56, %v532_v6  ;;  %v5039_v6 = vsel %vm503_vm1, %v534_v18, %v535_v14 }
  0xa0   : > { %v5003_v29 = vpop.permute.xlu1 %703  ;;  %v5005_v20 = vpop.permute.xlu0 %701 }
  0xa1   : > { %8761 = vst [vmem:[#allocation46_spill] sm:$0xff] %v5003_v29  ;;  %8762 = vst [vmem:[#allocation47_spill] sm:$0xff] %v5005_v20  ;;  %v5022_v20 = vsel %vm503_vm1, %v529_v33, %v530_v56  ;;  %v540_v56 = vrot.slane %v4680_v52, 1  ;;  %v5043_v33 = vsel %vm503_vm1, %v535_v14, %v537_v39  ;;  %v545_v14 = vrot.slane %v4697_v58, 1 }
  0xa2   : > { %887 = vrot.lane.b32.xlu1 %v4996_v31, %s4491_s29  ;;  %885 = vrot.lane.b32.xlu0 %v4999_v19, %s4491_s29  ;;  %v544_v39 = vrot.slane %v4700_v59, 1 }
  0xa4   : > { %v5025_v35 = vpop.permute.xlu1 %707  ;;  %v5027_v29 = vpop.permute.xlu0 %705 }
  0xa5   : > { %8765 = vst [vmem:[#allocation49_spill] sm:$0xff] %v5025_v35  ;;  %8766 = vst [vmem:[#allocation50_spill] sm:$0xff] %v5027_v29  ;;  %v542_v29 = vrot.slane %v5032_v49, 1  ;;  %v5050_v35 = vsel %vm337_vm0, %v8769_v41, 0.0  ;;  %v5067_v41 = vsel %vm503_vm1, %v539_v45, %v540_v56  ;;  %v5076_v49 = vsel %vm337_vm0, %v8775_v53, 0.0 }
  0xa6   : > { %891 = vrot.lane.b32.xlu1 %v5019_v27, %s4491_s29  ;;  %889 = vrot.lane.b32.xlu0 %v5022_v20, %s4491_s29  ;;  %8770 = vst [vmem:[#allocation52_spill] sm:$0xff] %v5050_v35  ;;  %v547_v18 = vrot.slane %v5050_v35, 1  ;;  %8776 = vst [vmem:[#allocation57_spill] sm:$0xff] %v5076_v49  ;;  %v550_v45 = vrot.slane %v4714_v0, 1  ;;  %v8777_v53 = vrot.slane %v4705_v63, 7 }
  0xa7   : > { %v5064_v51 = vsel %vm503_vm1, %v540_v56, %v542_v29  ;;  %v5086_v56 = vsel %vm503_vm1, %v544_v39, %v545_v14  ;;  %v554_v39 = vrot.slane %v4734_v11, 1 }
  0xa8   : > { %v5052_v47 = vpop.permute.xlu1 %711  ;;  %v5054_v17 = vpop.permute.xlu0 %709  ;;  %v5083_v29 = vsel %vm503_vm1, %v545_v14, %v547_v18  ;;  %v555_v14 = vrot.slane %v4731_v10, 1 }
  0xa9   : > { %8771 = vst [vmem:[#allocation53_spill] sm:$0xff] %v5052_v47  ;;  %8772 = vst [vmem:[#allocation54_spill] sm:$0xff] %v5054_v17 }
  0xaa   : > { %895 = vrot.lane.b32.xlu1 %v5043_v33, %s4491_s29  ;;  %893 = vrot.lane.b32.xlu0 %v5039_v6, %s4491_s29 }
  0xac   : > { %v5069_v47 = vpop.permute.xlu1 %715  ;;  %v5071_v17 = vpop.permute.xlu0 %713 }
  0xad   : > { %8773 = vst [vmem:[#allocation55_spill] sm:$0xff] %v5069_v47  ;;  %8774 = vst [vmem:[#allocation56_spill] sm:$0xff] %v5071_v17  ;;  %v552_v17 = vrot.slane %v5076_v49, 1  ;;  %v5094_v47 = vsel %vm337_vm0, %v8777_v53, 0.0  ;;  %v5111_v53 = vsel %vm503_vm1, %v549_v57, %v550_v45  ;;  %v5120_v49 = vsel %vm337_vm0, %v8783_v4, 0.0 }
  0xae   : > { %899 = vrot.lane.b32.xlu1 %v5064_v51, %s4491_s29  ;;  %897 = vrot.lane.b32.xlu0 %v5067_v41, %s4491_s29  ;;  %8778 = vst [vmem:[#allocation58_spill] sm:$0xff] %v5094_v47  ;;  %v557_v18 = vrot.slane %v5094_v47, 1  ;;  %8784 = vst [vmem:[#allocation63_spill] sm:$0xff] %v5120_v49  ;;  %v560_v57 = vrot.slane %v4748_v26, 1  ;;  %v8785_v4 = vrot.slane %v4739_v24, 7 }
  0xaf   : > { %v5108_v63 = vsel %vm503_vm1, %v550_v45, %v552_v17  ;;  %v5130_v45 = vsel %vm503_vm1, %v554_v39, %v555_v14  ;;  %v564_v39 = vrot.slane %v4768_v48, 1 }
  0xb0   : > { %v5096_v59 = vpop.permute.xlu1 %719  ;;  %v5098_v35 = vpop.permute.xlu0 %717  ;;  %v5127_v17 = vsel %vm503_vm1, %v555_v14, %v557_v18  ;;  %v565_v14 = vrot.slane %v4765_v44, 1 }
  0xb1   : > { %8779 = vst [vmem:[#allocation59_spill] sm:$0xff] %v5096_v59  ;;  %8780 = vst [vmem:[#allocation60_spill] sm:$0xff] %v5098_v35 }
  0xb2   : > { %903 = vrot.lane.b32.xlu1 %v5083_v29, %s4491_s29  ;;  %901 = vrot.lane.b32.xlu0 %v5086_v56, %s4491_s29 }
  0xb4   : > { %v5113_v59 = vpop.permute.xlu1 %723  ;;  %v5115_v35 = vpop.permute.xlu0 %721 }
  0xb5   : > { %8781 = vst [vmem:[#allocation61_spill] sm:$0xff] %v5113_v59  ;;  %8782 = vst [vmem:[#allocation62_spill] sm:$0xff] %v5115_v35  ;;  %v562_v35 = vrot.slane %v5120_v49, 1  ;;  %v5138_v59 = vsel %vm337_vm0, %v8785_v4, 0.0  ;;  %v5155_v4 = vsel %vm503_vm1, %v559_v8, %v560_v57  ;;  %v5164_v49 = vsel %vm337_vm0, %v8791_v30, 0.0 }
  0xb6   : > { %907 = vrot.lane.b32.xlu1 %v5108_v63, %s4491_s29  ;;  %905 = vrot.lane.b32.xlu0 %v5111_v53, %s4491_s29  ;;  %8786 = vst [vmem:[#allocation64_spill] sm:$0xff] %v5138_v59  ;;  %v567_v18 = vrot.slane %v5138_v59, 1  ;;  %8792 = vst [vmem:[#allocation69_spill] sm:$0xff] %v5164_v49  ;;  %v570_v8 = vrot.slane %v4782_v62, 1  ;;  %v8793_v30 = vrot.slane %v4773_v60, 7 }
  0xb7   : > { %v5152_v24 = vsel %vm503_vm1, %v560_v57, %v562_v35  ;;  %v5174_v57 = vsel %vm503_vm1, %v564_v39, %v565_v14 }
  0xb8   : > { %v5140_v11 = vpop.permute.xlu1 %727  ;;  %v5142_v47 = vpop.permute.xlu0 %725  ;;  %v5171_v35 = vsel %vm503_vm1, %v565_v14, %v567_v18  ;;  %v575_v14 = vrot.slane %v4799_v38, 1  ;;  %v5198_v60 = vsel %vm503_vm1, %v569_v42, %v570_v8  ;;  %v580_v42 = vrot.slane %v4816_v12, 1 }
  0xb9   : > { %8787 = vst [vmem:[#allocation65_spill] sm:$0xff] %v5140_v11  ;;  %8788 = vst [vmem:[#allocation66_spill] sm:$0xff] %v5142_v47 }
  0xba   : > { %911 = vrot.lane.b32.xlu1 %v5127_v17, %s4491_s29  ;;  %909 = vrot.lane.b32.xlu0 %v5130_v45, %s4491_s29 }
  0xbc   : > { %v5157_v11 = vpop.permute.xlu1 %731  ;;  %v5159_v47 = vpop.permute.xlu0 %729 }
  0xbd   : > { %8789 = vst [vmem:[#allocation67_spill] sm:$0xff] %v5157_v11  ;;  %8790 = vst [vmem:[#allocation68_spill] sm:$0xff] %v5159_v47  ;;  %v572_v47 = vrot.slane %v5164_v49, 1  ;;  %v5182_v11 = vsel %vm337_vm0, %v8793_v30, 0.0  ;;  %v574_v30 = vrot.slane %v4802_v50, 1  ;;  %v5208_v49 = vsel %vm337_vm0, %v8798_v5, 0.0 }
  0xbe   : > { %915 = vrot.lane.b32.xlu1 %v5152_v24, %s4491_s29  ;;  %913 = vrot.lane.b32.xlu0 %v5155_v4, %s4491_s29  ;;  %v577_v18 = vrot.slane %v5182_v11, 1  ;;  %8799 = vst [vmem:[#allocation74_spill] sm:$0xff] %v5208_v49 }
  0xbf   : > { %v5195_v39 = vsel %vm503_vm1, %v570_v8, %v572_v47  ;;  %v5218_v8 = vsel %vm503_vm1, %v574_v30, %v575_v14 }
  0xc0   : > { %v5184_v48 = vpop.permute.xlu1 %735  ;;  %v5186_v59 = vpop.permute.xlu0 %733  ;;  %v5215_v47 = vsel %vm503_vm1, %v575_v14, %v577_v18  ;;  %v5235_v14 = vsel %vm503_vm1, %v579_v32, %v580_v42 }
  0xc1   : > { %8794 = vst [vmem:[#allocation70_spill] sm:$0xff] %v5184_v48  ;;  %8795 = vst [vmem:[#allocation71_spill] sm:$0xff] %v5186_v59 }
  0xc2   : > { %919 = vrot.lane.b32.xlu1 %v5171_v35, %s4491_s29  ;;  %917 = vrot.lane.b32.xlu0 %v5174_v57, %s4491_s29 }
  0xc4   : > { %v5201_v48 = vpop.permute.xlu1 %739  ;;  %v5203_v59 = vpop.permute.xlu0 %737 }
  0xc5   : > { %8796 = vst [vmem:[#allocation72_spill] sm:$0xff] %v5201_v48  ;;  %8797 = vst [vmem:[#allocation73_spill] sm:$0xff] %v5203_v59  ;;  %v582_v59 = vrot.slane %v5208_v49, 1 }
  0xc6   : > { %923 = vrot.lane.b32.xlu1 %v5195_v39, %s4491_s29  ;;  %921 = vrot.lane.b32.xlu0 %v5198_v60, %s4491_s29 }
  0xc7   : > { %v5232_v18 = vsel %vm503_vm1, %v580_v42, %v582_v59 }
  0xc8   : > { %v5223_v5 = vpop.permute.xlu1 %775  ;;  %v5225_v48 = vpop.permute.xlu0 %773 }
  0xc9   : > { %8800 = vst [vmem:[#allocation75_spill] sm:$0xff] %v5223_v5  ;;  %8801 = vst [vmem:[#allocation76_spill] sm:$0xff] %v5225_v48 }
  0xca   : > { %927 = vrot.lane.b32.xlu1 %v5215_v47, %s4491_s29  ;;  %925 = vrot.lane.b32.xlu0 %v5218_v8, %s4491_s29 }
  0xcc   : > { %v5237_v30 = vpop.permute.xlu1 %779  ;;  %v5239_v49 = vpop.permute.xlu0 %777 }
  0xcd   : > { %8802 = vst [vmem:[#allocation77_spill] sm:$0xff] %v5237_v30  ;;  %8803 = vst [vmem:[#allocation78_spill] sm:$0xff] %v5239_v49 }
  0xce   : > { %931 = vrot.lane.b32.xlu1 %v5232_v18, %s4491_s29  ;;  %929 = vrot.lane.b32.xlu0 %v5235_v14, %s4491_s29 }
  0xd0   : > { %v5245_v48 = vpop.permute.xlu1 %783  ;;  %v5247_v5 = vpop.permute.xlu0 %781 }
  0xd1   : > { %8804 = vst [vmem:[#allocation79_spill] sm:$0xff] %v5245_v48  ;;  %8805 = vst [vmem:[#allocation80_spill] sm:$0xff] %v5247_v5 }
  0xd2   : > { %967 = vrot.lane.b32.xlu1 %v4930_v36, %s4492_s30  ;;  %965 = vrot.lane.b32.xlu0 %v4933_v25, %s4492_s30 }
  0xd4   : > { %v5253_v59 = vpop.permute.xlu1 %787  ;;  %v5255_v42 = vpop.permute.xlu0 %785 }
  0xd5   : > { %8806 = vst [vmem:[#allocation81_spill] sm:$0xff] %v5253_v59  ;;  %8807 = vst [vmem:[#allocation82_spill] sm:$0xff] %v5255_v42 }
  0xd6   : > { %971 = vrot.lane.b32.xlu1 %v4952_v37, %s4492_s30  ;;  %969 = vrot.lane.b32.xlu0 %v4955_v43, %s4492_s30 }
  0xd8   : > { %v5261_v32 = vpop.permute.xlu1 %791  ;;  %v5263_v5 = vpop.permute.xlu0 %789 }
  0xd9   : > { %8808 = vst [vmem:[#allocation83_spill] sm:$0xff] %v5261_v32  ;;  %8809 = vst [vmem:[#allocation84_spill] sm:$0xff] %v5263_v5 }
  0xda   : > { %975 = vrot.lane.b32.xlu1 %v4974_v15, %s4492_s30  ;;  %973 = vrot.lane.b32.xlu0 %v4977_v9, %s4492_s30 }
  0xdc   : > { %v5269_v25 = vpop.permute.xlu1 %795  ;;  %v5271_v36 = vpop.permute.xlu0 %793 }
  0xdd   : > { %8810 = vst [vmem:[#allocation85_spill] sm:$0xff] %v5269_v25  ;;  %8811 = vst [vmem:[#allocation86_spill] sm:$0xff] %v5271_v36 }
  0xde   : > { %979 = vrot.lane.b32.xlu1 %v4996_v31, %s4492_s30  ;;  %977 = vrot.lane.b32.xlu0 %v4999_v19, %s4492_s30 }
  0xe0   : > { %v5277_v42 = vpop.permute.xlu1 %799  ;;  %v5279_v32 = vpop.permute.xlu0 %797 }
  0xe1   : > { %8812 = vst [vmem:[#allocation87_spill] sm:$0xff] %v5277_v42  ;;  %8813 = vst [vmem:[#allocation88_spill] sm:$0xff] %v5279_v32 }
  0xe2   : > { %983 = vrot.lane.b32.xlu1 %v5019_v27, %s4492_s30  ;;  %981 = vrot.lane.b32.xlu0 %v5022_v20, %s4492_s30 }
  0xe4   : > { %v5285_v5 = vpop.permute.xlu1 %803  ;;  %v5287_v25 = vpop.permute.xlu0 %801 }
  0xe5   : > { %8814 = vst [vmem:[#allocation89_spill] sm:$0xff] %v5285_v5  ;;  %8815 = vst [vmem:[#allocation90_spill] sm:$0xff] %v5287_v25 }
  0xe6   : > { %987 = vrot.lane.b32.xlu1 %v5043_v33, %s4492_s30  ;;  %985 = vrot.lane.b32.xlu0 %v5039_v6, %s4492_s30 }
  0xe8   : > { %v5293_v36 = vpop.permute.xlu1 %807  ;;  %v5295_v42 = vpop.permute.xlu0 %805 }
  0xe9   : > { %8816 = vst [vmem:[#allocation91_spill] sm:$0xff] %v5293_v36  ;;  %8817 = vst [vmem:[#allocation92_spill] sm:$0xff] %v5295_v42 }
  0xea   : > { %991 = vrot.lane.b32.xlu1 %v5064_v51, %s4492_s30  ;;  %989 = vrot.lane.b32.xlu0 %v5067_v41, %s4492_s30 }
  0xec   : > { %v5301_v32 = vpop.permute.xlu1 %811  ;;  %v5303_v5 = vpop.permute.xlu0 %809 }
  0xed   : > { %8818 = vst [vmem:[#allocation93_spill] sm:$0xff] %v5301_v32  ;;  %8819 = vst [vmem:[#allocation94_spill] sm:$0xff] %v5303_v5 }
  0xee   : > { %995 = vrot.lane.b32.xlu1 %v5083_v29, %s4492_s30  ;;  %993 = vrot.lane.b32.xlu0 %v5086_v56, %s4492_s30 }
  0xf0   : > { %v5309_v25 = vpop.permute.xlu1 %815  ;;  %v5311_v36 = vpop.permute.xlu0 %813 }
  0xf1   : > { %8820 = vst [vmem:[#allocation95_spill] sm:$0xff] %v5309_v25  ;;  %8821 = vst [vmem:[#allocation96_spill] sm:$0xff] %v5311_v36 }
  0xf2   : > { %999 = vrot.lane.b32.xlu1 %v5108_v63, %s4492_s30  ;;  %997 = vrot.lane.b32.xlu0 %v5111_v53, %s4492_s30 }
  0xf4   : > { %v5317_v42 = vpop.permute.xlu1 %819  ;;  %v5319_v32 = vpop.permute.xlu0 %817 }
  0xf5   : > { %8822 = vst [vmem:[#allocation97_spill] sm:$0xff] %v5317_v42  ;;  %8823 = vst [vmem:[#allocation98_spill] sm:$0xff] %v5319_v32 }
  0xf6   : > { %1003 = vrot.lane.b32.xlu1 %v5127_v17, %s4492_s30  ;;  %1001 = vrot.lane.b32.xlu0 %v5130_v45, %s4492_s30 }
  0xf8   : > { %v5325_v5 = vpop.permute.xlu1 %823  ;;  %v5327_v25 = vpop.permute.xlu0 %821 }
  0xf9   : > { %8824 = vst [vmem:[#allocation99_spill] sm:$0xff] %v5325_v5  ;;  %8825 = vst [vmem:[#allocation100_spill] sm:$0xff] %v5327_v25 }
  0xfa   : > { %1007 = vrot.lane.b32.xlu1 %v5152_v24, %s4492_s30  ;;  %1005 = vrot.lane.b32.xlu0 %v5155_v4, %s4492_s30 }
  0xfc   : > { %v5333_v36 = vpop.permute.xlu1 %827  ;;  %v5335_v42 = vpop.permute.xlu0 %825 }
  0xfd   : > { %8826 = vst [vmem:[#allocation101_spill] sm:$0xff] %v5333_v36  ;;  %8827 = vst [vmem:[#allocation102_spill] sm:$0xff] %v5335_v42  ;;  %v8832_v42 = vrot.slane %v4807_v13, 7 }
  0xfe   : > { %1011 = vrot.lane.b32.xlu1 %v5171_v35, %s4492_s30  ;;  %1009 = vrot.lane.b32.xlu0 %v5174_v57, %s4492_s30 }
  0xff   : > { %v5356_v59 = vsel %vm337_vm0, %v8832_v42, 0.0 }
 0x100   : > { %v5341_v32 = vpop.permute.xlu1 %831  ;;  %v5343_v5 = vpop.permute.xlu0 %829  ;;  %v589_v48 = vrot.slane %v5356_v59, 1 }
 0x101   : > { %8828 = vst [vmem:[#allocation103_spill] sm:$0xff] %v5341_v32  ;;  %8829 = vst [vmem:[#allocation104_spill] sm:$0xff] %v5343_v5  ;;  %v587_v5 = vrot.slane %v4829_v61, 1  ;;  %v586_v32 = vrot.slane %v4832_v54, 1 }
 0x102   : > { %1015 = vrot.lane.b32.xlu1 %v5195_v39, %s4492_s30  ;;  %1013 = vrot.lane.b32.xlu0 %v5198_v60, %s4492_s30 }
 0x103   : > { %v5374_v13 = vsel %vm503_vm1, %v587_v5, %v589_v48  ;;  %v5377_v42 = vsel %vm503_vm1, %v586_v32, %v587_v5 }
 0x104   : > { %v5349_v25 = vpop.permute.xlu1 %4461  ;;  %v5351_v36 = vpop.permute.xlu0 %4456 }
 0x105   : > { %8830 = vst [vmem:[#allocation105_spill] sm:$0xff] %v5349_v25  ;;  %8831 = vst [vmem:[#allocation106_spill] sm:$0xff] %v5351_v36 }
 0x106   : > { %1019 = vrot.lane.b32.xlu1 %v5215_v47, %s4492_s30  ;;  %1017 = vrot.lane.b32.xlu0 %v5218_v8, %s4492_s30 }
 0x108   : > { %v5365_v49 = vpop.permute.xlu1 %875  ;;  %v5367_v36 = vpop.permute.xlu0 %873 }
 0x109   : > { %8833 = vst [vmem:[#allocation107_spill] sm:$0xff] %v5365_v49  ;;  %8834 = vst [vmem:[#allocation108_spill] sm:$0xff] %v5367_v36 }
 0x10a   : > { %1023 = vrot.lane.b32.xlu1 %v5232_v18, %s4492_s30  ;;  %1021 = vrot.lane.b32.xlu0 %v5235_v14, %s4492_s30 }
 0x10c   : > { %v5379_v30 = vpop.permute.xlu1 %879  ;;  %v5381_v25 = vpop.permute.xlu0 %877 }
 0x10e   : > { %1027 = vrot.lane.b32.xlu1 %v5374_v13, %s4492_s30  ;;  %1025 = vrot.lane.b32.xlu0 %v5377_v42, %s4492_s30 }
 0x110   : > { %v5387_v36 = vpop.permute.xlu1 %883  ;;  %v5389_v49 = vpop.permute.xlu0 %881 }
 0x111   : > { %8835 = vst [vmem:[#allocation109_spill] sm:$0xff] %v5389_v49 }
 0x112   : > { %1063 = vrot.lane.b32.xlu1 %v4952_v37, %s4493_s7  ;;  %1061 = vrot.lane.b32.xlu0 %v4955_v43, %s4493_s7 }
 0x114   : > { %v5395_v48 = vpop.permute.xlu1 %887  ;;  %v5397_v5 = vpop.permute.xlu0 %885 }
 0x115   : > { %8836 = vst [vmem:[#allocation110_spill] sm:$0xff] %v5395_v48  ;;  %8837 = vst [vmem:[#allocation111_spill] sm:$0xff] %v5397_v5 }
 0x116   : > { %1067 = vrot.lane.b32.xlu1 %v4974_v15, %s4493_s7  ;;  %1065 = vrot.lane.b32.xlu0 %v4977_v9, %s4493_s7 }
 0x118   : > { %v5403_v32 = vpop.permute.xlu1 %891  ;;  %v5405_v49 = vpop.permute.xlu0 %889 }
 0x119   : > { %8838 = vst [vmem:[#allocation112_spill] sm:$0xff] %v5403_v32  ;;  %8839 = vst [vmem:[#allocation113_spill] sm:$0xff] %v5405_v49  ;;  %v8876_v49 = vld [vmem:[#allocation11_spill] sm:$0xff] }
 0x11a   : > { %1071 = vrot.lane.b32.xlu1 %v4996_v31, %s4493_s7  ;;  %1069 = vrot.lane.b32.xlu0 %v4999_v19, %s4493_s7 }
 0x11c   : > { %v5411_v37 = vpop.permute.xlu1 %895  ;;  %v5413_v43 = vpop.permute.xlu0 %893 }
 0x11d   : > { %8840 = vst [vmem:[#allocation114_spill] sm:$0xff] %v5411_v37  ;;  %8841 = vst [vmem:[#allocation115_spill] sm:$0xff] %v5413_v43 }
 0x11e   : > { %1075 = vrot.lane.b32.xlu1 %v5019_v27, %s4493_s7  ;;  %1073 = vrot.lane.b32.xlu0 %v5022_v20, %s4493_s7 }
 0x120   : > { %v5419_v15 = vpop.permute.xlu1 %899  ;;  %v5421_v9 = vpop.permute.xlu0 %897 }
 0x121   : > { %8842 = vst [vmem:[#allocation116_spill] sm:$0xff] %v5419_v15  ;;  %8843 = vst [vmem:[#allocation117_spill] sm:$0xff] %v5421_v9  ;;  %v8872_v15 = vld [vmem:[#allocation9_spill] sm:$0xff] }
 0x122   : > { %1079 = vrot.lane.b32.xlu1 %v5043_v33, %s4493_s7  ;;  %1077 = vrot.lane.b32.xlu0 %v5039_v6, %s4493_s7  ;;  %v617_v43 = vrot.slane %v8872_v15, 2 }
 0x124   : > { %v5427_v31 = vpop.permute.xlu1 %903  ;;  %v5429_v19 = vpop.permute.xlu0 %901 }
 0x125   : > { %8844 = vst [vmem:[#allocation118_spill] sm:$0xff] %v5427_v31  ;;  %8845 = vst [vmem:[#allocation119_spill] sm:$0xff] %v5429_v19 }
 0x126   : > { %1083 = vrot.lane.b32.xlu1 %v5064_v51, %s4493_s7  ;;  %1081 = vrot.lane.b32.xlu0 %v5067_v41, %s4493_s7 }
 0x128   : > { %v5435_v20 = vpop.permute.xlu1 %907  ;;  %v5437_v27 = vpop.permute.xlu0 %905 }
 0x129   : > { %8846 = vst [vmem:[#allocation120_spill] sm:$0xff] %v5435_v20  ;;  %8847 = vst [vmem:[#allocation121_spill] sm:$0xff] %v5437_v27  ;;  %v8868_v27 = vld [vmem:[#allocation7_spill] sm:$0xff] }
 0x12a   : > { %1087 = vrot.lane.b32.xlu1 %v5083_v29, %s4493_s7  ;;  %1085 = vrot.lane.b32.xlu0 %v5086_v56, %s4493_s7  ;;  %v612_v20 = vrot.slane %v8868_v27, 2 }
 0x12c   : > { %v5443_v6 = vpop.permute.xlu1 %911  ;;  %v5445_v33 = vpop.permute.xlu0 %909 }
 0x12d   : > { %8848 = vst [vmem:[#allocation122_spill] sm:$0xff] %v5443_v6  ;;  %8849 = vst [vmem:[#allocation123_spill] sm:$0xff] %v5445_v33 }
 0x12e   : > { %1091 = vrot.lane.b32.xlu1 %v5108_v63, %s4493_s7  ;;  %1089 = vrot.lane.b32.xlu0 %v5111_v53, %s4493_s7 }
 0x130   : > { %v5451_v51 = vpop.permute.xlu1 %915  ;;  %v5453_v41 = vpop.permute.xlu0 %913 }
 0x131   : > { %8850 = vst [vmem:[#allocation124_spill] sm:$0xff] %v5451_v51  ;;  %8851 = vst [vmem:[#allocation125_spill] sm:$0xff] %v5453_v41 }
 0x132   : > { %1095 = vrot.lane.b32.xlu1 %v5127_v17, %s4493_s7  ;;  %1093 = vrot.lane.b32.xlu0 %v5130_v45, %s4493_s7 }
 0x134   : > { %v5459_v29 = vpop.permute.xlu1 %919  ;;  %v5461_v56 = vpop.permute.xlu0 %917 }
 0x135   : > { %8852 = vst [vmem:[#allocation126_spill] sm:$0xff] %v5459_v29  ;;  %8853 = vst [vmem:[#allocation127_spill] sm:$0xff] %v5461_v56  ;;  %v8864_v29 = vld [vmem:[#allocation5_spill] sm:$0xff] }
 0x136   : > { %1099 = vrot.lane.b32.xlu1 %v5152_v24, %s4493_s7  ;;  %1097 = vrot.lane.b32.xlu0 %v5155_v4, %s4493_s7  ;;  %v607_v41 = vrot.slane %v8864_v29, 2 }
 0x138   : > { %v5467_v63 = vpop.permute.xlu1 %923  ;;  %v5469_v53 = vpop.permute.xlu0 %921 }
 0x139   : > { %8854 = vst [vmem:[#allocation128_spill] sm:$0xff] %v5467_v63  ;;  %8855 = vst [vmem:[#allocation129_spill] sm:$0xff] %v5469_v53 }
 0x13a   : > { %1103 = vrot.lane.b32.xlu1 %v5171_v35, %s4493_s7  ;;  %1101 = vrot.lane.b32.xlu0 %v5174_v57, %s4493_s7  ;;  %v595_v35 = vrot.slane %v4549_v3, 2  ;;  %v592_v57 = vrot.slane %v4545_v2, 2 }
 0x13c   : > { %v5475_v17 = vpop.permute.xlu1 %927  ;;  %v5477_v45 = vpop.permute.xlu0 %925 }
 0x13d   : > { %8856 = vst [vmem:[#allocation130_spill] sm:$0xff] %v5475_v17  ;;  %8857 = vst [vmem:[#allocation131_spill] sm:$0xff] %v5477_v45  ;;  %v593_v45 = vrot.slane %v4541_v1, 2 }
 0x13e   : > { %1107 = vrot.lane.b32.xlu1 %v5195_v39, %s4493_s7  ;;  %1105 = vrot.lane.b32.xlu0 %v5198_v60, %s4493_s7 }
 0x13f   : > { %v594_v60 = vsel %vm591_vm2, %v592_v57, %v593_v45  ;;  %v600_v57 = vrot.slane %v4905_v55, 2 }
 0x140   : > { %v5483_v24 = vpop.permute.xlu1 %931  ;;  %v5485_v4 = vpop.permute.xlu0 %929 }
 0x141   : > { %8858 = vst [vmem:[#allocation132_spill] sm:$0xff] %v5483_v24  ;;  %8859 = vst [vmem:[#allocation133_spill] sm:$0xff] %v5485_v4 }
 0x142   : > { %1111 = vrot.lane.b32.xlu1 %v5215_v47, %s4493_s7  ;;  %1109 = vrot.lane.b32.xlu0 %v5218_v8, %s4493_s7  ;;  %v596_v47 = vsel %vm591_vm2, %v593_v45, %v595_v35 }
 0x143   : > { %v5512_v4 = vpack.i.bf16 %v596_v47, %v594_v60  ;;  %v8861_v47 = vld [vmem:[#allocation4_spill] sm:$0xff] }
 0x144   : > { %v5494_v39 = vpop.permute.xlu1 %967  ;;  %v5496_v17 = vpop.permute.xlu0 %965  ;;  %v602_v53 = vrot.slane %v8861_v47, 2 }
 0x146   : > { %1115 = vrot.lane.b32.xlu1 %v5232_v18, %s4493_s7  ;;  %1113 = vrot.lane.b32.xlu0 %v5235_v14, %s4493_s7  ;;  %v597_v18 = vrot.slane %v4584_v21, 2  ;;  %v598_v14 = vrot.slane %v4598_v23, 2 }
 0x148   : > { %v5504_v3 = vpop.permute.xlu1 %971  ;;  %v5506_v8 = vpop.permute.xlu0 %969  ;;  %v5528_v60 = vsel %vm591_vm2, %v598_v14, %v600_v57  ;;  %v5531_v55 = vsel %vm591_vm2, %v597_v18, %v598_v14  ;;  %v608_v18 = vrot.slane %v4612_v28, 2  ;;  %v8863_v14 = vld [vmem:[#allocation39_spill] sm:$0xff] }
 0x14a   : > { %1119 = vrot.lane.b32.xlu1 %v5374_v13, %s4493_s7  ;;  %1117 = vrot.lane.b32.xlu0 %v5377_v42, %s4493_s7  ;;  %v603_v13 = vrot.slane %v4593_v22, 2  ;;  %v8860_v42 = vld [vmem:[#allocation36_spill] sm:$0xff] }
 0x14b   : > { %v605_v35 = vrot.slane %v8860_v42, 2  ;;  %v610_v42 = vrot.slane %v8863_v14, 2  ;;  %v5565_v14 = vsel %vm591_vm2, %v607_v41, %v608_v18  ;;  %v618_v41 = vrot.slane %v4646_v40, 2 }
 0x14c   : > { %v5517_v24 = vpop.permute.xlu1 %975  ;;  %v5519_v45 = vpop.permute.xlu0 %973  ;;  %v5546_v57 = vsel %vm591_vm2, %v602_v53, %v603_v13  ;;  %v8867_v53 = vld [vmem:[#allocation42_spill] sm:$0xff] }
 0x14d   : > { %v5562_v6 = vsel %vm591_vm2, %v608_v18, %v610_v42  ;;  %v8871_v18 = vld [vmem:[#allocation45_spill] sm:$0xff] }
 0x14e   : > { %4471 = vrot.lane.b32.xlu1 %v5512_v4, %s4494_s8  ;;  %4466 = vrot.lane.b32.xlu0 %v4573_v16, %s4493_s7  ;;  %v5543_v16 = vsel %vm591_vm2, %v603_v13, %v605_v35  ;;  %v613_v35 = vrot.slane %v4629_v34, 2  ;;  %v615_v13 = vrot.slane %v8867_v53, 2  ;;  %v620_v9 = vrot.slane %v8871_v18, 2  ;;  %v1712_v34 = vld [vmem:[%s8537_s2 + $0x18] sm:$0xff] }
 0x14f   : > { %v5599_v18 = vsel %vm591_vm2, %v617_v43, %v618_v41  ;;  %v628_v43 = vrot.slane %v4680_v52, 2 }
 0x150   : > { %v5534_v63 = vpop.permute.xlu1 %979  ;;  %v5536_v56 = vpop.permute.xlu0 %977  ;;  %v5577_v53 = vsel %vm591_vm2, %v613_v35, %v615_v13  ;;  %v5580_v42 = vsel %vm591_vm2, %v612_v20, %v613_v35  ;;  %v623_v13 = vrot.slane %v4663_v46, 2  ;;  %v8875_v20 = vld [vmem:[#allocation48_spill] sm:$0xff]  ;;  %v8880_v46 = vld [vmem:[#allocation13_spill] sm:$0xff] }
 0x151   : > { %8862 = vst [vmem:[#allocation36_spill] sm:$0xff] %v5536_v56  ;;  %v625_v35 = vrot.slane %v8875_v20, 2 }
 0x152   : > { %1163 = vrot.lane.b32.xlu1 %v5528_v60, %s4494_s8  ;;  %1161 = vrot.lane.b32.xlu0 %v5531_v55, %s4494_s8 }
 0x153   : > { %v5611_v20 = vsel %vm591_vm2, %v623_v13, %v625_v35  ;;  %v633_v35 = vrot.slane %v4697_v58, 2  ;;  %v8888_v58 = vld [vmem:[#allocation17_spill] sm:$0xff] }
 0x154   : > { %v5551_v51 = vpop.permute.xlu1 %983  ;;  %v5553_v33 = vpop.permute.xlu0 %981 }
 0x155   : > { %8865 = vst [vmem:[#allocation4_spill] sm:$0xff] %v5551_v51  ;;  %8866 = vst [vmem:[#allocation39_spill] sm:$0xff] %v5553_v33 }
 0x156   : > { %1167 = vrot.lane.b32.xlu1 %v5543_v16, %s4494_s8  ;;  %1165 = vrot.lane.b32.xlu0 %v5546_v57, %s4494_s8 }
 0x158   : > { %v5568_v19 = vpop.permute.xlu1 %987  ;;  %v5570_v31 = vpop.permute.xlu0 %985 }
 0x159   : > { %8869 = vst [vmem:[#allocation5_spill] sm:$0xff] %v5568_v19  ;;  %8870 = vst [vmem:[#allocation42_spill] sm:$0xff] %v5570_v31  ;;  %v5596_v19 = vsel %vm591_vm2, %v618_v41, %v620_v9  ;;  %v8879_v41 = vld [vmem:[#allocation51_spill] sm:$0xff] }
 0x15a   : > { %1171 = vrot.lane.b32.xlu1 %v5562_v6, %s4494_s8  ;;  %1169 = vrot.lane.b32.xlu0 %v5565_v14, %s4494_s8 }
 0x15c   : > { %v5585_v37 = vpop.permute.xlu1 %991  ;;  %v5587_v31 = vpop.permute.xlu0 %989 }
 0x15d   : > { %8873 = vst [vmem:[#allocation45_spill] sm:$0xff] %v5585_v37  ;;  %8874 = vst [vmem:[#allocation134_spill] sm:$0xff] %v5587_v31  ;;  %v622_v37 = vrot.slane %v8876_v49, 2  ;;  %v630_v49 = vrot.slane %v8879_v41, 2 }
 0x15e   : > { %1175 = vrot.lane.b32.xlu1 %v5577_v53, %s4494_s8  ;;  %1173 = vrot.lane.b32.xlu0 %v5580_v42, %s4494_s8 }
 0x15f   : > { %v5614_v9 = vsel %vm591_vm2, %v622_v37, %v623_v13  ;;  %v8883_v37 = vld [vmem:[#allocation52_spill] sm:$0xff]  ;;  %v5630_v52 = vsel %vm591_vm2, %v628_v43, %v630_v49 }
 0x160   : > { %v5602_v32 = vpop.permute.xlu1 %995  ;;  %v5604_v31 = vpop.permute.xlu0 %993  ;;  %v635_v13 = vrot.slane %v8883_v37, 2 }
 0x161   : > { %8877 = vst [vmem:[#allocation48_spill] sm:$0xff] %v5602_v32  ;;  %8878 = vst [vmem:[#allocation135_spill] sm:$0xff] %v5604_v31  ;;  %v627_v32 = vrot.slane %v8880_v46, 2  ;;  %v8884_v46 = vld [vmem:[#allocation15_spill] sm:$0xff] }
 0x162   : > { %1179 = vrot.lane.b32.xlu1 %v5596_v19, %s4494_s8  ;;  %1177 = vrot.lane.b32.xlu0 %v5599_v18, %s4494_s8  ;;  %v5645_v37 = vsel %vm591_vm2, %v633_v35, %v635_v13  ;;  %v643_v13 = vrot.slane %v4731_v10, 2  ;;  %v8896_v10 = vld [vmem:[#allocation21_spill] sm:$0xff] }
 0x163   : > { %v5633_v41 = vsel %vm591_vm2, %v627_v32, %v628_v43  ;;  %v638_v32 = vrot.slane %v4714_v0, 2  ;;  %v8887_v43 = vld [vmem:[#allocation57_spill] sm:$0xff] }
 0x164   : > { %v5619_v15 = vpop.permute.xlu1 %999  ;;  %v5621_v31 = vpop.permute.xlu0 %997 }
 0x165   : > { %8881 = vst [vmem:[#allocation51_spill] sm:$0xff] %v5619_v15  ;;  %8882 = vst [vmem:[#allocation136_spill] sm:$0xff] %v5621_v31  ;;  %v632_v15 = vrot.slane %v8884_v46, 2  ;;  %v640_v46 = vrot.slane %v8887_v43, 2 }
 0x166   : > { %1183 = vrot.lane.b32.xlu1 %v5611_v20, %s4494_s8  ;;  %1181 = vrot.lane.b32.xlu0 %v5614_v9, %s4494_s8 }
 0x167   : > { %v5648_v49 = vsel %vm591_vm2, %v632_v15, %v633_v35  ;;  %v8891_v15 = vld [vmem:[#allocation58_spill] sm:$0xff]  ;;  %v5664_v0 = vsel %vm591_vm2, %v638_v32, %v640_v46 }
 0x168   : > { %v5636_v40 = vpop.permute.xlu1 %1003  ;;  %v5638_v31 = vpop.permute.xlu0 %1001  ;;  %v645_v35 = vrot.slane %v8891_v15, 2 }
 0x169   : > { %8885 = vst [vmem:[#allocation52_spill] sm:$0xff] %v5636_v40  ;;  %8886 = vst [vmem:[#allocation137_spill] sm:$0xff] %v5638_v31  ;;  %v637_v40 = vrot.slane %v8888_v58, 2  ;;  %v8892_v58 = vld [vmem:[#allocation19_spill] sm:$0xff] }
 0x16a   : > { %1187 = vrot.lane.b32.xlu1 %v5630_v52, %s4494_s8  ;;  %1185 = vrot.lane.b32.xlu0 %v5633_v41, %s4494_s8  ;;  %v5679_v15 = vsel %vm591_vm2, %v643_v13, %v645_v35  ;;  %v653_v35 = vrot.slane %v4765_v44, 2  ;;  %v8904_v44 = vld [vmem:[#allocation25_spill] sm:$0xff] }
 0x16b   : > { %v5667_v43 = vsel %vm591_vm2, %v637_v40, %v638_v32  ;;  %v648_v40 = vrot.slane %v4748_v26, 2  ;;  %v8895_v32 = vld [vmem:[#allocation63_spill] sm:$0xff] }
 0x16c   : > { %v5653_v33 = vpop.permute.xlu1 %1007  ;;  %v5655_v31 = vpop.permute.xlu0 %1005 }
 0x16d   : > { %8889 = vst [vmem:[#allocation57_spill] sm:$0xff] %v5653_v33  ;;  %8890 = vst [vmem:[#allocation138_spill] sm:$0xff] %v5655_v31  ;;  %v642_v33 = vrot.slane %v8892_v58, 2  ;;  %v650_v58 = vrot.slane %v8895_v32, 2 }
 0x16e   : > { %1191 = vrot.lane.b32.xlu1 %v5645_v37, %s4494_s8  ;;  %1189 = vrot.lane.b32.xlu0 %v5648_v49, %s4494_s8 }
 0x16f   : > { %v5682_v46 = vsel %vm591_vm2, %v642_v33, %v643_v13  ;;  %v8899_v33 = vld [vmem:[#allocation64_spill] sm:$0xff]  ;;  %v5698_v26 = vsel %vm591_vm2, %v648_v40, %v650_v58 }
 0x170   : > { %v5670_v51 = vpop.permute.xlu1 %1011  ;;  %v5672_v31 = vpop.permute.xlu0 %1009  ;;  %v655_v13 = vrot.slane %v8899_v33, 2 }
 0x171   : > { %8893 = vst [vmem:[#allocation58_spill] sm:$0xff] %v5670_v51  ;;  %8894 = vst [vmem:[#allocation139_spill] sm:$0xff] %v5672_v31  ;;  %v647_v51 = vrot.slane %v8896_v10, 2  ;;  %v8900_v10 = vld [vmem:[#allocation23_spill] sm:$0xff] }
 0x172   : > { %1195 = vrot.lane.b32.xlu1 %v5664_v0, %s4494_s8  ;;  %1193 = vrot.lane.b32.xlu0 %v5667_v43, %s4494_s8  ;;  %v5713_v33 = vsel %vm591_vm2, %v653_v35, %v655_v13  ;;  %v663_v13 = vrot.slane %v4799_v38, 2 }
 0x173   : > { %v5701_v32 = vsel %vm591_vm2, %v647_v51, %v648_v40  ;;  %v658_v51 = vrot.slane %v4782_v62, 2  ;;  %v8903_v40 = vld [vmem:[#allocation69_spill] sm:$0xff] }
 0x174   : > { %v5687_v5 = vpop.permute.xlu1 %1015  ;;  %v5689_v31 = vpop.permute.xlu0 %1013 }
 0x175   : > { %8897 = vst [vmem:[#allocation63_spill] sm:$0xff] %v5687_v5  ;;  %8898 = vst [vmem:[#allocation140_spill] sm:$0xff] %v5689_v31  ;;  %v652_v5 = vrot.slane %v8900_v10, 2  ;;  %v660_v10 = vrot.slane %v8903_v40, 2 }
 0x176   : > { %1199 = vrot.lane.b32.xlu1 %v5679_v15, %s4494_s8  ;;  %1197 = vrot.lane.b32.xlu0 %v5682_v46, %s4494_s8 }
 0x177   : > { %v5716_v58 = vsel %vm591_vm2, %v652_v5, %v653_v35  ;;  %v665_v5 = vrot.slane %v5182_v11, 2  ;;  %v5732_v35 = vsel %vm591_vm2, %v658_v51, %v660_v10 }
 0x178   : > { %v5704_v48 = vpop.permute.xlu1 %1019  ;;  %v5706_v31 = vpop.permute.xlu0 %1017 }
 0x179   : > { %8901 = vst [vmem:[#allocation64_spill] sm:$0xff] %v5704_v48  ;;  %8902 = vst [vmem:[#allocation141_spill] sm:$0xff] %v5706_v31  ;;  %v657_v48 = vrot.slane %v8904_v44, 2  ;;  %v5747_v11 = vsel %vm591_vm2, %v663_v13, %v665_v5 }
 0x17a   : > { %1203 = vrot.lane.b32.xlu1 %v5698_v26, %s4494_s8  ;;  %1201 = vrot.lane.b32.xlu0 %v5701_v32, %s4494_s8 }
 0x17b   : > { %v5735_v40 = vsel %vm591_vm2, %v657_v48, %v658_v51  ;;  %v668_v48 = vrot.slane %v4816_v12, 2  ;;  %v8909_v51 = vld [vmem:[#allocation74_spill] sm:$0xff] }
 0x17c   : > { %v5721_v27 = vpop.permute.xlu1 %1023  ;;  %v5723_v31 = vpop.permute.xlu0 %1021 }
 0x17d   : > { %8905 = vst [vmem:[#allocation69_spill] sm:$0xff] %v5721_v27  ;;  %8906 = vst [vmem:[#allocation142_spill] sm:$0xff] %v5723_v31  ;;  %v662_v27 = vrot.slane %v4802_v50, 2  ;;  %v670_v50 = vrot.slane %v8909_v51, 2 }
 0x17e   : > { %1207 = vrot.lane.b32.xlu1 %v5713_v33, %s4494_s8  ;;  %1205 = vrot.lane.b32.xlu0 %v5716_v58, %s4494_s8 }
 0x17f   : > { %v5750_v10 = vsel %vm591_vm2, %v662_v27, %v663_v13  ;;  %v5764_v5 = vsel %vm591_vm2, %v668_v48, %v670_v50 }
 0x180   : > { %v5738_v44 = vpop.permute.xlu1 %1027  ;;  %v5740_v31 = vpop.permute.xlu0 %1025 }
 0x181   : > { %8907 = vst [vmem:[#allocation143_spill] sm:$0xff] %v5738_v44  ;;  %8908 = vst [vmem:[#allocation144_spill] sm:$0xff] %v5740_v31  ;;  %v667_v44 = vrot.slane %v4819_v7, 2 }
 0x182   : > { %1211 = vrot.lane.b32.xlu1 %v5732_v35, %s4494_s8  ;;  %1209 = vrot.lane.b32.xlu0 %v5735_v40, %s4494_s8 }
 0x183   : > { %v5767_v27 = vsel %vm591_vm2, %v667_v44, %v668_v48 }
 0x184   : > { %v5755_v38 = vpop.permute.xlu1 %1063  ;;  %v5757_v31 = vpop.permute.xlu0 %1061 }
 0x186   : > { %1215 = vrot.lane.b32.xlu1 %v5747_v11, %s4494_s8  ;;  %1213 = vrot.lane.b32.xlu0 %v5750_v10, %s4494_s8 }
 0x188   : > { %v5769_v13 = vpop.permute.xlu1 %1067  ;;  %v5771_v51 = vpop.permute.xlu0 %1065 }
 0x18a   : > { %1219 = vrot.lane.b32.xlu1 %v5764_v5, %s4494_s8  ;;  %1217 = vrot.lane.b32.xlu0 %v5767_v27, %s4494_s8 }
 0x18c   : > { %v5777_v7 = vpop.permute.xlu1 %1071  ;;  %v5779_v12 = vpop.permute.xlu0 %1069 }
 0x18e   : > { %1255 = vrot.lane.b32.xlu1 %v5528_v60, %s4495_s9  ;;  %1253 = vrot.lane.b32.xlu0 %v5531_v55, %s4495_s9 }
 0x190   : > { %v5785_v44 = vpop.permute.xlu1 %1075  ;;  %v5787_v50 = vpop.permute.xlu0 %1073 }
 0x191   : > { %8910 = vst [vmem:[#allocation74_spill] sm:$0xff] %v5785_v44  ;;  %8911 = vst [vmem:[#allocation145_spill] sm:$0xff] %v5787_v50 }
 0x192   : > { %1259 = vrot.lane.b32.xlu1 %v5543_v16, %s4495_s9  ;;  %1257 = vrot.lane.b32.xlu0 %v5546_v57, %s4495_s9 }
 0x194   : > { %v5793_v48 = vpop.permute.xlu1 %1079  ;;  %v5795_v62 = vpop.permute.xlu0 %1077 }
 0x195   : > { %8912 = vst [vmem:[#allocation146_spill] sm:$0xff] %v5793_v48  ;;  %8913 = vst [vmem:[#allocation147_spill] sm:$0xff] %v5795_v62 }
 0x196   : > { %1263 = vrot.lane.b32.xlu1 %v5562_v6, %s4495_s9  ;;  %1261 = vrot.lane.b32.xlu0 %v5565_v14, %s4495_s9 }
 0x198   : > { %v5801_v60 = vpop.permute.xlu1 %1083  ;;  %v5803_v55 = vpop.permute.xlu0 %1081 }
 0x199   : > { %8914 = vst [vmem:[#allocation148_spill] sm:$0xff] %v5801_v60  ;;  %8915 = vst [vmem:[#allocation149_spill] sm:$0xff] %v5803_v55 }
 0x19a   : > { %1267 = vrot.lane.b32.xlu1 %v5577_v53, %s4495_s9  ;;  %1265 = vrot.lane.b32.xlu0 %v5580_v42, %s4495_s9 }
 0x19c   : > { %v5809_v50 = vpop.permute.xlu1 %1087  ;;  %v5811_v48 = vpop.permute.xlu0 %1085 }
 0x19d   : > { %8916 = vst [vmem:[#allocation150_spill] sm:$0xff] %v5809_v50  ;;  %8917 = vst [vmem:[#allocation151_spill] sm:$0xff] %v5811_v48 }
 0x19e   : > { %1271 = vrot.lane.b32.xlu1 %v5596_v19, %s4495_s9  ;;  %1269 = vrot.lane.b32.xlu0 %v5599_v18, %s4495_s9 }
 0x1a0   : > { %v5817_v62 = vpop.permute.xlu1 %1091  ;;  %v5819_v60 = vpop.permute.xlu0 %1089 }
 0x1a1   : > { %8918 = vst [vmem:[#allocation152_spill] sm:$0xff] %v5817_v62  ;;  %8919 = vst [vmem:[#allocation153_spill] sm:$0xff] %v5819_v60 }
 0x1a2   : > { %1275 = vrot.lane.b32.xlu1 %v5611_v20, %s4495_s9  ;;  %1273 = vrot.lane.b32.xlu0 %v5614_v9, %s4495_s9 }
 0x1a4   : > { %v5825_v55 = vpop.permute.xlu1 %1095  ;;  %v5827_v50 = vpop.permute.xlu0 %1093 }
 0x1a5   : > { %8920 = vst [vmem:[#allocation154_spill] sm:$0xff] %v5825_v55  ;;  %8921 = vst [vmem:[#allocation155_spill] sm:$0xff] %v5827_v50  ;;  %v1709_v50 = vld [vmem:[%s8537_s2] sm:$0xff]  ;;  %v1710_v55 = vld [vmem:[%s8537_s2 + $0x8] sm:$0xff] }
 0x1a6   : > { %1279 = vrot.lane.b32.xlu1 %v5630_v52, %s4495_s9  ;;  %1277 = vrot.lane.b32.xlu0 %v5633_v41, %s4495_s9  ;;  %v4421_v60 = vpack.c.bf16 %v1710_v55, %v1709_v50 }
 0x1a8   : > { %v5833_v48 = vpop.permute.xlu1 %1099  ;;  %v5835_v62 = vpop.permute.xlu0 %1097  ;;  %4422 = vmatprep.subr.bf16.mxu0 %v4421_v60 }
 0x1a9   : > { %8922 = vst [vmem:[#allocation156_spill] sm:$0xff] %v5833_v48  ;;  %8923 = vst [vmem:[#allocation157_spill] sm:$0xff] %v5835_v62  ;;  %v1711_v62 = vld [vmem:[%s8537_s2 + $0x10] sm:$0xff]  ;;  %4424 = vmatpush3.bf16.msra.mxu0 %v4421_v60 }
 0x1aa   : > { %1283 = vrot.lane.b32.xlu1 %v5645_v37, %s4495_s9  ;;  %1281 = vrot.lane.b32.xlu0 %v5648_v49, %s4495_s9  ;;  %v4425_v50 = vpack.c.bf16 %v1712_v34, %v1711_v62  ;;  %v1713_v34 = vld [vmem:[%s8537_s2 + $0x20] sm:$0xf] }
 0x1ac   : > { %v5847_v44 = vpop.permute.xlu1 %1103  ;;  %v5849_v48 = vpop.permute.xlu0 %1101  ;;  %4426 = vmatprep.subr.bf16.mxu0 %v4425_v50 }
 0x1ad   : > { %8924 = vst [vmem:[#allocation158_spill] sm:$0xff] %v5847_v44  ;;  %8925 = vst [vmem:[#allocation159_spill] sm:$0xff] %v5849_v48  ;;  %4428 = vmatpush3.bf16.msra.mxu0 %v4425_v50 }
 0x1ae   : > { %1287 = vrot.lane.b32.xlu1 %v5664_v0, %s4495_s9  ;;  %1285 = vrot.lane.b32.xlu0 %v5667_v43, %s4495_s9 }
 0x1af   : > { %4313 = vmatprep.subr.msk.mxu0 %vm1818_vm3, %v1713_v34 }
 0x1b0   : > { %v5861_v55 = vpop.permute.xlu1 %1107  ;;  %v5863_v48 = vpop.permute.xlu0 %1105 }
 0x1b1   : > { %8926 = vst [vmem:[#allocation160_spill] sm:$0xff] %v5861_v55  ;;  %8927 = vst [vmem:[#allocation161_spill] sm:$0xff] %v5863_v48  ;;  %4314 = vmatpush3.msk.msra.mxu0 %vm1818_vm3, %v1713_v34 }
 0x1b2   : > { %1291 = vrot.lane.b32.xlu1 %v5679_v15, %s4495_s9  ;;  %1289 = vrot.lane.b32.xlu0 %v5682_v46, %s4495_s9 }
 0x1b4   : > { %v5869_v44 = vpop.permute.xlu1 %1111  ;;  %v5871_v56 = vpop.permute.xlu0 %1109 }
 0x1b5   : > { %8928 = vst [vmem:[#allocation162_spill] sm:$0xff] %v5869_v44  ;;  %8929 = vst [vmem:[#allocation163_spill] sm:$0xff] %v5871_v56 }
 0x1b6   : > { %1295 = vrot.lane.b32.xlu1 %v5698_v26, %s4495_s9  ;;  %1293 = vrot.lane.b32.xlu0 %v5701_v32, %s4495_s9 }
 0x1b8   : > { %v5882_v62 = vpop.permute.xlu1 %1115  ;;  %v5884_v60 = vpop.permute.xlu0 %1113 }
 0x1b9   : > { %8930 = vst [vmem:[#allocation164_spill] sm:$0xff] %v5882_v62  ;;  %8931 = vst [vmem:[#allocation165_spill] sm:$0xff] %v5884_v60 }
 0x1ba   : > { %1299 = vrot.lane.b32.xlu1 %v5713_v33, %s4495_s9  ;;  %1297 = vrot.lane.b32.xlu0 %v5716_v58, %s4495_s9 }
 0x1bc   : > { %v5890_v50 = vpop.permute.xlu1 %1119  ;;  %v5892_v56 = vpop.permute.xlu0 %1117 }
 0x1bd   : > { %8932 = vst [vmem:[#allocation166_spill] sm:$0xff] %v5890_v50  ;;  %8933 = vst [vmem:[#allocation167_spill] sm:$0xff] %v5892_v56 }
 0x1be   : > { %1303 = vrot.lane.b32.xlu1 %v5732_v35, %s4495_s9  ;;  %1301 = vrot.lane.b32.xlu0 %v5735_v40, %s4495_s9 }
 0x1c0   : > { %v5898_v34 = vpop.permute.xlu1 %4471  ;;  %v5900_v62 = vpop.permute.xlu0 %4466 }
 0x1c1   : > { %8934 = vst [vmem:[#allocation168_spill] sm:$0xff] %v5898_v34  ;;  %8935 = vst [vmem:[#allocation169_spill] sm:$0xff] %v5900_v62 }
 0x1c2   : > { %1351 = vrot.lane.b32.xlu1 %v5543_v16, %s4496_s20  ;;  %1349 = vrot.lane.b32.xlu0 %v5546_v57, %s4496_s20 }
 0x1c4   : > { %v5906_v50 = vpop.permute.xlu1 %1163  ;;  %v5908_v56 = vpop.permute.xlu0 %1161 }
 0x1c6   : > { %1355 = vrot.lane.b32.xlu1 %v5562_v6, %s4496_s20  ;;  %1353 = vrot.lane.b32.xlu0 %v5565_v14, %s4496_s20 }
 0x1c8   : > { %v5914_v60 = vpop.permute.xlu1 %1167  ;;  %v5916_v62 = vpop.permute.xlu0 %1165 }
 0x1ca   : > { %1359 = vrot.lane.b32.xlu1 %v5577_v53, %s4496_s20  ;;  %1357 = vrot.lane.b32.xlu0 %v5580_v42, %s4496_s20 }
 0x1cc   : > { %v5922_v16 = vpop.permute.xlu1 %1171  ;;  %v5924_v57 = vpop.permute.xlu0 %1169 }
 0x1ce   : > { %1363 = vrot.lane.b32.xlu1 %v5596_v19, %s4496_s20  ;;  %1361 = vrot.lane.b32.xlu0 %v5599_v18, %s4496_s20 }
 0x1d0   : > { %v5930_v6 = vpop.permute.xlu1 %1175  ;;  %v5932_v14 = vpop.permute.xlu0 %1173 }
 0x1d2   : > { %1367 = vrot.lane.b32.xlu1 %v5611_v20, %s4496_s20  ;;  %1365 = vrot.lane.b32.xlu0 %v5614_v9, %s4496_s20 }
 0x1d4   : > { %v5938_v53 = vpop.permute.xlu1 %1179  ;;  %v5940_v42 = vpop.permute.xlu0 %1177 }
 0x1d6   : > { %1371 = vrot.lane.b32.xlu1 %v5630_v52, %s4496_s20  ;;  %1369 = vrot.lane.b32.xlu0 %v5633_v41, %s4496_s20 }
 0x1d8   : > { %v5946_v19 = vpop.permute.xlu1 %1183  ;;  %v5948_v18 = vpop.permute.xlu0 %1181 }
 0x1da   : > { %1375 = vrot.lane.b32.xlu1 %v5645_v37, %s4496_s20  ;;  %1373 = vrot.lane.b32.xlu0 %v5648_v49, %s4496_s20 }
 0x1dc   : > { %v5954_v20 = vpop.permute.xlu1 %1187  ;;  %v5956_v9 = vpop.permute.xlu0 %1185 }
 0x1dd   : > { %8936 = vst [vmem:[#allocation170_spill] sm:$0xff] %v5956_v9  ;;  %v8968_v9 = vld [vmem:[#allocation30_spill] sm:$0xff] }
 0x1de   : > { %1379 = vrot.lane.b32.xlu1 %v5664_v0, %s4496_s20  ;;  %1377 = vrot.lane.b32.xlu0 %v5667_v43, %s4496_s20 }
 0x1e0   : > { %v5962_v52 = vpop.permute.xlu1 %1191  ;;  %v5964_v41 = vpop.permute.xlu0 %1189 }
 0x1e1   : > { %8937 = vst [vmem:[#allocation171_spill] sm:$0xff] %v5962_v52  ;;  %8938 = vst [vmem:[#allocation172_spill] sm:$0xff] %v5964_v41  ;;  %v8967_v41 = vld [vmem:[#allocation76_spill] sm:$0xff] }
 0x1e2   : > { %1383 = vrot.lane.b32.xlu1 %v5679_v15, %s4496_s20  ;;  %1381 = vrot.lane.b32.xlu0 %v5682_v46, %s4496_s20 }
 0x1e4   : > { %v5970_v37 = vpop.permute.xlu1 %1195  ;;  %v5972_v49 = vpop.permute.xlu0 %1193 }
 0x1e5   : > { %8939 = vst [vmem:[#allocation173_spill] sm:$0xff] %v5970_v37  ;;  %8940 = vst [vmem:[#allocation174_spill] sm:$0xff] %v5972_v49  ;;  %v8961_v37 = vld [vmem:[#allocation105_spill] sm:$0xff] }
 0x1e6   : > { %1387 = vrot.lane.b32.xlu1 %v5698_v26, %s4496_s20  ;;  %1385 = vrot.lane.b32.xlu0 %v5701_v32, %s4496_s20 }
 0x1e8   : > { %v5978_v0 = vpop.permute.xlu1 %1199  ;;  %v5980_v43 = vpop.permute.xlu0 %1197 }
 0x1e9   : > { %8941 = vst [vmem:[#allocation175_spill] sm:$0xff] %v5978_v0  ;;  %8942 = vst [vmem:[#allocation176_spill] sm:$0xff] %v5980_v43 }
 0x1ea   : > { %1391 = vrot.lane.b32.xlu1 %v5713_v33, %s4496_s20  ;;  %1389 = vrot.lane.b32.xlu0 %v5716_v58, %s4496_s20 }
 0x1ec   : > { %v5986_v15 = vpop.permute.xlu1 %1203  ;;  %v5988_v46 = vpop.permute.xlu0 %1201 }
 0x1ed   : > { %8943 = vst [vmem:[#allocation177_spill] sm:$0xff] %v5986_v15  ;;  %8944 = vst [vmem:[#allocation178_spill] sm:$0xff] %v5988_v46 }
 0x1ee   : > { %1395 = vrot.lane.b32.xlu1 %v5732_v35, %s4496_s20  ;;  %1393 = vrot.lane.b32.xlu0 %v5735_v40, %s4496_s20 }
 0x1f0   : > { %v5994_v26 = vpop.permute.xlu1 %1207  ;;  %v5996_v32 = vpop.permute.xlu0 %1205 }
 0x1f1   : > { %8945 = vst [vmem:[#allocation179_spill] sm:$0xff] %v5994_v26  ;;  %8946 = vst [vmem:[#allocation180_spill] sm:$0xff] %v5996_v32  ;;  %v675_v32 = vrot.slane %v5356_v59, 2 }
 0x1f2   : > { %1399 = vrot.lane.b32.xlu1 %v5747_v11, %s4496_s20  ;;  %1397 = vrot.lane.b32.xlu0 %v5750_v10, %s4496_s20 }
 0x1f4   : > { %v6002_v33 = vpop.permute.xlu1 %1211  ;;  %v6004_v58 = vpop.permute.xlu0 %1209 }
 0x1f5   : > { %8947 = vst [vmem:[#allocation181_spill] sm:$0xff] %v6002_v33  ;;  %8948 = vst [vmem:[#allocation182_spill] sm:$0xff] %v6004_v58  ;;  %v673_v33 = vrot.slane %v4829_v61, 2  ;;  %v672_v58 = vrot.slane %v4832_v54, 2 }
 0x1f6   : > { %1307 = vrot.lane.b32.xlu1 %v5747_v11, %s4495_s9  ;;  %1305 = vrot.lane.b32.xlu0 %v5750_v10, %s4495_s9 }
 0x1f7   : > { %v676_v10 = vsel %vm591_vm2, %v673_v33, %v675_v32 }
 0x1f8   : > { %v6010_v35 = vpop.permute.xlu1 %1215  ;;  %v6012_v40 = vpop.permute.xlu0 %1213 }
 0x1f9   : > { %8949 = vst [vmem:[#allocation183_spill] sm:$0xff] %v6010_v35  ;;  %8950 = vst [vmem:[#allocation184_spill] sm:$0xff] %v6012_v40  ;;  %v674_v40 = vsel %vm591_vm2, %v672_v58, %v673_v33 }
 0x1fa   : > { %1403 = vrot.lane.b32.xlu1 %v5764_v5, %s4496_s20  ;;  %1401 = vrot.lane.b32.xlu0 %v5767_v27, %s4496_s20 }
 0x1fc   : > { %v6021_v11 = vpop.permute.xlu1 %1219  ;;  %v6023_v26 = vpop.permute.xlu0 %1217 }
 0x1fd   : > { %8951 = vst [vmem:[#allocation185_spill] sm:$0xff] %v6021_v11  ;;  %8952 = vst [vmem:[#allocation186_spill] sm:$0xff] %v6023_v26 }
 0x1fe   : > { %1311 = vrot.lane.b32.xlu1 %v5764_v5, %s4495_s9  ;;  %1309 = vrot.lane.b32.xlu0 %v5767_v27, %s4495_s9 }
 0x200   : > { %v6031_v35 = vpop.permute.xlu1 %1255  ;;  %v6033_v61 = vpop.permute.xlu0 %1253 }
 0x202   : > { %1407 = vrot.lane.b32.xlu1 %v676_v10, %s4496_s20  ;;  %1405 = vrot.lane.b32.xlu0 %v674_v40, %s4496_s20 }
 0x204   : > { %v6037_v54 = vpop.permute.xlu1 %1259  ;;  %v6039_v59 = vpop.permute.xlu0 %1257 }
 0x206   : > { %1315 = vrot.lane.b32.xlu1 %v676_v10, %s4495_s9  ;;  %1313 = vrot.lane.b32.xlu0 %v674_v40, %s4495_s9 }
 0x208   : > { %v6043_v5 = vpop.permute.xlu1 %1263  ;;  %v6045_v27 = vpop.permute.xlu0 %1261 }
 0x20a   : > { %4476 = vrot.lane.b32.xlu0 %v5512_v4, %s4496_s20 }
 0x20c   : > { %v6049_v32 = vpop.permute.xlu1 %1267  ;;  %v6051_v33 = vpop.permute.xlu0 %1265 }
 0x210   : > { %v6053_v58 = vpop.permute.xlu1 %1271  ;;  %v6055_v26 = vpop.permute.xlu0 %1269 }
 0x214   : > { %v6057_v11 = vpop.permute.xlu1 %1275  ;;  %v6059_v10 = vpop.permute.xlu0 %1273 }
 0x218   : > { %v6061_v40 = vpop.permute.xlu1 %1279  ;;  %v6063_v44 = vpop.permute.xlu0 %1277 }
 0x21c   : > { %v6065_v46 = vpop.permute.xlu1 %1283  ;;  %v6067_v15 = vpop.permute.xlu0 %1281 }
 0x21d   : > { %8953 = vst [vmem:[#allocation187_spill] sm:$0xff] %v6065_v46  ;;  %8954 = vst [vmem:[#allocation188_spill] sm:$0xff] %v6067_v15 }
 0x220   : > { %v6069_v4 = vpop.permute.xlu1 %1287  ;;  %v6071_v48 = vpop.permute.xlu0 %1285 }
 0x221   : > { %8955 = vst [vmem:[#allocation189_spill] sm:$0xff] %v6069_v4  ;;  %8956 = vst [vmem:[#allocation190_spill] sm:$0xff] %v6071_v48  ;;  %v8964_v4 = vld [vmem:[#allocation33_spill] sm:$0xff] }
 0x224   : > { %v6073_v55 = vpop.permute.xlu1 %1291  ;;  %v6075_v43 = vpop.permute.xlu0 %1289 }
 0x225   : > { %8957 = vst [vmem:[#allocation191_spill] sm:$0xff] %v6073_v55  ;;  %8958 = vst [vmem:[#allocation192_spill] sm:$0xff] %v6075_v43  ;;  %v1447_v55 = vsel %vm1445_vm4, %v4541_v1, %v8964_v4  ;;  %v8965_v43 = vld [vmem:[#allocation31_spill] sm:$0xff]  ;;  %v1448_v4 = vsel %vm1445_vm4, %v4584_v21, %v8968_v9  ;;  %v8969_v1 = vunpack.i.h.bf16 %v8961_v37 }
 0x228   : > { %v6077_v0 = vpop.permute.xlu1 %1295  ;;  %v6079_v49 = vpop.permute.xlu0 %1293 }
 0x229   : > { %8959 = vst [vmem:[#allocation193_spill] sm:$0xff] %v6077_v0  ;;  %8960 = vst [vmem:[#allocation194_spill] sm:$0xff] %v6079_v49  ;;  %v1446_v0 = vsel %vm1445_vm4, %v4545_v2, %v8965_v43  ;;  %v8966_v49 = vld [vmem:[#allocation75_spill] sm:$0xff]  ;;  %v8970_v2 = vunpack.i.l.bf16 %v8961_v37 }
 0x22a   : > { %v1480_v48 = vsel %vm1478_vm5, %v1447_v55, %v8966_v49  ;;  %v1479_v52 = vsel %vm1478_vm5, %v1446_v0, %v8967_v41  ;;  %v8971_v0 = vld [vmem:[#allocation32_spill] sm:$0xff] }
 0x22b   : > { %v1513_v43 = vsel %vm1511_vm6, %v1480_v48, %v8969_v1  ;;  %v1512_v55 = vsel %vm1511_vm6, %v1479_v52, %v8970_v2  ;;  %v8972_v1 = vld [vmem:[#allocation77_spill] sm:$0xff] }
 0x22c   : > { %v6083_v46 = vpop.permute.xlu1 %1299  ;;  %v6085_v15 = vpop.permute.xlu0 %1297  ;;  %v1546_v21 = vsel %vm1544_vm7, %v1513_v43, %v5494_v39  ;;  %v1545_v9 = vsel %vm1544_vm7, %v1512_v55, %v5496_v17  ;;  %v8975_v17 = vunpack.i.l.bf16 %v5898_v34 }
 0x22d   : > { %8962 = vst [vmem:[#allocation195_spill] sm:$0xff] %v6083_v46  ;;  %8963 = vst [vmem:[#allocation196_spill] sm:$0xff] %v6085_v15  ;;  %v1449_v15 = vsel %vm1445_vm4, %v4598_v23, %v8971_v0  ;;  %v1579_v2 = vsel %vm1577_vm8, %v1546_v21, %v5755_v38  ;;  %v1578_v52 = vsel %vm1577_vm8, %v1545_v9, %v5757_v31  ;;  %v8973_v46 = vld [vmem:[#allocation78_spill] sm:$0xff]  ;;  %v8974_v0 = vunpack.i.h.bf16 %v5898_v34  ;;  %v8977_v38 = vld [vmem:[#allocation108_spill] sm:$0xff] }
 0x22e   : > { %v1482_v48 = vsel %vm1478_vm5, %v1449_v15, %v8972_v1  ;;  %v1481_v23 = vsel %vm1478_vm5, %v1448_v4, %v8973_v46  ;;  %v1611_v43 = vsel %vm1610_vm9, %v1578_v52, %v8975_v17  ;;  %v8976_v15 = vld [vmem:[#allocation107_spill] sm:$0xff] }
 0x22f   : > { %v1612_v39 = vsel %vm1610_vm9, %v1579_v2, %v8974_v0  ;;  %v1515_v55 = vsel %vm1511_vm6, %v1482_v48, %v8976_v15  ;;  %v1514_v21 = vsel %vm1511_vm6, %v1481_v23, %v8977_v38  ;;  %v1644_v46 = vsel %vm1643_vm10, %v1611_v43, %v6033_v61  ;;  %v8978_v0 = vld [vmem:[#allocation34_spill] sm:$0xff]  ;;  %v8981_v43 = vld [vmem:[#allocation80_spill] sm:$0xff] }
 0x230   : > { %v6108_v49 = vpop.permute.xlu1 %1303  ;;  %v6110_v41 = vpop.permute.xlu0 %1301  ;;  %v1645_v31 = vsel %vm1643_vm10, %v1612_v39, %v6031_v35  ;;  %v1548_v1 = vsel %vm1544_vm7, %v1515_v55, %v5504_v3  ;;  %v1547_v2 = vsel %vm1544_vm7, %v1514_v21, %v5506_v8  ;;  %v1451_v23 = vsel %vm1445_vm4, %v4593_v22, %v8978_v0  ;;  %v8979_v35 = vld [vmem:[#allocation35_spill] sm:$0xff] }
 0x231   : > { %v1450_v61 = vsel %vm1445_vm4, %v8861_v47, %v8979_v35  ;;  %v1581_v39 = vsel %vm1577_vm8, %v1548_v1, %v5769_v13  ;;  %v1580_v3 = vsel %vm1577_vm8, %v1547_v2, %v5771_v51  ;;  %v8980_v8 = vld [vmem:[#allocation79_spill] sm:$0xff]  ;;  %v8985_v2 = vld [vmem:[#allocation82_spill] sm:$0xff] }
 0x232   : > { %v1484_v17 = vsel %vm1478_vm5, %v1451_v23, %v8980_v8  ;;  %v1483_v15 = vsel %vm1478_vm5, %v1450_v61, %v8981_v43  ;;  %v1614_v22 = vsel %vm1610_vm9, %v1581_v39, %v5906_v50  ;;  %v1613_v47 = vsel %vm1610_vm9, %v1580_v3, %v5908_v56  ;;  %v8988_v8 = vld [vmem:[#allocation40_spill] sm:$0xff] }
 0x233   : > { %v1517_v13 = vsel %vm1511_vm6, %v1484_v17, %v5379_v30  ;;  %v1516_v51 = vsel %vm1511_vm6, %v1483_v15, %v5381_v25  ;;  %v1647_v55 = vsel %vm1643_vm10, %v1614_v22, %v6037_v54  ;;  %v1646_v38 = vsel %vm1643_vm10, %v1613_v47, %v6039_v59  ;;  %v8983_v54 = vld [vmem:[#allocation38_spill] sm:$0xff]  ;;  %v8991_v15 = vld [vmem:[#allocation7_spill] sm:$0xff] }
 0x234   : > { %v1352_v4 = vpop.permute.xlu1 %1351  ;;  %v1350_v9 = vpop.permute.xlu0 %1349  ;;  %v1550_v50 = vsel %vm1544_vm7, %v1517_v13, %v5517_v24  ;;  %v1549_v56 = vsel %vm1544_vm7, %v1516_v51, %v5519_v45  ;;  %v1452_v59 = vsel %vm1445_vm4, %v8864_v29, %v8983_v54  ;;  %v8984_v45 = vld [vmem:[#allocation81_spill] sm:$0xff]  ;;  %v8989_v17 = vld [vmem:[#allocation6_spill] sm:$0xff]  ;;  %v8994_v51 = vld [vmem:[#allocation83_spill] sm:$0xff] }
 0x235   : > { %v1678_v52 = vsel %vm1676_vm11, %v1645_v31, %v1352_v4  ;;  %v1677_v48 = vsel %vm1676_vm11, %v1644_v46, %v1350_v9  ;;  %v8982_v4 = vld [vmem:[#allocation37_spill] sm:$0xff]  ;;  %v1583_v9 = vsel %vm1577_vm8, %v1550_v50, %v5777_v7  ;;  %v1582_v24 = vsel %vm1577_vm8, %v1549_v56, %v5779_v12  ;;  %v8992_v22 = vld [vmem:[#allocation74_spill] sm:$0xff] }
 0x236   : > { %4315 = vmatprep.mubr.msk.f32.mxu0 %vm1721_vm12, %v1677_v48  ;;  %v1453_v25 = vsel %vm1445_vm4, %v4612_v28, %v8982_v4  ;;  %v1616_v28 = vsel %vm1610_vm9, %v1583_v9, %v5914_v60  ;;  %v1615_v29 = vsel %vm1610_vm9, %v1582_v24, %v5916_v62  ;;  %v8986_v12 = vld [vmem:[#allocation109_spill] sm:$0xff]  ;;  %v8987_v62 = vld [vmem:[#allocation36_spill] sm:$0xff]  ;;  %v1455_v43 = vsel %vm1445_vm4, %v8989_v17, %v8988_v8  ;;  %v8996_v56 = vld [vmem:[#allocation110_spill] sm:$0xff] }
 0x237   : > { %4316 = vmatmul.mubr.msk.f32.vlgmr.msra.gmra.mrb[0].mxu0 %vm1721_vm12, %v1678_v52  ;;  %v1486_v1 = vsel %vm1478_vm5, %v1453_v25, %v8984_v45  ;;  %v1485_v52 = vsel %vm1478_vm5, %v1452_v59, %v8985_v2  ;;  %v1649_v0 = vsel %vm1643_vm10, %v1616_v28, %v6043_v5  ;;  %v1648_v23 = vsel %vm1643_vm10, %v1615_v29, %v6045_v27  ;;  %v8990_v5 = vld [vmem:[#allocation41_spill] sm:$0xff]  ;;  %v9001_v28 = vld [vmem:[#allocation8_spill] sm:$0xff] }
 0x238   : > { %v1356_v21 = vpop.permute.xlu1 %1355  ;;  %v1354_v31 = vpop.permute.xlu0 %1353  ;;  %v1519_v7 = vsel %vm1511_vm6, %v1486_v1, %v5387_v36  ;;  %v1518_v48 = vsel %vm1511_vm6, %v1485_v52, %v8986_v12  ;;  %v1454_v27 = vsel %vm1445_vm4, %v8991_v15, %v8990_v5  ;;  %v8993_v13 = vld [vmem:[#allocation145_spill] sm:$0xff]  ;;  %v9000_v52 = vld [vmem:[#allocation43_spill] sm:$0xff]  ;;  %v9004_v12 = vld [vmem:[#allocation146_spill] sm:$0xff] }
 0x239   : > { %v1680_v46 = vsel %vm1676_vm11, %v1647_v55, %v1356_v21  ;;  %v1679_v30 = vsel %vm1676_vm11, %v1646_v38, %v1354_v31  ;;  %v1552_v60 = vsel %vm1544_vm7, %v1519_v7, %v5534_v63  ;;  %v1551_v39 = vsel %vm1544_vm7, %v1518_v48, %v8987_v62  ;;  %v8995_v38 = vld [vmem:[#allocation84_spill] sm:$0xff]  ;;  %v9003_v7 = vld [vmem:[#allocation9_spill] sm:$0xff] }
 0x23a   : > { %4318 = vmatprep.mubr.msk.f32.mxu0 %vm1721_vm12, %v1679_v30  ;;  %v1585_v47 = vsel %vm1577_vm8, %v1552_v60, %v8992_v22  ;;  %v1584_v63 = vsel %vm1577_vm8, %v1551_v39, %v8993_v13  ;;  %v1488_v55 = vsel %vm1478_vm5, %v1455_v43, %v8994_v51  ;;  %v1487_v21 = vsel %vm1478_vm5, %v1454_v27, %v8995_v38  ;;  %v8997_v30 = vld [vmem:[#allocation111_spill] sm:$0xff]  ;;  %v9007_v60 = vld [vmem:[#allocation86_spill] sm:$0xff]  ;;  %v9009_v17 = vld [vmem:[#allocation113_spill] sm:$0xff] }
 0x23b   : > { %4319 = vmatmul.mubr.msk.f32.gmra.mrb[2].mxu0 %vm1721_vm12, %v1680_v46  ;;  %v1618_v31 = vsel %vm1610_vm9, %v1585_v47, %v5922_v16  ;;  %v1617_v50 = vsel %vm1610_vm9, %v1584_v63, %v5924_v57  ;;  %v1521_v46 = vsel %vm1511_vm6, %v1488_v55, %v8996_v56  ;;  %v1520_v4 = vsel %vm1511_vm6, %v1487_v21, %v8997_v30  ;;  %v8998_v16 = vld [vmem:[#allocation4_spill] sm:$0xff]  ;;  %v8999_v57 = vld [vmem:[#allocation39_spill] sm:$0xff]  ;;  %v9012_v55 = vld [vmem:[#allocation46_spill] sm:$0xff] }
 0x23c   : > { %v1360_v35 = vpop.permute.xlu1 %1359  ;;  %v1358_v61 = vpop.permute.xlu0 %1357  ;;  %v1651_v25 = vsel %vm1643_vm10, %v1618_v31, %v6049_v32  ;;  %v1650_v54 = vsel %vm1643_vm10, %v1617_v50, %v6051_v33  ;;  %v1554_v24 = vsel %vm1544_vm7, %v1521_v46, %v8998_v16  ;;  %v1553_v45 = vsel %vm1544_vm7, %v1520_v4, %v8999_v57  ;;  %v9002_v32 = vld [vmem:[#allocation44_spill] sm:$0xff]  ;;  %v9013_v38 = vld [vmem:[#allocation10_spill] sm:$0xff]  ;;  %v9015_v31 = vld [vmem:[#allocation11_spill] sm:$0xff] }
 0x23d   : > { %v1682_v3 = vsel %vm1676_vm11, %v1649_v0, %v1360_v35  ;;  %v1681_v36 = vsel %vm1676_vm11, %v1648_v23, %v1358_v61  ;;  %v1457_v29 = vsel %vm1445_vm4, %v9001_v28, %v9000_v52  ;;  %v1456_v33 = vsel %vm1445_vm4, %v9003_v7, %v9002_v32  ;;  %v9005_v0 = vld [vmem:[#allocation147_spill] sm:$0xff]  ;;  %v9006_v35 = vld [vmem:[#allocation85_spill] sm:$0xff]  ;;  %v9016_v50 = vld [vmem:[#allocation148_spill] sm:$0xff] }
 0x23e   : > { %4321 = vmatprep.mubr.msk.f32.mxu0 %vm1721_vm12, %v1681_v36  ;;  %v1587_v48 = vsel %vm1577_vm8, %v1554_v24, %v9004_v12  ;;  %v1586_v23 = vsel %vm1577_vm8, %v1553_v45, %v9005_v0  ;;  %v1490_v61 = vsel %vm1478_vm5, %v1457_v29, %v9006_v35  ;;  %v1489_v62 = vsel %vm1478_vm5, %v1456_v33, %v9007_v60  ;;  %v9008_v36 = vld [vmem:[#allocation112_spill] sm:$0xff]  ;;  %v9017_v46 = vld [vmem:[#allocation149_spill] sm:$0xff]  ;;  %v9018_v4 = vld [vmem:[#allocation87_spill] sm:$0xff] }
 0x23f   : > { %4322 = vmatmul.mubr.msk.f32.gmra.mrb[4].mxu0 %vm1721_vm12, %v1682_v3  ;;  %v1620_v39 = vsel %vm1610_vm9, %v1587_v48, %v5930_v6  ;;  %v1619_v3 = vsel %vm1610_vm9, %v1586_v23, %v5932_v14  ;;  %v1523_v8 = vsel %vm1511_vm6, %v1490_v61, %v9008_v36  ;;  %v1522_v43 = vsel %vm1511_vm6, %v1489_v62, %v9009_v17  ;;  %v9010_v6 = vld [vmem:[#allocation5_spill] sm:$0xff]  ;;  %v9011_v14 = vld [vmem:[#allocation42_spill] sm:$0xff]  ;;  %v9021_v45 = vld [vmem:[#allocation115_spill] sm:$0xff] }
 0x240   : > { %v1364_v59 = vpop.permute.xlu1 %1363  ;;  %v1362_v9 = vpop.permute.xlu0 %1361  ;;  %v1653_v5 = vsel %vm1643_vm10, %v1620_v39, %v6053_v58  ;;  %v1652_v15 = vsel %vm1643_vm10, %v1619_v3, %v6055_v26  ;;  %v1556_v47 = vsel %vm1544_vm7, %v1523_v8, %v9010_v6  ;;  %v1555_v13 = vsel %vm1544_vm7, %v1522_v43, %v9011_v14  ;;  %v9014_v58 = vld [vmem:[#allocation47_spill] sm:$0xff]  ;;  %v9020_v24 = vld [vmem:[#allocation114_spill] sm:$0xff]  ;;  %v9024_v48 = vld [vmem:[#allocation49_spill] sm:$0xff] }
 0x241   : > { %v1684_v1 = vsel %vm1676_vm11, %v1651_v25, %v1364_v59  ;;  %v1683_v2 = vsel %vm1676_vm11, %v1650_v54, %v1362_v9  ;;  %v1459_v21 = vsel %vm1445_vm4, %v9013_v38, %v9012_v55  ;;  %v1458_v26 = vsel %vm1445_vm4, %v9015_v31, %v9014_v58  ;;  %v9019_v54 = vld [vmem:[#allocation88_spill] sm:$0xff]  ;;  %v9027_v35 = vld [vmem:[#allocation13_spill] sm:$0xff]  ;;  %v9028_v61 = vld [vmem:[#allocation150_spill] sm:$0xff] }
 0x242   : > { %4324 = vmatprep.mubr.msk.f32.mxu0 %vm1721_vm12, %v1683_v2  ;;  %v1589_v56 = vsel %vm1577_vm8, %v1556_v47, %v9016_v50  ;;  %v1588_v30 = vsel %vm1577_vm8, %v1555_v13, %v9017_v46  ;;  %v1492_v25 = vsel %vm1478_vm5, %v1459_v21, %v9018_v4  ;;  %v1491_v59 = vsel %vm1478_vm5, %v1458_v26, %v9019_v54  ;;  %v9025_v0 = vld [vmem:[#allocation12_spill] sm:$0xff]  ;;  %v9029_v62 = vld [vmem:[#allocation151_spill] sm:$0xff]  ;;  %v9030_v3 = vld [vmem:[#allocation89_spill] sm:$0xff] }
 0x243   : > { %4325 = vmatmul.mubr.msk.f32.gmra.mrb[6].mxu0 %vm1721_vm12, %v1684_v1  ;;  %v1622_v9 = vsel %vm1610_vm9, %v1589_v56, %v5938_v53  ;;  %v1621_v16 = vsel %vm1610_vm9, %v1588_v30, %v5940_v42  ;;  %v1525_v57 = vsel %vm1511_vm6, %v1492_v25, %v9020_v24  ;;  %v1524_v1 = vsel %vm1511_vm6, %v1491_v59, %v9021_v45  ;;  %v9022_v53 = vld [vmem:[#allocation45_spill] sm:$0xff]  ;;  %v9023_v42 = vld [vmem:[#allocation134_spill] sm:$0xff]  ;;  %v9039_v50 = vld [vmem:[#allocation15_spill] sm:$0xff] }
 0x244   : > { %v1368_v27 = vpop.permute.xlu1 %1367  ;;  %v1366_v22 = vpop.permute.xlu0 %1365  ;;  %v1655_v2 = vsel %vm1643_vm10, %v1622_v9, %v6057_v11  ;;  %v1654_v52 = vsel %vm1643_vm10, %v1621_v16, %v6059_v10  ;;  %v1558_v32 = vsel %vm1544_vm7, %v1525_v57, %v9022_v53  ;;  %v1557_v7 = vsel %vm1544_vm7, %v1524_v1, %v9023_v42  ;;  %v9026_v11 = vld [vmem:[#allocation50_spill] sm:$0xff]  ;;  %v9036_v58 = vld [vmem:[#allocation53_spill] sm:$0xff]  ;;  %v9040_v56 = vld [vmem:[#allocation152_spill] sm:$0xff] }
 0x245   : > { %v1686_v63 = vsel %vm1676_vm11, %v1653_v5, %v1368_v27  ;;  %v1685_v51 = vsel %vm1676_vm11, %v1652_v15, %v1366_v22  ;;  %v1461_v23 = vsel %vm1445_vm4, %v9025_v0, %v9024_v48  ;;  %v1460_v10 = vsel %vm1445_vm4, %v9027_v35, %v9026_v11  ;;  %v9031_v8 = vld [vmem:[#allocation90_spill] sm:$0xff]  ;;  %v9032_v15 = vld [vmem:[#allocation116_spill] sm:$0xff]  ;;  %v9033_v22 = vld [vmem:[#allocation117_spill] sm:$0xff] }
 0x246   : > { %4327 = vmatprep.mubr.msk.f32.mxu0 %vm1721_vm12, %v1685_v51  ;;  %v1591_v60 = vsel %vm1577_vm8, %v1558_v32, %v9028_v61  ;;  %v1590_v39 = vsel %vm1577_vm8, %v1557_v7, %v9029_v62  ;;  %v1494_v36 = vsel %vm1478_vm5, %v1461_v23, %v9030_v3  ;;  %v1493_v17 = vsel %vm1478_vm5, %v1460_v10, %v9031_v8  ;;  %v9037_v31 = vld [vmem:[#allocation14_spill] sm:$0xff]  ;;  %v9041_v30 = vld [vmem:[#allocation153_spill] sm:$0xff]  ;;  %v9042_v25 = vld [vmem:[#allocation91_spill] sm:$0xff] }
 0x247   : > { %4328 = vmatmul.mubr.msk.f32.gmra.mrb[8].mxu0 %vm1721_vm12, %v1686_v63  ;;  %v1624_v43 = vsel %vm1610_vm9, %v1591_v60, %v5946_v19  ;;  %v1623_v5 = vsel %vm1610_vm9, %v1590_v39, %v5948_v18  ;;  %v1527_v27 = vsel %vm1511_vm6, %v1494_v36, %v9032_v15  ;;  %v1526_v6 = vsel %vm1511_vm6, %v1493_v17, %v9033_v22  ;;  %v9034_v19 = vld [vmem:[#allocation48_spill] sm:$0xff]  ;;  %v9035_v18 = vld [vmem:[#allocation135_spill] sm:$0xff]  ;;  %v9044_v24 = vld [vmem:[#allocation170_spill] sm:$0xff] }
 0x248   : > { %v1372_v28 = vpop.permute.xlu1 %1371  ;;  %v1370_v29 = vpop.permute.xlu0 %1369  ;;  %v1657_v47 = vsel %vm1643_vm10, %v1624_v43, %v6061_v40  ;;  %v1656_v14 = vsel %vm1643_vm10, %v1623_v5, %v6063_v44  ;;  %v1560_v51 = vsel %vm1544_vm7, %v1527_v27, %v9034_v19  ;;  %v1559_v55 = vsel %vm1544_vm7, %v1526_v6, %v9035_v18  ;;  %v9038_v40 = vld [vmem:[#allocation54_spill] sm:$0xff]  ;;  %v9043_v59 = vld [vmem:[#allocation92_spill] sm:$0xff]  ;;  %v9051_v11 = vld [vmem:[#allocation55_spill] sm:$0xff] }
 0x249   : > { %v1688_v33 = vsel %vm1676_vm11, %v1655_v2, %v1372_v28  ;;  %v1687_v12 = vsel %vm1676_vm11, %v1654_v52, %v1370_v29  ;;  %v1463_v26 = vsel %vm1445_vm4, %v9037_v31, %v9036_v58  ;;  %v1462_v44 = vsel %vm1445_vm4, %v9039_v50, %v9038_v40  ;;  %v9045_v45 = vld [vmem:[#allocation118_spill] sm:$0xff]  ;;  %v9046_v2 = vld [vmem:[#allocation119_spill] sm:$0xff]  ;;  %v9048_v53 = vld [vmem:[#allocation188_spill] sm:$0xff] }
 0x24a   : > { %4330 = vmatprep.mubr.msk.f32.mxu0 %vm1721_vm12, %v1687_v12  ;;  %v1593_v46 = vsel %vm1577_vm8, %v1560_v51, %v9040_v56  ;;  %v1592_v4 = vsel %vm1577_vm8, %v1559_v55, %v9041_v30  ;;  %v1496_v54 = vsel %vm1478_vm5, %v1463_v26, %v9042_v25  ;;  %v1495_v9 = vsel %vm1478_vm5, %v1462_v44, %v9043_v59  ;;  %v9047_v28 = vld [vmem:[#allocation187_spill] sm:$0xff]  ;;  %v9050_v12 = vld [vmem:[#allocation136_spill] sm:$0xff]  ;;  %v9054_v60 = vld [vmem:[#allocation17_spill] sm:$0xff] }
 0x24b   : > { %4331 = vmatmul.mubr.msk.f32.gmra.mrb[10].mxu0 %vm1721_vm12, %v1688_v33  ;;  %v1626_v16 = vsel %vm1610_vm9, %v1593_v46, %v5954_v20  ;;  %v1625_v57 = vsel %vm1610_vm9, %v1592_v4, %v9044_v24  ;;  %v1529_v1 = vsel %vm1511_vm6, %v1496_v54, %v9045_v45  ;;  %v1528_v52 = vsel %vm1511_vm6, %v1495_v9, %v9046_v2  ;;  %v9049_v20 = vld [vmem:[#allocation51_spill] sm:$0xff]  ;;  %v9052_v35 = vld [vmem:[#allocation16_spill] sm:$0xff]  ;;  %v9055_v39 = vld [vmem:[#allocation154_spill] sm:$0xff] }
 0x24c   : > { %v1376_v13 = vpop.permute.xlu1 %1375  ;;  %v1374_v63 = vpop.permute.xlu0 %1373  ;;  %v1659_v29 = vsel %vm1643_vm10, %v1626_v16, %v9047_v28  ;;  %v1658_v32 = vsel %vm1643_vm10, %v1625_v57, %v9048_v53  ;;  %v1562_v33 = vsel %vm1544_vm7, %v1529_v1, %v9049_v20  ;;  %v1561_v48 = vsel %vm1544_vm7, %v1528_v52, %v9050_v12  ;;  %v9053_v61 = vld [vmem:[#allocation56_spill] sm:$0xff]  ;;  %v9056_v36 = vld [vmem:[#allocation155_spill] sm:$0xff]  ;;  %v9057_v17 = vld [vmem:[#allocation93_spill] sm:$0xff] }
 0x24d   : > { %v1690_v38 = vsel %vm1676_vm11, %v1657_v47, %v1376_v13  ;;  %v1689_v21 = vsel %vm1676_vm11, %v1656_v14, %v1374_v63  ;;  %v1465_v10 = vsel %vm1445_vm4, %v9052_v35, %v9051_v11  ;;  %v1464_v62 = vsel %vm1445_vm4, %v9054_v60, %v9053_v61  ;;  %v9058_v5 = vld [vmem:[#allocation94_spill] sm:$0xff]  ;;  %v9059_v27 = vld [vmem:[#allocation171_spill] sm:$0xff]  ;;  %v9060_v6 = vld [vmem:[#allocation172_spill] sm:$0xff] }
 0x24e   : > { %4333 = vmatprep.mubr.msk.f32.mxu0 %vm1721_vm12, %v1689_v21  ;;  %v1595_v3 = vsel %vm1577_vm8, %v1562_v33, %v9055_v39  ;;  %v1594_v8 = vsel %vm1577_vm8, %v1561_v48, %v9056_v36  ;;  %v1498_v43 = vsel %vm1478_vm5, %v1465_v10, %v9057_v17  ;;  %v1497_v15 = vsel %vm1478_vm5, %v1464_v62, %v9058_v5  ;;  %v9061_v14 = vld [vmem:[#allocation120_spill] sm:$0xff]  ;;  %v9062_v63 = vld [vmem:[#allocation121_spill] sm:$0xff]  ;;  %v9064_v55 = vld [vmem:[#allocation190_spill] sm:$0xff] }
 0x24f   : > { %4334 = vmatmul.mubr.msk.f32.gmra.mrb[12].mxu0 %vm1721_vm12, %v1690_v38  ;;  %v1628_v22 = vsel %vm1610_vm9, %v1595_v3, %v9059_v27  ;;  %v1627_v47 = vsel %vm1610_vm9, %v1594_v8, %v9060_v6  ;;  %v1531_v13 = vsel %vm1511_vm6, %v1498_v43, %v9061_v14  ;;  %v1530_v19 = vsel %vm1511_vm6, %v1497_v15, %v9062_v63  ;;  %v9063_v51 = vld [vmem:[#allocation189_spill] sm:$0xff]  ;;  %v9065_v31 = vld [vmem:[#allocation52_spill] sm:$0xff]  ;;  %v9067_v46 = vld [vmem:[#allocation59_spill] sm:$0xff] }
 0x250   : > { %v1380_v42 = vpop.permute.xlu1 %1379  ;;  %v1378_v7 = vpop.permute.xlu0 %1377  ;;  %v1661_v18 = vsel %vm1643_vm10, %v1628_v22, %v9063_v51  ;;  %v1660_v38 = vsel %vm1643_vm10, %v1627_v47, %v9064_v55  ;;  %v1564_v26 = vsel %vm1544_vm7, %v1531_v13, %v9065_v31  ;;  %v9066_v40 = vld [vmem:[#allocation137_spill] sm:$0xff]  ;;  %v9068_v30 = vld [vmem:[#allocation18_spill] sm:$0xff]  ;;  %v9069_v25 = vld [vmem:[#allocation60_spill] sm:$0xff] }
 0x251   : > { %v1692_v0 = vsel %vm1676_vm11, %v1659_v29, %v1380_v42  ;;  %v1691_v23 = vsel %vm1676_vm11, %v1658_v32, %v1378_v7  ;;  %v1563_v50 = vsel %vm1544_vm7, %v1530_v19, %v9066_v40  ;;  %v1467_v4 = vsel %vm1445_vm4, %v9068_v30, %v9067_v46  ;;  %v9070_v54 = vld [vmem:[#allocation19_spill] sm:$0xff]  ;;  %v9071_v9 = vld [vmem:[#allocation156_spill] sm:$0xff]  ;;  %v9072_v24 = vld [vmem:[#allocation157_spill] sm:$0xff] }
 0x252   : > { %4336 = vmatprep.mubr.msk.f32.mxu0 %vm1721_vm12, %v1691_v23  ;;  %v1466_v59 = vsel %vm1445_vm4, %v9070_v54, %v9069_v25  ;;  %v1597_v16 = vsel %vm1577_vm8, %v1564_v26, %v9071_v9  ;;  %v1596_v57 = vsel %vm1577_vm8, %v1563_v50, %v9072_v24  ;;  %v9073_v45 = vld [vmem:[#allocation95_spill] sm:$0xff]  ;;  %v9074_v2 = vld [vmem:[#allocation96_spill] sm:$0xff]  ;;  %v9075_v28 = vld [vmem:[#allocation173_spill] sm:$0xff] }
 0x253   : > { %4337 = vmatmul.mubr.msk.f32.gmra.mrb[14].mxu0 %vm1721_vm12, %v1692_v0  ;;  %v1500_v1 = vsel %vm1478_vm5, %v1467_v4, %v9073_v45  ;;  %v1499_v52 = vsel %vm1478_vm5, %v1466_v59, %v9074_v2  ;;  %v1630_v29 = vsel %vm1610_vm9, %v1597_v16, %v9075_v28  ;;  %v9076_v53 = vld [vmem:[#allocation174_spill] sm:$0xff]  ;;  %v9078_v20 = vld [vmem:[#allocation123_spill] sm:$0xff]  ;;  %v9080_v0 = vld [vmem:[#allocation192_spill] sm:$0xff] }
 0x254   : > { %v1384_v21 = vpop.permute.xlu1 %1383  ;;  %v1382_v58 = vpop.permute.xlu0 %1381  ;;  %v1629_v32 = vsel %vm1610_vm9, %v1596_v57, %v9076_v53  ;;  %v9077_v42 = vld [vmem:[#allocation122_spill] sm:$0xff]  ;;  %v1532_v33 = vsel %vm1511_vm6, %v1499_v52, %v9078_v20  ;;  %v9079_v12 = vld [vmem:[#allocation191_spill] sm:$0xff]  ;;  %v9081_v10 = vld [vmem:[#allocation57_spill] sm:$0xff] }
 0x255   : > { %v1694_v44 = vsel %vm1676_vm11, %v1661_v18, %v1384_v21  ;;  %v1693_v56 = vsel %vm1676_vm11, %v1660_v38, %v1382_v58  ;;  %v1533_v7 = vsel %vm1511_vm6, %v1500_v1, %v9077_v42  ;;  %v1663_v48 = vsel %vm1643_vm10, %v1630_v29, %v9079_v12  ;;  %v9082_v60 = vld [vmem:[#allocation138_spill] sm:$0xff]  ;;  %v9083_v36 = vld [vmem:[#allocation61_spill] sm:$0xff]  ;;  %v9084_v8 = vld [vmem:[#allocation20_spill] sm:$0xff] }
 0x256   : > { %4339 = vmatprep.mubr.msk.f32.mxu0 %vm1721_vm12, %v1693_v56  ;;  %v1662_v23 = vsel %vm1643_vm10, %v1629_v32, %v9080_v0  ;;  %v1566_v61 = vsel %vm1544_vm7, %v1533_v7, %v9081_v10  ;;  %v1565_v62 = vsel %vm1544_vm7, %v1532_v33, %v9082_v60  ;;  %v1469_v17 = vsel %vm1445_vm4, %v9084_v8, %v9083_v36  ;;  %v9085_v43 = vld [vmem:[#allocation62_spill] sm:$0xff]  ;;  %v9086_v5 = vld [vmem:[#allocation21_spill] sm:$0xff]  ;;  %v9088_v6 = vld [vmem:[#allocation159_spill] sm:$0xff] }
 0x257   : > { %4340 = vmatmul.mubr.msk.f32.gmra.mrb[16].mxu0 %vm1721_vm12, %v1694_v44  ;;  %v1468_v15 = vsel %vm1445_vm4, %v9086_v5, %v9085_v43  ;;  %v9087_v27 = vld [vmem:[#allocation158_spill] sm:$0xff]  ;;  %v1598_v47 = vsel %vm1577_vm8, %v1565_v62, %v9088_v6  ;;  %v9089_v14 = vld [vmem:[#allocation97_spill] sm:$0xff]  ;;  %v9091_v51 = vld [vmem:[#allocation175_spill] sm:$0xff] }
 0x258   : > { %v1388_v11 = vpop.permute.xlu1 %1387  ;;  %v1386_v35 = vpop.permute.xlu0 %1385  ;;  %v1599_v22 = vsel %vm1577_vm8, %v1566_v61, %v9087_v27  ;;  %v1502_v13 = vsel %vm1478_vm5, %v1469_v17, %v9089_v14  ;;  %v9090_v63 = vld [vmem:[#allocation98_spill] sm:$0xff]  ;;  %v9092_v55 = vld [vmem:[#allocation176_spill] sm:$0xff]  ;;  %v9094_v31 = vld [vmem:[#allocation125_spill] sm:$0xff] }
 0x259   : > { %v1696_v39 = vsel %vm1676_vm11, %v1663_v48, %v1388_v11  ;;  %v1695_v3 = vsel %vm1676_vm11, %v1662_v23, %v1386_v35  ;;  %v1501_v19 = vsel %vm1478_vm5, %v1468_v15, %v9090_v63  ;;  %v1632_v18 = vsel %vm1610_vm9, %v1599_v22, %v9091_v51  ;;  %v9093_v21 = vld [vmem:[#allocation124_spill] sm:$0xff]  ;;  %v9095_v40 = vld [vmem:[#allocation193_spill] sm:$0xff]  ;;  %v9096_v44 = vld [vmem:[#allocation194_spill] sm:$0xff] }
 0x25a   : > { %4342 = vmatprep.mubr.msk.f32.mxu0 %vm1721_vm12, %v1695_v3  ;;  %v1631_v38 = vsel %vm1610_vm9, %v1598_v47, %v9092_v55  ;;  %v1535_v58 = vsel %vm1511_vm6, %v1502_v13, %v9093_v21  ;;  %v1534_v26 = vsel %vm1511_vm6, %v1501_v19, %v9094_v31  ;;  %v1665_v50 = vsel %vm1643_vm10, %v1632_v18, %v9095_v40  ;;  %v9097_v4 = vld [vmem:[#allocation58_spill] sm:$0xff]  ;;  %v9098_v54 = vld [vmem:[#allocation139_spill] sm:$0xff]  ;;  %v9099_v24 = vld [vmem:[#allocation65_spill] sm:$0xff] }
 0x25b   : > { %4343 = vmatmul.mubr.msk.f32.gmra.mrb[18].mxu0 %vm1721_vm12, %v1696_v39  ;;  %v1664_v56 = vsel %vm1643_vm10, %v1631_v38, %v9096_v44  ;;  %v1568_v25 = vsel %vm1544_vm7, %v1535_v58, %v9097_v4  ;;  %v1567_v59 = vsel %vm1544_vm7, %v1534_v26, %v9098_v54  ;;  %v9100_v57 = vld [vmem:[#allocation22_spill] sm:$0xff]  ;;  %v9102_v2 = vld [vmem:[#allocation23_spill] sm:$0xff]  ;;  %v9103_v28 = vld [vmem:[#allocation160_spill] sm:$0xff] }
 0x25c   : > { %v1392_v46 = vpop.permute.xlu1 %1391  ;;  %v1390_v30 = vpop.permute.xlu0 %1389  ;;  %v1471_v45 = vsel %vm1445_vm4, %v9100_v57, %v9099_v24  ;;  %v9101_v1 = vld [vmem:[#allocation66_spill] sm:$0xff]  ;;  %v1601_v29 = vsel %vm1577_vm8, %v1568_v25, %v9103_v28  ;;  %v9104_v53 = vld [vmem:[#allocation161_spill] sm:$0xff]  ;;  %v9105_v42 = vld [vmem:[#allocation99_spill] sm:$0xff] }
 0x25d   : > { %v1698_v9 = vsel %vm1676_vm11, %v1665_v50, %v1392_v46  ;;  %v1697_v16 = vsel %vm1676_vm11, %v1664_v56, %v1390_v30  ;;  %v1470_v52 = vsel %vm1445_vm4, %v9102_v2, %v9101_v1  ;;  %v1600_v32 = vsel %vm1577_vm8, %v1567_v59, %v9104_v53  ;;  %v9106_v20 = vld [vmem:[#allocation100_spill] sm:$0xff]  ;;  %v9107_v12 = vld [vmem:[#allocation177_spill] sm:$0xff]  ;;  %v9108_v0 = vld [vmem:[#allocation178_spill] sm:$0xff] }
 0x25e   : > { %4345 = vmatprep.mubr.msk.f32.mxu0 %vm1721_vm12, %v1697_v16  ;;  %v1504_v7 = vsel %vm1478_vm5, %v1471_v45, %v9105_v42  ;;  %v1503_v33 = vsel %vm1478_vm5, %v1470_v52, %v9106_v20  ;;  %v1634_v48 = vsel %vm1610_vm9, %v1601_v29, %v9107_v12  ;;  %v1633_v23 = vsel %vm1610_vm9, %v1600_v32, %v9108_v0  ;;  %v9109_v11 = vld [vmem:[#allocation126_spill] sm:$0xff]  ;;  %v9110_v10 = vld [vmem:[#allocation127_spill] sm:$0xff]  ;;  %v9112_v39 = vld [vmem:[#allocation196_spill] sm:$0xff] }
 0x25f   : > { %4346 = vmatmul.mubr.msk.f32.gmra.mrb[20].mxu0 %vm1721_vm12, %v1698_v9  ;;  %v1537_v35 = vsel %vm1511_vm6, %v1504_v7, %v9109_v11  ;;  %v1536_v61 = vsel %vm1511_vm6, %v1503_v33, %v9110_v10  ;;  %v9111_v60 = vld [vmem:[#allocation195_spill] sm:$0xff]  ;;  %v1666_v3 = vsel %vm1643_vm10, %v1633_v23, %v9112_v39  ;;  %v9114_v5 = vld [vmem:[#allocation140_spill] sm:$0xff]  ;;  %v9115_v6 = vld [vmem:[#allocation162_spill] sm:$0xff] }
 0x260   : > { %v1667_v62 = vsel %vm1643_vm10, %v1634_v48, %v9111_v60  ;;  %v1396_v36 = vpop.permute.xlu1 %1395  ;;  %v1394_v8 = vpop.permute.xlu0 %1393  ;;  %v9113_v17 = vld [vmem:[#allocation63_spill] sm:$0xff]  ;;  %v1569_v15 = vsel %vm1544_vm7, %v1536_v61, %v9114_v5  ;;  %v9118_v51 = vld [vmem:[#allocation180_spill] sm:$0xff]  ;;  %v9122_v46 = vld [vmem:[#allocation25_spill] sm:$0xff] }
 0x261   : > { %v1570_v43 = vsel %vm1544_vm7, %v1537_v35, %v9113_v17  ;;  %v1700_v27 = vsel %vm1676_vm11, %v1667_v62, %v1396_v36  ;;  %v1699_v22 = vsel %vm1676_vm11, %v1666_v3, %v1394_v8  ;;  %v9116_v14 = vld [vmem:[#allocation163_spill] sm:$0xff]  ;;  %v9120_v50 = vld [vmem:[#allocation24_spill] sm:$0xff]  ;;  %v9126_v9 = vld [vmem:[#allocation129_spill] sm:$0xff] }
 0x262   : > { %v1603_v47 = vsel %vm1577_vm8, %v1570_v43, %v9115_v6  ;;  %v1602_v13 = vsel %vm1577_vm8, %v1569_v15, %v9116_v14  ;;  %4348 = vmatprep.mubr.msk.f32.mxu0 %vm1721_vm12, %v1699_v22  ;;  %v9117_v63 = vld [vmem:[#allocation179_spill] sm:$0xff]  ;;  %v9121_v56 = vld [vmem:[#allocation68_spill] sm:$0xff]  ;;  %v9128_v2 = vld [vmem:[#allocation141_spill] sm:$0xff] }
 0x263   : > { %v1636_v19 = vsel %vm1610_vm9, %v1603_v47, %v9117_v63  ;;  %v1635_v18 = vsel %vm1610_vm9, %v1602_v13, %v9118_v51  ;;  %4349 = vmatmul.mubr.msk.f32.gmra.mrb[22].mxu0 %vm1721_vm12, %v1700_v27  ;;  %v9119_v40 = vld [vmem:[#allocation67_spill] sm:$0xff]  ;;  %v1472_v30 = vsel %vm1445_vm4, %v9122_v46, %v9121_v56  ;;  %v9125_v54 = vld [vmem:[#allocation128_spill] sm:$0xff]  ;;  %v9130_v53 = vld [vmem:[#allocation165_spill] sm:$0xff] }
 0x264   : > { %v1669_v55 = vsel %vm1643_vm10, %v1636_v19, %v6108_v49  ;;  %v1668_v38 = vsel %vm1643_vm10, %v1635_v18, %v6110_v41  ;;  %v1400_v21 = vpop.permute.xlu1 %1399  ;;  %v1398_v58 = vpop.permute.xlu0 %1397  ;;  %v1473_v44 = vsel %vm1445_vm4, %v9120_v50, %v9119_v40  ;;  %v9123_v49 = vld [vmem:[#allocation101_spill] sm:$0xff]  ;;  %v9124_v41 = vld [vmem:[#allocation102_spill] sm:$0xff]  ;;  %v9127_v45 = vld [vmem:[#allocation64_spill] sm:$0xff] }
 0x265   : > { %v1702_v31 = vsel %vm1676_vm11, %v1669_v55, %v1400_v21  ;;  %v1701_v26 = vsel %vm1676_vm11, %v1668_v38, %v1398_v58  ;;  %v1506_v4 = vsel %vm1478_vm5, %v1473_v44, %v9123_v49  ;;  %v1505_v25 = vsel %vm1478_vm5, %v1472_v30, %v9124_v41  ;;  %v9129_v28 = vld [vmem:[#allocation164_spill] sm:$0xff]  ;;  %v9131_v42 = vld [vmem:[#allocation181_spill] sm:$0xff]  ;;  %v9132_v20 = vld [vmem:[#allocation182_spill] sm:$0xff] }
 0x266   : > { %4351 = vmatprep.mubr.msk.f32.mxu0 %vm1721_vm12, %v1701_v26  ;;  %v1539_v59 = vsel %vm1511_vm6, %v1506_v4, %v9125_v54  ;;  %v1538_v16 = vsel %vm1511_vm6, %v1505_v25, %v9126_v9  ;;  %v9133_v10 = vld [vmem:[#allocation70_spill] sm:$0xff]  ;;  %v9135_v62 = vld [vmem:[#allocation71_spill] sm:$0xff]  ;;  %v9138_v17 = vld [vmem:[#allocation104_spill] sm:$0xff] }
 0x267   : > { %4352 = vmatmul.mubr.msk.f32.gmra.mrb[24].mxu0 %vm1721_vm12, %v1702_v31  ;;  %v1572_v1 = vsel %vm1544_vm7, %v1539_v59, %v9127_v45  ;;  %v1571_v52 = vsel %vm1544_vm7, %v1538_v16, %v9128_v2  ;;  %v9134_v61 = vld [vmem:[#allocation26_spill] sm:$0xff]  ;;  %v9136_v39 = vld [vmem:[#allocation27_spill] sm:$0xff]  ;;  %v9141_v14 = vld [vmem:[#allocation69_spill] sm:$0xff] }
 0x268   : > { %v1308_v24 = vpop.permute.xlu1 %1307  ;;  %v1306_v57 = vpop.permute.xlu0 %1305  ;;  %v1605_v29 = vsel %vm1577_vm8, %v1572_v1, %v9129_v28  ;;  %v1604_v32 = vsel %vm1577_vm8, %v1571_v52, %v9130_v53  ;;  %v1475_v60 = vsel %vm1445_vm4, %v9134_v61, %v9133_v10  ;;  %v1474_v3 = vsel %vm1445_vm4, %v9136_v39, %v9135_v62  ;;  %v9137_v36 = vld [vmem:[#allocation103_spill] sm:$0xff]  ;;  %v9139_v5 = vld [vmem:[#allocation130_spill] sm:$0xff]  ;;  %v9146_v31 = vld [vmem:[#allocation184_spill] sm:$0xff] }
 0x269   : > { %v1638_v7 = vsel %vm1610_vm9, %v1605_v29, %v9131_v42  ;;  %v1637_v33 = vsel %vm1610_vm9, %v1604_v32, %v9132_v20  ;;  %v1508_v8 = vsel %vm1478_vm5, %v1475_v60, %v9137_v36  ;;  %v1507_v43 = vsel %vm1478_vm5, %v1474_v3, %v9138_v17  ;;  %v9140_v27 = vld [vmem:[#allocation131_spill] sm:$0xff]  ;;  %v9142_v63 = vld [vmem:[#allocation142_spill] sm:$0xff]  ;;  %v9148_v25 = vld [vmem:[#allocation72_spill] sm:$0xff] }
 0x26a   : > { %v1671_v12 = vsel %vm1643_vm10, %v1638_v7, %v1308_v24  ;;  %v1670_v48 = vsel %vm1643_vm10, %v1637_v33, %v1306_v57  ;;  %v1541_v15 = vsel %vm1511_vm6, %v1508_v8, %v9139_v5  ;;  %v1540_v22 = vsel %vm1511_vm6, %v1507_v43, %v9140_v27  ;;  %v9143_v51 = vld [vmem:[#allocation166_spill] sm:$0xff]  ;;  %v9144_v55 = vld [vmem:[#allocation167_spill] sm:$0xff]  ;;  %v9149_v54 = vld [vmem:[#allocation28_spill] sm:$0xff] }
 0x26b   : > { %v1574_v13 = vsel %vm1544_vm7, %v1541_v15, %v9141_v14  ;;  %v1573_v19 = vsel %vm1544_vm7, %v1540_v22, %v9142_v63  ;;  %v9145_v21 = vld [vmem:[#allocation183_spill] sm:$0xff]  ;;  %v9147_v46 = vld [vmem:[#allocation106_spill] sm:$0xff]  ;;  %v1477_v59 = vsel %vm1445_vm4, %v9149_v54, %v9148_v25  ;;  %v9150_v9 = vld [vmem:[#allocation73_spill] sm:$0xff] }
 0x26c   : > { %v1404_v0 = vpop.permute.xlu1 %1403  ;;  %v1402_v23 = vpop.permute.xlu0 %1401  ;;  %v1607_v18 = vsel %vm1577_vm8, %v1574_v13, %v9143_v51  ;;  %v1606_v38 = vsel %vm1577_vm8, %v1573_v19, %v9144_v55  ;;  %v8616_v30 = vunpack.i.h.bf16 %v9147_v46  ;;  %v8617_v49 = vunpack.i.l.bf16 %v9147_v46  ;;  %v9151_v16 = vld [vmem:[#allocation29_spill] sm:$0xff]  ;;  %v9153_v29 = vld [vmem:[#allocation132_spill] sm:$0xff]  ;;  %v9155_v7 = vld [vmem:[#allocation143_spill] sm:$0xff] }
 0x26d   : > { %v1704_v11 = vsel %vm1676_vm11, %v1671_v12, %v1404_v0  ;;  %v1703_v35 = vsel %vm1676_vm11, %v1670_v48, %v1402_v23  ;;  %v1640_v58 = vsel %vm1610_vm9, %v1607_v18, %v9145_v21  ;;  %v1639_v26 = vsel %vm1610_vm9, %v1606_v38, %v9146_v31  ;;  %v9152_v57 = vld [vmem:[#allocation169_spill] sm:$0xff]  ;;  %v9156_v33 = vld [vmem:[#allocation144_spill] sm:$0xff]  ;;  %v9159_v61 = vld [vmem:[#allocation186_spill] sm:$0xff] }
 0x26e   : > { %4354 = vmatprep.mubr.msk.f32.mxu0 %vm1721_vm12, %v1703_v35  ;;  %v1476_v24 = vsel %vm1445_vm4, %v9151_v16, %v9150_v9  ;;  %v8614_v45 = vunpack.i.h.bf16 %v9152_v57  ;;  %v8615_v1 = vunpack.i.l.bf16 %v9152_v57  ;;  %v1510_v52 = vsel %vm1478_vm5, %v1477_v59, %v8616_v30  ;;  %v9154_v32 = vld [vmem:[#allocation133_spill] sm:$0xff]  ;;  %v6654_v43 = vld [vmem:[%s8538_s3] ss:$0 sm:$0xff] }
 0x26f   : > { %4355 = vmatmul.mubr.msk.f32.gmra.mrb[26].mxu0 %vm1721_vm12, %v1704_v11  ;;  %v1509_v28 = vsel %vm1478_vm5, %v1476_v24, %v8617_v49  ;;  %v1543_v53 = vsel %vm1511_vm6, %v1510_v52, %v9153_v29  ;;  %v9158_v35 = vld [vmem:[#allocation185_spill] sm:$0xff] }
 0x270   : > { %v1312_v6 = vpop.permute.xlu1 %1311  ;;  %v1310_v47 = vpop.permute.xlu0 %1309  ;;  %v1542_v42 = vsel %vm1511_vm6, %v1509_v28, %v9154_v32  ;;  %v1576_v20 = vsel %vm1544_vm7, %v1543_v53, %v9155_v7 }
 0x271   : > { %v1673_v40 = vsel %vm1643_vm10, %v1640_v58, %v1312_v6  ;;  %v1672_v50 = vsel %vm1643_vm10, %v1639_v26, %v1310_v47  ;;  %v1575_v12 = vsel %vm1544_vm7, %v1542_v42, %v9156_v33  ;;  %v1609_v0 = vsel %vm1577_vm8, %v1576_v20, %v8614_v45 }
 0x272   : > { %v1608_v23 = vsel %vm1577_vm8, %v1575_v12, %v8615_v1  ;;  %v1642_v10 = vsel %vm1610_vm9, %v1609_v0, %v9158_v35 }
 0x273   : > { %v1641_v60 = vsel %vm1610_vm9, %v1608_v23, %v9159_v61 }
 0x274   : > { %v1408_v44 = vpop.permute.xlu1 %1407  ;;  %v1406_v56 = vpop.permute.xlu0 %1405 }
 0x275   : > { %v1706_v4 = vsel %vm1676_vm11, %v1673_v40, %v1408_v44  ;;  %v1705_v41 = vsel %vm1676_vm11, %v1672_v50, %v1406_v56 }
 0x276   : > { %4357 = vmatprep.mubr.msk.f32.mxu0 %vm1721_vm12, %v1705_v41 }
 0x277   : > { %4358 = vmatmul.mubr.msk.f32.gmra.mrb[28].mxu0 %vm1721_vm12, %v1706_v4 }
 0x278   : > { %v1314_v2 = vpop.permute.xlu0 %1313  ;;  %v1316_v48 = vpop.permute.xlu1 %1315 }
 0x279   : > { %v1675_v3 = vsel %vm1643_vm10, %v1642_v10, %v1316_v48  ;;  %v1674_v36 = vsel %vm1643_vm10, %v1641_v60, %v1314_v2 }
 0x27c   : > { %v6633_v11 = vpop.permute.xlu0 %4476 }
 0x27d   : > { %9157 = vst [vmem:[#allocation33_spill] sm:$0xff] %v6633_v11  ;;  %v8612_v62 = vunpack.i.h.bf16 %v6633_v11  ;;  %v8613_v39 = vunpack.i.l.bf16 %v6633_v11 }
 0x27f   : > { %v1707_v8 = vsel %vm1676_vm11, %v1674_v36, %v8613_v39  ;;  %v1708_v17 = vsel %vm1676_vm11, %v1675_v3, %v8612_v62 }
 0x280   : > { %4360 = vmatprep.mubr.msk.f32.mxu0 %vm1721_vm12, %v1707_v8 }
 0x281   : > { %4361 = vmatmul.mubr.msk.f32.gmra.mrb[30].mxu0 %vm1721_vm12, %v1708_v17 }
 0x30a   : > { %v4317_v5 = vpop.f32.mrb[0].mxu0 }
 0x30b   : > { %v6657_v15 = vadd.f32 %v4317_v5, %v6654_v43  ;;  %v1888_v27 = vpop.f32.mrb[1].mxu0 }
 0x30c   : > { %v6660_v22 = vadd.f32 %v6654_v43, %v1888_v27 }
 0x30d   : > { %9160 = vst [vmem:[#allocation31_spill] sm:$0xff] %v6657_v15  ;;  %v2048_v6 = vmax.f32 %v6657_v15, 0.0 }
 0x30e   : > { %9161 = vst [vmem:[#allocation75_spill] sm:$0xff] %v6660_v22  ;;  %v2047_v47 = vmax.f32 %v6660_v22, 0.0  ;;  %v4320_v14 = vpop.f32.mrb[2].mxu0 }
 0x30f   : > { %v6665_v13 = vadd.f32 %v4320_v14, %v6654_v43  ;;  %v1898_v63 = vpop.f32.mrb[3].mxu0  ;;  %v6667_v19 = vrot.slane %v2048_v6, 7 }
 0x310   : > { %v2111_v51 = vrot.slane %v2047_v47, 7  ;;  %v6670_v18 = vadd.f32 %v6654_v43, %v1898_v63 }
 0x311   : > { %9162 = vst [vmem:[#allocation76_spill] sm:$0xff] %v6665_v13  ;;  %v2050_v55 = vmax.f32 %v6665_v13, 0.0 }
 0x312   : > { %9163 = vst [vmem:[#allocation30_spill] sm:$0xff] %v6670_v18  ;;  %v2049_v38 = vmax.f32 %v6670_v18, 0.0  ;;  %v4323_v21 = vpop.f32.mrb[4].mxu0  ;;  %v6675_v58 = vsel %vm337_vm0, 0.0, %v2111_v51  ;;  %v6686_v44 = vsel %vm337_vm0, %v2111_v51, %v6667_v19 }
 0x313   : > { %v6677_v31 = vrot.slane %v2050_v55, 7  ;;  %v6680_v26 = vadd.f32 %v4323_v21, %v6654_v43  ;;  %2430 = vrot.lane.b32.xlu1 %v6675_v58, %s4489_s27  ;;  %v1908_v40 = vpop.f32.mrb[5].mxu0  ;;  %2432 = vrot.lane.b32.xlu0 %v6686_v44, %s4489_s27 }
 0x314   : > { %v2114_v50 = vrot.slane %v2049_v38, 7  ;;  %v6689_v56 = vadd.f32 %v6654_v43, %v1908_v40 }
 0x315   : > { %9164 = vst [vmem:[#allocation32_spill] sm:$0xff] %v6680_v26  ;;  %v2052_v4 = vmax.f32 %v6680_v26, 0.0 }
 0x316   : > { %9165 = vst [vmem:[#allocation77_spill] sm:$0xff] %v6689_v56  ;;  %v6695_v41 = vsel %vm337_vm0, 0.0, %v2114_v50  ;;  %v2051_v25 = vmax.f32 %v6689_v56, 0.0  ;;  %v4326_v54 = vpop.f32.mrb[6].mxu0  ;;  %v6707_v16 = vsel %vm337_vm0, %v2114_v50, %v6677_v31 }
 0x317   : > { %v6698_v59 = vrot.slane %v2052_v4, 7  ;;  %v6701_v9 = vadd.f32 %v4326_v54, %v6654_v43  ;;  %2434 = vrot.lane.b32.xlu1 %v6695_v41, %s4489_s27  ;;  %v1918_v24 = vpop.f32.mrb[7].mxu0  ;;  %2436 = vrot.lane.b32.xlu0 %v6707_v16, %s4489_s27 }
 0x318   : > { %v2117_v2 = vrot.slane %v2051_v25, 7  ;;  %v6710_v52 = vadd.f32 %v6654_v43, %v1918_v24 }
 0x319   : > { %9166 = vst [vmem:[#allocation78_spill] sm:$0xff] %v6701_v9  ;;  %v2054_v28 = vmax.f32 %v6701_v9, 0.0 }
 0x31a   : > { %9167 = vst [vmem:[#allocation107_spill] sm:$0xff] %v6710_v52  ;;  %v6716_v29 = vsel %vm337_vm0, 0.0, %v2117_v2  ;;  %v2053_v53 = vmax.f32 %v6710_v52, 0.0  ;;  %v4329_v32 = vpop.f32.mrb[8].mxu0  ;;  %v6728_v20 = vsel %vm337_vm0, %v2117_v2, %v6698_v59 }
 0x31b   : > { %v6719_v42 = vrot.slane %v2054_v28, 7  ;;  %v6722_v7 = vadd.f32 %v4329_v32, %v6654_v43  ;;  %2438 = vrot.lane.b32.xlu1 %v6716_v29, %s4489_s27  ;;  %v1928_v33 = vpop.f32.mrb[9].mxu0  ;;  %2440 = vrot.lane.b32.xlu0 %v6728_v20, %s4489_s27 }
 0x31c   : > { %v2120_v12 = vrot.slane %v2053_v53, 7  ;;  %v6731_v48 = vadd.f32 %v6654_v43, %v1928_v33 }
 0x31d   : > { %9168 = vst [vmem:[#allocation108_spill] sm:$0xff] %v6722_v7  ;;  %v2056_v0 = vmax.f32 %v6722_v7, 0.0 }
 0x31e   : > { %9169 = vst [vmem:[#allocation34_spill] sm:$0xff] %v6731_v48  ;;  %v6737_v23 = vsel %vm337_vm0, 0.0, %v2120_v12  ;;  %v2055_v35 = vmax.f32 %v6731_v48, 0.0  ;;  %v4332_v10 = vpop.f32.mrb[10].mxu0  ;;  %v6749_v3 = vsel %vm337_vm0, %v2120_v12, %v6719_v42 }
 0x31f   : > { %v6740_v61 = vrot.slane %v2056_v0, 7  ;;  %v6743_v60 = vadd.f32 %v4332_v10, %v6654_v43  ;;  %2442 = vrot.lane.b32.xlu1 %v6737_v23, %s4489_s27  ;;  %v1938_v36 = vpop.f32.mrb[11].mxu0  ;;  %2444 = vrot.lane.b32.xlu0 %v6749_v3, %s4489_s27 }
 0x320   : > { %v2123_v8 = vrot.slane %v2055_v35, 7  ;;  %v6752_v17 = vadd.f32 %v6654_v43, %v1938_v36 }
 0x321   : > { %9170 = vst [vmem:[#allocation35_spill] sm:$0xff] %v6743_v60  ;;  %v2058_v5 = vmax.f32 %v6743_v60, 0.0 }
 0x322   : > { %9171 = vst [vmem:[#allocation79_spill] sm:$0xff] %v6752_v17  ;;  %v6758_v27 = vsel %vm337_vm0, 0.0, %v2123_v8  ;;  %v2057_v6 = vmax.f32 %v6752_v17, 0.0  ;;  %v4335_v47 = vpop.f32.mrb[12].mxu0  ;;  %v6770_v51 = vsel %vm337_vm0, %v2123_v8, %v6740_v61 }
 0x323   : > { %9172 = vst [vmem:[#allocation80_spill] sm:$0xff] %v6758_v27  ;;  %v6761_v14 = vrot.slane %v2058_v5, 7  ;;  %v6764_v63 = vadd.f32 %v4335_v47, %v6654_v43  ;;  %2446 = vrot.lane.b32.xlu1 %v6758_v27, %s4489_s27  ;;  %9174 = vst [vmem:[#allocation38_spill] sm:$0xff] %v6770_v51  ;;  %v1948_v55 = vpop.f32.mrb[13].mxu0  ;;  %2448 = vrot.lane.b32.xlu0 %v6770_v51, %s4489_s27 }
 0x324   : > { %v2126_v38 = vrot.slane %v2057_v6, 7  ;;  %v6773_v21 = vadd.f32 %v6654_v43, %v1948_v55 }
 0x325   : > { %9173 = vst [vmem:[#allocation37_spill] sm:$0xff] %v6764_v63  ;;  %v2060_v40 = vmax.f32 %v6764_v63, 0.0 }
 0x326   : > { %9175 = vst [vmem:[#allocation81_spill] sm:$0xff] %v6773_v21  ;;  %v6779_v50 = vsel %vm337_vm0, 0.0, %v2126_v38  ;;  %v2059_v4 = vmax.f32 %v6773_v21, 0.0  ;;  %v4338_v25 = vpop.f32.mrb[14].mxu0  ;;  %v6791_v2 = vsel %vm337_vm0, %v2126_v38, %v6761_v14 }
 0x327   : > { %9176 = vst [vmem:[#allocation82_spill] sm:$0xff] %v6779_v50  ;;  %v6782_v54 = vrot.slane %v2060_v40, 7  ;;  %v6785_v24 = vadd.f32 %v4338_v25, %v6654_v43  ;;  %2450 = vrot.lane.b32.xlu1 %v6779_v50, %s4489_s27  ;;  %9178 = vst [vmem:[#allocation36_spill] sm:$0xff] %v6791_v2  ;;  %v1958_v28 = vpop.f32.mrb[15].mxu0  ;;  %2452 = vrot.lane.b32.xlu0 %v6791_v2, %s4489_s27 }
 0x328   : > { %v2129_v53 = vrot.slane %v2059_v4, 7  ;;  %v6794_v32 = vadd.f32 %v6654_v43, %v1958_v28 }
 0x329   : > { %9177 = vst [vmem:[#allocation109_spill] sm:$0xff] %v6785_v24  ;;  %v2062_v33 = vmax.f32 %v6785_v24, 0.0 }
 0x32a   : > { %9179 = vst [vmem:[#allocation40_spill] sm:$0xff] %v6794_v32  ;;  %v6800_v12 = vsel %vm337_vm0, 0.0, %v2129_v53  ;;  %v2061_v0 = vmax.f32 %v6794_v32, 0.0  ;;  %v4341_v35 = vpop.f32.mrb[16].mxu0  ;;  %v6812_v8 = vsel %vm337_vm0, %v2129_v53, %v6782_v54 }
 0x32b   : > { %9180 = vst [vmem:[#allocation6_spill] sm:$0xff] %v6800_v12  ;;  %v6803_v10 = vrot.slane %v2062_v33, 7  ;;  %v6806_v36 = vadd.f32 %v4341_v35, %v6654_v43  ;;  %2454 = vrot.lane.b32.xlu1 %v6800_v12, %s4489_s27  ;;  %9182 = vst [vmem:[#allocation7_spill] sm:$0xff] %v6812_v8  ;;  %v1968_v5 = vpop.f32.mrb[17].mxu0  ;;  %2456 = vrot.lane.b32.xlu0 %v6812_v8, %s4489_s27 }
 0x32c   : > { %v2132_v6 = vrot.slane %v2061_v0, 7  ;;  %v6815_v47 = vadd.f32 %v6654_v43, %v1968_v5 }
 0x32d   : > { %9181 = vst [vmem:[#allocation41_spill] sm:$0xff] %v6806_v36  ;;  %v2064_v55 = vmax.f32 %v6806_v36, 0.0 }
 0x32e   : > { %9183 = vst [vmem:[#allocation74_spill] sm:$0xff] %v6815_v47  ;;  %v6821_v38 = vsel %vm337_vm0, 0.0, %v2132_v6  ;;  %v2063_v40 = vmax.f32 %v6815_v47, 0.0  ;;  %v4344_v4 = vpop.f32.mrb[18].mxu0  ;;  %v6833_v53 = vsel %vm337_vm0, %v2132_v6, %v6803_v10 }
 0x32f   : > { %9184 = vst [vmem:[#allocation145_spill] sm:$0xff] %v6821_v38  ;;  %v6824_v25 = vrot.slane %v2064_v55, 7  ;;  %v6827_v28 = vadd.f32 %v4344_v4, %v6654_v43  ;;  %2458 = vrot.lane.b32.xlu1 %v6821_v38, %s4489_s27  ;;  %9186 = vst [vmem:[#allocation84_spill] sm:$0xff] %v6833_v53  ;;  %v1978_v33 = vpop.f32.mrb[19].mxu0  ;;  %2460 = vrot.lane.b32.xlu0 %v6833_v53, %s4489_s27 }
 0x330   : > { %v2135_v0 = vrot.slane %v2063_v40, 7  ;;  %v6836_v35 = vadd.f32 %v6654_v43, %v1978_v33 }
 0x331   : > { %9185 = vst [vmem:[#allocation83_spill] sm:$0xff] %v6827_v28  ;;  %v2066_v5 = vmax.f32 %v6827_v28, 0.0 }
 0x332   : > { %9187 = vst [vmem:[#allocation110_spill] sm:$0xff] %v6836_v35  ;;  %v6842_v55 = vsel %vm337_vm0, 0.0, %v2135_v0  ;;  %v2065_v4 = vmax.f32 %v6836_v35, 0.0  ;;  %v4347_v62 = vpop.f32.mrb[20].mxu0  ;;  %v6854_v40 = vsel %vm337_vm0, %v2135_v0, %v6824_v25 }
 0x333   : > { %v6845_v39 = vrot.slane %v2066_v5, 7  ;;  %v6848_v6 = vadd.f32 %v4347_v62, %v6654_v43  ;;  %2462 = vrot.lane.b32.xlu1 %v6842_v55, %s4489_s27  ;;  %9189 = vst [vmem:[#allocation4_spill] sm:$0xff] %v6854_v40  ;;  %v1988_v33 = vpop.f32.mrb[21].mxu0  ;;  %2464 = vrot.lane.b32.xlu0 %v6854_v40, %s4489_s27 }
 0x334   : > { %v2138_v45 = vrot.slane %v2065_v4, 7  ;;  %v6857_v1 = vadd.f32 %v6654_v43, %v1988_v33 }
 0x335   : > { %9188 = vst [vmem:[#allocation111_spill] sm:$0xff] %v6848_v6  ;;  %v2068_v30 = vmax.f32 %v6848_v6, 0.0 }
 0x336   : > { %9190 = vst [vmem:[#allocation39_spill] sm:$0xff] %v6857_v1  ;;  %v6863_v62 = vsel %vm337_vm0, 0.0, %v2138_v45  ;;  %v2067_v5 = vmax.f32 %v6857_v1, 0.0  ;;  %v4350_v49 = vpop.f32.mrb[22].mxu0  ;;  %v6875_v4 = vsel %vm337_vm0, %v2138_v45, %v6845_v39 }
 0x337   : > { %v6866_v11 = vrot.slane %v2068_v30, 7  ;;  %v6869_v0 = vadd.f32 %v4350_v49, %v6654_v43  ;;  %2466 = vrot.lane.b32.xlu1 %v6863_v62, %s4489_s27  ;;  %v1998_v33 = vpop.f32.mrb[23].mxu0  ;;  %2468 = vrot.lane.b32.xlu0 %v6875_v4, %s4489_s27 }
 0x338   : > { %v2141_v57 = vrot.slane %v2067_v5, 7  ;;  %v6878_v46 = vadd.f32 %v6654_v43, %v1998_v33 }
 0x339   : > { %9191 = vst [vmem:[#allocation43_spill] sm:$0xff] %v6869_v0  ;;  %v2070_v6 = vmax.f32 %v6869_v0, 0.0 }
 0x33a   : > { %9192 = vst [vmem:[#allocation8_spill] sm:$0xff] %v6878_v46  ;;  %v6884_v30 = vsel %vm337_vm0, 0.0, %v2141_v57  ;;  %v2069_v49 = vmax.f32 %v6878_v46, 0.0  ;;  %v4353_v1 = vpop.f32.mrb[24].mxu0  ;;  %v6896_v5 = vsel %vm337_vm0, %v2141_v57, %v6866_v11 }
 0x33b   : > { %9193 = vst [vmem:[#allocation44_spill] sm:$0xff] %v6884_v30  ;;  %v6887_v28 = vrot.slane %v2070_v6, 7  ;;  %v6890_v45 = vadd.f32 %v4353_v1, %v6654_v43  ;;  %2470 = vrot.lane.b32.xlu1 %v6884_v30, %s4489_s27  ;;  %9195 = vst [vmem:[#allocation146_spill] sm:$0xff] %v6896_v5  ;;  %v2008_v33 = vpop.f32.mrb[25].mxu0  ;;  %2472 = vrot.lane.b32.xlu0 %v6896_v5, %s4489_s27 }
 0x33c   : > { %v2144_v0 = vrot.slane %v2069_v49, 7  ;;  %v6899_v35 = vadd.f32 %v6654_v43, %v2008_v33 }
 0x33d   : > { %9194 = vst [vmem:[#allocation9_spill] sm:$0xff] %v6890_v45  ;;  %v2072_v46 = vmax.f32 %v6890_v45, 0.0 }
 0x33e   : > { %9196 = vst [vmem:[#allocation147_spill] sm:$0xff] %v6899_v35  ;;  %v6905_v1 = vsel %vm337_vm0, 0.0, %v2144_v0  ;;  %v2071_v6 = vmax.f32 %v6899_v35, 0.0  ;;  %v6914_v57 = vsel %vm337_vm0, %v2144_v0, %v6887_v28 }
 0x33f   : > { %v6908_v36 = vrot.slane %v2072_v46, 7  ;;  %2474 = vrot.lane.b32.xlu1 %v6905_v1, %s4489_s27  ;;  %9197 = vst [vmem:[#allocation85_spill] sm:$0xff] %v6914_v57  ;;  %2476 = vrot.lane.b32.xlu0 %v6914_v57, %s4489_s27 }
 0x340   : > { %v2147_v49 = vrot.slane %v2071_v6, 7 }
 0x342   : > { %v6919_v33 = vsel %vm337_vm0, 0.0, %v2147_v49  ;;  %v4356_v45 = vpop.f32.mrb[26].mxu0  ;;  %v6923_v35 = vsel %vm337_vm0, %v2147_v49, %v6908_v36 }
 0x343   : > { %9198 = vst [vmem:[#allocation86_spill] sm:$0xff] %v6919_v33  ;;  %9199 = vst [vmem:[#allocation112_spill] sm:$0xff] %v6923_v35  ;;  %v6926_v46 = vadd.f32 %v4356_v45, %v6654_v43  ;;  %2478 = vrot.lane.b32.xlu1 %v6919_v33, %s4489_s27  ;;  %v2018_v0 = vpop.f32.mrb[27].mxu0  ;;  %2480 = vrot.lane.b32.xlu0 %v6923_v35, %s4489_s27 }
 0x344   : > { %v6931_v6 = vadd.f32 %v6654_v43, %v2018_v0 }
 0x345   : > { %9200 = vst [vmem:[#allocation113_spill] sm:$0xff] %v6926_v46  ;;  %v2074_v47 = vmax.f32 %v6926_v46, 0.0 }
 0x346   : > { %9201 = vst [vmem:[#allocation5_spill] sm:$0xff] %v6931_v6  ;;  %v2073_v24 = vmax.f32 %v6931_v6, 0.0 }
 0x347   : > { %v6937_v32 = vrot.slane %v2074_v47, 7 }
 0x348   : > { %v2150_v49 = vrot.slane %v2073_v24, 7 }
 0x34a   : > { %v6940_v45 = vsel %vm337_vm0, 0.0, %v2150_v49  ;;  %v4359_v63 = vpop.f32.mrb[28].mxu0  ;;  %v6944_v21 = vsel %vm337_vm0, %v2150_v49, %v6937_v32 }
 0x34b   : > { %9202 = vst [vmem:[#allocation42_spill] sm:$0xff] %v6940_v45  ;;  %9203 = vst [vmem:[#allocation46_spill] sm:$0xff] %v6944_v21  ;;  %v6947_v0 = vadd.f32 %v4359_v63, %v6654_v43  ;;  %2482 = vrot.lane.b32.xlu1 %v6940_v45, %s4489_s27  ;;  %2484 = vrot.lane.b32.xlu0 %v6944_v21, %s4489_s27  ;;  %v2028_v47 = vpop.f32.mrb[29].mxu0 }
 0x34c   : > { %v6954_v24 = vadd.f32 %v6654_v43, %v2028_v47 }
 0x34d   : > { %9204 = vst [vmem:[#allocation10_spill] sm:$0xff] %v6947_v0  ;;  %v2076_v46 = vmax.f32 %v6947_v0, 0.0 }
 0x34e   : > { %9205 = vst [vmem:[#allocation47_spill] sm:$0xff] %v6954_v24  ;;  %v2075_v6 = vmax.f32 %v6954_v24, 0.0 }
 0x34f   : > { %v6958_v60 = vrot.slane %v2076_v46, 7 }
 0x350   : > { %v2153_v49 = vrot.slane %v2075_v6, 7 }
 0x352   : > { %v6961_v63 = vsel %vm337_vm0, 0.0, %v2153_v49  ;;  %v6965_v17 = vsel %vm337_vm0, %v2153_v49, %v6958_v60 }
 0x353   : > { %9206 = vst [vmem:[#allocation11_spill] sm:$0xff] %v6961_v63  ;;  %9207 = vst [vmem:[#allocation148_spill] sm:$0xff] %v6965_v17  ;;  %2486 = vrot.lane.b32.xlu1 %v6961_v63, %s4489_s27  ;;  %2488 = vrot.lane.b32.xlu0 %v6965_v17, %s4489_s27 }
 0x354   : > { %v4362_v47 = vpop.f32.mrb[30].mxu0 }
 0x355   : > { %v6972_v0 = vadd.f32 %v4362_v47, %v6654_v43  ;;  %v2038_v46 = vpop.f32.mrb[31].mxu0 }
 0x356   : > { %v6975_v6 = vadd.f32 %v6654_v43, %v2038_v46 }
 0x357   : > { %9208 = vst [vmem:[#allocation149_spill] sm:$0xff] %v6972_v0  ;;  %v2078_v24 = vmax.f32 %v6972_v0, 0.0 }
 0x358   : > { %9209 = vst [vmem:[#allocation87_spill] sm:$0xff] %v6975_v6  ;;  %v2077_v7 = vmax.f32 %v6975_v6, 0.0  ;;  %v7066_v6 = vsel %vm337_vm0, %v6667_v19, 0.0  ;;  %v7081_v19 = vsel %vm337_vm0, %v6677_v31, 0.0 }
 0x359   : > { %v2157_v49 = vrot.slane %v2078_v24, 7 }
 0x35a   : > { %v2156_v48 = vrot.slane %v2077_v7, 7 }
 0x35b   : > { %v2237_v9 = vsel %vm337_vm0, %v2157_v49, 0.0 }
 0x35c   : > { %v2348_v52 = vrot.slane %v2237_v9, 1  ;;  %v2428_v26 = vrot.slane %v2237_v9, 2  ;;  %v2221_v56 = vsel %vm337_vm0, 0.0, %v2156_v48  ;;  %v2158_v13 = vsel %vm337_vm0, %v2156_v48, %v2157_v49 }
 0x35d   : > { %2490 = vrot.lane.b32.xlu1 %v2221_v56, %s4489_s27  ;;  %v2345_v47 = vrot.slane %v2221_v56, 1  ;;  %v2425_v18 = vrot.slane %v2221_v56, 2  ;;  %2492 = vrot.lane.b32.xlu0 %v2158_v13, %s4489_s27  ;;  %v2346_v43 = vrot.slane %v2158_v13, 1  ;;  %v2426_v46 = vrot.slane %v2158_v13, 2 }
 0x35f   : > { %v6985_v0 = vsel %vm503_vm1, %v2345_v47, %v2346_v43  ;;  %v6988_v7 = vsel %vm503_vm1, %v2346_v43, %v2348_v52  ;;  %v6991_v9 = vsel %vm591_vm2, %v2425_v18, %v2426_v46  ;;  %v6994_v24 = vsel %vm591_vm2, %v2426_v46, %v2428_v26 }
 0x360   : > { %9210 = vst [vmem:[#allocation88_spill] sm:$0xff] %v6985_v0  ;;  %9211 = vst [vmem:[#allocation114_spill] sm:$0xff] %v6988_v7  ;;  %v2269_v7 = vrot.slane %v6686_v44, 1 }
 0x361   : > { %9212 = vst [vmem:[#allocation115_spill] sm:$0xff] %v6991_v9  ;;  %9213 = vst [vmem:[#allocation45_spill] sm:$0xff] %v6994_v24  ;;  %2526 = vrot.lane.b32.xlu1 %v6695_v41, %s4490_s28  ;;  %2528 = vrot.lane.b32.xlu0 %v6707_v16, %s4490_s28  ;;  %v2271_v24 = vrot.slane %v7066_v6, 1  ;;  %v2268_v9 = vrot.slane %v6675_v58, 1 }
 0x363   : > { %v7097_v31 = vsel %vm503_vm1, %v2268_v9, %v2269_v7  ;;  %v7116_v9 = vsel %vm337_vm0, %v6719_v42, 0.0 }
 0x365   : > { %2530 = vrot.lane.b32.xlu1 %v6716_v29, %s4490_s28  ;;  %2532 = vrot.lane.b32.xlu0 %v6728_v20, %s4490_s28 }
 0x369   : > { %2534 = vrot.lane.b32.xlu1 %v6737_v23, %s4490_s28  ;;  %2536 = vrot.lane.b32.xlu0 %v6749_v3, %s4490_s28 }
 0x36d   : > { %2538 = vrot.lane.b32.xlu1 %v6758_v27, %s4490_s28  ;;  %2540 = vrot.lane.b32.xlu0 %v6770_v51, %s4490_s28 }
 0x371   : > { %2542 = vrot.lane.b32.xlu1 %v6779_v50, %s4490_s28  ;;  %2544 = vrot.lane.b32.xlu0 %v6791_v2, %s4490_s28 }
 0x375   : > { %2546 = vrot.lane.b32.xlu1 %v6800_v12, %s4490_s28  ;;  %2548 = vrot.lane.b32.xlu0 %v6812_v8, %s4490_s28 }
 0x379   : > { %2550 = vrot.lane.b32.xlu1 %v6821_v38, %s4490_s28  ;;  %2552 = vrot.lane.b32.xlu0 %v6833_v53, %s4490_s28 }
 0x37d   : > { %2554 = vrot.lane.b32.xlu1 %v6842_v55, %s4490_s28  ;;  %2556 = vrot.lane.b32.xlu0 %v6854_v40, %s4490_s28 }
 0x381   : > { %2558 = vrot.lane.b32.xlu1 %v6863_v62, %s4490_s28  ;;  %2560 = vrot.lane.b32.xlu0 %v6875_v4, %s4490_s28 }
 0x385   : > { %v7032_v18 = vpop.permute.xlu1 %2430  ;;  %2562 = vrot.lane.b32.xlu1 %v6884_v30, %s4490_s28  ;;  %2564 = vrot.lane.b32.xlu0 %v6896_v5, %s4490_s28  ;;  %v7038_v26 = vpop.permute.xlu0 %2432 }
 0x386   : > { %9214 = vst [vmem:[#allocation134_spill] sm:$0xff] %v7032_v18  ;;  %9215 = vst [vmem:[#allocation49_spill] sm:$0xff] %v7038_v26  ;;  %v2294_v18 = vrot.slane %v6791_v2, 1 }
 0x389   : > { %v7040_v52 = vpop.permute.xlu1 %2434  ;;  %2566 = vrot.lane.b32.xlu1 %v6905_v1, %s4490_s28  ;;  %2568 = vrot.lane.b32.xlu0 %v6914_v57, %s4490_s28  ;;  %v7046_v48 = vpop.permute.xlu0 %2436 }
 0x38a   : > { %9216 = vst [vmem:[#allocation12_spill] sm:$0xff] %v7040_v52  ;;  %9217 = vst [vmem:[#allocation50_spill] sm:$0xff] %v7046_v48 }
 0x38d   : > { %v7048_v49 = vpop.permute.xlu1 %2438  ;;  %2570 = vrot.lane.b32.xlu1 %v6919_v33, %s4490_s28  ;;  %2572 = vrot.lane.b32.xlu0 %v6923_v35, %s4490_s28  ;;  %v7054_v47 = vpop.permute.xlu0 %2440 }
 0x38e   : > { %9218 = vst [vmem:[#allocation13_spill] sm:$0xff] %v7048_v49  ;;  %9219 = vst [vmem:[#allocation150_spill] sm:$0xff] %v7054_v47  ;;  %v7094_v47 = vsel %vm337_vm0, %v6698_v59, 0.0  ;;  %v2279_v49 = vrot.slane %v6728_v20, 1 }
 0x391   : > { %v7056_v43 = vpop.permute.xlu1 %2442  ;;  %2574 = vrot.lane.b32.xlu1 %v6940_v45, %s4490_s28  ;;  %2576 = vrot.lane.b32.xlu0 %v6944_v21, %s4490_s28  ;;  %v7062_v46 = vpop.permute.xlu0 %2444 }
 0x392   : > { %9220 = vst [vmem:[#allocation151_spill] sm:$0xff] %v7056_v43  ;;  %9221 = vst [vmem:[#allocation89_spill] sm:$0xff] %v7062_v46  ;;  %v2274_v46 = vrot.slane %v6707_v16, 1  ;;  %v2276_v43 = vrot.slane %v7081_v19, 1 }
 0x395   : > { %v7068_v15 = vpop.permute.xlu1 %2446  ;;  %2578 = vrot.lane.b32.xlu1 %v6961_v63, %s4490_s28  ;;  %2580 = vrot.lane.b32.xlu0 %v6965_v17, %s4490_s28  ;;  %v7074_v22 = vpop.permute.xlu0 %2448 }
 0x396   : > { %9222 = vst [vmem:[#allocation90_spill] sm:$0xff] %v7068_v15  ;;  %9223 = vst [vmem:[#allocation116_spill] sm:$0xff] %v7074_v22  ;;  %v2273_v22 = vrot.slane %v6695_v41, 1 }
 0x398   : > { %v7112_v59 = vsel %vm503_vm1, %v2273_v22, %v2274_v46  ;;  %v2286_v22 = vrot.slane %v7116_v9, 1 }
 0x399   : > { %v7083_v0 = vpop.permute.xlu1 %2450  ;;  %2582 = vrot.lane.b32.xlu1 %v2221_v56, %s4490_s28  ;;  %2584 = vrot.lane.b32.xlu0 %v2158_v13, %s4490_s28  ;;  %v7087_v15 = vpop.permute.xlu0 %2452  ;;  %v2281_v13 = vrot.slane %v7094_v47, 1 }
 0x39a   : > { %9224 = vst [vmem:[#allocation117_spill] sm:$0xff] %v7083_v0  ;;  %9225 = vst [vmem:[#allocation48_spill] sm:$0xff] %v7087_v15  ;;  %v7100_v0 = vsel %vm503_vm1, %v2269_v7, %v2271_v24  ;;  %v7119_v7 = vsel %vm503_vm1, %v2274_v46, %v2276_v43  ;;  %v2278_v24 = vrot.slane %v6716_v29, 1  ;;  %v2283_v43 = vrot.slane %v6737_v23, 1 }
 0x39b   : > { %v7132_v42 = vsel %vm503_vm1, %v2279_v49, %v2281_v13  ;;  %v2284_v46 = vrot.slane %v6749_v3, 1  ;;  %v2289_v13 = vrot.slane %v6770_v51, 1 }
 0x39d   : > { %2616 = vrot.lane.b32.xlu1 %v7097_v31, %s4491_s29  ;;  %2618 = vrot.lane.b32.xlu0 %v7100_v0, %s4491_s29  ;;  %v7107_v56 = vpop.permute.xlu1 %2454  ;;  %v7109_v15 = vpop.permute.xlu0 %2456 }
 0x39e   : > { %9226 = vst [vmem:[#allocation135_spill] sm:$0xff] %v7107_v56  ;;  %9227 = vst [vmem:[#allocation53_spill] sm:$0xff] %v7109_v15  ;;  %v7129_v15 = vsel %vm503_vm1, %v2278_v24, %v2279_v49  ;;  %v7138_v56 = vsel %vm337_vm0, %v6740_v61, 0.0  ;;  %v2288_v49 = vrot.slane %v6758_v27, 1  ;;  %v7153_v61 = vsel %vm337_vm0, %v6761_v14, 0.0 }
 0x39f   : > { %v2291_v24 = vrot.slane %v7138_v56, 1  ;;  %9230 = vst [vmem:[#allocation15_spill] sm:$0xff] %v7153_v61  ;;  %v2296_v34 = vrot.slane %v7153_v61, 1 }
 0x3a0   : > { %v7171_v14 = vsel %vm503_vm1, %v2288_v49, %v2289_v13 }
 0x3a1   : > { %2620 = vrot.lane.b32.xlu1 %v7112_v59, %s4491_s29  ;;  %2622 = vrot.lane.b32.xlu0 %v7119_v7, %s4491_s29  ;;  %v7140_v48 = vpop.permute.xlu1 %2458  ;;  %v7142_v52 = vpop.permute.xlu0 %2460 }
 0x3a2   : > { %9228 = vst [vmem:[#allocation14_spill] sm:$0xff] %v7140_v48  ;;  %9229 = vst [vmem:[#allocation54_spill] sm:$0xff] %v7142_v52  ;;  %v7156_v48 = vsel %vm503_vm1, %v2283_v43, %v2284_v46  ;;  %v7159_v52 = vsel %vm503_vm1, %v2284_v46, %v2286_v22  ;;  %v7175_v43 = vsel %vm337_vm0, %v6782_v54, 0.0  ;;  %v7178_v22 = vsel %vm503_vm1, %v2289_v13, %v2291_v24 }
 0x3a3   : > { %9233 = vst [vmem:[#allocation91_spill] sm:$0xff] %v7175_v43  ;;  %v2293_v46 = vrot.slane %v6779_v50, 1  ;;  %v2301_v49 = vrot.slane %v7175_v43, 1  ;;  %v7191_v54 = vsel %vm503_vm1, %v2294_v18, %v2296_v34  ;;  %v2298_v13 = vrot.slane %v6800_v12, 1 }
 0x3a4   : > { %v2299_v24 = vrot.slane %v6812_v8, 1  ;;  %v2303_v34 = vrot.slane %v6821_v38, 1  ;;  %v2309_v43 = vrot.slane %v6854_v40, 1 }
 0x3a5   : > { %2624 = vrot.lane.b32.xlu1 %v7129_v15, %s4491_s29  ;;  %2626 = vrot.lane.b32.xlu0 %v7132_v42, %s4491_s29  ;;  %v7166_v37 = vpop.permute.xlu1 %2462  ;;  %v7168_v26 = vpop.permute.xlu0 %2464 }
 0x3a6   : > { %9231 = vst [vmem:[#allocation152_spill] sm:$0xff] %v7166_v37  ;;  %9232 = vst [vmem:[#allocation153_spill] sm:$0xff] %v7168_v26  ;;  %v7188_v26 = vsel %vm503_vm1, %v2293_v46, %v2294_v18  ;;  %v7197_v37 = vsel %vm337_vm0, %v6803_v10, 0.0  ;;  %v2304_v18 = vrot.slane %v6833_v53, 1  ;;  %v7212_v10 = vsel %vm337_vm0, %v6824_v25, 0.0 }
 0x3a7   : > { %9234 = vst [vmem:[#allocation92_spill] sm:$0xff] %v7197_v37  ;;  %v2306_v46 = vrot.slane %v7197_v37, 1  ;;  %9237 = vst [vmem:[#allocation119_spill] sm:$0xff] %v7212_v10  ;;  %v2311_v53 = vrot.slane %v7212_v10, 1 }
 0x3a8   : > { %v7230_v25 = vsel %vm503_vm1, %v2303_v34, %v2304_v18 }
 0x3a9   : > { %2628 = vrot.lane.b32.xlu1 %v7156_v48, %s4491_s29  ;;  %2630 = vrot.lane.b32.xlu0 %v7159_v52, %s4491_s29  ;;  %v7199_v61 = vpop.permute.xlu1 %2466  ;;  %v7201_v2 = vpop.permute.xlu0 %2468 }
 0x3aa   : > { %9235 = vst [vmem:[#allocation170_spill] sm:$0xff] %v7199_v61  ;;  %9236 = vst [vmem:[#allocation118_spill] sm:$0xff] %v7201_v2  ;;  %v7215_v61 = vsel %vm503_vm1, %v2298_v13, %v2299_v24  ;;  %v7218_v2 = vsel %vm503_vm1, %v2299_v24, %v2301_v49  ;;  %v7234_v13 = vsel %vm337_vm0, %v6845_v39, 0.0  ;;  %v7237_v49 = vsel %vm503_vm1, %v2304_v18, %v2306_v46 }
 0x3ab   : > { %9240 = vst [vmem:[#allocation51_spill] sm:$0xff] %v7234_v13  ;;  %v2308_v24 = vrot.slane %v6842_v55, 1  ;;  %v2316_v34 = vrot.slane %v7234_v13, 1  ;;  %v7250_v39 = vsel %vm503_vm1, %v2309_v43, %v2311_v53  ;;  %v2313_v18 = vrot.slane %v6863_v62, 1 }
 0x3ac   : > { %v2314_v46 = vrot.slane %v6875_v4, 1  ;;  %v2318_v53 = vrot.slane %v6884_v30, 1  ;;  %v2324_v13 = vrot.slane %v6914_v57, 1  ;;  %v7319_v57 = vsel %vm337_vm0, %v6937_v32, 0.0 }
 0x3ad   : > { %2632 = vrot.lane.b32.xlu1 %v7171_v14, %s4491_s29  ;;  %2634 = vrot.lane.b32.xlu0 %v7178_v22, %s4491_s29  ;;  %v7225_v38 = vpop.permute.xlu1 %2470  ;;  %v7227_v37 = vpop.permute.xlu0 %2472  ;;  %9250 = vst [vmem:[#allocation171_spill] sm:$0xff] %v7319_v57 }
 0x3ae   : > { %9238 = vst [vmem:[#allocation187_spill] sm:$0xff] %v7225_v38  ;;  %9239 = vst [vmem:[#allocation188_spill] sm:$0xff] %v7227_v37  ;;  %v7247_v37 = vsel %vm503_vm1, %v2308_v24, %v2309_v43  ;;  %v7256_v38 = vsel %vm337_vm0, %v6866_v11, 0.0  ;;  %v2319_v43 = vrot.slane %v6896_v5, 1  ;;  %v7271_v11 = vsel %vm337_vm0, %v6887_v28, 0.0 }
 0x3af   : > { %9241 = vst [vmem:[#allocation136_spill] sm:$0xff] %v7256_v38  ;;  %v2321_v24 = vrot.slane %v7256_v38, 1  ;;  %9244 = vst [vmem:[#allocation56_spill] sm:$0xff] %v7271_v11  ;;  %v2326_v5 = vrot.slane %v7271_v11, 1  ;;  %v2329_v11 = vrot.slane %v6923_v35, 1  ;;  %v7340_v35 = vsel %vm337_vm0, %v6958_v60, 0.0 }
 0x3b0   : > { %v7289_v28 = vsel %vm503_vm1, %v2318_v53, %v2319_v43  ;;  %9255 = vst [vmem:[#allocation190_spill] sm:$0xff] %v7340_v35  ;;  %v2338_v60 = vrot.slane %v6961_v63, 1  ;;  %v3424_v63 = vld [vmem:[%s8539_s4] sm:$0xff] }
 0x3b1   : > { %2636 = vrot.lane.b32.xlu1 %v7188_v26, %s4491_s29  ;;  %2638 = vrot.lane.b32.xlu0 %v7191_v54, %s4491_s29  ;;  %v7258_v10 = vpop.permute.xlu1 %2474  ;;  %v7260_v40 = vpop.permute.xlu0 %2476 }
 0x3b2   : > { %9242 = vst [vmem:[#allocation55_spill] sm:$0xff] %v7258_v10  ;;  %9243 = vst [vmem:[#allocation16_spill] sm:$0xff] %v7260_v40  ;;  %v7274_v10 = vsel %vm503_vm1, %v2313_v18, %v2314_v46  ;;  %v7277_v40 = vsel %vm503_vm1, %v2314_v46, %v2316_v34  ;;  %v7293_v18 = vsel %vm337_vm0, %v6908_v36, 0.0  ;;  %v7296_v34 = vsel %vm503_vm1, %v2319_v43, %v2321_v24 }
 0x3b3   : > { %9247 = vst [vmem:[#allocation155_spill] sm:$0xff] %v7293_v18  ;;  %v2323_v46 = vrot.slane %v6905_v1, 1  ;;  %v2331_v53 = vrot.slane %v7293_v18, 1  ;;  %v7313_v43 = vsel %vm503_vm1, %v2324_v13, %v2326_v5  ;;  %v2328_v24 = vrot.slane %v6919_v33, 1  ;;  %v3428_v33 = vld [vmem:[%s8539_s4 + $0x20] sm:$0xf] }
 0x3b4   : > { %v2333_v5 = vrot.slane %v6940_v45, 1 }
 0x3b5   : > { %2640 = vrot.lane.b32.xlu1 %v7215_v61, %s4491_s29  ;;  %2642 = vrot.lane.b32.xlu0 %v7218_v2, %s4491_s29  ;;  %v7284_v30 = vpop.permute.xlu1 %2478  ;;  %v7286_v38 = vpop.permute.xlu0 %2480  ;;  %v7310_v36 = vsel %vm503_vm1, %v2323_v46, %v2324_v13  ;;  %v2334_v13 = vrot.slane %v6944_v21, 1  ;;  %v7333_v18 = vsel %vm503_vm1, %v2328_v24, %v2329_v11  ;;  %v7336_v32 = vsel %vm503_vm1, %v2329_v11, %v2331_v53 }
 0x3b6   : > { %9245 = vst [vmem:[#allocation17_spill] sm:$0xff] %v7284_v30  ;;  %9246 = vst [vmem:[#allocation154_spill] sm:$0xff] %v7286_v38  ;;  %v2341_v11 = vrot.slane %v7340_v35, 1 }
 0x3b7   : > { %9253 = vst [vmem:[#allocation121_spill] sm:$0xff] %v7333_v18  ;;  %9254 = vst [vmem:[#allocation189_spill] sm:$0xff] %v7336_v32  ;;  %v7351_v24 = vsel %vm503_vm1, %v2333_v5, %v2334_v13 }
 0x3b8   : > { %9258 = vst [vmem:[#allocation59_spill] sm:$0xff] %v7351_v24 }
 0x3b9   : > { %2644 = vrot.lane.b32.xlu1 %v7230_v25, %s4491_s29  ;;  %2646 = vrot.lane.b32.xlu0 %v7237_v49, %s4491_s29 }
 0x3bd   : > { %2648 = vrot.lane.b32.xlu1 %v7247_v37, %s4491_s29  ;;  %2650 = vrot.lane.b32.xlu0 %v7250_v39, %s4491_s29  ;;  %v7305_v38 = vpop.permute.xlu1 %2482  ;;  %v7307_v30 = vpop.permute.xlu0 %2484 }
 0x3be   : > { %9248 = vst [vmem:[#allocation93_spill] sm:$0xff] %v7305_v38  ;;  %9249 = vst [vmem:[#allocation94_spill] sm:$0xff] %v7307_v30  ;;  %v2336_v38 = vrot.slane %v7319_v57, 1  ;;  %v2339_v57 = vrot.slane %v6965_v17, 1 }
 0x3c0   : > { %v7355_v53 = vsel %vm503_vm1, %v2334_v13, %v2336_v38  ;;  %v7368_v5 = vsel %vm503_vm1, %v2338_v60, %v2339_v57  ;;  %v7371_v38 = vsel %vm503_vm1, %v2339_v57, %v2341_v11 }
 0x3c1   : > { %2652 = vrot.lane.b32.xlu1 %v7274_v10, %s4491_s29  ;;  %2654 = vrot.lane.b32.xlu0 %v7277_v40, %s4491_s29  ;;  %9259 = vst [vmem:[#allocation18_spill] sm:$0xff] %v7355_v53  ;;  %9260 = vst [vmem:[#allocation60_spill] sm:$0xff] %v7368_v5 }
 0x3c2   : > { %9261 = vst [vmem:[#allocation19_spill] sm:$0xff] %v7371_v38 }
 0x3c5   : > { %2656 = vrot.lane.b32.xlu1 %v7289_v28, %s4491_s29  ;;  %2658 = vrot.lane.b32.xlu0 %v7296_v34, %s4491_s29  ;;  %v7325_v30 = vpop.permute.xlu1 %2486  ;;  %v7327_v46 = vpop.permute.xlu0 %2488 }
 0x3c6   : > { %9251 = vst [vmem:[#allocation172_spill] sm:$0xff] %v7325_v30  ;;  %9252 = vst [vmem:[#allocation120_spill] sm:$0xff] %v7327_v46 }
 0x3c9   : > { %2660 = vrot.lane.b32.xlu1 %v7310_v36, %s4491_s29  ;;  %2662 = vrot.lane.b32.xlu0 %v7313_v43, %s4491_s29 }
 0x3cd   : > { %2664 = vrot.lane.b32.xlu1 %v7333_v18, %s4491_s29  ;;  %2666 = vrot.lane.b32.xlu0 %v7336_v32, %s4491_s29  ;;  %v2356_v32 = vrot.slane %v6707_v16, 2 }
 0x3cf   : > { %v7346_v46 = vpop.permute.xlu1 %2490  ;;  %v7348_v30 = vpop.permute.xlu0 %2492 }
 0x3d0   : > { %9256 = vst [vmem:[#allocation52_spill] sm:$0xff] %v7346_v46  ;;  %9257 = vst [vmem:[#allocation137_spill] sm:$0xff] %v7348_v30 }
 0x3d1   : > { %2668 = vrot.lane.b32.xlu1 %v7351_v24, %s4491_s29  ;;  %2670 = vrot.lane.b32.xlu0 %v7355_v53, %s4491_s29  ;;  %v3426_v53 = vld [vmem:[%s8539_s4 + $0x10] sm:$0xff]  ;;  %v3427_v24 = vld [vmem:[%s8539_s4 + $0x18] sm:$0xff] }
 0x3d3   : > { %v7363_v46 = vpop.permute.xlu1 %2526  ;;  %v7365_v30 = vpop.permute.xlu0 %2528 }
 0x3d5   : > { %2672 = vrot.lane.b32.xlu1 %v7368_v5, %s4491_s29  ;;  %2674 = vrot.lane.b32.xlu0 %v7371_v38, %s4491_s29  ;;  %v3425_v38 = vld [vmem:[%s8539_s4 + $0x8] sm:$0xff] }
 0x3d6   : > { %v4429_v5 = vpack.c.bf16 %v3425_v38, %v3424_v63  ;;  %v4433_v63 = vpack.c.bf16 %v3427_v24, %v3426_v53  ;;  %v2350_v24 = vrot.slane %v6675_v58, 2  ;;  %v2351_v53 = vrot.slane %v6686_v44, 2 }
 0x3d7   : > { %v7377_v13 = vpop.permute.xlu1 %2530  ;;  %v7379_v35 = vpop.permute.xlu0 %2532 }
 0x3d8   : > { %4430 = vmatprep.subr.bf16.mxu1 %v4429_v5 }
 0x3d9   : > { %2706 = vrot.lane.b32.xlu1 %v7097_v31, %s4492_s30  ;;  %2708 = vrot.lane.b32.xlu0 %v7100_v0, %s4492_s30 }
 0x3da   : > { %4432 = vmatpush3.bf16.msra.mxu1 %v4429_v5 }
 0x3db   : > { %v7385_v60 = vpop.permute.xlu1 %2534  ;;  %v7387_v57 = vpop.permute.xlu0 %2536  ;;  %4434 = vmatprep.subr.bf16.mxu1 %v4433_v63 }
 0x3dd   : > { %2710 = vrot.lane.b32.xlu1 %v7112_v59, %s4492_s30  ;;  %2712 = vrot.lane.b32.xlu0 %v7119_v7, %s4492_s30 }
 0x3de   : > { %4436 = vmatpush3.bf16.msra.mxu1 %v4433_v63 }
 0x3df   : > { %v7393_v11 = vpop.permute.xlu1 %2538  ;;  %v7395_v17 = vpop.permute.xlu0 %2540  ;;  %4371 = vmatprep.subr.msk.mxu1 %vm1818_vm3, %v3428_v33 }
 0x3e1   : > { %2714 = vrot.lane.b32.xlu1 %v7129_v15, %s4492_s30  ;;  %2716 = vrot.lane.b32.xlu0 %v7132_v42, %s4492_s30 }
 0x3e2   : > { %4372 = vmatpush3.msk.msra.mxu1 %vm1818_vm3, %v3428_v33 }
 0x3e3   : > { %v7401_v0 = vpop.permute.xlu1 %2542  ;;  %v7403_v31 = vpop.permute.xlu0 %2544 }
 0x3e5   : > { %2718 = vrot.lane.b32.xlu1 %v7156_v48, %s4492_s30  ;;  %2720 = vrot.lane.b32.xlu0 %v7159_v52, %s4492_s30 }
 0x3e7   : > { %v7415_v21 = vpop.permute.xlu1 %2546  ;;  %v7417_v45 = vpop.permute.xlu0 %2548 }
 0x3e8   : > { %9262 = vst [vmem:[#allocation156_spill] sm:$0xff] %v7415_v21  ;;  %9263 = vst [vmem:[#allocation157_spill] sm:$0xff] %v7417_v45 }
 0x3e9   : > { %2722 = vrot.lane.b32.xlu1 %v7171_v14, %s4492_s30  ;;  %2724 = vrot.lane.b32.xlu0 %v7178_v22, %s4492_s30 }
 0x3eb   : > { %v7429_v38 = vpop.permute.xlu1 %2550  ;;  %v7431_v45 = vpop.permute.xlu0 %2552 }
 0x3ec   : > { %9264 = vst [vmem:[#allocation95_spill] sm:$0xff] %v7429_v38  ;;  %9265 = vst [vmem:[#allocation96_spill] sm:$0xff] %v7431_v45  ;;  %v2355_v38 = vrot.slane %v6695_v41, 2 }
 0x3ed   : > { %2726 = vrot.lane.b32.xlu1 %v7188_v26, %s4492_s30  ;;  %2728 = vrot.lane.b32.xlu0 %v7191_v54, %s4492_s30 }
 0x3ef   : > { %v7440_v21 = vpop.permute.xlu1 %2554  ;;  %v7442_v5 = vpop.permute.xlu0 %2556 }
 0x3f0   : > { %9266 = vst [vmem:[#allocation173_spill] sm:$0xff] %v7440_v21  ;;  %9267 = vst [vmem:[#allocation174_spill] sm:$0xff] %v7442_v5  ;;  %v2353_v5 = vrot.slane %v7066_v6, 2  ;;  %v2352_v21 = vsel %vm591_vm2, %v2350_v24, %v2351_v53  ;;  %v2357_v6 = vsel %vm591_vm2, %v2355_v38, %v2356_v32 }
 0x3f1   : > { %2730 = vrot.lane.b32.xlu1 %v7215_v61, %s4492_s30  ;;  %2802 = vrot.lane.b32.xlu0 %v7112_v59, %s4493_s7 }
 0x3f3   : > { %v7452_v63 = vpop.permute.xlu1 %2558  ;;  %v7454_v45 = vpop.permute.xlu0 %2560 }
 0x3f4   : > { %9268 = vst [vmem:[#allocation122_spill] sm:$0xff] %v7452_v63  ;;  %9269 = vst [vmem:[#allocation123_spill] sm:$0xff] %v7454_v45  ;;  %v2358_v63 = vrot.slane %v7081_v19, 2  ;;  %v2354_v45 = vsel %vm591_vm2, %v2351_v53, %v2353_v5 }
 0x3f5   : > { %2804 = vrot.lane.b32.xlu1 %v7119_v7, %s4493_s7  ;;  %2982 = vrot.lane.b32.xlu0 %v2352_v21, %s4495_s9 }
 0x3f6   : > { %v2359_v7 = vsel %vm591_vm2, %v2356_v32, %v2358_v63  ;;  %v2360_v32 = vrot.slane %v6716_v29, 2  ;;  %v2361_v63 = vrot.slane %v6728_v20, 2 }
 0x3f7   : > { %v7463_v59 = vpop.permute.xlu1 %2562  ;;  %v7465_v33 = vpop.permute.xlu0 %2564 }
 0x3f8   : > { %9270 = vst [vmem:[#allocation191_spill] sm:$0xff] %v7463_v59  ;;  %9271 = vst [vmem:[#allocation192_spill] sm:$0xff] %v7465_v33 }
 0x3f9   : > { %2984 = vrot.lane.b32.xlu1 %v2354_v45, %s4495_s9  ;;  %3078 = vrot.lane.b32.xlu0 %v2357_v6, %s4496_s20 }
 0x3fb   : > { %v7472_v24 = vpop.permute.xlu1 %2566  ;;  %v7474_v18 = vpop.permute.xlu0 %2568 }
 0x3fc   : > { %9272 = vst [vmem:[#allocation57_spill] sm:$0xff] %v7472_v24  ;;  %9273 = vst [vmem:[#allocation138_spill] sm:$0xff] %v7474_v18 }
 0x3fd   : > { %2806 = vrot.lane.b32.xlu1 %v7129_v15, %s4493_s7  ;;  %3080 = vrot.lane.b32.xlu0 %v2359_v7, %s4496_s20 }
 0x3ff   : > { %v7480_v19 = vpop.permute.xlu1 %2570  ;;  %v7482_v5 = vpop.permute.xlu0 %2572 }
 0x400   : > { %9274 = vst [vmem:[#allocation61_spill] sm:$0xff] %v7480_v19  ;;  %9275 = vst [vmem:[#allocation20_spill] sm:$0xff] %v7482_v5 }
 0x401   : > { %2808 = vrot.lane.b32.xlu1 %v7132_v42, %s4493_s7  ;;  %2892 = vrot.lane.b32.xlu0 %v2352_v21, %s4494_s8  ;;  %v2363_v42 = vrot.slane %v7094_v47, 2  ;;  %v2362_v21 = vsel %vm591_vm2, %v2360_v32, %v2361_v63 }
 0x403   : > { %v7487_v38 = vpop.permute.xlu1 %2574  ;;  %v7489_v53 = vpop.permute.xlu0 %2576 }
 0x404   : > { %9276 = vst [vmem:[#allocation62_spill] sm:$0xff] %v7487_v38  ;;  %9277 = vst [vmem:[#allocation21_spill] sm:$0xff] %v7489_v53 }
 0x405   : > { %2894 = vrot.lane.b32.xlu1 %v2354_v45, %s4494_s8  ;;  %2986 = vrot.lane.b32.xlu0 %v2357_v6, %s4495_s9  ;;  %v2364_v45 = vsel %vm591_vm2, %v2361_v63, %v2363_v42  ;;  %v2365_v63 = vrot.slane %v6737_v23, 2  ;;  %v2366_v42 = vrot.slane %v6749_v3, 2 }
 0x407   : > { %v7495_v15 = vpop.permute.xlu1 %2578  ;;  %v7497_v5 = vpop.permute.xlu0 %2580 }
 0x408   : > { %9278 = vst [vmem:[#allocation158_spill] sm:$0xff] %v7495_v15  ;;  %9279 = vst [vmem:[#allocation159_spill] sm:$0xff] %v7497_v5 }
 0x409   : > { %2988 = vrot.lane.b32.xlu1 %v2359_v7, %s4495_s9  ;;  %3082 = vrot.lane.b32.xlu0 %v2362_v21, %s4496_s20 }
 0x40b   : > { %v7503_v53 = vpop.permute.xlu1 %2582  ;;  %v7505_v38 = vpop.permute.xlu0 %2584 }
 0x40c   : > { %9280 = vst [vmem:[#allocation97_spill] sm:$0xff] %v7503_v53  ;;  %9281 = vst [vmem:[#allocation98_spill] sm:$0xff] %v7505_v38 }
 0x40d   : > { %2810 = vrot.lane.b32.xlu1 %v7156_v48, %s4493_s7  ;;  %3084 = vrot.lane.b32.xlu0 %v2364_v45, %s4496_s20 }
 0x40f   : > { %v7511_v5 = vpop.permute.xlu1 %2616  ;;  %v7513_v47 = vpop.permute.xlu0 %2618 }
 0x411   : > { %2812 = vrot.lane.b32.xlu1 %v7159_v52, %s4493_s7  ;;  %2896 = vrot.lane.b32.xlu0 %v2357_v6, %s4494_s8  ;;  %v2368_v52 = vrot.slane %v7116_v9, 2  ;;  %v2367_v6 = vsel %vm591_vm2, %v2365_v63, %v2366_v42 }
 0x413   : > { %v7518_v32 = vpop.permute.xlu1 %2620  ;;  %v7520_v53 = vpop.permute.xlu0 %2622 }
 0x415   : > { %2898 = vrot.lane.b32.xlu1 %v2359_v7, %s4494_s8  ;;  %2990 = vrot.lane.b32.xlu0 %v2362_v21, %s4495_s9  ;;  %v2369_v7 = vsel %vm591_vm2, %v2366_v42, %v2368_v52  ;;  %v2370_v42 = vrot.slane %v6758_v27, 2  ;;  %v2371_v52 = vrot.slane %v6770_v51, 2 }
 0x417   : > { %v7526_v48 = vpop.permute.xlu1 %2624  ;;  %v7528_v38 = vpop.permute.xlu0 %2626 }
 0x419   : > { %2992 = vrot.lane.b32.xlu1 %v2364_v45, %s4495_s9  ;;  %3086 = vrot.lane.b32.xlu0 %v2367_v6, %s4496_s20 }
 0x41b   : > { %v7534_v15 = vpop.permute.xlu1 %2628  ;;  %v7536_v19 = vpop.permute.xlu0 %2630 }
 0x41d   : > { %2814 = vrot.lane.b32.xlu1 %v7171_v14, %s4493_s7  ;;  %3088 = vrot.lane.b32.xlu0 %v2369_v7, %s4496_s20 }
 0x41f   : > { %v7542_v18 = vpop.permute.xlu1 %2632  ;;  %v7544_v9 = vpop.permute.xlu0 %2634 }
 0x420   : > { %9282 = vst [vmem:[#allocation175_spill] sm:$0xff] %v7542_v18  ;;  %9283 = vst [vmem:[#allocation176_spill] sm:$0xff] %v7544_v9  ;;  %v9316_v18 = vld [vmem:[#allocation49_spill] sm:$0xff] }
 0x421   : > { %2816 = vrot.lane.b32.xlu1 %v7178_v22, %s4493_s7  ;;  %2900 = vrot.lane.b32.xlu0 %v2362_v21, %s4494_s8  ;;  %v2373_v22 = vrot.slane %v7138_v56, 2  ;;  %v2372_v21 = vsel %vm591_vm2, %v2370_v42, %v2371_v52 }
 0x423   : > { %v7549_v63 = vpop.permute.xlu1 %2636  ;;  %v7551_v24 = vpop.permute.xlu0 %2638 }
 0x424   : > { %9284 = vst [vmem:[#allocation124_spill] sm:$0xff] %v7549_v63  ;;  %9285 = vst [vmem:[#allocation125_spill] sm:$0xff] %v7551_v24 }
 0x425   : > { %2902 = vrot.lane.b32.xlu1 %v2364_v45, %s4494_s8  ;;  %2994 = vrot.lane.b32.xlu0 %v2367_v6, %s4495_s9  ;;  %v2374_v45 = vsel %vm591_vm2, %v2371_v52, %v2373_v22  ;;  %v2375_v52 = vrot.slane %v6779_v50, 2  ;;  %v9294_v22 = vld [vmem:[#allocation36_spill] sm:$0xff]  ;;  %v9313_v50 = vld [vmem:[#allocation134_spill] sm:$0xff] }
 0x427   : > { %v7557_v14 = vpop.permute.xlu1 %2640  ;;  %v7559_v33 = vpop.permute.xlu0 %2642 }
 0x428   : > { %9286 = vst [vmem:[#allocation193_spill] sm:$0xff] %v7557_v14  ;;  %9287 = vst [vmem:[#allocation194_spill] sm:$0xff] %v7559_v33 }
 0x429   : > { %2996 = vrot.lane.b32.xlu1 %v2369_v7, %s4495_s9  ;;  %3090 = vrot.lane.b32.xlu0 %v2372_v21, %s4496_s20 }
 0x42b   : > { %v7565_v59 = vpop.permute.xlu1 %2644  ;;  %v7567_v24 = vpop.permute.xlu0 %2646 }
 0x42c   : > { %9288 = vst [vmem:[#allocation58_spill] sm:$0xff] %v7565_v59  ;;  %9289 = vst [vmem:[#allocation139_spill] sm:$0xff] %v7567_v24  ;;  %v2376_v24 = vrot.slane %v9294_v22, 2 }
 0x42d   : > { %2818 = vrot.lane.b32.xlu1 %v7188_v26, %s4493_s7  ;;  %3092 = vrot.lane.b32.xlu0 %v2374_v45, %s4496_s20 }
 0x42f   : > { %v7573_v33 = vpop.permute.xlu1 %2648  ;;  %v7575_v56 = vpop.permute.xlu0 %2650 }
 0x430   : > { %9290 = vst [vmem:[#allocation65_spill] sm:$0xff] %v7573_v33  ;;  %9291 = vst [vmem:[#allocation22_spill] sm:$0xff] %v7575_v56  ;;  %v9297_v33 = vld [vmem:[#allocation15_spill] sm:$0xff] }
 0x431   : > { %2820 = vrot.lane.b32.xlu1 %v7191_v54, %s4493_s7  ;;  %2904 = vrot.lane.b32.xlu0 %v2367_v6, %s4494_s8  ;;  %v2378_v54 = vrot.slane %v9297_v33, 2  ;;  %v2377_v6 = vsel %vm591_vm2, %v2375_v52, %v2376_v24 }
 0x433   : > { %v7580_v42 = vpop.permute.xlu1 %2652  ;;  %v7582_v59 = vpop.permute.xlu0 %2654 }
 0x434   : > { %9292 = vst [vmem:[#allocation66_spill] sm:$0xff] %v7580_v42  ;;  %9293 = vst [vmem:[#allocation23_spill] sm:$0xff] %v7582_v59 }
 0x435   : > { %2906 = vrot.lane.b32.xlu1 %v2369_v7, %s4494_s8  ;;  %2998 = vrot.lane.b32.xlu0 %v2372_v21, %s4495_s9  ;;  %v2379_v7 = vsel %vm591_vm2, %v2376_v24, %v2378_v54  ;;  %v2380_v24 = vrot.slane %v6800_v12, 2  ;;  %v2381_v54 = vrot.slane %v6812_v8, 2  ;;  %v9307_v8 = vld [vmem:[#allocation145_spill] sm:$0xff] }
 0x436   : > { %v2385_v14 = vrot.slane %v9307_v8, 2  ;;  %v9312_v8 = vld [vmem:[#allocation92_spill] sm:$0xff] }
 0x437   : > { %v7588_v26 = vpop.permute.xlu1 %2656  ;;  %v7590_v56 = vpop.permute.xlu0 %2658  ;;  %v2388_v63 = vrot.slane %v9312_v8, 2  ;;  %v9317_v8 = vld [vmem:[#allocation2_spill] sm:$0xff] }
 0x438   : > { %9295 = vst [vmem:[#allocation160_spill] sm:$0xff] %v7588_v26  ;;  %9296 = vst [vmem:[#allocation161_spill] sm:$0xff] %v7590_v56  ;;  %v3169_v27 = vsel %vm1445_vm4, %v9317_v8, %v9316_v18 }
 0x439   : > { %3000 = vrot.lane.b32.xlu1 %v2374_v45, %s4495_s9  ;;  %3094 = vrot.lane.b32.xlu0 %v2377_v6, %s4496_s20 }
 0x43b   : > { %v7596_v59 = vpop.permute.xlu1 %2660  ;;  %v7598_v42 = vpop.permute.xlu0 %2662 }
 0x43c   : > { %9298 = vst [vmem:[#allocation99_spill] sm:$0xff] %v7596_v59  ;;  %9299 = vst [vmem:[#allocation100_spill] sm:$0xff] %v7598_v42 }
 0x43d   : > { %2822 = vrot.lane.b32.xlu1 %v7215_v61, %s4493_s7  ;;  %3096 = vrot.lane.b32.xlu0 %v2379_v7, %s4496_s20 }
 0x43f   : > { %v7604_v56 = vpop.permute.xlu1 %2664  ;;  %v7606_v33 = vpop.permute.xlu0 %2666 }
 0x440   : > { %9300 = vst [vmem:[#allocation177_spill] sm:$0xff] %v7604_v56  ;;  %9301 = vst [vmem:[#allocation178_spill] sm:$0xff] %v7606_v33  ;;  %v2382_v56 = vsel %vm591_vm2, %v2380_v24, %v2381_v54 }
 0x441   : > { %2824 = vrot.lane.b32.xlu1 %v7218_v2, %s4493_s7  ;;  %2908 = vrot.lane.b32.xlu0 %v2372_v21, %s4494_s8 }
 0x443   : > { %v7611_v52 = vpop.permute.xlu1 %2668  ;;  %v7613_v59 = vpop.permute.xlu0 %2670 }
 0x444   : > { %9302 = vst [vmem:[#allocation126_spill] sm:$0xff] %v7611_v52  ;;  %9303 = vst [vmem:[#allocation127_spill] sm:$0xff] %v7613_v59  ;;  %v9306_v52 = vld [vmem:[#allocation91_spill] sm:$0xff] }
 0x445   : > { %2910 = vrot.lane.b32.xlu1 %v2374_v45, %s4494_s8  ;;  %3002 = vrot.lane.b32.xlu0 %v2377_v6, %s4495_s9  ;;  %v2383_v42 = vrot.slane %v9306_v52, 2 }
 0x447   : > { %v7619_v61 = vpop.permute.xlu1 %2672  ;;  %v7621_v33 = vpop.permute.xlu0 %2674  ;;  %v2384_v24 = vsel %vm591_vm2, %v2381_v54, %v2383_v42  ;;  %v9308_v42 = vld [vmem:[#allocation84_spill] sm:$0xff] }
 0x448   : > { %9304 = vst [vmem:[#allocation195_spill] sm:$0xff] %v7619_v61  ;;  %9305 = vst [vmem:[#allocation196_spill] sm:$0xff] %v7621_v33  ;;  %v2386_v54 = vrot.slane %v9308_v42, 2 }
 0x449   : > { %3004 = vrot.lane.b32.xlu1 %v2379_v7, %s4495_s9  ;;  %3098 = vrot.lane.b32.xlu0 %v2382_v56, %s4496_s20 }
 0x44b   : > { %v2707_v21 = vpop.permute.xlu1 %2706  ;;  %v2709_v59 = vpop.permute.xlu0 %2708 }
 0x44d   : > { %2732 = vrot.lane.b32.xlu1 %v7218_v2, %s4492_s30  ;;  %2826 = vrot.lane.b32.xlu0 %v7230_v25, %s4493_s7 }
 0x44f   : > { %v7631_v45 = vpop.permute.xlu1 %2710  ;;  %v7633_v61 = vpop.permute.xlu0 %2712 }
 0x451   : > { %3100 = vrot.lane.b32.xlu1 %v2384_v24, %s4496_s20  ;;  %2828 = vrot.lane.b32.xlu0 %v7237_v49, %s4493_s7 }
 0x453   : > { %v7639_v33 = vpop.permute.xlu1 %2714  ;;  %v7641_v52 = vpop.permute.xlu0 %2716 }
 0x455   : > { %2912 = vrot.lane.b32.xlu1 %v2377_v6, %s4494_s8  ;;  %2914 = vrot.lane.b32.xlu0 %v2379_v7, %s4494_s8  ;;  %v7659_v6 = vsel %vm591_vm2, %v2385_v14, %v2386_v54 }
 0x457   : > { %v7645_v2 = vpop.permute.xlu1 %2718  ;;  %v7647_v26 = vpop.permute.xlu0 %2720 }
 0x459   : > { %3006 = vrot.lane.b32.xlu1 %v2382_v56, %s4495_s9  ;;  %2734 = vrot.lane.b32.xlu0 %v7230_v25, %s4492_s30  ;;  %v9314_v25 = vld [vmem:[#allocation3_spill] sm:$0xff] }
 0x45a   : > { %v3168_v9 = vsel %vm1445_vm4, %v9314_v25, %v9313_v50 }
 0x45b   : > { %v7654_v12 = vpop.permute.xlu1 %2722  ;;  %v7656_v22 = vpop.permute.xlu0 %2724  ;;  %v3200_v14 = vsel %vm1478_vm5, %v3168_v9, %v7363_v46 }
 0x45c   : > { %9309 = vst [vmem:[#allocation63_spill] sm:$0xff] %v7656_v22  ;;  %v9318_v22 = vld [vmem:[#allocation105_spill] sm:$0xff] }
 0x45d   : > { %3008 = vrot.lane.b32.xlu1 %v2384_v24, %s4495_s9  ;;  %3102 = vrot.lane.b32.xlu0 %v7659_v6, %s4496_s20  ;;  %v9319_v50 = vunpack.i.l.bf16 %v9318_v22  ;;  %v9320_v18 = vunpack.i.h.bf16 %v9318_v22 }
 0x45f   : > { %v7664_v7 = vpop.permute.xlu1 %2726  ;;  %v7666_v42 = vpop.permute.xlu0 %2728  ;;  %v3232_v25 = vsel %vm1511_vm6, %v3200_v14, %v9319_v50  ;;  %v9321_v50 = vld [vmem:[#allocation168_spill] sm:$0xff] }
 0x460   : > { %9310 = vst [vmem:[#allocation140_spill] sm:$0xff] %v7664_v7  ;;  %9311 = vst [vmem:[#allocation162_spill] sm:$0xff] %v7666_v42  ;;  %v2389_v42 = vsel %vm591_vm2, %v2386_v54, %v2388_v63  ;;  %v3264_v46 = vsel %vm1544_vm7, %v3232_v25, %v2707_v21 }
 0x461   : > { %2736 = vrot.lane.b32.xlu1 %v7237_v49, %s4492_s30  ;;  %2830 = vrot.lane.b32.xlu0 %v7247_v37, %s4493_s7  ;;  %v3201_v49 = vsel %vm1478_vm5, %v3169_v27, %v7365_v30 }
 0x462   : > { %v3233_v8 = vsel %vm1511_vm6, %v3201_v49, %v9320_v18  ;;  %v2390_v49 = vrot.slane %v6842_v55, 2 }
 0x463   : > { %v7678_v51 = vpop.permute.xlu1 %2730  ;;  %v2803_v7 = vpop.permute.xlu0 %2802  ;;  %v3265_v14 = vsel %vm1544_vm7, %v3233_v8, %v2709_v59 }
 0x464   : > { %9315 = vst [vmem:[#allocation163_spill] sm:$0xff] %v7678_v51  ;;  %v3296_v9 = vsel %vm1577_vm8, %v3264_v46, %v2803_v7  ;;  %v9322_v51 = vunpack.i.l.bf16 %v9321_v50  ;;  %v9323_v46 = vld [vmem:[#allocation4_spill] sm:$0xff] }
 0x465   : > { %3104 = vrot.lane.b32.xlu1 %v2389_v42, %s4496_s20  ;;  %2832 = vrot.lane.b32.xlu0 %v7250_v39, %s4493_s7 }
 0x466   : > { %v3328_v27 = vsel %vm1610_vm9, %v3296_v9, %v9322_v51  ;;  %v9324_v51 = vunpack.i.h.bf16 %v9321_v50 }
 0x467   : > { %v2805_v63 = vpop.permute.xlu1 %2804  ;;  %v2983_v54 = vpop.permute.xlu0 %2982 }
 0x468   : > { %v3297_v30 = vsel %vm1577_vm8, %v3265_v14, %v2805_v63  ;;  %v3360_v21 = vsel %vm1643_vm10, %v3328_v27, %v2983_v54  ;;  %v9325_v14 = vld [vmem:[#allocation119_spill] sm:$0xff]  ;;  %v9326_v27 = vld [vmem:[#allocation12_spill] sm:$0xff] }
 0x469   : > { %2916 = vrot.lane.b32.xlu1 %v2382_v56, %s4494_s8  ;;  %2918 = vrot.lane.b32.xlu0 %v2384_v24, %s4494_s8  ;;  %v2391_v56 = vrot.slane %v9323_v46, 2  ;;  %v3329_v59 = vsel %vm1610_vm9, %v3297_v30, %v9324_v51  ;;  %v2393_v50 = vrot.slane %v9325_v14, 2  ;;  %v3170_v30 = vsel %vm1445_vm4, %v6675_v58, %v9326_v27  ;;  %v9327_v58 = vld [vmem:[#allocation50_spill] sm:$0xff] }
 0x46a   : > { %v2396_v27 = vrot.slane %v6875_v4, 2 }
 0x46b   : > { %v2985_v7 = vpop.permute.xlu1 %2984  ;;  %v3079_v25 = vpop.permute.xlu0 %3078  ;;  %v7719_v18 = vsel %vm591_vm2, %v2390_v49, %v2391_v56  ;;  %v2394_v51 = vsel %vm591_vm2, %v2391_v56, %v2393_v50 }
 0x46c   : > { %v3392_v22 = vsel %vm1676_vm11, %v3360_v21, %v3079_v25  ;;  %v3361_v24 = vsel %vm1643_vm10, %v3329_v59, %v2985_v7  ;;  %v3202_v21 = vsel %vm1478_vm5, %v3170_v30, %v7377_v13  ;;  %v9328_v30 = vld [vmem:[#allocation13_spill] sm:$0xff] }
 0x46d   : > { %3010 = vrot.lane.b32.xlu1 %v7659_v6, %s4495_s9  ;;  %2738 = vrot.lane.b32.xlu0 %v7247_v37, %s4492_s30  ;;  %v3234_v7 = vsel %vm1511_vm6, %v3202_v21, %v7511_v5  ;;  %v3172_v21 = vsel %vm1445_vm4, %v6695_v41, %v9328_v30 }
 0x46e   : > { %4373 = vmatprep.mubr.msk.f32.mxu1 %vm1721_vm12, %v3392_v22  ;;  %v3266_v49 = vsel %vm1544_vm7, %v3234_v7, %v7631_v45  ;;  %v3204_v7 = vsel %vm1478_vm5, %v3172_v21, %v7385_v60 }
 0x46f   : > { %v2807_v9 = vpop.permute.xlu1 %2806  ;;  %v3081_v63 = vpop.permute.xlu0 %3080 }
 0x470   : > { %v3393_v54 = vsel %vm1676_vm11, %v3361_v24, %v3081_v63  ;;  %v3298_v59 = vsel %vm1577_vm8, %v3266_v49, %v2807_v9  ;;  %v9329_v49 = vld [vmem:[#allocation51_spill] sm:$0xff] }
 0x471   : > { %3012 = vrot.lane.b32.xlu1 %v2389_v42, %s4495_s9  ;;  %3106 = vrot.lane.b32.xlu0 %v7719_v18, %s4496_s20 }
 0x472   : > { %4374 = vmatmul.mubr.msk.f32.vlgmr.msra.gmra.mrb[0].mxu1 %vm1721_vm12, %v3393_v54 }
 0x473   : > { %v2809_v37 = vpop.permute.xlu1 %2808  ;;  %v2893_v8 = vpop.permute.xlu0 %2892 }
 0x474   : > { %v3330_v5 = vsel %vm1610_vm9, %v3298_v59, %v2893_v8  ;;  %v9330_v59 = vld [vmem:[#allocation150_spill] sm:$0xff] }
 0x475   : > { %2740 = vrot.lane.b32.xlu1 %v7250_v39, %s4492_s30  ;;  %2834 = vrot.lane.b32.xlu0 %v7274_v10, %s4493_s7  ;;  %v3171_v39 = vsel %vm1445_vm4, %v6686_v44, %v9327_v58  ;;  %v2398_v58 = vrot.slane %v9329_v49, 2  ;;  %v3173_v41 = vsel %vm1445_vm4, %v6707_v16, %v9330_v59 }
 0x476   : > { %v3203_v13 = vsel %vm1478_vm5, %v3171_v39, %v7379_v35  ;;  %v3205_v60 = vsel %vm1478_vm5, %v3173_v41, %v7387_v57 }
 0x477   : > { %v2895_v25 = vpop.permute.xlu1 %2894  ;;  %v2987_v22 = vpop.permute.xlu0 %2986  ;;  %v3235_v45 = vsel %vm1511_vm6, %v3203_v13, %v7513_v47 }
 0x478   : > { %v3362_v56 = vsel %vm1643_vm10, %v3330_v5, %v2987_v22  ;;  %v3267_v44 = vsel %vm1544_vm7, %v3235_v45, %v7633_v61  ;;  %v2395_v61 = vrot.slane %v6863_v62, 2 }
 0x479   : > { %3108 = vrot.lane.b32.xlu1 %v2394_v51, %s4496_s20  ;;  %2836 = vrot.lane.b32.xlu0 %v7277_v40, %s4493_s7  ;;  %v3299_v54 = vsel %vm1577_vm8, %v3267_v44, %v2809_v37 }
 0x47a   : > { %v3331_v35 = vsel %vm1610_vm9, %v3299_v54, %v2895_v25  ;;  %v7772_v37 = vsel %vm591_vm2, %v2395_v61, %v2396_v27  ;;  %v9333_v61 = vld [vmem:[#allocation151_spill] sm:$0xff] }
 0x47b   : > { %v2989_v24 = vpop.permute.xlu1 %2988  ;;  %v3083_v63 = vpop.permute.xlu0 %3082 }
 0x47c   : > { %v3394_v9 = vsel %vm1676_vm11, %v3362_v56, %v3083_v63  ;;  %v3363_v47 = vsel %vm1643_vm10, %v3331_v35, %v2989_v24  ;;  %v2399_v24 = vsel %vm591_vm2, %v2396_v27, %v2398_v58  ;;  %v3174_v27 = vsel %vm1445_vm4, %v6716_v29, %v9333_v61  ;;  %v9334_v29 = vld [vmem:[#allocation89_spill] sm:$0xff] }
 0x47d   : > { %2920 = vrot.lane.b32.xlu1 %v7659_v6, %s4494_s8  ;;  %2922 = vrot.lane.b32.xlu0 %v2389_v42, %s4494_s8 }
 0x47e   : > { %4376 = vmatprep.mubr.msk.f32.mxu1 %vm1721_vm12, %v3394_v9 }
 0x47f   : > { %v2811_v8 = vpop.permute.xlu1 %2810  ;;  %v3085_v14 = vpop.permute.xlu0 %3084 }
 0x480   : > { %v3395_v50 = vsel %vm1676_vm11, %v3363_v47, %v3085_v14  ;;  %v9331_v47 = vld [vmem:[#allocation44_spill] sm:$0xff]  ;;  %v9332_v14 = vld [vmem:[#allocation146_spill] sm:$0xff] }
 0x481   : > { %3014 = vrot.lane.b32.xlu1 %v7719_v18, %s4495_s9  ;;  %2742 = vrot.lane.b32.xlu0 %v7274_v10, %s4492_s30  ;;  %v3236_v10 = vsel %vm1511_vm6, %v3204_v7, %v7518_v32  ;;  %v3175_v7 = vsel %vm1445_vm4, %v6728_v20, %v9334_v29  ;;  %v9335_v20 = vld [vmem:[#allocation136_spill] sm:$0xff] }
 0x482   : > { %4377 = vmatmul.mubr.msk.f32.gmra.mrb[2].mxu1 %vm1721_vm12, %v3395_v50  ;;  %v3268_v39 = vsel %vm1544_vm7, %v3236_v10, %v7639_v33  ;;  %v3237_v33 = vsel %vm1511_vm6, %v3205_v60, %v7520_v53  ;;  %v2401_v50 = vrot.slane %v9332_v14, 2  ;;  %v2403_v49 = vrot.slane %v9335_v20, 2 }
 0x483   : > { %v2813_v42 = vpop.permute.xlu1 %2812  ;;  %v2897_v6 = vpop.permute.xlu0 %2896  ;;  %v3300_v13 = vsel %vm1577_vm8, %v3268_v39, %v2811_v8  ;;  %v3269_v56 = vsel %vm1544_vm7, %v3237_v33, %v7641_v52  ;;  %v2400_v8 = vrot.slane %v9331_v47, 2  ;;  %v9336_v33 = vld [vmem:[#allocation90_spill] sm:$0xff] }
 0x484   : > { %v3332_v32 = vsel %vm1610_vm9, %v3300_v13, %v2897_v6  ;;  %v3301_v63 = vsel %vm1577_vm8, %v3269_v56, %v2813_v42  ;;  %v2404_v60 = vsel %vm591_vm2, %v2401_v50, %v2403_v49 }
 0x485   : > { %3016 = vrot.lane.b32.xlu1 %v2394_v51, %s4495_s9  ;;  %3110 = vrot.lane.b32.xlu0 %v7772_v37, %s4496_s20  ;;  %v7833_v21 = vsel %vm591_vm2, %v2400_v8, %v2401_v50 }
 0x487   : > { %v2899_v25 = vpop.permute.xlu1 %2898  ;;  %v2991_v22 = vpop.permute.xlu0 %2990 }
 0x488   : > { %v3364_v5 = vsel %vm1643_vm10, %v3332_v32, %v2991_v22  ;;  %v3333_v57 = vsel %vm1610_vm9, %v3301_v63, %v2899_v25 }
 0x489   : > { %2744 = vrot.lane.b32.xlu1 %v7277_v40, %s4492_s30  ;;  %2838 = vrot.lane.b32.xlu0 %v7289_v28, %s4493_s7 }
 0x48b   : > { %v2993_v45 = vpop.permute.xlu1 %2992  ;;  %v3087_v16 = vpop.permute.xlu0 %3086 }
 0x48c   : > { %v3396_v40 = vsel %vm1676_vm11, %v3364_v5, %v3087_v16  ;;  %v3365_v53 = vsel %vm1643_vm10, %v3333_v57, %v2993_v45  ;;  %v3176_v5 = vsel %vm1445_vm4, %v6737_v23, %v9336_v33  ;;  %v2405_v57 = vrot.slane %v6905_v1, 2  ;;  %v9349_v33 = vld [vmem:[#allocation112_spill] sm:$0xff] }
 0x48d   : > { %3112 = vrot.lane.b32.xlu1 %v2399_v24, %s4496_s20  ;;  %2840 = vrot.lane.b32.xlu0 %v7296_v34, %s4493_s7  ;;  %v3208_v45 = vsel %vm1478_vm5, %v3176_v5, %v7401_v0  ;;  %v2411_v5 = vrot.slane %v9349_v33, 2 }
 0x48e   : > { %4379 = vmatprep.mubr.msk.f32.mxu1 %vm1721_vm12, %v3396_v40  ;;  %v3240_v16 = vsel %vm1511_vm6, %v3208_v45, %v7534_v15  ;;  %v9350_v45 = vld [vmem:[#allocation48_spill] sm:$0xff] }
 0x48f   : > { %v2815_v44 = vpop.permute.xlu1 %2814  ;;  %v3089_v9 = vpop.permute.xlu0 %3088  ;;  %v3272_v63 = vsel %vm1544_vm7, %v3240_v16, %v7654_v12  ;;  %v9351_v16 = vld [vmem:[#allocation38_spill] sm:$0xff] }
 0x490   : > { %v3397_v52 = vsel %vm1676_vm11, %v3365_v53, %v3089_v9  ;;  %v9337_v53 = vld [vmem:[#allocation85_spill] sm:$0xff] }
 0x491   : > { %2924 = vrot.lane.b32.xlu1 %v7719_v18, %s4494_s8  ;;  %2926 = vrot.lane.b32.xlu0 %v2394_v51, %s4494_s8  ;;  %v3206_v18 = vsel %vm1478_vm5, %v3174_v27, %v7393_v11  ;;  %v3207_v11 = vsel %vm1478_vm5, %v3175_v7, %v7395_v17  ;;  %v2406_v23 = vrot.slane %v9337_v53, 2 }
 0x492   : > { %4380 = vmatmul.mubr.msk.f32.gmra.mrb[4].mxu1 %vm1721_vm12, %v3397_v52  ;;  %v3238_v51 = vsel %vm1511_vm6, %v3206_v18, %v7526_v48  ;;  %v9340_v18 = vld [vmem:[#allocation56_spill] sm:$0xff] }
 0x493   : > { %v2817_v54 = vpop.permute.xlu1 %2816  ;;  %v2901_v35 = vpop.permute.xlu0 %2900  ;;  %v3270_v30 = vsel %vm1544_vm7, %v3238_v51, %v7645_v2  ;;  %v3239_v2 = vsel %vm1511_vm6, %v3207_v11, %v7528_v38  ;;  %v7898_v50 = vsel %vm591_vm2, %v2405_v57, %v2406_v23  ;;  %v2408_v51 = vrot.slane %v9340_v18, 2  ;;  %v9343_v11 = vld [vmem:[#allocation80_spill] sm:$0xff] }
 0x494   : > { %v3271_v58 = vsel %vm1544_vm7, %v3239_v2, %v7647_v26  ;;  %v9344_v2 = vld [vmem:[#allocation189_spill] sm:$0xff] }
 0x495   : > { %3018 = vrot.lane.b32.xlu1 %v7772_v37, %s4495_s9  ;;  %2746 = vrot.lane.b32.xlu0 %v7289_v28, %s4492_s30  ;;  %v3302_v28 = vsel %vm1577_vm8, %v3270_v30, %v2815_v44  ;;  %v3303_v59 = vsel %vm1577_vm8, %v3271_v58, %v2817_v54  ;;  %v9338_v44 = vld [vmem:[#allocation116_spill] sm:$0xff]  ;;  %v9339_v54 = vld [vmem:[#allocation63_spill] sm:$0xff]  ;;  %v2409_v7 = vsel %vm591_vm2, %v2406_v23, %v2408_v51  ;;  %v9359_v51 = vld [vmem:[#allocation18_spill] sm:$0xff] }
 0x496   : > { %v3334_v48 = vsel %vm1610_vm9, %v3302_v28, %v2901_v35  ;;  %v9342_v28 = vld [vmem:[#allocation117_spill] sm:$0xff]  ;;  %v9347_v58 = vld [vmem:[#allocation140_spill] sm:$0xff] }
 0x497   : > { %v2903_v42 = vpop.permute.xlu1 %2902  ;;  %v2995_v6 = vpop.permute.xlu0 %2994 }
 0x498   : > { %v3366_v10 = vsel %vm1643_vm10, %v3334_v48, %v2995_v6  ;;  %v3335_v17 = vsel %vm1610_vm9, %v3303_v59, %v2903_v42  ;;  %v9341_v6 = vld [vmem:[#allocation121_spill] sm:$0xff]  ;;  %v3178_v48 = vsel %vm1445_vm4, %v9343_v11, %v9342_v28 }
 0x499   : > { %3020 = vrot.lane.b32.xlu1 %v2399_v24, %s4495_s9  ;;  %3114 = vrot.lane.b32.xlu0 %v7833_v21, %s4496_s20 }
 0x49b   : > { %v2997_v25 = vpop.permute.xlu1 %2996  ;;  %v3091_v22 = vpop.permute.xlu0 %3090 }
 0x49c   : > { %v3398_v39 = vsel %vm1676_vm11, %v3366_v10, %v3091_v22  ;;  %v3367_v38 = vsel %vm1643_vm10, %v3335_v17, %v2997_v25  ;;  %v9345_v10 = vld [vmem:[#allocation156_spill] sm:$0xff]  ;;  %v9346_v25 = vld [vmem:[#allocation175_spill] sm:$0xff] }
 0x49d   : > { %2748 = vrot.lane.b32.xlu1 %v7296_v34, %s4492_s30  ;;  %2842 = vrot.lane.b32.xlu0 %v7310_v36, %s4493_s7 }
 0x49e   : > { %4382 = vmatprep.mubr.msk.f32.mxu1 %vm1721_vm12, %v3398_v39 }
 0x49f   : > { %v2819_v41 = vpop.permute.xlu1 %2818  ;;  %v3093_v13 = vpop.permute.xlu0 %3092 }
 0x4a0   : > { %v3399_v26 = vsel %vm1676_vm11, %v3367_v38, %v3093_v13 }
 0x4a1   : > { %3116 = vrot.lane.b32.xlu1 %v2404_v60, %s4496_s20  ;;  %2844 = vrot.lane.b32.xlu0 %v7313_v43, %s4493_s7 }
 0x4a2   : > { %4383 = vmatmul.mubr.msk.f32.gmra.mrb[6].mxu1 %vm1721_vm12, %v3399_v26 }
 0x4a3   : > { %v2821_v34 = vpop.permute.xlu1 %2820  ;;  %v2905_v32 = vpop.permute.xlu0 %2904 }
 0x4a5   : > { %2928 = vrot.lane.b32.xlu1 %v7772_v37, %s4494_s8  ;;  %2930 = vrot.lane.b32.xlu0 %v2399_v24, %s4494_s8  ;;  %v3177_v37 = vsel %vm1445_vm4, %v6749_v3, %v9338_v44  ;;  %v3304_v24 = vsel %vm1577_vm8, %v3272_v63, %v2819_v41  ;;  %v9354_v44 = vld [vmem:[#allocation162_spill] sm:$0xff] }
 0x4a6   : > { %v3209_v0 = vsel %vm1478_vm5, %v3177_v37, %v7403_v31  ;;  %v3336_v12 = vsel %vm1610_vm9, %v3304_v24, %v2905_v32 }
 0x4a7   : > { %v2907_v56 = vpop.permute.xlu1 %2906  ;;  %v2999_v40 = vpop.permute.xlu0 %2998  ;;  %v3241_v15 = vsel %vm1511_vm6, %v3209_v0, %v7536_v19 }
 0x4a8   : > { %v3368_v9 = vsel %vm1643_vm10, %v3336_v12, %v2999_v40  ;;  %v3273_v35 = vsel %vm1544_vm7, %v3241_v15, %v9339_v54  ;;  %v9353_v40 = vld [vmem:[#allocation176_spill] sm:$0xff] }
 0x4a9   : > { %3022 = vrot.lane.b32.xlu1 %v7833_v21, %s4495_s9  ;;  %2750 = vrot.lane.b32.xlu0 %v7310_v36, %s4492_s30  ;;  %v3305_v36 = vsel %vm1577_vm8, %v3273_v35, %v2821_v34  ;;  %v9348_v34 = vld [vmem:[#allocation86_spill] sm:$0xff] }
 0x4aa   : > { %v3337_v31 = vsel %vm1610_vm9, %v3305_v36, %v2907_v56  ;;  %v2410_v32 = vrot.slane %v9348_v34, 2  ;;  %v3179_v56 = vsel %vm1445_vm4, %v9351_v16, %v9350_v45 }
 0x4ab   : > { %v3001_v52 = vpop.permute.xlu1 %3000  ;;  %v3095_v3 = vpop.permute.xlu0 %3094 }
 0x4ac   : > { %v3400_v8 = vsel %vm1676_vm11, %v3368_v9, %v3095_v3  ;;  %v3369_v19 = vsel %vm1643_vm10, %v3337_v31, %v3001_v52  ;;  %v7951_v24 = vsel %vm591_vm2, %v2410_v32, %v2411_v5  ;;  %v9355_v3 = vld [vmem:[#allocation155_spill] sm:$0xff] }
 0x4ad   : > { %3024 = vrot.lane.b32.xlu1 %v2404_v60, %s4495_s9  ;;  %3118 = vrot.lane.b32.xlu0 %v7898_v50, %s4496_s20  ;;  %v2413_v54 = vrot.slane %v9355_v3, 2  ;;  %v9372_v3 = vld [vmem:[#allocation6_spill] sm:$0xff] }
 0x4ae   : > { %4385 = vmatprep.mubr.msk.f32.mxu1 %vm1721_vm12, %v3400_v8  ;;  %v9356_v8 = vld [vmem:[#allocation59_spill] sm:$0xff] }
 0x4af   : > { %v2823_v61 = vpop.permute.xlu1 %2822  ;;  %v3097_v27 = vpop.permute.xlu0 %3096 }
 0x4b0   : > { %v3401_v42 = vsel %vm1676_vm11, %v3369_v19, %v3097_v27  ;;  %v2414_v19 = vsel %vm591_vm2, %v2411_v5, %v2413_v54  ;;  %v9358_v27 = vld [vmem:[#allocation82_spill] sm:$0xff] }
 0x4b1   : > { %2752 = vrot.lane.b32.xlu1 %v7313_v43, %s4492_s30  ;;  %2846 = vrot.lane.b32.xlu0 %v9341_v6, %s4493_s7  ;;  %v3210_v43 = vsel %vm1478_vm5, %v3178_v48, %v9345_v10  ;;  %v9362_v48 = vld [vmem:[#allocation163_spill] sm:$0xff] }
 0x4b2   : > { %4386 = vmatmul.mubr.msk.f32.gmra.mrb[8].mxu1 %vm1721_vm12, %v3401_v42  ;;  %v3242_v22 = vsel %vm1511_vm6, %v3210_v43, %v9346_v25  ;;  %v9360_v42 = vld [vmem:[#allocation95_spill] sm:$0xff] }
 0x4b3   : > { %v2825_v30 = vpop.permute.xlu1 %2824  ;;  %v2909_v29 = vpop.permute.xlu0 %2908  ;;  %v3274_v39 = vsel %vm1544_vm7, %v3242_v22, %v9347_v58  ;;  %v9363_v58 = vld [vmem:[#allocation42_spill] sm:$0xff] }
 0x4b4   : > { %v3306_v59 = vsel %vm1577_vm8, %v3274_v39, %v2823_v61  ;;  %v9357_v61 = vld [vmem:[#allocation135_spill] sm:$0xff]  ;;  %v2415_v39 = vrot.slane %v9363_v58, 2 }
 0x4b5   : > { %3120 = vrot.lane.b32.xlu1 %v2409_v7, %s4496_s20  ;;  %2848 = vrot.lane.b32.xlu0 %v9344_v2, %s4493_s7  ;;  %v3338_v17 = vsel %vm1610_vm9, %v3306_v59, %v2909_v29  ;;  %v3180_v18 = vsel %vm1445_vm4, %v9358_v27, %v9357_v61  ;;  %v9364_v59 = vld [vmem:[#allocation46_spill] sm:$0xff] }
 0x4b7   : > { %v2911_v20 = vpop.permute.xlu1 %2910  ;;  %v3003_v49 = vpop.permute.xlu0 %3002 }
 0x4b8   : > { %v3370_v38 = vsel %vm1643_vm10, %v3338_v17, %v3003_v49  ;;  %v2416_v17 = vrot.slane %v9364_v59, 2 }
 0x4b9   : > { %2932 = vrot.lane.b32.xlu1 %v7833_v21, %s4494_s8  ;;  %2934 = vrot.lane.b32.xlu0 %v2404_v60, %s4494_s8  ;;  %v9352_v21 = vld [vmem:[#allocation157_spill] sm:$0xff] }
 0x4ba   : > { %v3211_v60 = vsel %vm1478_vm5, %v3179_v56, %v9352_v21  ;;  %v8002_v56 = vsel %vm591_vm2, %v2415_v39, %v2416_v17 }
 0x4bb   : > { %v3005_v41 = vpop.permute.xlu1 %3004  ;;  %v3099_v13 = vpop.permute.xlu0 %3098  ;;  %v3243_v63 = vsel %vm1511_vm6, %v3211_v60, %v9353_v40 }
 0x4bc   : > { %v3402_v26 = vsel %vm1676_vm11, %v3370_v38, %v3099_v13  ;;  %v3275_v37 = vsel %vm1544_vm7, %v3243_v63, %v9354_v44  ;;  %v9365_v38 = vld [vmem:[#allocation53_spill] sm:$0xff]  ;;  %v9369_v44 = vld [vmem:[#allocation171_spill] sm:$0xff] }
 0x4bd   : > { %3026 = vrot.lane.b32.xlu1 %v7898_v50, %s4495_s9  ;;  %2754 = vrot.lane.b32.xlu0 %v9341_v6, %s4492_s30  ;;  %v3307_v0 = vsel %vm1577_vm8, %v3275_v37, %v2825_v30  ;;  %v3212_v6 = vsel %vm1478_vm5, %v3180_v18, %v9360_v42  ;;  %v9361_v30 = vld [vmem:[#allocation124_spill] sm:$0xff]  ;;  %v2418_v37 = vrot.slane %v9369_v44, 2 }
 0x4be   : > { %4388 = vmatprep.mubr.msk.f32.mxu1 %vm1721_vm12, %v3402_v26  ;;  %v3339_v12 = vsel %vm1610_vm9, %v3307_v0, %v2911_v20  ;;  %v3244_v29 = vsel %vm1511_vm6, %v3212_v6, %v9361_v30  ;;  %v9368_v26 = vld [vmem:[#allocation125_spill] sm:$0xff]  ;;  %v9370_v0 = vld [vmem:[#allocation60_spill] sm:$0xff] }
 0x4bf   : > { %v2733_v57 = vpop.permute.xlu1 %2732  ;;  %v2827_v23 = vpop.permute.xlu0 %2826  ;;  %v3371_v15 = vsel %vm1643_vm10, %v3339_v12, %v3005_v41  ;;  %v9366_v41 = vld [vmem:[#allocation36_spill] sm:$0xff] }
 0x4c0   : > { %v3181_v13 = vsel %vm1445_vm4, %v9366_v41, %v9365_v38  ;;  %v9384_v44 = vld [vmem:[#allocation152_spill] sm:$0xff] }
 0x4c1   : > { %3028 = vrot.lane.b32.xlu1 %v2409_v7, %s4495_s9  ;;  %3122 = vrot.lane.b32.xlu0 %v7951_v24, %s4496_s20 }
 0x4c3   : > { %v3101_v9 = vpop.permute.xlu1 %3100  ;;  %v2829_v52 = vpop.permute.xlu0 %2828 }
 0x4c4   : > { %v3403_v35 = vsel %vm1676_vm11, %v3371_v15, %v3101_v9  ;;  %v2419_v9 = vsel %vm591_vm2, %v2416_v17, %v2418_v37  ;;  %v9385_v37 = vld [vmem:[#allocation145_spill] sm:$0xff] }
 0x4c5   : > { %2756 = vrot.lane.b32.xlu1 %v9344_v2, %s4492_s30  ;;  %2850 = vrot.lane.b32.xlu0 %v9356_v8, %s4493_s7  ;;  %v3276_v2 = vsel %vm1544_vm7, %v3244_v29, %v9362_v48 }
 0x4c6   : > { %4389 = vmatmul.mubr.msk.f32.gmra.mrb[10].mxu1 %vm1721_vm12, %v3403_v35  ;;  %v3308_v10 = vsel %vm1577_vm8, %v3276_v2, %v2827_v23  ;;  %v9373_v35 = vld [vmem:[#allocation19_spill] sm:$0xff] }
 0x4c7   : > { %v2913_v36 = vpop.permute.xlu1 %2912  ;;  %v2915_v31 = vpop.permute.xlu0 %2914  ;;  %v9376_v2 = vld [vmem:[#allocation11_spill] sm:$0xff] }
 0x4c8   : > { %v3340_v43 = vsel %vm1610_vm9, %v3308_v10, %v2913_v36  ;;  %v2420_v10 = vrot.slane %v9376_v2, 2 }
 0x4c9   : > { %3124 = vrot.lane.b32.xlu1 %v2414_v19, %s4496_s20  ;;  %2852 = vrot.lane.b32.xlu0 %v9359_v51, %s4493_s7 }
 0x4cb   : > { %v3007_v28 = vpop.permute.xlu1 %3006  ;;  %v2735_v11 = vpop.permute.xlu0 %2734 }
 0x4cc   : > { %v3372_v25 = vsel %vm1643_vm10, %v3340_v43, %v3007_v28  ;;  %v9377_v43 = vld [vmem:[#allocation148_spill] sm:$0xff] }
 0x4cd   : > { %2936 = vrot.lane.b32.xlu1 %v7898_v50, %s4494_s8  ;;  %2938 = vrot.lane.b32.xlu0 %v2409_v7, %s4494_s8  ;;  %v9367_v50 = vld [vmem:[#allocation96_spill] sm:$0xff] }
 0x4ce   : > { %v3213_v7 = vsel %vm1478_vm5, %v3181_v13, %v9367_v50 }
 0x4cf   : > { %v3009_v22 = vpop.permute.xlu1 %3008  ;;  %v3103_v20 = vpop.permute.xlu0 %3102  ;;  %v3245_v32 = vsel %vm1511_vm6, %v3213_v7, %v9368_v26 }
 0x4d0   : > { %v3404_v49 = vsel %vm1676_vm11, %v3372_v25, %v3103_v20  ;;  %v3277_v16 = vsel %vm1544_vm7, %v3245_v32, %v2733_v57  ;;  %v2421_v25 = vrot.slane %v9377_v43, 2 }
 0x4d1   : > { %3030 = vrot.lane.b32.xlu1 %v7951_v24, %s4495_s9  ;;  %2758 = vrot.lane.b32.xlu0 %v9356_v8, %s4492_s30  ;;  %v3309_v21 = vsel %vm1577_vm8, %v3277_v16, %v2829_v52  ;;  %v9371_v52 = vld [vmem:[#allocation14_spill] sm:$0xff]  ;;  %v9374_v8 = vld [vmem:[#allocation173_spill] sm:$0xff] }
 0x4d2   : > { %4391 = vmatprep.mubr.msk.f32.mxu1 %vm1721_vm12, %v3404_v49  ;;  %v3341_v60 = vsel %vm1610_vm9, %v3309_v21, %v2915_v31  ;;  %v3182_v54 = vsel %vm1445_vm4, %v9372_v3, %v9371_v52  ;;  %v9375_v31 = vld [vmem:[#allocation193_spill] sm:$0xff]  ;;  %v9381_v49 = vld [vmem:[#allocation194_spill] sm:$0xff]  ;;  %v2422_v13 = vsel %vm591_vm2, %v2420_v10, %v2421_v25 }
 0x4d3   : > { %v2737_v5 = vpop.permute.xlu1 %2736  ;;  %v2831_v45 = vpop.permute.xlu0 %2830  ;;  %v3373_v40 = vsel %vm1643_vm10, %v3341_v60, %v3009_v22  ;;  %v3214_v36 = vsel %vm1478_vm5, %v3182_v54, %v9374_v8  ;;  %v9379_v22 = vld [vmem:[#allocation7_spill] sm:$0xff]  ;;  %v9382_v16 = vld [vmem:[#allocation190_spill] sm:$0xff] }
 0x4d4   : > { %v3246_v61 = vsel %vm1511_vm6, %v3214_v36, %v9375_v31  ;;  %v2423_v21 = vrot.slane %v9382_v16, 2  ;;  %v9388_v52 = vld [vmem:[#allocation58_spill] sm:$0xff] }
 0x4d5   : > { %3032 = vrot.lane.b32.xlu1 %v2414_v19, %s4495_s9  ;;  %3126 = vrot.lane.b32.xlu0 %v8002_v56, %s4496_s20 }
 0x4d7   : > { %v3105_v63 = vpop.permute.xlu1 %3104  ;;  %v2833_v23 = vpop.permute.xlu0 %2832 }
 0x4d8   : > { %v3405_v57 = vsel %vm1676_vm11, %v3373_v40, %v3105_v63 }
 0x4d9   : > { %2760 = vrot.lane.b32.xlu1 %v9359_v51, %s4492_s30  ;;  %2854 = vrot.lane.b32.xlu0 %v9370_v0, %s4493_s7  ;;  %v3278_v51 = vsel %vm1544_vm7, %v3246_v61, %v2735_v11  ;;  %v9378_v11 = vld [vmem:[#allocation54_spill] sm:$0xff] }
 0x4da   : > { %4392 = vmatmul.mubr.msk.f32.gmra.mrb[12].mxu1 %vm1721_vm12, %v3405_v57  ;;  %v3310_v42 = vsel %vm1577_vm8, %v3278_v51, %v2831_v45  ;;  %v3183_v20 = vsel %vm1445_vm4, %v9379_v22, %v9378_v11  ;;  %v3184_v57 = vsel %vm1445_vm4, %v9385_v37, %v9384_v44  ;;  %v9398_v37 = vld [vmem:[#allocation118_spill] sm:$0xff] }
 0x4db   : > { %v2917_v12 = vpop.permute.xlu1 %2916  ;;  %v2919_v15 = vpop.permute.xlu0 %2918 }
 0x4dc   : > { %v3342_v6 = vsel %vm1610_vm9, %v3310_v42, %v2917_v12 }
 0x4dd   : > { %3128 = vrot.lane.b32.xlu1 %v2419_v9, %s4496_s20  ;;  %2856 = vrot.lane.b32.xlu0 %v9373_v35, %s4493_s7 }
 0x4df   : > { %v3011_v27 = vpop.permute.xlu1 %3010  ;;  %v2739_v18 = vpop.permute.xlu0 %2738 }
 0x4e0   : > { %v3374_v30 = vsel %vm1643_vm10, %v3342_v6, %v3011_v27  ;;  %v9389_v6 = vld [vmem:[#allocation153_spill] sm:$0xff] }
 0x4e1   : > { %2940 = vrot.lane.b32.xlu1 %v7951_v24, %s4494_s8  ;;  %2942 = vrot.lane.b32.xlu0 %v2414_v19, %s4494_s8  ;;  %v9380_v24 = vld [vmem:[#allocation174_spill] sm:$0xff] }
 0x4e2   : > { %v3215_v19 = vsel %vm1478_vm5, %v3183_v20, %v9380_v24  ;;  %v9393_v20 = vld [vmem:[#allocation115_spill] sm:$0xff] }
 0x4e3   : > { %v3013_v29 = vpop.permute.xlu1 %3012  ;;  %v3107_v28 = vpop.permute.xlu0 %3106  ;;  %v3247_v39 = vsel %vm1511_vm6, %v3215_v19, %v9381_v49 }
 0x4e4   : > { %v3406_v48 = vsel %vm1676_vm11, %v3374_v30, %v3107_v28  ;;  %v3279_v41 = vsel %vm1544_vm7, %v3247_v39, %v2737_v5  ;;  %v9383_v5 = vld [vmem:[#allocation88_spill] sm:$0xff] }
 0x4e5   : > { %3034 = vrot.lane.b32.xlu1 %v8002_v56, %s4495_s9  ;;  %2762 = vrot.lane.b32.xlu0 %v9370_v0, %s4492_s30  ;;  %v3311_v50 = vsel %vm1577_vm8, %v3279_v41, %v2833_v23  ;;  %v2424_v23 = vsel %vm591_vm2, %v2421_v25, %v2423_v21  ;;  %v9386_v0 = vld [vmem:[#allocation122_spill] sm:$0xff]  ;;  %v9390_v30 = vld [vmem:[#allocation84_spill] sm:$0xff] }
 0x4e6   : > { %4394 = vmatprep.mubr.msk.f32.mxu1 %vm1721_vm12, %v3406_v48  ;;  %v3343_v7 = vsel %vm1610_vm9, %v3311_v50, %v2919_v15  ;;  %v3216_v12 = vsel %vm1478_vm5, %v3184_v57, %v9386_v0  ;;  %v9387_v15 = vld [vmem:[#allocation114_spill] sm:$0xff]  ;;  %v3187_v57 = vsel %vm1445_vm4, %v9323_v46, %v9398_v37  ;;  %v9399_v0 = vld [vmem:[#allocation75_spill] sm:$0xff]  ;;  %v9419_v37 = vld [vmem:[#allocation81_spill] sm:$0xff] }
 0x4e7   : > { %v2741_v17 = vpop.permute.xlu1 %2740  ;;  %v2835_v38 = vpop.permute.xlu0 %2834  ;;  %v3375_v26 = vsel %vm1643_vm10, %v3343_v7, %v3013_v29  ;;  %v3248_v3 = vsel %vm1511_vm6, %v3216_v12, %v9388_v52  ;;  %v3185_v29 = vsel %vm1445_vm4, %v9390_v30, %v9389_v6  ;;  %v9395_v50 = vld [vmem:[#allocation170_spill] sm:$0xff]  ;;  %v9400_v12 = vld [vmem:[#allocation192_spill] sm:$0xff]  ;;  %v9401_v52 = vld [vmem:[#allocation31_spill] sm:$0xff] }
 0x4e8   : > { %v3280_v8 = vsel %vm1544_vm7, %v3248_v3, %v2739_v18  ;;  %v9391_v18 = vld [vmem:[#allocation123_spill] sm:$0xff]  ;;  %v3186_v7 = vsel %vm1445_vm4, %v6842_v55, %v9395_v50  ;;  %v9402_v3 = vld [vmem:[#allocation22_spill] sm:$0xff] }
 0x4e9   : > { %3036 = vrot.lane.b32.xlu1 %v2419_v9, %s4495_s9  ;;  %3130 = vrot.lane.b32.xlu0 %v2422_v13, %s4496_s20  ;;  %v3312_v36 = vsel %vm1577_vm8, %v3280_v8, %v2835_v38 }
 0x4eb   : > { %v3109_v32 = vpop.permute.xlu1 %3108  ;;  %v2837_v45 = vpop.permute.xlu0 %2836 }
 0x4ec   : > { %v3407_v60 = vsel %vm1676_vm11, %v3375_v26, %v3109_v32  ;;  %v9396_v26 = vld [vmem:[#allocation191_spill] sm:$0xff] }
 0x4ed   : > { %2764 = vrot.lane.b32.xlu1 %v9373_v35, %s4492_s30  ;;  %4395 = vmatmul.mubr.msk.f32.gmra.mrb[14].mxu1 %vm1721_vm12, %v3407_v60  ;;  %v3218_v32 = vsel %vm1478_vm5, %v3186_v7, %v9396_v26 }
 0x4ee   : > { %2858 = vrot.lane.b32.xlu0 %v9383_v5, %s4493_s7 }
 0x4ef   : > { %v2921_v40 = vpop.permute.xlu1 %2920  ;;  %v2923_v63 = vpop.permute.xlu0 %2922 }
 0x4f0   : > { %v3344_v31 = vsel %vm1610_vm9, %v3312_v36, %v2921_v40 }
 0x4f1   : > { %3132 = vrot.lane.b32.xlu1 %v2424_v23, %s4496_s20 }
 0x4f2   : > { %2860 = vrot.lane.b32.xlu0 %v9387_v15, %s4493_s7 }
 0x4f3   : > { %v3015_v54 = vpop.permute.xlu1 %3014  ;;  %v2743_v35 = vpop.permute.xlu0 %2742 }
 0x4f4   : > { %v3376_v61 = vsel %vm1643_vm10, %v3344_v31, %v3015_v54  ;;  %v9403_v31 = vld [vmem:[#allocation30_spill] sm:$0xff] }
 0x4f5   : > { %2944 = vrot.lane.b32.xlu1 %v8002_v56, %s4494_s8  ;;  %v3217_v56 = vsel %vm1478_vm5, %v3185_v29, %v9391_v18  ;;  %v9405_v29 = vld [vmem:[#allocation77_spill] sm:$0xff]  ;;  %v9406_v18 = vld [vmem:[#allocation32_spill] sm:$0xff] }
 0x4f6   : > { %2946 = vrot.lane.b32.xlu0 %v2419_v9, %s4494_s8  ;;  %v9392_v9 = vld [vmem:[#allocation139_spill] sm:$0xff] }
 0x4f7   : > { %v3017_v27 = vpop.permute.xlu1 %3016  ;;  %v3111_v51 = vpop.permute.xlu0 %3110  ;;  %v3249_v28 = vsel %vm1511_vm6, %v3217_v56, %v9392_v9 }
 0x4f8   : > { %v3408_v42 = vsel %vm1676_vm11, %v3376_v61, %v3111_v51  ;;  %v3281_v25 = vsel %vm1544_vm7, %v3249_v28, %v2741_v17  ;;  %v9394_v17 = vld [vmem:[#allocation45_spill] sm:$0xff]  ;;  %v9407_v28 = vld [vmem:[#allocation187_spill] sm:$0xff] }
 0x4f9   : > { %3038 = vrot.lane.b32.xlu1 %v2422_v13, %s4495_s9  ;;  %4397 = vmatprep.mubr.msk.f32.mxu1 %vm1721_vm12, %v3408_v42  ;;  %v3313_v11 = vsel %vm1577_vm8, %v3281_v25, %v2837_v45  ;;  %v9397_v45 = vld [vmem:[#allocation65_spill] sm:$0xff] }
 0x4fa   : > { %2766 = vrot.lane.b32.xlu0 %v9383_v5, %s4492_s30  ;;  %v3345_v22 = vsel %vm1610_vm9, %v3313_v11, %v2923_v63  ;;  %v3250_v16 = vsel %vm1511_vm6, %v3218_v32, %v9397_v45  ;;  %v9409_v25 = vld [vmem:[#allocation57_spill] sm:$0xff]  ;;  %v9414_v45 = vld [vmem:[#allocation188_spill] sm:$0xff] }
 0x4fb   : > { %v2745_v48 = vpop.permute.xlu1 %2744  ;;  %v2839_v10 = vpop.permute.xlu0 %2838  ;;  %v3377_v24 = vsel %vm1643_vm10, %v3345_v22, %v3017_v27  ;;  %v3282_v5 = vsel %vm1544_vm7, %v3250_v16, %v2743_v35  ;;  %v9404_v27 = vld [vmem:[#allocation76_spill] sm:$0xff]  ;;  %v9410_v22 = vld [vmem:[#allocation78_spill] sm:$0xff]  ;;  %v3189_v16 = vsel %vm1445_vm4, %v6875_v4, %v9414_v45  ;;  %v9436_v45 = vld [vmem:[#allocation43_spill] sm:$0xff] }
 0x4fc   : > { %v3314_v40 = vsel %vm1577_vm8, %v3282_v5, %v2839_v10  ;;  %v9408_v10 = vld [vmem:[#allocation107_spill] sm:$0xff] }
 0x4fd   : > { %3040 = vrot.lane.b32.xlu1 %v2424_v23, %s4495_s9 }
 0x4fe   : > { %3134 = vrot.lane.b32.xlu0 %v9393_v20, %s4496_s20 }
 0x4ff   : > { %v3113_v19 = vpop.permute.xlu1 %3112  ;;  %v2841_v49 = vpop.permute.xlu0 %2840 }
 0x500   : > { %v3409_v39 = vsel %vm1676_vm11, %v3377_v24, %v3113_v19 }
 0x501   : > { %4398 = vmatmul.mubr.msk.f32.gmra.mrb[16].mxu1 %vm1721_vm12, %v3409_v39  ;;  %2768 = vrot.lane.b32.xlu1 %v9387_v15, %s4492_s30  ;;  %s4497_s30 = smov 124   ;;  %v3219_v15 = vsel %vm1478_vm5, %v3187_v57, %v9400_v12 }
 0x502   : > { %3136 = vrot.lane.b32.xlu0 %v9394_v17, %s4496_s20  ;;  %v3251_v54 = vsel %vm1511_vm6, %v3219_v15, %v9402_v3 }
 0x503   : > { %v2925_v38 = vpop.permute.xlu1 %2924  ;;  %v2927_v41 = vpop.permute.xlu0 %2926  ;;  %v3283_v36 = vsel %vm1544_vm7, %v3251_v54, %v2745_v48  ;;  %v3188_v48 = vsel %vm1445_vm4, %v6863_v62, %v9407_v28  ;;  %v9412_v62 = vld [vmem:[#allocation34_spill] sm:$0xff]  ;;  %v9421_v54 = vld [vmem:[#allocation40_spill] sm:$0xff] }
 0x504   : > { %v3346_v55 = vsel %vm1610_vm9, %v3314_v40, %v2925_v38  ;;  %v3315_v46 = vsel %vm1577_vm8, %v3283_v36, %v2841_v49  ;;  %v3220_v11 = vsel %vm1478_vm5, %v3188_v48, %v9409_v25  ;;  %v9417_v40 = vld [vmem:[#allocation35_spill] sm:$0xff] }
 0x505   : > { %2948 = vrot.lane.b32.xlu1 %v2422_v13, %s4494_s8  ;;  %v3347_v61 = vsel %vm1610_vm9, %v3315_v46, %v2927_v41  ;;  %v9413_v41 = vld [vmem:[#allocation108_spill] sm:$0xff]  ;;  %v9423_v46 = vld [vmem:[#allocation55_spill] sm:$0xff] }
 0x506   : > { %2950 = vrot.lane.b32.xlu0 %v2424_v23, %s4494_s8  ;;  %v9429_v48 = vld [vmem:[#allocation83_spill] sm:$0xff] }
 0x507   : > { %v3019_v21 = vpop.permute.xlu1 %3018  ;;  %v2747_v60 = vpop.permute.xlu0 %2746 }
 0x508   : > { %v3378_v13 = vsel %vm1643_vm10, %v3346_v55, %v3019_v21  ;;  %v9415_v21 = vld [vmem:[#allocation79_spill] sm:$0xff] }
 0x509   : > { %3042 = vrot.lane.b32.xlu1 %v9393_v20, %s4495_s9  ;;  %v9411_v20 = vld [vmem:[#allocation66_spill] sm:$0xff]  ;;  %v9418_v55 = vld [vmem:[#allocation23_spill] sm:$0xff] }
 0x50a   : > { %3044 = vrot.lane.b32.xlu0 %v9394_v17, %s4495_s9  ;;  %v3252_v24 = vsel %vm1511_vm6, %v3220_v11, %v9411_v20  ;;  %v9430_v20 = vld [vmem:[#allocation16_spill] sm:$0xff] }
 0x50b   : > { %v3021_v63 = vpop.permute.xlu1 %3020  ;;  %v3115_v23 = vpop.permute.xlu0 %3114  ;;  %v3284_v39 = vsel %vm1544_vm7, %v3252_v24, %v2747_v60  ;;  %v9416_v60 = vld [vmem:[#allocation138_spill] sm:$0xff]  ;;  %v3191_v24 = vsel %vm1445_vm4, %v9332_v14, %v9430_v20 }
 0x50c   : > { %v3410_v44 = vsel %vm1676_vm11, %v3378_v13, %v3115_v23  ;;  %v3379_v51 = vsel %vm1643_vm10, %v3347_v61, %v3021_v63  ;;  %v3221_v5 = vsel %vm1478_vm5, %v3189_v16, %v9416_v60  ;;  %v9424_v61 = vld [vmem:[#allocation74_spill] sm:$0xff] }
 0x50d   : > { %4400 = vmatprep.mubr.msk.f32.mxu1 %vm1721_vm12, %v3410_v44  ;;  %3824 = vrot.lane.b32.xlu1 %v9399_v0, %s4497_s30  ;;  %v3253_v13 = vsel %vm1511_vm6, %v3221_v5, %v9418_v55  ;;  %v9420_v0 = vld [vmem:[#allocation37_spill] sm:$0xff] }
 0x50e   : > { %3826 = vrot.lane.b32.xlu0 %v9401_v52, %s4497_s30  ;;  %v9438_v55 = vld [vmem:[#allocation9_spill] sm:$0xff] }
 0x50f   : > { %v2749_v35 = vpop.permute.xlu1 %2748  ;;  %v2843_v8 = vpop.permute.xlu0 %2842 }
 0x510   : > { %v3316_v17 = vsel %vm1577_vm8, %v3284_v39, %v2843_v8  ;;  %v3285_v44 = vsel %vm1544_vm7, %v3253_v13, %v2749_v35  ;;  %v9422_v35 = vld [vmem:[#allocation109_spill] sm:$0xff] }
 0x511   : > { %3828 = vrot.lane.b32.xlu1 %v9403_v31, %s4497_s30  ;;  %v3190_v31 = vsel %vm1445_vm4, %v9331_v47, %v9423_v46  ;;  %v9428_v47 = vld [vmem:[#allocation110_spill] sm:$0xff] }
 0x512   : > { %3830 = vrot.lane.b32.xlu0 %v9404_v27, %s4497_s30  ;;  %v9425_v27 = vld [vmem:[#allocation61_spill] sm:$0xff] }
 0x513   : > { %v3117_v42 = vpop.permute.xlu1 %3116  ;;  %v2845_v6 = vpop.permute.xlu0 %2844 }
 0x514   : > { %v3411_v30 = vsel %vm1676_vm11, %v3379_v51, %v3117_v42  ;;  %v3317_v4 = vsel %vm1577_vm8, %v3285_v44, %v2845_v6  ;;  %v3222_v51 = vsel %vm1478_vm5, %v3190_v31, %v9425_v27  ;;  %v9426_v42 = vld [vmem:[#allocation41_spill] sm:$0xff]  ;;  %v9427_v6 = vld [vmem:[#allocation160_spill] sm:$0xff]  ;;  %v9445_v31 = vld [vmem:[#allocation10_spill] sm:$0xff] }
 0x515   : > { %4401 = vmatmul.mubr.msk.f32.gmra.mrb[18].mxu1 %vm1721_vm12, %v3411_v30  ;;  %3832 = vrot.lane.b32.xlu1 %v9405_v29, %s4497_s30  ;;  %v3254_v30 = vsel %vm1511_vm6, %v3222_v51, %v9427_v6  ;;  %v9446_v6 = vld [vmem:[#allocation154_spill] sm:$0xff] }
 0x516   : > { %3834 = vrot.lane.b32.xlu0 %v9406_v18, %s4497_s30 }
 0x517   : > { %v2929_v56 = vpop.permute.xlu1 %2928  ;;  %v2931_v9 = vpop.permute.xlu0 %2930 }
 0x518   : > { %v3348_v38 = vsel %vm1610_vm9, %v3316_v17, %v2929_v56  ;;  %v3349_v57 = vsel %vm1610_vm9, %v3317_v4, %v2931_v9  ;;  %v9433_v17 = vld [vmem:[#allocation111_spill] sm:$0xff]  ;;  %v9440_v4 = vld [vmem:[#allocation5_spill] sm:$0xff] }
 0x519   : > { %3836 = vrot.lane.b32.xlu1 %v9408_v10, %s4497_s30 }
 0x51a   : > { %3838 = vrot.lane.b32.xlu0 %v9410_v22, %s4497_s30 }
 0x51b   : > { %v3023_v19 = vpop.permute.xlu1 %3022  ;;  %v2751_v49 = vpop.permute.xlu0 %2750 }
 0x51c   : > { %v3380_v50 = vsel %vm1643_vm10, %v3348_v38, %v3023_v19  ;;  %v3286_v56 = vsel %vm1544_vm7, %v3254_v30, %v2751_v49  ;;  %v9431_v19 = vld [vmem:[#allocation39_spill] sm:$0xff]  ;;  %v9432_v49 = vld [vmem:[#allocation20_spill] sm:$0xff]  ;;  %v3193_v30 = vsel %vm1445_vm4, %v9337_v53, %v9446_v6 }
 0x51d   : > { %3840 = vrot.lane.b32.xlu1 %v9412_v62, %s4497_s30  ;;  %v3223_v39 = vsel %vm1478_vm5, %v3191_v24, %v9432_v49  ;;  %v9434_v62 = vld [vmem:[#allocation161_spill] sm:$0xff] }
 0x51e   : > { %3842 = vrot.lane.b32.xlu0 %v9413_v41, %s4497_s30  ;;  %v3255_v38 = vsel %vm1511_vm6, %v3223_v39, %v9434_v62 }
 0x51f   : > { %v3025_v7 = vpop.permute.xlu1 %3024  ;;  %v3119_v26 = vpop.permute.xlu0 %3118 }
 0x520   : > { %v3412_v32 = vsel %vm1676_vm11, %v3380_v50, %v3119_v26  ;;  %v3381_v12 = vsel %vm1643_vm10, %v3349_v57, %v3025_v7  ;;  %v9435_v26 = vld [vmem:[#allocation8_spill] sm:$0xff] }
 0x521   : > { %4403 = vmatprep.mubr.msk.f32.mxu1 %vm1721_vm12, %v3412_v32  ;;  %3844 = vrot.lane.b32.xlu1 %v9415_v21, %s4497_s30 }
 0x522   : > { %3846 = vrot.lane.b32.xlu0 %v9417_v40, %s4497_s30  ;;  %v9437_v40 = vld [vmem:[#allocation147_spill] sm:$0xff] }
 0x523   : > { %v2753_v63 = vpop.permute.xlu1 %2752  ;;  %v2847_v23 = vpop.permute.xlu0 %2846 }
 0x524   : > { %v3318_v9 = vsel %vm1577_vm8, %v3286_v56, %v2847_v23  ;;  %v3287_v7 = vsel %vm1544_vm7, %v3255_v38, %v2753_v63  ;;  %v9439_v23 = vld [vmem:[#allocation17_spill] sm:$0xff] }
 0x525   : > { %3848 = vrot.lane.b32.xlu1 %v9419_v37, %s4497_s30  ;;  %v3192_v44 = vsel %vm1445_vm4, %v6905_v1, %v9439_v23  ;;  %v9441_v37 = vld [vmem:[#allocation62_spill] sm:$0xff]  ;;  %v9444_v1 = vld [vmem:[#allocation47_spill] sm:$0xff] }
 0x526   : > { %3850 = vrot.lane.b32.xlu0 %v9420_v0, %s4497_s30  ;;  %v3224_v57 = vsel %vm1478_vm5, %v3192_v44, %v9441_v37  ;;  %v9442_v0 = vld [vmem:[#allocation113_spill] sm:$0xff]  ;;  %v9455_v23 = vld [vmem:[#allocation159_spill] sm:$0xff] }
 0x527   : > { %v3121_v15 = vpop.permute.xlu1 %3120  ;;  %v2849_v52 = vpop.permute.xlu0 %2848 }
 0x528   : > { %v3413_v3 = vsel %vm1676_vm11, %v3381_v12, %v3121_v15  ;;  %v3319_v14 = vsel %vm1577_vm8, %v3287_v7, %v2849_v52  ;;  %v9443_v12 = vld [vmem:[#allocation99_spill] sm:$0xff] }
 0x529   : > { %4404 = vmatmul.mubr.msk.f32.gmra.mrb[20].mxu1 %vm1721_vm12, %v3413_v3  ;;  %3852 = vrot.lane.b32.xlu1 %v9421_v54, %s4497_s30  ;;  %v3256_v15 = vsel %vm1511_vm6, %v3224_v57, %v9443_v12 }
 0x52a   : > { %3854 = vrot.lane.b32.xlu0 %v9422_v35, %s4497_s30 }
 0x52b   : > { %v2933_v8 = vpop.permute.xlu1 %2932  ;;  %v2935_v36 = vpop.permute.xlu0 %2934 }
 0x52c   : > { %v3350_v28 = vsel %vm1610_vm9, %v3318_v9, %v2933_v8  ;;  %v3351_v32 = vsel %vm1610_vm9, %v3319_v14, %v2935_v36  ;;  %v9449_v9 = vld [vmem:[#allocation149_spill] sm:$0xff] }
 0x52d   : > { %3856 = vrot.lane.b32.xlu1 %v9424_v61, %s4497_s30  ;;  %v9453_v14 = vld [vmem:[#allocation177_spill] sm:$0xff] }
 0x52e   : > { %3858 = vrot.lane.b32.xlu0 %v9426_v42, %s4497_s30 }
 0x52f   : > { %v3027_v29 = vpop.permute.xlu1 %3026  ;;  %v2755_v18 = vpop.permute.xlu0 %2754 }
 0x530   : > { %v3382_v10 = vsel %vm1643_vm10, %v3350_v28, %v3027_v29  ;;  %v3288_v54 = vsel %vm1544_vm7, %v3256_v15, %v2755_v18  ;;  %v9447_v29 = vld [vmem:[#allocation87_spill] sm:$0xff]  ;;  %v9448_v18 = vld [vmem:[#allocation21_spill] sm:$0xff] }
 0x531   : > { %3860 = vrot.lane.b32.xlu1 %v9428_v47, %s4497_s30  ;;  %v3225_v56 = vsel %vm1478_vm5, %v3193_v30, %v9448_v18  ;;  %v9450_v47 = vld [vmem:[#allocation100_spill] sm:$0xff] }
 0x532   : > { %3862 = vrot.lane.b32.xlu0 %v9429_v48, %s4497_s30  ;;  %v3257_v28 = vsel %vm1511_vm6, %v3225_v56, %v9450_v47  ;;  %v9460_v47 = vld [vmem:[#allocation120_spill] sm:$0xff] }
 0x533   : > { %v3029_v25 = vpop.permute.xlu1 %3028  ;;  %v3123_v11 = vpop.permute.xlu0 %3122 }
 0x534   : > { %v3414_v22 = vsel %vm1676_vm11, %v3382_v10, %v3123_v11  ;;  %v3383_v16 = vsel %vm1643_vm10, %v3351_v32, %v3029_v25 }
 0x535   : > { %4406 = vmatprep.mubr.msk.f32.mxu1 %vm1721_vm12, %v3414_v22  ;;  %3864 = vrot.lane.b32.xlu1 %v9431_v19, %s4497_s30 }
 0x536   : > { %3866 = vrot.lane.b32.xlu0 %v9433_v17, %s4497_s30  ;;  %v9451_v17 = vld [vmem:[#allocation93_spill] sm:$0xff] }
 0x537   : > { %v2757_v41 = vpop.permute.xlu1 %2756  ;;  %v2851_v50 = vpop.permute.xlu0 %2850  ;;  %v3194_v62 = vsel %vm1445_vm4, %v9348_v34, %v9451_v17 }
 0x538   : > { %v3320_v35 = vsel %vm1577_vm8, %v3288_v54, %v2851_v50  ;;  %v3289_v25 = vsel %vm1544_vm7, %v3257_v28, %v2757_v41  ;;  %v9452_v41 = vld [vmem:[#allocation158_spill] sm:$0xff]  ;;  %v3197_v28 = vsel %vm1445_vm4, %v9364_v59, %v9460_v47 }
 0x539   : > { %3868 = vrot.lane.b32.xlu1 %v9435_v26, %s4497_s30  ;;  %v3226_v50 = vsel %vm1478_vm5, %v3194_v62, %v9452_v41  ;;  %v9464_v62 = vld [vmem:[#allocation137_spill] sm:$0xff] }
 0x53a   : > { %3870 = vrot.lane.b32.xlu0 %v9436_v45, %s4497_s30  ;;  %v3258_v26 = vsel %vm1511_vm6, %v3226_v50, %v9453_v14  ;;  %v3199_v41 = vsel %vm1445_vm4, %v9377_v43, %v9464_v62 }
 0x53b   : > { %v3125_v21 = vpop.permute.xlu1 %3124  ;;  %v2853_v60 = vpop.permute.xlu0 %2852 }
 0x53c   : > { %v3415_v5 = vsel %vm1676_vm11, %v3383_v16, %v3125_v21  ;;  %v3321_v53 = vsel %vm1577_vm8, %v3289_v25, %v2853_v60 }
 0x53d   : > { %4407 = vmatmul.mubr.msk.f32.gmra.mrb[22].mxu1 %vm1721_vm12, %v3415_v5  ;;  %3872 = vrot.lane.b32.xlu1 %v9437_v40, %s4497_s30 }
 0x53e   : > { %3874 = vrot.lane.b32.xlu0 %v9438_v55, %s4497_s30 }
 0x53f   : > { %v2937_v13 = vpop.permute.xlu1 %2936  ;;  %v2939_v63 = vpop.permute.xlu0 %2938 }
 0x540   : > { %v3352_v36 = vsel %vm1610_vm9, %v3320_v35, %v2937_v13  ;;  %v3353_v11 = vsel %vm1610_vm9, %v3321_v53, %v2939_v63  ;;  %v9454_v13 = vld [vmem:[#allocation94_spill] sm:$0xff] }
 0x541   : > { %3876 = vrot.lane.b32.xlu1 %v9440_v4, %s4497_s30  ;;  %v3195_v63 = vsel %vm1445_vm4, %v9349_v33, %v9454_v13  ;;  %v9456_v4 = vld [vmem:[#allocation178_spill] sm:$0xff]  ;;  %v9469_v13 = vld [vmem:[#allocation196_spill] sm:$0xff] }
 0x542   : > { %3878 = vrot.lane.b32.xlu0 %v9442_v0, %s4497_s30  ;;  %v3227_v44 = vsel %vm1478_vm5, %v3195_v63, %v9455_v23  ;;  %v8364_v23 = vld [vmem:[%s8540_s5] ss:$0 sm:$0xff] }
 0x543   : > { %v3031_v52 = vpop.permute.xlu1 %3030  ;;  %v2759_v3 = vpop.permute.xlu0 %2758  ;;  %v3259_v37 = vsel %vm1511_vm6, %v3227_v44, %v9456_v4 }
 0x544   : > { %v3384_v61 = vsel %vm1643_vm10, %v3352_v36, %v3031_v52  ;;  %v3290_v16 = vsel %vm1544_vm7, %v3258_v26, %v2759_v3 }
 0x545   : > { %v8256_v8 = vpop.f32.mrb[0].mxu1  ;;  %3880 = vrot.lane.b32.xlu1 %v9444_v1, %s4497_s30 }
 0x546   : > { %v8261_v46 = vpop.f32.mrb[1].mxu1  ;;  %3882 = vrot.lane.b32.xlu0 %v9445_v31, %s4497_s30 }
 0x547   : > { %v3033_v27 = vpop.permute.xlu1 %3032  ;;  %v3127_v51 = vpop.permute.xlu0 %3126 }
 0x548   : > { %v3416_v42 = vsel %vm1676_vm11, %v3384_v61, %v3127_v51  ;;  %v3385_v22 = vsel %vm1643_vm10, %v3353_v11, %v3033_v27  ;;  %v9457_v27 = vld [vmem:[#allocation172_spill] sm:$0xff]  ;;  %v9462_v11 = vld [vmem:[#allocation127_spill] sm:$0xff] }
 0x549   : > { %4409 = vmatprep.mubr.msk.f32.mxu1 %vm1721_vm12, %v3416_v42  ;;  %3884 = vrot.lane.b32.xlu1 %v9447_v29, %s4497_s30  ;;  %v3196_v51 = vsel %vm1445_vm4, %v9363_v58, %v9457_v27  ;;  %v9458_v42 = vld [vmem:[#allocation97_spill] sm:$0xff]  ;;  %v9459_v29 = vld [vmem:[#allocation126_spill] sm:$0xff] }
 0x54a   : > { %3886 = vrot.lane.b32.xlu0 %v9449_v9, %s4497_s30  ;;  %v3228_v6 = vsel %vm1478_vm5, %v3196_v51, %v9458_v42  ;;  %v9473_v42 = vld [vmem:[#allocation33_spill] sm:$0xff] }
 0x54b   : > { %v2761_v48 = vpop.permute.xlu1 %2760  ;;  %v2855_v10 = vpop.permute.xlu0 %2854  ;;  %v3260_v18 = vsel %vm1511_vm6, %v3228_v6, %v9459_v29  ;;  %v9474_v6 = vunpack.i.l.bf16 %v9473_v42 }
 0x54c   : > { %v3322_v21 = vsel %vm1577_vm8, %v3290_v16, %v2855_v10  ;;  %v3291_v0 = vsel %vm1544_vm7, %v3259_v37, %v2761_v48  ;;  %v9461_v10 = vld [vmem:[#allocation98_spill] sm:$0xff] }
 0x54d   : > { %v3229_v25 = vsel %vm1478_vm5, %v3197_v28, %v9461_v10  ;;  %v3984_v10 = vld [vmem:[%s8392_s16] sm:$0xff] }
 0x54f   : > { %v3129_v20 = vpop.permute.xlu1 %3128  ;;  %v2857_v24 = vpop.permute.xlu0 %2856 }
 0x550   : > { %v3417_v19 = vsel %vm1676_vm11, %v3385_v22, %v3129_v20  ;;  %v3323_v15 = vsel %vm1577_vm8, %v3291_v0, %v2857_v24  ;;  %v3261_v22 = vsel %vm1511_vm6, %v3229_v25, %v9462_v11  ;;  %v3602_v0 = vadd.f32 %v8364_v23, %v8261_v46 }
 0x551   : > { %4410 = vmatmul.mubr.msk.f32.gmra.mrb[24].mxu1 %vm1721_vm12, %v3417_v19 }
 0x552   : > { %v3760_v29 = vmax.f32 %v3602_v0, 0.0 }
 0x553   : > { %v2941_v49 = vpop.permute.xlu1 %2940  ;;  %v2943_v39 = vpop.permute.xlu0 %2942 }
 0x554   : > { %v3354_v60 = vsel %vm1610_vm9, %v3322_v21, %v2941_v49  ;;  %v3355_v52 = vsel %vm1610_vm9, %v3323_v15, %v2943_v39  ;;  %v9463_v39 = vld [vmem:[#allocation52_spill] sm:$0xff] }
 0x555   : > { %v8288_v38 = vpop.f32.mrb[2].mxu1  ;;  %v3198_v59 = vsel %vm1445_vm4, %v9376_v2, %v9463_v39 }
 0x556   : > { %v8292_v7 = vpop.f32.mrb[3].mxu1  ;;  %v3617_v47 = vadd.f32 %v8288_v38, %v8364_v23 }
 0x557   : > { %v3035_v32 = vpop.permute.xlu1 %3034  ;;  %v2763_v45 = vpop.permute.xlu0 %2762 }
 0x558   : > { %v3386_v34 = vsel %vm1643_vm10, %v3354_v60, %v3035_v32  ;;  %v3292_v9 = vsel %vm1544_vm7, %v3260_v18, %v2763_v45  ;;  %v9465_v45 = vld [vmem:[#allocation106_spill] sm:$0xff]  ;;  %v9475_v18 = vunpack.i.h.bf16 %v9473_v42 }
 0x559   : > { %v9466_v16 = vunpack.i.l.bf16 %v9465_v45 }
 0x55b   : > { %v3037_v5 = vpop.permute.xlu1 %3036  ;;  %v3131_v40 = vpop.permute.xlu0 %3130  ;;  %v3230_v21 = vsel %vm1478_vm5, %v3198_v59, %v9466_v16 }
 0x55c   : > { %v3418_v55 = vsel %vm1676_vm11, %v3386_v34, %v3131_v40  ;;  %v3387_v3 = vsel %vm1643_vm10, %v3355_v52, %v3037_v5  ;;  %v9467_v34 = vld [vmem:[#allocation195_spill] sm:$0xff]  ;;  %v9468_v40 = vunpack.i.h.bf16 %v9465_v45 }
 0x55d   : > { %4412 = vmatprep.mubr.msk.f32.mxu1 %vm1721_vm12, %v3418_v55  ;;  %v3262_v5 = vsel %vm1511_vm6, %v3230_v21, %v9467_v34 }
 0x55e   : > { %v3231_v43 = vsel %vm1478_vm5, %v3199_v41, %v9468_v40 }
 0x55f   : > { %v2765_v57 = vpop.permute.xlu1 %2764  ;;  %v3263_v63 = vsel %vm1511_vm6, %v3231_v43, %v9469_v13 }
 0x560   : > { %v2859_v12 = vpop.permute.xlu0 %2858  ;;  %v3293_v19 = vsel %vm1544_vm7, %v3261_v22, %v2765_v57  ;;  %v3985_v22 = vld [vmem:[%s8392_s16 + $0x8] sm:$0xff] }
 0x561   : > { %v3324_v48 = vsel %vm1577_vm8, %v3292_v9, %v2859_v12  ;;  %v9470_v12 = vld [vmem:[#allocation169_spill] sm:$0xff] }
 0x562   : > { %v9471_v15 = vunpack.i.l.bf16 %v9470_v12 }
 0x563   : > { %v3133_v54 = vpop.permute.xlu1 %3132 }
 0x564   : > { %v3419_v33 = vsel %vm1676_vm11, %v3387_v3, %v3133_v54  ;;  %v2861_v35 = vpop.permute.xlu0 %2860  ;;  %v3607_v3 = vadd.f32 %v8256_v8, %v8364_v23  ;;  %v3612_v8 = vadd.f32 %v8364_v23, %v8292_v7 }
 0x565   : > { %v8314_v1 = vpop.f32.mrb[4].mxu1  ;;  %4413 = vmatmul.mubr.msk.f32.gmra.mrb[26].mxu1 %vm1721_vm12, %v3419_v33  ;;  %v3325_v17 = vsel %vm1577_vm8, %v3293_v19, %v2861_v35  ;;  %v9472_v33 = vunpack.i.h.bf16 %v9470_v12 }
 0x566   : > { %v8317_v36 = vpop.f32.mrb[5].mxu1  ;;  %v3761_v9 = vmax.f32 %v3607_v3, 0.0 }
 0x567   : > { %v2945_v31 = vpop.permute.xlu1 %2944 }
 0x568   : > { %v2947_v61 = vpop.permute.xlu0 %2946  ;;  %v3356_v58 = vsel %vm1610_vm9, %v3324_v48, %v2945_v31 }
 0x569   : > { %v3357_v50 = vsel %vm1610_vm9, %v3325_v17, %v2947_v61  ;;  %v3986_v17 = vld [vmem:[%s8392_s16 + $0x10] sm:$0xff] }
 0x56b   : > { %v3039_v30 = vpop.permute.xlu1 %3038 }
 0x56c   : > { %v2767_v56 = vpop.permute.xlu0 %2766  ;;  %v3388_v20 = vsel %vm1643_vm10, %v3356_v58, %v3039_v30  ;;  %v3762_v58 = vmax.f32 %v3612_v8, 0.0 }
 0x56d   : > { %v3294_v44 = vsel %vm1544_vm7, %v3262_v5, %v2767_v56 }
 0x56e   : > { %v3326_v52 = vsel %vm1577_vm8, %v3294_v44, %v9471_v15 }
 0x56f   : > { %v3041_v53 = vpop.permute.xlu1 %3040 }
 0x570   : > { %v3135_v24 = vpop.permute.xlu0 %3134  ;;  %v3389_v26 = vsel %vm1643_vm10, %v3357_v50, %v3041_v53  ;;  %v3622_v53 = vadd.f32 %v8364_v23, %v8317_v36 }
 0x571   : > { %v3420_v49 = vsel %vm1676_vm11, %v3388_v20, %v3135_v24  ;;  %v3763_v20 = vmax.f32 %v3617_v47, 0.0  ;;  %v3627_v24 = vadd.f32 %v8314_v1, %v8364_v23  ;;  %v3993_v47 = vld [vmem:[%s8392_s16 + $0x48] sm:$0xff] }
 0x572   : > { %4415 = vmatprep.mubr.msk.f32.mxu1 %vm1721_vm12, %v3420_v49  ;;  %v3764_v50 = vmax.f32 %v3622_v53, 0.0 }
 0x573   : > { %v2769_v14 = vpop.permute.xlu1 %2768  ;;  %v3765_v45 = vmax.f32 %v3627_v24, 0.0 }
 0x574   : > { %v3137_v32 = vpop.permute.xlu0 %3136  ;;  %v3295_v37 = vsel %vm1544_vm7, %v3263_v63, %v2769_v14 }
 0x575   : > { %v3421_v2 = vsel %vm1676_vm11, %v3389_v26, %v3137_v32  ;;  %v4384_v60 = vpop.f32.mrb[6].mxu1  ;;  %v3327_v35 = vsel %vm1577_vm8, %v3295_v37, %v9472_v33  ;;  %v3987_v26 = vld [vmem:[%s8392_s16 + $0x18] sm:$0xff]  ;;  %v3990_v33 = vld [vmem:[%s8392_s16 + $0x30] sm:$0xff] }
 0x576   : > { %v3631_v55 = vpop.f32.mrb[7].mxu1  ;;  %4416 = vmatmul.mubr.msk.f32.gmra.mrb[28].mxu1 %vm1721_vm12, %v3421_v2  ;;  %v3637_v16 = vadd.f32 %v4384_v60, %v8364_v23  ;;  %v3989_v60 = vld [vmem:[%s8392_s16 + $0x28] sm:$0xff] }
 0x577   : > { %v2949_v4 = vpop.permute.xlu1 %2948  ;;  %v3632_v1 = vadd.f32 %v8364_v23, %v3631_v55  ;;  %v3988_v55 = vld [vmem:[%s8392_s16 + $0x20] sm:$0xff] }
 0x578   : > { %v2951_v57 = vpop.permute.xlu0 %2950  ;;  %v3358_v54 = vsel %vm1610_vm9, %v3326_v52, %v2949_v4  ;;  %v3767_v37 = vmax.f32 %v3637_v16, 0.0 }
 0x579   : > { %v3359_v61 = vsel %vm1610_vm9, %v3327_v35, %v2951_v57  ;;  %v3766_v63 = vmax.f32 %v3632_v1, 0.0 }
 0x57b   : > { %v3043_v31 = vpop.permute.xlu1 %3042 }
 0x57c   : > { %v3390_v27 = vsel %vm1643_vm10, %v3358_v54, %v3043_v31  ;;  %v3045_v51 = vpop.permute.xlu0 %3044 }
 0x57d   : > { %v3391_v46 = vsel %vm1643_vm10, %v3359_v61, %v3045_v51  ;;  %v3422_v30 = vsel %vm1676_vm11, %v3390_v27, %v9474_v6  ;;  %v3991_v27 = vld [vmem:[%s8392_s16 + $0x38] sm:$0xff] }
 0x57e   : > { %4418 = vmatprep.mubr.msk.f32.mxu1 %vm1721_vm12, %v3422_v30  ;;  %v3423_v56 = vsel %vm1676_vm11, %v3391_v46, %v9475_v18  ;;  %v3992_v18 = vld [vmem:[%s8392_s16 + $0x40] sm:$0xff] }
 0x57f   : > { %v3825_v28 = vpop.permute.xlu1 %3824  ;;  %4419 = vmatmul.mubr.msk.f32.gmra.mrb[30].mxu1 %vm1721_vm12, %v3423_v56 }
 0x580   : > { %v3920_v7 = vadd.f32 %v3825_v28, %v3760_v29  ;;  %v3827_v48 = vpop.permute.xlu0 %3826 }
 0x581   : > { %v3921_v25 = vadd.f32 %v3827_v48, %v3761_v9 }
 0x582   : > { %v3952_v11 = vmax.f32 %v3920_v7, 0.0 }
 0x583   : > { %v3953_v38 = vmax.f32 %v3921_v25, 0.0  ;;  %v3829_v19 = vpop.permute.xlu1 %3828 }
 0x584   : > { %v4016_v49 = vadd.f32 %v3984_v10, %v3952_v11  ;;  %v3922_v39 = vadd.f32 %v3829_v19, %v3762_v58  ;;  %v3831_v59 = vpop.permute.xlu0 %3830  ;;  %v3995_v19 = vld [vmem:[%s8392_s16 + $0x58] sm:$0xff] }
 0x585   : > { %v4017_v36 = vadd.f32 %v3985_v22, %v3953_v38  ;;  %v3923_v62 = vadd.f32 %v3831_v59, %v3763_v20  ;;  %v4387_v41 = vpop.f32.mrb[8].mxu1  ;;  %v3994_v59 = vld [vmem:[%s8392_s16 + $0x50] sm:$0xff] }
 0x586   : > { %4048 = vst.msk [vmem:[%s8410_s19] sm:$0xff] %vm1445_vm4, %v4016_v49  ;;  %v3954_v14 = vmax.f32 %v3922_v39, 0.0  ;;  %v3641_v32 = vpop.f32.mrb[9].mxu1  ;;  %v3647_v57 = vadd.f32 %v4387_v41, %v8364_v23 }
 0x587   : > { %4049 = vst.msk [vmem:[%s8410_s19 + $0x8] sm:$0xff] %vm1445_vm4, %v4017_v36  ;;  %v3955_v21 = vmax.f32 %v3923_v62, 0.0  ;;  %v3833_v2 = vpop.permute.xlu1 %3832  ;;  %v3642_v44 = vadd.f32 %v8364_v23, %v3641_v32 }
 0x588   : > { %v4018_v34 = vadd.f32 %v3986_v17, %v3954_v14  ;;  %v3924_v5 = vadd.f32 %v3833_v2, %v3764_v50  ;;  %v3835_v40 = vpop.permute.xlu0 %3834  ;;  %v3769_v51 = vmax.f32 %v3647_v57, 0.0  ;;  %v3997_v2 = vld [vmem:[%s8392_s16 + $0x68] sm:$0xff] }
 0x589   : > { %v4019_v43 = vadd.f32 %v3987_v26, %v3955_v21  ;;  %v3925_v13 = vadd.f32 %v3835_v40, %v3765_v45  ;;  %v3768_v31 = vmax.f32 %v3642_v44, 0.0  ;;  %v3996_v40 = vld [vmem:[%s8392_s16 + $0x60] sm:$0xff] }
 0x58a   : > { %4050 = vst.msk [vmem:[%s8410_s19 + $0x10] sm:$0xff] %vm1445_vm4, %v4018_v34  ;;  %v3956_v4 = vmax.f32 %v3924_v5, 0.0 }
 0x58b   : > { %4051 = vst.msk [vmem:[%s8410_s19 + $0x18] sm:$0xff] %vm1445_vm4, %v4019_v43  ;;  %v3957_v0 = vmax.f32 %v3925_v13, 0.0  ;;  %v3837_v12 = vpop.permute.xlu1 %3836 }
 0x58c   : > { %v4020_v15 = vadd.f32 %v3988_v55, %v3956_v4  ;;  %v3926_v52 = vadd.f32 %v3837_v12, %v3766_v63  ;;  %v3839_v3 = vpop.permute.xlu0 %3838 }
 0x58d   : > { %v4021_v54 = vadd.f32 %v3989_v60, %v3957_v0  ;;  %v3927_v35 = vadd.f32 %v3839_v3, %v3767_v37 }
 0x58e   : > { %4052 = vst.msk [vmem:[%s8410_s19 + $0x20] sm:$0xff] %vm1445_vm4, %v4020_v15  ;;  %v3958_v61 = vmax.f32 %v3926_v52, 0.0  ;;  %v3999_v52 = vld [vmem:[%s8392_s16 + $0x78] sm:$0xff] }
 0x58f   : > { %4053 = vst.msk [vmem:[%s8410_s19 + $0x28] sm:$0xff] %vm1445_vm4, %v4021_v54  ;;  %v3959_v46 = vmax.f32 %v3927_v35, 0.0  ;;  %v3841_v42 = vpop.permute.xlu1 %3840 }
 0x590   : > { %v4022_v6 = vadd.f32 %v3990_v33, %v3958_v61  ;;  %v3928_v30 = vadd.f32 %v3841_v42, %v3768_v31  ;;  %v3843_v29 = vpop.permute.xlu0 %3842  ;;  %v3998_v33 = vld [vmem:[%s8392_s16 + $0x70] sm:$0xff] }
 0x591   : > { %v4023_v8 = vadd.f32 %v3991_v27, %v3959_v46  ;;  %v3929_v56 = vadd.f32 %v3843_v29, %v3769_v51 }
 0x592   : > { %4054 = vst.msk [vmem:[%s8410_s19 + $0x30] sm:$0xff] %vm1445_vm4, %v4022_v6  ;;  %v3960_v9 = vmax.f32 %v3928_v30, 0.0 }
 0x593   : > { %4055 = vst.msk [vmem:[%s8410_s19 + $0x38] sm:$0xff] %vm1445_vm4, %v4023_v8  ;;  %v3961_v28 = vmax.f32 %v3929_v56, 0.0  ;;  %v3845_v24 = vpop.permute.xlu1 %3844  ;;  %v4001_v56 = vld [vmem:[%s8392_s16 + $0x88] sm:$0xff] }
 0x594   : > { %v4024_v7 = vadd.f32 %v3992_v18, %v3960_v9  ;;  %v3847_v22 = vpop.permute.xlu0 %3846 }
 0x595   : > { %v4025_v48 = vadd.f32 %v3993_v47, %v3961_v28  ;;  %v4000_v28 = vld [vmem:[%s8392_s16 + $0x80] sm:$0xff] }
 0x596   : > { %4056 = vst.msk [vmem:[%s8410_s19 + $0x40] sm:$0xff] %vm1445_vm4, %v4024_v7 }
 0x597   : > { %4057 = vst.msk [vmem:[%s8410_s19 + $0x48] sm:$0xff] %vm1445_vm4, %v4025_v48  ;;  %v3849_v16 = vpop.permute.xlu1 %3848 }
 0x598   : > { %v3851_v32 = vpop.permute.xlu0 %3850 }
 0x599   : > { %v4390_v10 = vpop.f32.mrb[10].mxu1 }
 0x59a   : > { %v3657_v25 = vadd.f32 %v4390_v10, %v8364_v23  ;;  %v3651_v58 = vpop.f32.mrb[11].mxu1 }
 0x59b   : > { %v3652_v53 = vadd.f32 %v8364_v23, %v3651_v58  ;;  %v3853_v12 = vpop.permute.xlu1 %3852 }
 0x59c   : > { %v3771_v11 = vmax.f32 %v3657_v25, 0.0  ;;  %v3855_v57 = vpop.permute.xlu0 %3854 }
 0x59d   : > { %v3770_v20 = vmax.f32 %v3652_v53, 0.0 }
 0x59e   : > { %v3931_v38 = vadd.f32 %v3847_v22, %v3771_v11 }
 0x59f   : > { %v3930_v49 = vadd.f32 %v3845_v24, %v3770_v20  ;;  %v3857_v8 = vpop.permute.xlu1 %3856 }
 0x5a0   : > { %v3963_v39 = vmax.f32 %v3931_v38, 0.0  ;;  %v3859_v30 = vpop.permute.xlu0 %3858 }
 0x5a1   : > { %v3962_v36 = vmax.f32 %v3930_v49, 0.0  ;;  %v4003_v49 = vld [vmem:[%s8392_s16 + $0x98] sm:$0xff] }
 0x5a2   : > { %v4027_v17 = vadd.f32 %v3995_v19, %v3963_v39 }
 0x5a3   : > { %v4026_v62 = vadd.f32 %v3994_v59, %v3962_v36  ;;  %v3861_v38 = vpop.permute.xlu1 %3860  ;;  %v4002_v36 = vld [vmem:[%s8392_s16 + $0x90] sm:$0xff] }
 0x5a4   : > { %4059 = vst.msk [vmem:[%s8410_s19 + $0x58] sm:$0xff] %vm1445_vm4, %v4027_v17  ;;  %v3863_v20 = vpop.permute.xlu0 %3862 }
 0x5a5   : > { %4058 = vst.msk [vmem:[%s8410_s19 + $0x50] sm:$0xff] %vm1445_vm4, %v4026_v62 }
 0x5ad   : > { %v4393_v41 = vpop.f32.mrb[12].mxu1 }
 0x5ae   : > { %v3667_v50 = vadd.f32 %v4393_v41, %v8364_v23  ;;  %v3661_v1 = vpop.f32.mrb[13].mxu1 }
 0x5af   : > { %v3662_v14 = vadd.f32 %v8364_v23, %v3661_v1 }
 0x5b0   : > { %v3773_v26 = vmax.f32 %v3667_v50, 0.0 }
 0x5b1   : > { %v3772_v45 = vmax.f32 %v3662_v14, 0.0 }
 0x5b2   : > { %v3933_v21 = vadd.f32 %v3851_v32, %v3773_v26 }
 0x5b3   : > { %v3932_v34 = vadd.f32 %v3849_v16, %v3772_v45  ;;  %v3867_v45 = vpop.permute.xlu0 %3866 }
 0x5b4   : > { %v3965_v5 = vmax.f32 %v3933_v21, 0.0  ;;  %v3865_v21 = vpop.permute.xlu1 %3864 }
 0x5b5   : > { %v3964_v43 = vmax.f32 %v3932_v34, 0.0  ;;  %v4005_v34 = vld [vmem:[%s8392_s16 + $0xa8] sm:$0xff] }
 0x5b6   : > { %v4029_v55 = vadd.f32 %v3997_v2, %v3965_v5 }
 0x5b7   : > { %v4028_v13 = vadd.f32 %v3996_v40, %v3964_v43  ;;  %v4004_v43 = vld [vmem:[%s8392_s16 + $0xa0] sm:$0xff] }
 0x5b8   : > { %4061 = vst.msk [vmem:[%s8410_s19 + $0x68] sm:$0xff] %vm1445_vm4, %v4029_v55 }
 0x5b9   : > { %4060 = vst.msk [vmem:[%s8410_s19 + $0x60] sm:$0xff] %vm1445_vm4, %v4028_v13 }
 0x5c0   : > { %v4396_v63 = vpop.f32.mrb[14].mxu1 }
 0x5c1   : > { %v3677_v44 = vadd.f32 %v4396_v63, %v8364_v23  ;;  %v3671_v4 = vpop.f32.mrb[15].mxu1 }
 0x5c2   : > { %v3672_v60 = vadd.f32 %v8364_v23, %v3671_v4 }
 0x5c3   : > { %v3775_v37 = vmax.f32 %v3677_v44, 0.0 }
 0x5c4   : > { %v3774_v0 = vmax.f32 %v3672_v60, 0.0 }
 0x5c5   : > { %v3935_v15 = vadd.f32 %v3855_v57, %v3775_v37 }
 0x5c6   : > { %v3934_v3 = vadd.f32 %v3853_v12, %v3774_v0  ;;  %v3871_v0 = vpop.permute.xlu0 %3870 }
 0x5c7   : > { %v3967_v54 = vmax.f32 %v3935_v15, 0.0  ;;  %v3869_v15 = vpop.permute.xlu1 %3868 }
 0x5c8   : > { %v3966_v35 = vmax.f32 %v3934_v3, 0.0  ;;  %v4007_v3 = vld [vmem:[%s8392_s16 + $0xb8] sm:$0xff] }
 0x5c9   : > { %v4031_v31 = vadd.f32 %v3999_v52, %v3967_v54 }
 0x5ca   : > { %v4030_v61 = vadd.f32 %v3998_v33, %v3966_v35  ;;  %v4006_v35 = vld [vmem:[%s8392_s16 + $0xb0] sm:$0xff] }
 0x5cb   : > { %4063 = vst.msk [vmem:[%s8410_s19 + $0x78] sm:$0xff] %vm1445_vm4, %v4031_v31 }
 0x5cc   : > { %4062 = vst.msk [vmem:[%s8410_s19 + $0x70] sm:$0xff] %vm1445_vm4, %v4030_v61 }
 0x5d4   : > { %v4399_v27 = vpop.f32.mrb[16].mxu1 }
 0x5d5   : > { %v3687_v51 = vadd.f32 %v4399_v27, %v8364_v23  ;;  %v3681_v46 = vpop.f32.mrb[17].mxu1 }
 0x5d6   : > { %v3682_v42 = vadd.f32 %v8364_v23, %v3681_v46 }
 0x5d7   : > { %v3777_v6 = vmax.f32 %v3687_v51, 0.0 }
 0x5d8   : > { %v3776_v29 = vmax.f32 %v3682_v42, 0.0 }
 0x5d9   : > { %v3937_v18 = vadd.f32 %v3859_v30, %v3777_v6 }
 0x5da   : > { %v3936_v9 = vadd.f32 %v3857_v8, %v3776_v29  ;;  %v3875_v29 = vpop.permute.xlu0 %3874 }
 0x5db   : > { %v3969_v47 = vmax.f32 %v3937_v18, 0.0  ;;  %v3873_v18 = vpop.permute.xlu1 %3872 }
 0x5dc   : > { %v3968_v7 = vmax.f32 %v3936_v9, 0.0  ;;  %v4009_v9 = vld [vmem:[%s8392_s16 + $0xc8] sm:$0xff] }
 0x5dd   : > { %v4033_v48 = vadd.f32 %v4001_v56, %v3969_v47 }
 0x5de   : > { %v4032_v10 = vadd.f32 %v4000_v28, %v3968_v7  ;;  %v4008_v7 = vld [vmem:[%s8392_s16 + $0xc0] sm:$0xff] }
 0x5df   : > { %4065 = vst.msk [vmem:[%s8410_s19 + $0x88] sm:$0xff] %vm1445_vm4, %v4033_v48 }
 0x5e0   : > { %4064 = vst.msk [vmem:[%s8410_s19 + $0x80] sm:$0xff] %vm1445_vm4, %v4032_v10 }
 0x5e8   : > { %v4402_v25 = vpop.f32.mrb[18].mxu1 }
 0x5e9   : > { %v3697_v58 = vadd.f32 %v4402_v25, %v8364_v23  ;;  %v3691_v53 = vpop.f32.mrb[19].mxu1 }
 0x5ea   : > { %v3692_v11 = vadd.f32 %v8364_v23, %v3691_v53 }
 0x5eb   : > { %v3779_v22 = vmax.f32 %v3697_v58, 0.0 }
 0x5ec   : > { %v3778_v24 = vmax.f32 %v3692_v11, 0.0 }
 0x5ed   : > { %v3939_v19 = vadd.f32 %v3863_v20, %v3779_v22 }
 0x5ee   : > { %v3938_v39 = vadd.f32 %v3861_v38, %v3778_v24  ;;  %v3879_v24 = vpop.permute.xlu0 %3878 }
 0x5ef   : > { %v3971_v59 = vmax.f32 %v3939_v19, 0.0  ;;  %v3877_v19 = vpop.permute.xlu1 %3876 }
 0x5f0   : > { %v3970_v17 = vmax.f32 %v3938_v39, 0.0  ;;  %v4011_v39 = vld [vmem:[%s8392_s16 + $0xd8] sm:$0xff] }
 0x5f1   : > { %v4035_v62 = vadd.f32 %v4003_v49, %v3971_v59 }
 0x5f2   : > { %v4034_v41 = vadd.f32 %v4002_v36, %v3970_v17  ;;  %v4010_v17 = vld [vmem:[%s8392_s16 + $0xd0] sm:$0xff] }
 0x5f3   : > { %4067 = vst.msk [vmem:[%s8410_s19 + $0x98] sm:$0xff] %vm1445_vm4, %v4035_v62 }
 0x5f4   : > { %4066 = vst.msk [vmem:[%s8410_s19 + $0x90] sm:$0xff] %vm1445_vm4, %v4034_v41 }
 0x5fc   : > { %v4405_v50 = vpop.f32.mrb[20].mxu1 }
 0x5fd   : > { %v3707_v1 = vadd.f32 %v4405_v50, %v8364_v23  ;;  %v3701_v14 = vpop.f32.mrb[21].mxu1 }
 0x5fe   : > { %v3702_v26 = vadd.f32 %v8364_v23, %v3701_v14 }
 0x5ff   : > { %v3781_v32 = vmax.f32 %v3707_v1, 0.0 }
 0x600   : > { %v3780_v16 = vmax.f32 %v3702_v26, 0.0 }
 0x601   : > { %v3941_v2 = vadd.f32 %v3867_v45, %v3781_v32 }
 0x602   : > { %v3940_v5 = vadd.f32 %v3865_v21, %v3780_v16  ;;  %v3883_v16 = vpop.permute.xlu0 %3882 }
 0x603   : > { %v3973_v40 = vmax.f32 %v3941_v2, 0.0  ;;  %v3881_v2 = vpop.permute.xlu1 %3880 }
 0x604   : > { %v3972_v55 = vmax.f32 %v3940_v5, 0.0  ;;  %v4013_v5 = vld [vmem:[%s8392_s16 + $0xe8] sm:$0xff] }
 0x605   : > { %v4037_v13 = vadd.f32 %v4005_v34, %v3973_v40 }
 0x606   : > { %v4036_v63 = vadd.f32 %v4004_v43, %v3972_v55  ;;  %v4012_v55 = vld [vmem:[%s8392_s16 + $0xe0] sm:$0xff] }
 0x607   : > { %4069 = vst.msk [vmem:[%s8410_s19 + $0xa8] sm:$0xff] %vm1445_vm4, %v4037_v13 }
 0x608   : > { %4068 = vst.msk [vmem:[%s8410_s19 + $0xa0] sm:$0xff] %vm1445_vm4, %v4036_v63 }
 0x610   : > { %v4408_v44 = vpop.f32.mrb[22].mxu1 }
 0x611   : > { %v3717_v4 = vadd.f32 %v4408_v44, %v8364_v23  ;;  %v3711_v60 = vpop.f32.mrb[23].mxu1 }
 0x612   : > { %v3712_v37 = vadd.f32 %v8364_v23, %v3711_v60 }
 0x613   : > { %v3783_v57 = vmax.f32 %v3717_v4, 0.0 }
 0x614   : > { %v3782_v12 = vmax.f32 %v3712_v37, 0.0 }
 0x615   : > { %v3943_v52 = vadd.f32 %v3871_v0, %v3783_v57 }
 0x616   : > { %v3942_v54 = vadd.f32 %v3869_v15, %v3782_v12  ;;  %v3887_v12 = vpop.permute.xlu0 %3886 }
 0x617   : > { %v3975_v33 = vmax.f32 %v3943_v52, 0.0  ;;  %v3885_v52 = vpop.permute.xlu1 %3884 }
 0x618   : > { %v3974_v31 = vmax.f32 %v3942_v54, 0.0  ;;  %v4015_v54 = vld [vmem:[%s8392_s16 + $0xf8] sm:$0xff] }
 0x619   : > { %v4039_v61 = vadd.f32 %v4007_v3, %v3975_v33 }
 0x61a   : > { %v4038_v27 = vadd.f32 %v4006_v35, %v3974_v31  ;;  %v4014_v31 = vld [vmem:[%s8392_s16 + $0xf0] sm:$0xff] }
 0x61b   : > { %4071 = vst.msk [vmem:[%s8410_s19 + $0xb8] sm:$0xff] %vm1445_vm4, %v4039_v61 }
 0x61c   : > { %4070 = vst.msk [vmem:[%s8410_s19 + $0xb0] sm:$0xff] %vm1445_vm4, %v4038_v27 }
 0x624   : > { %v4411_v51 = vpop.f32.mrb[24].mxu1 }
 0x625   : > { %v3727_v46 = vadd.f32 %v4411_v51, %v8364_v23  ;;  %v3721_v42 = vpop.f32.mrb[25].mxu1 }
 0x626   : > { %v3722_v6 = vadd.f32 %v8364_v23, %v3721_v42 }
 0x627   : > { %v3785_v30 = vmax.f32 %v3727_v46, 0.0 }
 0x628   : > { %v3784_v8 = vmax.f32 %v3722_v6, 0.0 }
 0x629   : > { %v3945_v56 = vadd.f32 %v3875_v29, %v3785_v30 }
 0x62a   : > { %v3944_v47 = vadd.f32 %v3873_v18, %v3784_v8 }
 0x62b   : > { %v3977_v28 = vmax.f32 %v3945_v56, 0.0 }
 0x62c   : > { %v3976_v48 = vmax.f32 %v3944_v47, 0.0 }
 0x62d   : > { %v4041_v10 = vadd.f32 %v4009_v9, %v3977_v28 }
 0x62e   : > { %v4040_v25 = vadd.f32 %v4008_v7, %v3976_v48 }
 0x62f   : > { %4073 = vst.msk [vmem:[%s8410_s19 + $0xc8] sm:$0xff] %vm1445_vm4, %v4041_v10 }
 0x630   : > { %4072 = vst.msk [vmem:[%s8410_s19 + $0xc0] sm:$0xff] %vm1445_vm4, %v4040_v25 }
 0x638   : > { %v4414_v58 = vpop.f32.mrb[26].mxu1 }
 0x639   : > { %v3737_v53 = vadd.f32 %v4414_v58, %v8364_v23  ;;  %v3731_v11 = vpop.f32.mrb[27].mxu1 }
 0x63a   : > { %v3732_v22 = vadd.f32 %v8364_v23, %v3731_v11 }
 0x63b   : > { %v3787_v20 = vmax.f32 %v3737_v53, 0.0 }
 0x63c   : > { %v3786_v38 = vmax.f32 %v3732_v22, 0.0 }
 0x63d   : > { %v3947_v49 = vadd.f32 %v3879_v24, %v3787_v20 }
 0x63e   : > { %v3946_v59 = vadd.f32 %v3877_v19, %v3786_v38 }
 0x63f   : > { %v3979_v36 = vmax.f32 %v3947_v49, 0.0 }
 0x640   : > { %v3978_v62 = vmax.f32 %v3946_v59, 0.0 }
 0x641   : > { %v4043_v41 = vadd.f32 %v4011_v39, %v3979_v36 }
 0x642   : > { %v4042_v50 = vadd.f32 %v4010_v17, %v3978_v62 }
 0x643   : > { %4075 = vst.msk [vmem:[%s8410_s19 + $0xd8] sm:$0xff] %vm1445_vm4, %v4043_v41 }
 0x644   : > { %4074 = vst.msk [vmem:[%s8410_s19 + $0xd0] sm:$0xff] %vm1445_vm4, %v4042_v50 }
 0x649   : > { %v4417_v1 = vpop.f32.mrb[28].mxu1 }
 0x64a   : > { %v3747_v14 = vadd.f32 %v4417_v1, %v8364_v23  ;;  %v3741_v26 = vpop.f32.mrb[29].mxu1 }
 0x64b   : > { %v3742_v32 = vadd.f32 %v8364_v23, %v3741_v26 }
 0x64c   : > { %v3789_v45 = vmax.f32 %v3747_v14, 0.0 }
 0x64d   : > { %v3788_v21 = vmax.f32 %v3742_v32, 0.0 }
 0x64e   : > { %v3949_v34 = vadd.f32 %v3883_v16, %v3789_v45 }
 0x64f   : > { %v3948_v40 = vadd.f32 %v3881_v2, %v3788_v21 }
 0x650   : > { %v3981_v43 = vmax.f32 %v3949_v34, 0.0 }
 0x651   : > { %v3980_v13 = vmax.f32 %v3948_v40, 0.0 }
 0x652   : > { %v4045_v63 = vadd.f32 %v4013_v5, %v3981_v43  ;;  %v4420_v44 = vpop.f32.mrb[30].mxu1 }
 0x653   : > { %v4044_v4 = vadd.f32 %v4012_v55, %v3980_v13  ;;  %v3757_v60 = vadd.f32 %v4420_v44, %v8364_v23  ;;  %v3751_v37 = vpop.f32.mrb[31].mxu1 }
 0x654   : > { %4077 = vst.msk [vmem:[%s8410_s19 + $0xe8] sm:$0xff] %vm1445_vm4, %v4045_v63  ;;  %v3752_v57 = vadd.f32 %v8364_v23, %v3751_v37 }
 0x655   : > { %4076 = vst.msk [vmem:[%s8410_s19 + $0xe0] sm:$0xff] %vm1445_vm4, %v4044_v4  ;;  %v3791_v0 = vmax.f32 %v3757_v60, 0.0 }
 0x656   : > { %v3790_v15 = vmax.f32 %v3752_v57, 0.0 }
 0x657   : > { %v3951_v3 = vadd.f32 %v3887_v12, %v3791_v0 }
 0x658   : > { %v3950_v33 = vadd.f32 %v3885_v52, %v3790_v15 }
 0x659   : > { %v3983_v35 = vmax.f32 %v3951_v3, 0.0 }
 0x65a   : > { %v3982_v61 = vmax.f32 %v3950_v33, 0.0 }
 0x65b   : > { %v4047_v27 = vadd.f32 %v4015_v54, %v3983_v35 }
 0x65c   : > { %v4046_v51 = vadd.f32 %v4014_v31, %v3982_v61 }
 0x65d   : > { %4079 = vst.msk [vmem:[%s8410_s19 + $0xf8] sm:$0xff] %vm1445_vm4, %v4047_v27 }
 0x65e   : > { %4078 = vst.msk [vmem:[%s8410_s19 + $0xf0] sm:$0xff] %vm1445_vm4, %v4046_v51 }
 0x65f PF: > { %s16_s21 = sadd.s32 1, %s4486_s21  }
 0x660   : > { %p13_p4 = scmp.ge.s32.totalorder %s16_s21, 4  }
 0x662   :  { %15 = sbr.rel (!%p13_p4) target bundleno = 1 (0x1), region = 77 }

</bundles_post_ra>
